<compile_context>
chip_gen: v7x
topology: tpu7x:2x2x1
jax: 0.10.0
libtpu: 0.0.40
codegen_flags: <defaults>
</compile_context>

<pallas_src>
import math

import jax
import jax.numpy as jnp
from jax.experimental import pallas as pl
from jax.experimental.pallas import tpu as pltpu

_LN_EPS = 1e-5


def _compiler_params():
    return pltpu.CompilerParams(
        dimension_semantics=("parallel",),
        vmem_limit_bytes=32 * 1024 * 1024,   # explicit budget; safe on v5e/v6e/v7x
    )


def _layer_norm(z, gamma, beta):
    mu = jnp.mean(z, axis=-1, keepdims=True)
    zc = z - mu
    var = jnp.mean(zc * zc, axis=-1, keepdims=True)
    return zc * jax.lax.rsqrt(var + _LN_EPS) * gamma + beta


def _mha(q_in, k_in, v_in, wq, bq, wk, bk, wv, bv, wo, bo, *,
         nhead, cd, approx):
    """Multi-head attention on (Nb, L, E) queries vs (Nb, S, E) keys/values.

    Projections run on the flattened (Nb*L, E) slab; score/softmax/PV is
    head-batched per batch element.  Matmul operands are cast to `cd`
    (e.g. bf16), accumulation is f32.
    """
    Nb, L, E = q_in.shape
    S = k_in.shape[1]
    Dh = E // nhead
    scale = 1.0 / math.sqrt(Dh)
    f32 = jnp.float32

    qf = q_in.reshape(Nb * L, E).astype(cd)
    kf = k_in.reshape(Nb * S, E).astype(cd)
    vf = v_in.reshape(Nb * S, E).astype(cd)
    q = jnp.dot(qf, wq, preferred_element_type=f32) + bq        # (Nb*L, E)
    k = jnp.dot(kf, wk, preferred_element_type=f32) + bk        # (Nb*S, E)
    v = jnp.dot(vf, wv, preferred_element_type=f32) + bv        # (Nb*S, E)

    outs = []
    for b in range(Nb):                     # static, small, unrolled
        qb = jnp.swapaxes(
            (q[b * L:(b + 1) * L] * scale).reshape(L, nhead, Dh), 0, 1
        ).astype(cd)                                              # (H, L, Dh)
        kb = jnp.swapaxes(
            k[b * S:(b + 1) * S].reshape(S, nhead, Dh), 0, 1).astype(cd)
        vb = jnp.swapaxes(
            v[b * S:(b + 1) * S].reshape(S, nhead, Dh), 0, 1).astype(cd)

        s = jnp.einsum("hld,hsd->hls", qb, kb,
                       preferred_element_type=f32)                # (H, L, S)
        s = s - jnp.max(s, axis=-1, keepdims=True)
        e = jnp.exp(s)
        denom = jnp.sum(e, axis=-1, keepdims=True)
        if approx:
            p = e * pl.reciprocal(denom, approx=True)             # EUP slot
        else:
            p = e / denom
        o = jnp.einsum("hls,hsd->hld", p.astype(cd), vb,
                       preferred_element_type=f32)                # (H, L, Dh)
        outs.append(jnp.swapaxes(o, 0, 1).reshape(L, E))          # (L, E)

    o_all = jnp.concatenate(outs, axis=0)                         # (Nb*L, E)
    o_proj = jnp.dot(o_all.astype(cd), wo, preferred_element_type=f32) + bo
    return o_proj.reshape(Nb, L, E)


# --------------------------------------------------------------- kernels ----

def _make_attn_kernel(nhead, has_qpos, has_mpos, cd, approx):
    """Fused: self-attn + residual + LN1, then cross-attn MHA (two outputs)."""

    def kernel(*refs):
        it = iter(refs)
        x_ref = next(it)
        qpos_ref = next(it) if has_qpos else None
        mem_ref = next(it)
        mpos_ref = next(it) if has_mpos else None
        (sa_wq, sa_bq, sa_wk, sa_bk, sa_wv, sa_bv, sa_wo, sa_bo,
         g1, b1,
         ca_wq, ca_bq, ca_wk, ca_bk, ca_wv, ca_bv, ca_wo, ca_bo,
         x1_ref, ca_ref) = tuple(it)

        x = x_ref[...]                                            # (Nb, L, E)
        if has_qpos:
            qk = x + qpos_ref[...]                                # q = k = tgt + query_pos
        else:
            qk = x

        # ---- self-attention + residual + LayerNorm1 ----
        sa = _mha(qk, qk, x,
                  sa_wq[...], sa_bq[...], sa_wk[...], sa_bk[...],
                  sa_wv[...], sa_bv[...], sa_wo[...], sa_bo[...],
                  nhead=nhead, cd=cd, approx=approx)
        x1 = _layer_norm(x + sa, g1[...], b1[...])
        x1_ref[...] = x1

        # ---- cross-attention MHA (the module transposes tgt2 across the
        #      batch before its residual, so add+LN2 happens in kernel B) ----
        mem = mem_ref[...]                                        # (Nb, S, E)
        q_in = x1 + qpos_ref[...] if has_qpos else x1
        k_in = mem + mpos_ref[...] if has_mpos else mem
        ca_ref[...] = _mha(q_in, k_in, mem,
                           ca_wq[...], ca_bq[...], ca_wk[...], ca_bk[...],
                           ca_wv[...], ca_bv[...], ca_wo[...], ca_bo[...],
                           nhead=nhead, cd=cd, approx=approx)

    return kernel


def _make_ffn_kernel(cd):
    """Fused: residual + LN2 + FFN (linear1->relu->linear2) + residual + LN3."""

    def kernel(x1_ref, cat_ref, g2_ref, be2_ref, w1_ref, fb1_ref,
               w2_ref, fb2_ref, g3_ref, be3_ref, out_ref):
        Nb, L, E = x1_ref.shape
        f32 = jnp.float32
        x2 = _layer_norm(x1_ref[...] + cat_ref[...], g2_ref[...], be2_ref[...])
        xf = x2.reshape(Nb * L, E)
        h = jnp.dot(xf.astype(cd), w1_ref[...],
                    preferred_element_type=f32) + fb1_ref[...]
        h = jnp.maximum(h, 0.0)                                   # relu
        y = jnp.dot(h.astype(cd), w2_ref[...],
                    preferred_element_type=f32) + fb2_ref[...]
        out = _layer_norm(xf + y, g3_ref[...], be3_ref[...])
        out_ref[...] = out.reshape(Nb, L, E)

    return kernel


# ---------------------------------------------------------------- wrapper ---

def _rep_spec(shape):
    nd = len(shape)
    return pl.BlockSpec(shape, lambda i: (0,) * nd)


def _pick_batch_block(n):
    """Largest divisor of n leaving >= 2 grid steps (keeps both v7x TCs busy)."""
    best = 1
    for d in range(1, n + 1):
        if n % d == 0 and n // d >= 2:
            best = d
    return best


def transformer_decoder_layer(tgt, memory, params, *, nhead,
                              pos=None, query_pos=None,
                              compute_dtype=jnp.float32,
                              batch_block=None):
    """Pallas forward of TransformerDecoderLayer.forward_post (inference).

    tgt: (L, N, E); memory: (S, N, E); pos: (S, N, E)|None; query_pos:
    (L, N, E)|None.  Returns (L, N, E).  Like the PyTorch module, the
    `tgt2.transpose(0, 1)` residual after cross-attention requires L == N.
    """
    L, N, E = tgt.shape
    S = memory.shape[0]
    assert E % nhead == 0
    assert L == N, "forward_post's tgt2.transpose(0,1) residual requires L == N"

    f32 = jnp.float32
    cd = compute_dtype
    approx = (cd == jnp.bfloat16)
    has_qpos = query_pos is not None
    has_mpos = pos is not None

    bb = batch_block if batch_block is not None else _pick_batch_block(N)
    assert N % bb == 0, "batch_block must divide the batch size"
    grid = (N // bb,)

    # Single layout change to batch-first at the boundary.
    x = jnp.swapaxes(tgt, 0, 1).astype(f32)               # (N, L, E)
    mem = jnp.swapaxes(memory, 0, 1).astype(f32)          # (N, S, E)

    p = params
    F = p["lin1_w"].shape[1]

    def wmat(a):                                          # matmul operand
        return a.astype(cd)

    def row(v):                                           # (D,) -> (1, D) f32
        return v.reshape(1, -1).astype(f32)

    seq_L = pl.BlockSpec((bb, L, E), lambda i: (i, 0, 0))
    seq_S = pl.BlockSpec((bb, S, E), lambda i: (i, 0, 0))
    w_EE = _rep_spec((E, E))
    b_E = _rep_spec((1, E))

    # ---- kernel A: self-attn + LN1 fused with cross-attn MHA ---------------
    in_specs = [seq_L]
    args = [x]
    if has_qpos:
        in_specs.append(seq_L)
        args.append(jnp.swapaxes(query_pos, 0, 1).astype(f32))
    in_specs.append(seq_S)
    args.append(mem)
    if has_mpos:
        in_specs.append(seq_S)
        args.append(jnp.swapaxes(pos, 0, 1).astype(f32))

    def add_attn_weights(prefix):
        for wname, bname in (("wq", "bq"), ("wk", "bk"), ("wv", "bv"), ("wo", "bo")):
            in_specs.extend([w_EE, b_E])
            args.extend([wmat(p[f"{prefix}_{wname}"]), row(p[f"{prefix}_{bname}"])])

    add_attn_weights("sa")
    in_specs.extend([b_E, b_E])
    args.extend([row(p["norm1_g"]), row(p["norm1_b"])])
    add_attn_weights("ca")

    x1, ca = pl.pallas_call(
        _make_attn_kernel(nhead, has_qpos, has_mpos, cd, approx),
        out_shape=(jax.ShapeDtypeStruct((N, L, E), f32),
                   jax.ShapeDtypeStruct((N, L, E), f32)),
        grid=grid,
        in_specs=in_specs,
        out_specs=(seq_L, seq_L),
        compiler_params=_compiler_params(),
    )(*args)

    # Module semantics: tgt2 = tgt2.transpose(0, 1) before the residual.
    ca_t = jnp.swapaxes(ca, 0, 1)

    # ---- kernel B: add + LN2 + FFN + add + LN3 ------------------------------
    out = pl.pallas_call(
        _make_ffn_kernel(cd),
        out_shape=jax.ShapeDtypeStruct((N, L, E), f32),
        grid=grid,
        in_specs=[seq_L, seq_L, b_E, b_E,
                  _rep_spec((E, F)), _rep_spec((1, F)),
                  _rep_spec((F, E)), b_E, b_E, b_E],
        out_specs=seq_L,
        compiler_params=_compiler_params(),
    )(x1, ca_t, row(p["norm2_g"]), row(p["norm2_b"]),
      wmat(p["lin1_w"]), row(p["lin1_b"]), wmat(p["lin2_w"]), row(p["lin2_b"]),
      row(p["norm3_g"]), row(p["norm3_b"]))

    return jnp.swapaxes(out, 0, 1)                        # back to (L, N, E)


# -------------------------------------------------------------- reference ---

def _reference(tgt, memory, params, *, nhead, pos, query_pos):
    """Pure-JAX mirror of TransformerDecoderLayer.forward_post (eval mode)."""

    def ln(z, g, b):
        mu = z.mean(-1, keepdims=True)
        var = ((z - mu) ** 2).mean(-1, keepdims=True)
        return (z - mu) / jnp.sqrt(var + _LN_EPS) * g + b

    def mha(q_in, k_in, v_in, wq, bq, wk, bk, wv, bv, wo, bo):
        Lq, N, E = q_in.shape
        Sk = k_in.shape[0]
        Dh = E // nhead
        q = (q_in @ wq + bq).reshape(Lq, N, nhead, Dh) / math.sqrt(Dh)
        k = (k_in @ wk + bk).reshape(Sk, N, nhead, Dh)
        v = (v_in @ wv + bv).reshape(Sk, N, nhead, Dh)
        s = jnp.einsum("lnhd,snhd->nhls", q, k)
        a = jax.nn.softmax(s, axis=-1)
        o = jnp.einsum("nhls,snhd->lnhd", a, v).reshape(Lq, N, E)
        return o @ wo + bo

    p = params
    q = k = tgt + query_pos
    tgt2 = mha(q, k, tgt, p["sa_wq"], p["sa_bq"], p["sa_wk"], p["sa_bk"],
               p["sa_wv"], p["sa_bv"], p["sa_wo"], p["sa_bo"])
    t = ln(tgt + tgt2, p["norm1_g"], p["norm1_b"])
    tgt2 = mha(t + query_pos, memory + pos, memory,
               p["ca_wq"], p["ca_bq"], p["ca_wk"], p["ca_bk"],
               p["ca_wv"], p["ca_bv"], p["ca_wo"], p["ca_bo"])
    tgt2 = jnp.swapaxes(tgt2, 0, 1)
    t = ln(t + tgt2, p["norm2_g"], p["norm2_b"])
    tgt2 = jnp.maximum(t @ p["lin1_w"] + p["lin1_b"], 0.0) @ p["lin2_w"] + p["lin2_b"]
    t = ln(t + tgt2, p["norm3_g"], p["norm3_b"])
    return t


def _init_params(key, E, F):
    ks = jax.random.split(key, 26)
    it = iter(ks)
    sE = 1.0 / math.sqrt(E)
    sF = 1.0 / math.sqrt(F)
    p = {}
    for name in ("sa", "ca"):
        for proj in ("wq", "wk", "wv", "wo"):
            p[f"{name}_{proj}"] = (
                jax.random.normal(next(it), (E, E), jnp.float32) * sE)
            p[f"{name}_{proj.replace('w', 'b')}"] = (
                jax.random.normal(next(it), (E,), jnp.float32) * 0.02)
    p["lin1_w"] = jax.random.normal(next(it), (E, F), jnp.float32) * sE
    p["lin1_b"] = jax.random.normal(next(it), (F,), jnp.float32) * 0.02
    p["lin2_w"] = jax.random.normal(next(it), (F, E), jnp.float32) * sF
    p["lin2_b"] = jax.random.normal(next(it), (E,), jnp.float32) * 0.02
    for i in (1, 2, 3):
        p[f"norm{i}_g"] = 1.0 + jax.random.normal(next(it), (E,), jnp.float32) * 0.05
        p[f"norm{i}_b"] = jax.random.normal(next(it), (E,), jnp.float32) * 0.05
    return p


if __name__ == "__main__":
    key = jax.random.PRNGKey(0)
    d_model, nhead, dim_feedforward = 32, 4, 64
    L = N = 8          # the module's tgt2.transpose(0,1) residual requires L == N
    S = 16

    k_in, k_par = jax.random.split(key)
    k1, k2, k3, k4 = jax.random.split(k_in, 4)
    tgt = jax.random.normal(k1, (L, N, d_model), jnp.float32)
    memory = jax.random.normal(k2, (S, N, d_model), jnp.float32)
    query_pos = jax.random.normal(k3, (L, N, d_model), jnp.float32) * 0.5
    pos = jax.random.normal(k4, (S, N, d_model), jnp.float32) * 0.5

    params = _init_params(k_par, d_model, dim_feedforward)

    ref = _reference(tgt, memory, params, nhead=nhead, pos=pos,
                     query_pos=query_pos)

    # Strict correctness gate: f32 matmul operands.
    out_f32 = transformer_decoder_layer(tgt, memory, params, nhead=nhead,
                                        pos=pos, query_pos=query_pos,
                                        compute_dtype=jnp.float32)
    out_f32 = jax.block_until_ready(out_f32)

    # Fast path: bf16 matmul operands, f32 accumulation / softmax / LayerNorm.
    out_bf16 = transformer_decoder_layer(tgt, memory, params, nhead=nhead,
                                         pos=pos, query_pos=query_pos,
                                         compute_dtype=jnp.bfloat16)
    out_bf16 = jax.block_until_ready(out_bf16)

    ok = (out_f32.shape == (L, N, d_model)
          and bool(jnp.all(jnp.isfinite(out_f32)))
          and bool(jnp.allclose(out_f32, ref, atol=5e-4, rtol=5e-4))
          and bool(jnp.all(jnp.isfinite(out_bf16)))
          and bool(jnp.allclose(out_bf16, ref, atol=1e-1, rtol=1e-1)))
    print("KERNEL_OK" if ok else "KERNEL_MISMATCH")
</pallas_src>

<mosaic_0001>
module attributes {stable_mosaic.version = 11 : i64} {
  func.func @kernel(%arg0: i32, %arg1: memref<4x8x32xf32, #tpu.memory_space<vmem>>, %arg2: memref<4x8x32xf32, #tpu.memory_space<vmem>>, %arg3: memref<4x16x32xf32, #tpu.memory_space<vmem>>, %arg4: memref<4x16x32xf32, #tpu.memory_space<vmem>>, %arg5: memref<32x32xf32, #tpu.memory_space<vmem>>, %arg6: memref<1x32xf32, #tpu.memory_space<vmem>>, %arg7: memref<32x32xf32, #tpu.memory_space<vmem>>, %arg8: memref<1x32xf32, #tpu.memory_space<vmem>>, %arg9: memref<32x32xf32, #tpu.memory_space<vmem>>, %arg10: memref<1x32xf32, #tpu.memory_space<vmem>>, %arg11: memref<32x32xf32, #tpu.memory_space<vmem>>, %arg12: memref<1x32xf32, #tpu.memory_space<vmem>>, %arg13: memref<1x32xf32, #tpu.memory_space<vmem>>, %arg14: memref<1x32xf32, #tpu.memory_space<vmem>>, %arg15: memref<32x32xf32, #tpu.memory_space<vmem>>, %arg16: memref<1x32xf32, #tpu.memory_space<vmem>>, %arg17: memref<32x32xf32, #tpu.memory_space<vmem>>, %arg18: memref<1x32xf32, #tpu.memory_space<vmem>>, %arg19: memref<32x32xf32, #tpu.memory_space<vmem>>, %arg20: memref<1x32xf32, #tpu.memory_space<vmem>>, %arg21: memref<32x32xf32, #tpu.memory_space<vmem>>, %arg22: memref<1x32xf32, #tpu.memory_space<vmem>>, %arg23: memref<4x8x32xf32, #tpu.memory_space<vmem>>, %arg24: memref<4x8x32xf32, #tpu.memory_space<vmem>>) attributes {dimension_semantics = [#tpu.dimension_semantics<parallel>], iteration_bounds = array<i64: 2>, scalar_prefetch = 0 : i64, scratch_operands = 0 : i64, tpu.core_type = #tpu.core_type<tc>, window_params = [{transform_indices = @transform_0, window_bounds = array<i64: 4, 8, 32>}, {transform_indices = @transform_1, window_bounds = array<i64: 4, 8, 32>}, {transform_indices = @transform_2, window_bounds = array<i64: 4, 16, 32>}, {transform_indices = @transform_3, window_bounds = array<i64: 4, 16, 32>}, {pipeline_mode = #tpu.pipeline_mode<synchronous>, transform_indices = @transform_4, window_bounds = array<i64: 32, 32>}, {pipeline_mode = #tpu.pipeline_mode<synchronous>, transform_indices = @transform_5, window_bounds = array<i64: 1, 32>}, {pipeline_mode = #tpu.pipeline_mode<synchronous>, transform_indices = @transform_6, window_bounds = array<i64: 32, 32>}, {pipeline_mode = #tpu.pipeline_mode<synchronous>, transform_indices = @transform_7, window_bounds = array<i64: 1, 32>}, {pipeline_mode = #tpu.pipeline_mode<synchronous>, transform_indices = @transform_8, window_bounds = array<i64: 32, 32>}, {pipeline_mode = #tpu.pipeline_mode<synchronous>, transform_indices = @transform_9, window_bounds = array<i64: 1, 32>}, {pipeline_mode = #tpu.pipeline_mode<synchronous>, transform_indices = @transform_10, window_bounds = array<i64: 32, 32>}, {pipeline_mode = #tpu.pipeline_mode<synchronous>, transform_indices = @transform_11, window_bounds = array<i64: 1, 32>}, {pipeline_mode = #tpu.pipeline_mode<synchronous>, transform_indices = @transform_12, window_bounds = array<i64: 1, 32>}, {pipeline_mode = #tpu.pipeline_mode<synchronous>, transform_indices = @transform_13, window_bounds = array<i64: 1, 32>}, {pipeline_mode = #tpu.pipeline_mode<synchronous>, transform_indices = @transform_14, window_bounds = array<i64: 32, 32>}, {pipeline_mode = #tpu.pipeline_mode<synchronous>, transform_indices = @transform_15, window_bounds = array<i64: 1, 32>}, {pipeline_mode = #tpu.pipeline_mode<synchronous>, transform_indices = @transform_16, window_bounds = array<i64: 32, 32>}, {pipeline_mode = #tpu.pipeline_mode<synchronous>, transform_indices = @transform_17, window_bounds = array<i64: 1, 32>}, {pipeline_mode = #tpu.pipeline_mode<synchronous>, transform_indices = @transform_18, window_bounds = array<i64: 32, 32>}, {pipeline_mode = #tpu.pipeline_mode<synchronous>, transform_indices = @transform_19, window_bounds = array<i64: 1, 32>}, {pipeline_mode = #tpu.pipeline_mode<synchronous>, transform_indices = @transform_20, window_bounds = array<i64: 32, 32>}, {pipeline_mode = #tpu.pipeline_mode<synchronous>, transform_indices = @transform_21, window_bounds = array<i64: 1, 32>}, {transform_indices = @transform_22, window_bounds = array<i64: 4, 8, 32>}, {transform_indices = @transform_23, window_bounds = array<i64: 4, 8, 32>}]} {
    %c0 = arith.constant 0 : index
    %c0_0 = arith.constant 0 : index
    %c0_1 = arith.constant 0 : index
    %0 = vector.load %arg1[%c0, %c0_0, %c0_1] : memref<4x8x32xf32, #tpu.memory_space<vmem>>, vector<4x8x32xf32>
    %c0_2 = arith.constant 0 : index
    %c0_3 = arith.constant 0 : index
    %c0_4 = arith.constant 0 : index
    %1 = vector.load %arg2[%c0_2, %c0_3, %c0_4] : memref<4x8x32xf32, #tpu.memory_space<vmem>>, vector<4x8x32xf32>
    %2 = arith.addf %0, %1 : vector<4x8x32xf32>
    %c0_5 = arith.constant 0 : index
    %c0_6 = arith.constant 0 : index
    %3 = vector.load %arg5[%c0_5, %c0_6] : memref<32x32xf32, #tpu.memory_space<vmem>>, vector<32x32xf32>
    %c0_7 = arith.constant 0 : index
    %c0_8 = arith.constant 0 : index
    %4 = vector.load %arg6[%c0_7, %c0_8] : memref<1x32xf32, #tpu.memory_space<vmem>>, vector<1x32xf32>
    %c0_9 = arith.constant 0 : index
    %c0_10 = arith.constant 0 : index
    %5 = vector.load %arg7[%c0_9, %c0_10] : memref<32x32xf32, #tpu.memory_space<vmem>>, vector<32x32xf32>
    %c0_11 = arith.constant 0 : index
    %c0_12 = arith.constant 0 : index
    %6 = vector.load %arg8[%c0_11, %c0_12] : memref<1x32xf32, #tpu.memory_space<vmem>>, vector<1x32xf32>
    %c0_13 = arith.constant 0 : index
    %c0_14 = arith.constant 0 : index
    %7 = vector.load %arg9[%c0_13, %c0_14] : memref<32x32xf32, #tpu.memory_space<vmem>>, vector<32x32xf32>
    %c0_15 = arith.constant 0 : index
    %c0_16 = arith.constant 0 : index
    %8 = vector.load %arg10[%c0_15, %c0_16] : memref<1x32xf32, #tpu.memory_space<vmem>>, vector<1x32xf32>
    %c0_17 = arith.constant 0 : index
    %c0_18 = arith.constant 0 : index
    %9 = vector.load %arg11[%c0_17, %c0_18] : memref<32x32xf32, #tpu.memory_space<vmem>>, vector<32x32xf32>
    %c0_19 = arith.constant 0 : index
    %c0_20 = arith.constant 0 : index
    %10 = vector.load %arg12[%c0_19, %c0_20] : memref<1x32xf32, #tpu.memory_space<vmem>>, vector<1x32xf32>
    %11 = vector.shape_cast %2 : vector<4x8x32xf32> to vector<32x32xf32>
    %12 = vector.shape_cast %2 : vector<4x8x32xf32> to vector<32x32xf32>
    %13 = vector.shape_cast %0 : vector<4x8x32xf32> to vector<32x32xf32>
    %cst = arith.constant dense<0.000000e+00> : vector<32x32xf32>
    %14 = tpu.matmul %11, %3, %cst {dimension_numbers = #tpu.dot_dimension_numbers<[1], [0], [0], [1], [0, 0, 1, 1], [], []>} : vector<32x32xf32>, vector<32x32xf32>, vector<32x32xf32> -> vector<32x32xf32>
    %15 = vector.broadcast %4 : vector<1x32xf32> to vector<32x32xf32>
    %16 = arith.addf %14, %15 : vector<32x32xf32>
    %cst_21 = arith.constant dense<0.000000e+00> : vector<32x32xf32>
    %17 = tpu.matmul %12, %5, %cst_21 {dimension_numbers = #tpu.dot_dimension_numbers<[1], [0], [0], [1], [0, 0, 1, 1], [], []>} : vector<32x32xf32>, vector<32x32xf32>, vector<32x32xf32> -> vector<32x32xf32>
    %18 = vector.broadcast %6 : vector<1x32xf32> to vector<32x32xf32>
    %19 = arith.addf %17, %18 : vector<32x32xf32>
    %cst_22 = arith.constant dense<0.000000e+00> : vector<32x32xf32>
    %20 = tpu.matmul %13, %7, %cst_22 {dimension_numbers = #tpu.dot_dimension_numbers<[1], [0], [0], [1], [0, 0, 1, 1], [], []>} : vector<32x32xf32>, vector<32x32xf32>, vector<32x32xf32> -> vector<32x32xf32>
    %21 = vector.broadcast %8 : vector<1x32xf32> to vector<32x32xf32>
    %22 = arith.addf %20, %21 : vector<32x32xf32>
    %23 = vector.extract_strided_slice %16 {offsets = [0, 0], sizes = [8, 32], strides = [1, 1]} : vector<32x32xf32> to vector<8x32xf32>
    %cst_23 = arith.constant 0.353553385 : f32
    %24 = vector.broadcast %cst_23 : f32 to vector<8x32xf32>
    %25 = arith.mulf %23, %24 : vector<8x32xf32>
    %26 = vector.shape_cast %25 : vector<8x32xf32> to vector<8x4x8xf32>
    %27 = tpu.transpose %26, [1, 0, 2] : vector<8x4x8xf32> -> vector<4x8x8xf32>
    %28 = vector.extract_strided_slice %19 {offsets = [0, 0], sizes = [8, 32], strides = [1, 1]} : vector<32x32xf32> to vector<8x32xf32>
    %29 = vector.shape_cast %28 : vector<8x32xf32> to vector<8x4x8xf32>
    %30 = tpu.transpose %29, [1, 0, 2] : vector<8x4x8xf32> -> vector<4x8x8xf32>
    %31 = vector.extract_strided_slice %22 {offsets = [0, 0], sizes = [8, 32], strides = [1, 1]} : vector<32x32xf32> to vector<8x32xf32>
    %32 = vector.shape_cast %31 : vector<8x32xf32> to vector<8x4x8xf32>
    %33 = tpu.transpose %32, [1, 0, 2] : vector<8x4x8xf32> -> vector<4x8x8xf32>
    "tpu.trace_start"() <{level = 10 : i32, message = "hld,hsd->hls"}> : () -> ()
    %cst_24 = arith.constant dense<0.000000e+00> : vector<4x8x8xf32>
    %34 = tpu.matmul %27, %30, %cst_24 {dimension_numbers = #tpu.dot_dimension_numbers<[2], [2], [1], [1], [0, 0, 0, 1, 1, 1], [0], [0]>} : vector<4x8x8xf32>, vector<4x8x8xf32>, vector<4x8x8xf32> -> vector<4x8x8xf32>
    "tpu.trace_stop"() : () -> ()
    %cst_25 = arith.constant dense<0xFF800000> : vector<4x8xf32>
    %35 = vector.multi_reduction <maximumf>, %34, %cst_25 [2] : vector<4x8x8xf32> to vector<4x8xf32>
    %36 = vector.shape_cast %35 : vector<4x8xf32> to vector<4x8x1xf32>
    %37 = vector.broadcast %36 : vector<4x8x1xf32> to vector<4x8x8xf32>
    %38 = arith.subf %34, %37 : vector<4x8x8xf32>
    %39 = math.exp %38 : vector<4x8x8xf32>
    %cst_26 = arith.constant dense<0.000000e+00> : vector<4x8xf32>
    %40 = vector.multi_reduction <add>, %39, %cst_26 [2] : vector<4x8x8xf32> to vector<4x8xf32>
    %41 = vector.shape_cast %40 : vector<4x8xf32> to vector<4x8x1xf32>
    %42 = vector.broadcast %41 : vector<4x8x1xf32> to vector<4x8x8xf32>
    %43 = arith.divf %39, %42 : vector<4x8x8xf32>
    "tpu.trace_start"() <{level = 10 : i32, message = "hls,hsd->hld"}> : () -> ()
    %cst_27 = arith.constant dense<0.000000e+00> : vector<4x8x8xf32>
    %44 = tpu.matmul %43, %33, %cst_27 {dimension_numbers = #tpu.dot_dimension_numbers<[2], [1], [1], [2], [0, 0, 0, 1, 1, 2], [0], [0]>} : vector<4x8x8xf32>, vector<4x8x8xf32>, vector<4x8x8xf32> -> vector<4x8x8xf32>
    "tpu.trace_stop"() : () -> ()
    %45 = tpu.transpose %44, [1, 0, 2] : vector<4x8x8xf32> -> vector<8x4x8xf32>
    %46 = vector.shape_cast %45 : vector<8x4x8xf32> to vector<8x32xf32>
    %47 = vector.extract_strided_slice %16 {offsets = [8, 0], sizes = [8, 32], strides = [1, 1]} : vector<32x32xf32> to vector<8x32xf32>
    %cst_28 = arith.constant 0.353553385 : f32
    %48 = vector.broadcast %cst_28 : f32 to vector<8x32xf32>
    %49 = arith.mulf %47, %48 : vector<8x32xf32>
    %50 = vector.shape_cast %49 : vector<8x32xf32> to vector<8x4x8xf32>
    %51 = tpu.transpose %50, [1, 0, 2] : vector<8x4x8xf32> -> vector<4x8x8xf32>
    %52 = vector.extract_strided_slice %19 {offsets = [8, 0], sizes = [8, 32], strides = [1, 1]} : vector<32x32xf32> to vector<8x32xf32>
    %53 = vector.shape_cast %52 : vector<8x32xf32> to vector<8x4x8xf32>
    %54 = tpu.transpose %53, [1, 0, 2] : vector<8x4x8xf32> -> vector<4x8x8xf32>
    %55 = vector.extract_strided_slice %22 {offsets = [8, 0], sizes = [8, 32], strides = [1, 1]} : vector<32x32xf32> to vector<8x32xf32>
    %56 = vector.shape_cast %55 : vector<8x32xf32> to vector<8x4x8xf32>
    %57 = tpu.transpose %56, [1, 0, 2] : vector<8x4x8xf32> -> vector<4x8x8xf32>
    "tpu.trace_start"() <{level = 10 : i32, message = "hld,hsd->hls"}> : () -> ()
    %cst_29 = arith.constant dense<0.000000e+00> : vector<4x8x8xf32>
    %58 = tpu.matmul %51, %54, %cst_29 {dimension_numbers = #tpu.dot_dimension_numbers<[2], [2], [1], [1], [0, 0, 0, 1, 1, 1], [0], [0]>} : vector<4x8x8xf32>, vector<4x8x8xf32>, vector<4x8x8xf32> -> vector<4x8x8xf32>
    "tpu.trace_stop"() : () -> ()
    %cst_30 = arith.constant dense<0xFF800000> : vector<4x8xf32>
    %59 = vector.multi_reduction <maximumf>, %58, %cst_30 [2] : vector<4x8x8xf32> to vector<4x8xf32>
    %60 = vector.shape_cast %59 : vector<4x8xf32> to vector<4x8x1xf32>
    %61 = vector.broadcast %60 : vector<4x8x1xf32> to vector<4x8x8xf32>
    %62 = arith.subf %58, %61 : vector<4x8x8xf32>
    %63 = math.exp %62 : vector<4x8x8xf32>
    %cst_31 = arith.constant dense<0.000000e+00> : vector<4x8xf32>
    %64 = vector.multi_reduction <add>, %63, %cst_31 [2] : vector<4x8x8xf32> to vector<4x8xf32>
    %65 = vector.shape_cast %64 : vector<4x8xf32> to vector<4x8x1xf32>
    %66 = vector.broadcast %65 : vector<4x8x1xf32> to vector<4x8x8xf32>
    %67 = arith.divf %63, %66 : vector<4x8x8xf32>
    "tpu.trace_start"() <{level = 10 : i32, message = "hls,hsd->hld"}> : () -> ()
    %cst_32 = arith.constant dense<0.000000e+00> : vector<4x8x8xf32>
    %68 = tpu.matmul %67, %57, %cst_32 {dimension_numbers = #tpu.dot_dimension_numbers<[2], [1], [1], [2], [0, 0, 0, 1, 1, 2], [0], [0]>} : vector<4x8x8xf32>, vector<4x8x8xf32>, vector<4x8x8xf32> -> vector<4x8x8xf32>
    "tpu.trace_stop"() : () -> ()
    %69 = tpu.transpose %68, [1, 0, 2] : vector<4x8x8xf32> -> vector<8x4x8xf32>
    %70 = vector.shape_cast %69 : vector<8x4x8xf32> to vector<8x32xf32>
    %71 = vector.extract_strided_slice %16 {offsets = [16, 0], sizes = [8, 32], strides = [1, 1]} : vector<32x32xf32> to vector<8x32xf32>
    %cst_33 = arith.constant 0.353553385 : f32
    %72 = vector.broadcast %cst_33 : f32 to vector<8x32xf32>
    %73 = arith.mulf %71, %72 : vector<8x32xf32>
    %74 = vector.shape_cast %73 : vector<8x32xf32> to vector<8x4x8xf32>
    %75 = tpu.transpose %74, [1, 0, 2] : vector<8x4x8xf32> -> vector<4x8x8xf32>
    %76 = vector.extract_strided_slice %19 {offsets = [16, 0], sizes = [8, 32], strides = [1, 1]} : vector<32x32xf32> to vector<8x32xf32>
    %77 = vector.shape_cast %76 : vector<8x32xf32> to vector<8x4x8xf32>
    %78 = tpu.transpose %77, [1, 0, 2] : vector<8x4x8xf32> -> vector<4x8x8xf32>
    %79 = vector.extract_strided_slice %22 {offsets = [16, 0], sizes = [8, 32], strides = [1, 1]} : vector<32x32xf32> to vector<8x32xf32>
    %80 = vector.shape_cast %79 : vector<8x32xf32> to vector<8x4x8xf32>
    %81 = tpu.transpose %80, [1, 0, 2] : vector<8x4x8xf32> -> vector<4x8x8xf32>
    "tpu.trace_start"() <{level = 10 : i32, message = "hld,hsd->hls"}> : () -> ()
    %cst_34 = arith.constant dense<0.000000e+00> : vector<4x8x8xf32>
    %82 = tpu.matmul %75, %78, %cst_34 {dimension_numbers = #tpu.dot_dimension_numbers<[2], [2], [1], [1], [0, 0, 0, 1, 1, 1], [0], [0]>} : vector<4x8x8xf32>, vector<4x8x8xf32>, vector<4x8x8xf32> -> vector<4x8x8xf32>
    "tpu.trace_stop"() : () -> ()
    %cst_35 = arith.constant dense<0xFF800000> : vector<4x8xf32>
    %83 = vector.multi_reduction <maximumf>, %82, %cst_35 [2] : vector<4x8x8xf32> to vector<4x8xf32>
    %84 = vector.shape_cast %83 : vector<4x8xf32> to vector<4x8x1xf32>
    %85 = vector.broadcast %84 : vector<4x8x1xf32> to vector<4x8x8xf32>
    %86 = arith.subf %82, %85 : vector<4x8x8xf32>
    %87 = math.exp %86 : vector<4x8x8xf32>
    %cst_36 = arith.constant dense<0.000000e+00> : vector<4x8xf32>
    %88 = vector.multi_reduction <add>, %87, %cst_36 [2] : vector<4x8x8xf32> to vector<4x8xf32>
    %89 = vector.shape_cast %88 : vector<4x8xf32> to vector<4x8x1xf32>
    %90 = vector.broadcast %89 : vector<4x8x1xf32> to vector<4x8x8xf32>
    %91 = arith.divf %87, %90 : vector<4x8x8xf32>
    "tpu.trace_start"() <{level = 10 : i32, message = "hls,hsd->hld"}> : () -> ()
    %cst_37 = arith.constant dense<0.000000e+00> : vector<4x8x8xf32>
    %92 = tpu.matmul %91, %81, %cst_37 {dimension_numbers = #tpu.dot_dimension_numbers<[2], [1], [1], [2], [0, 0, 0, 1, 1, 2], [0], [0]>} : vector<4x8x8xf32>, vector<4x8x8xf32>, vector<4x8x8xf32> -> vector<4x8x8xf32>
    "tpu.trace_stop"() : () -> ()
    %93 = tpu.transpose %92, [1, 0, 2] : vector<4x8x8xf32> -> vector<8x4x8xf32>
    %94 = vector.shape_cast %93 : vector<8x4x8xf32> to vector<8x32xf32>
    %95 = vector.extract_strided_slice %16 {offsets = [24, 0], sizes = [8, 32], strides = [1, 1]} : vector<32x32xf32> to vector<8x32xf32>
    %cst_38 = arith.constant 0.353553385 : f32
    %96 = vector.broadcast %cst_38 : f32 to vector<8x32xf32>
    %97 = arith.mulf %95, %96 : vector<8x32xf32>
    %98 = vector.shape_cast %97 : vector<8x32xf32> to vector<8x4x8xf32>
    %99 = tpu.transpose %98, [1, 0, 2] : vector<8x4x8xf32> -> vector<4x8x8xf32>
    %100 = vector.extract_strided_slice %19 {offsets = [24, 0], sizes = [8, 32], strides = [1, 1]} : vector<32x32xf32> to vector<8x32xf32>
    %101 = vector.shape_cast %100 : vector<8x32xf32> to vector<8x4x8xf32>
    %102 = tpu.transpose %101, [1, 0, 2] : vector<8x4x8xf32> -> vector<4x8x8xf32>
    %103 = vector.extract_strided_slice %22 {offsets = [24, 0], sizes = [8, 32], strides = [1, 1]} : vector<32x32xf32> to vector<8x32xf32>
    %104 = vector.shape_cast %103 : vector<8x32xf32> to vector<8x4x8xf32>
    %105 = tpu.transpose %104, [1, 0, 2] : vector<8x4x8xf32> -> vector<4x8x8xf32>
    "tpu.trace_start"() <{level = 10 : i32, message = "hld,hsd->hls"}> : () -> ()
    %cst_39 = arith.constant dense<0.000000e+00> : vector<4x8x8xf32>
    %106 = tpu.matmul %99, %102, %cst_39 {dimension_numbers = #tpu.dot_dimension_numbers<[2], [2], [1], [1], [0, 0, 0, 1, 1, 1], [0], [0]>} : vector<4x8x8xf32>, vector<4x8x8xf32>, vector<4x8x8xf32> -> vector<4x8x8xf32>
    "tpu.trace_stop"() : () -> ()
    %cst_40 = arith.constant dense<0xFF800000> : vector<4x8xf32>
    %107 = vector.multi_reduction <maximumf>, %106, %cst_40 [2] : vector<4x8x8xf32> to vector<4x8xf32>
    %108 = vector.shape_cast %107 : vector<4x8xf32> to vector<4x8x1xf32>
    %109 = vector.broadcast %108 : vector<4x8x1xf32> to vector<4x8x8xf32>
    %110 = arith.subf %106, %109 : vector<4x8x8xf32>
    %111 = math.exp %110 : vector<4x8x8xf32>
    %cst_41 = arith.constant dense<0.000000e+00> : vector<4x8xf32>
    %112 = vector.multi_reduction <add>, %111, %cst_41 [2] : vector<4x8x8xf32> to vector<4x8xf32>
    %113 = vector.shape_cast %112 : vector<4x8xf32> to vector<4x8x1xf32>
    %114 = vector.broadcast %113 : vector<4x8x1xf32> to vector<4x8x8xf32>
    %115 = arith.divf %111, %114 : vector<4x8x8xf32>
    "tpu.trace_start"() <{level = 10 : i32, message = "hls,hsd->hld"}> : () -> ()
    %cst_42 = arith.constant dense<0.000000e+00> : vector<4x8x8xf32>
    %116 = tpu.matmul %115, %105, %cst_42 {dimension_numbers = #tpu.dot_dimension_numbers<[2], [1], [1], [2], [0, 0, 0, 1, 1, 2], [0], [0]>} : vector<4x8x8xf32>, vector<4x8x8xf32>, vector<4x8x8xf32> -> vector<4x8x8xf32>
    "tpu.trace_stop"() : () -> ()
    %117 = tpu.transpose %116, [1, 0, 2] : vector<4x8x8xf32> -> vector<8x4x8xf32>
    %118 = vector.shape_cast %117 : vector<8x4x8xf32> to vector<8x32xf32>
    %119 = tpu.concatenate %46, %70, %94, %118 in 0 : vector<8x32xf32>, vector<8x32xf32>, vector<8x32xf32>, vector<8x32xf32> -> vector<32x32xf32>
    %cst_43 = arith.constant dense<0.000000e+00> : vector<32x32xf32>
    %120 = tpu.matmul %119, %9, %cst_43 {dimension_numbers = #tpu.dot_dimension_numbers<[1], [0], [0], [1], [0, 0, 1, 1], [], []>} : vector<32x32xf32>, vector<32x32xf32>, vector<32x32xf32> -> vector<32x32xf32>
    %121 = vector.broadcast %10 : vector<1x32xf32> to vector<32x32xf32>
    %122 = arith.addf %120, %121 : vector<32x32xf32>
    %123 = vector.shape_cast %122 : vector<32x32xf32> to vector<4x8x32xf32>
    %124 = arith.addf %0, %123 : vector<4x8x32xf32>
    %c0_44 = arith.constant 0 : index
    %c0_45 = arith.constant 0 : index
    %125 = vector.load %arg13[%c0_44, %c0_45] : memref<1x32xf32, #tpu.memory_space<vmem>>, vector<1x32xf32>
    %c0_46 = arith.constant 0 : index
    %c0_47 = arith.constant 0 : index
    %126 = vector.load %arg14[%c0_46, %c0_47] : memref<1x32xf32, #tpu.memory_space<vmem>>, vector<1x32xf32>
    %cst_48 = arith.constant dense<0.000000e+00> : vector<4x8xf32>
    %127 = vector.multi_reduction <add>, %124, %cst_48 [2] : vector<4x8x32xf32> to vector<4x8xf32>
    %128 = vector.shape_cast %127 : vector<4x8xf32> to vector<4x8x1xf32>
    %cst_49 = arith.constant 3.200000e+01 : f32
    %129 = vector.broadcast %cst_49 : f32 to vector<4x8x1xf32>
    %130 = arith.divf %128, %129 : vector<4x8x1xf32>
    %131 = vector.broadcast %130 : vector<4x8x1xf32> to vector<4x8x32xf32>
    %132 = arith.subf %124, %131 : vector<4x8x32xf32>
    %133 = arith.mulf %132, %132 : vector<4x8x32xf32>
    %cst_50 = arith.constant dense<0.000000e+00> : vector<4x8xf32>
    %134 = vector.multi_reduction <add>, %133, %cst_50 [2] : vector<4x8x32xf32> to vector<4x8xf32>
    %135 = vector.shape_cast %134 : vector<4x8xf32> to vector<4x8x1xf32>
    %cst_51 = arith.constant 3.200000e+01 : f32
    %136 = vector.broadcast %cst_51 : f32 to vector<4x8x1xf32>
    %137 = arith.divf %135, %136 : vector<4x8x1xf32>
    %cst_52 = arith.constant 9.99999974E-6 : f32
    %138 = vector.broadcast %cst_52 : f32 to vector<4x8x1xf32>
    %139 = arith.addf %137, %138 : vector<4x8x1xf32>
    %140 = math.rsqrt %139 : vector<4x8x1xf32>
    %141 = vector.broadcast %140 : vector<4x8x1xf32> to vector<4x8x32xf32>
    %142 = arith.mulf %132, %141 : vector<4x8x32xf32>
    %143 = vector.shape_cast %125 : vector<1x32xf32> to vector<1x1x32xf32>
    %144 = vector.broadcast %143 : vector<1x1x32xf32> to vector<4x8x32xf32>
    %145 = arith.mulf %142, %144 : vector<4x8x32xf32>
    %146 = vector.shape_cast %126 : vector<1x32xf32> to vector<1x1x32xf32>
    %147 = vector.broadcast %146 : vector<1x1x32xf32> to vector<4x8x32xf32>
    %148 = arith.addf %145, %147 : vector<4x8x32xf32>
    %c0_53 = arith.constant 0 : index
    %c0_54 = arith.constant 0 : index
    %c0_55 = arith.constant 0 : index
    %149 = vector.load %arg23[%c0_53, %c0_54, %c0_55] : memref<4x8x32xf32, #tpu.memory_space<vmem>>, vector<4x8x32xf32>
    tpu.vector_store %arg23[%c0_53, %c0_54, %c0_55], %148 {strides = array<i32>} : memref<4x8x32xf32, #tpu.memory_space<vmem>>, vector<4x8x32xf32>,
    %c0_56 = arith.constant 0 : index
    %c0_57 = arith.constant 0 : index
    %c0_58 = arith.constant 0 : index
    %150 = vector.load %arg3[%c0_56, %c0_57, %c0_58] : memref<4x16x32xf32, #tpu.memory_space<vmem>>, vector<4x16x32xf32>
    %c0_59 = arith.constant 0 : index
    %c0_60 = arith.constant 0 : index
    %c0_61 = arith.constant 0 : index
    %151 = vector.load %arg2[%c0_59, %c0_60, %c0_61] : memref<4x8x32xf32, #tpu.memory_space<vmem>>, vector<4x8x32xf32>
    %152 = arith.addf %148, %151 : vector<4x8x32xf32>
    %c0_62 = arith.constant 0 : index
    %c0_63 = arith.constant 0 : index
    %c0_64 = arith.constant 0 : index
    %153 = vector.load %arg4[%c0_62, %c0_63, %c0_64] : memref<4x16x32xf32, #tpu.memory_space<vmem>>, vector<4x16x32xf32>
    %154 = arith.addf %150, %153 : vector<4x16x32xf32>
    %c0_65 = arith.constant 0 : index
    %c0_66 = arith.constant 0 : index
    %155 = vector.load %arg15[%c0_65, %c0_66] : memref<32x32xf32, #tpu.memory_space<vmem>>, vector<32x32xf32>
    %c0_67 = arith.constant 0 : index
    %c0_68 = arith.constant 0 : index
    %156 = vector.load %arg16[%c0_67, %c0_68] : memref<1x32xf32, #tpu.memory_space<vmem>>, vector<1x32xf32>
    %c0_69 = arith.constant 0 : index
    %c0_70 = arith.constant 0 : index
    %157 = vector.load %arg17[%c0_69, %c0_70] : memref<32x32xf32, #tpu.memory_space<vmem>>, vector<32x32xf32>
    %c0_71 = arith.constant 0 : index
    %c0_72 = arith.constant 0 : index
    %158 = vector.load %arg18[%c0_71, %c0_72] : memref<1x32xf32, #tpu.memory_space<vmem>>, vector<1x32xf32>
    %c0_73 = arith.constant 0 : index
    %c0_74 = arith.constant 0 : index
    %159 = vector.load %arg19[%c0_73, %c0_74] : memref<32x32xf32, #tpu.memory_space<vmem>>, vector<32x32xf32>
    %c0_75 = arith.constant 0 : index
    %c0_76 = arith.constant 0 : index
    %160 = vector.load %arg20[%c0_75, %c0_76] : memref<1x32xf32, #tpu.memory_space<vmem>>, vector<1x32xf32>
    %c0_77 = arith.constant 0 : index
    %c0_78 = arith.constant 0 : index
    %161 = vector.load %arg21[%c0_77, %c0_78] : memref<32x32xf32, #tpu.memory_space<vmem>>, vector<32x32xf32>
    %c0_79 = arith.constant 0 : index
    %c0_80 = arith.constant 0 : index
    %162 = vector.load %arg22[%c0_79, %c0_80] : memref<1x32xf32, #tpu.memory_space<vmem>>, vector<1x32xf32>
    %163 = vector.shape_cast %152 : vector<4x8x32xf32> to vector<32x32xf32>
    %164 = vector.shape_cast %154 : vector<4x16x32xf32> to vector<64x32xf32>
    %165 = vector.shape_cast %150 : vector<4x16x32xf32> to vector<64x32xf32>
    %cst_81 = arith.constant dense<0.000000e+00> : vector<32x32xf32>
    %166 = tpu.matmul %163, %155, %cst_81 {dimension_numbers = #tpu.dot_dimension_numbers<[1], [0], [0], [1], [0, 0, 1, 1], [], []>} : vector<32x32xf32>, vector<32x32xf32>, vector<32x32xf32> -> vector<32x32xf32>
    %167 = vector.broadcast %156 : vector<1x32xf32> to vector<32x32xf32>
    %168 = arith.addf %166, %167 : vector<32x32xf32>
    %cst_82 = arith.constant dense<0.000000e+00> : vector<64x32xf32>
    %169 = tpu.matmul %164, %157, %cst_82 {dimension_numbers = #tpu.dot_dimension_numbers<[1], [0], [0], [1], [0, 0, 1, 1], [], []>} : vector<64x32xf32>, vector<32x32xf32>, vector<64x32xf32> -> vector<64x32xf32>
    %170 = vector.broadcast %158 : vector<1x32xf32> to vector<64x32xf32>
    %171 = arith.addf %169, %170 : vector<64x32xf32>
    %cst_83 = arith.constant dense<0.000000e+00> : vector<64x32xf32>
    %172 = tpu.matmul %165, %159, %cst_83 {dimension_numbers = #tpu.dot_dimension_numbers<[1], [0], [0], [1], [0, 0, 1, 1], [], []>} : vector<64x32xf32>, vector<32x32xf32>, vector<64x32xf32> -> vector<64x32xf32>
    %173 = vector.broadcast %160 : vector<1x32xf32> to vector<64x32xf32>
    %174 = arith.addf %172, %173 : vector<64x32xf32>
    %175 = vector.extract_strided_slice %168 {offsets = [0, 0], sizes = [8, 32], strides = [1, 1]} : vector<32x32xf32> to vector<8x32xf32>
    %cst_84 = arith.constant 0.353553385 : f32
    %176 = vector.broadcast %cst_84 : f32 to vector<8x32xf32>
    %177 = arith.mulf %175, %176 : vector<8x32xf32>
    %178 = vector.shape_cast %177 : vector<8x32xf32> to vector<8x4x8xf32>
    %179 = tpu.transpose %178, [1, 0, 2] : vector<8x4x8xf32> -> vector<4x8x8xf32>
    %180 = vector.extract_strided_slice %171 {offsets = [0, 0], sizes = [16, 32], strides = [1, 1]} : vector<64x32xf32> to vector<16x32xf32>
    %181 = vector.shape_cast %180 : vector<16x32xf32> to vector<16x4x8xf32>
    %182 = tpu.transpose %181, [1, 0, 2] : vector<16x4x8xf32> -> vector<4x16x8xf32>
    %183 = vector.extract_strided_slice %174 {offsets = [0, 0], sizes = [16, 32], strides = [1, 1]} : vector<64x32xf32> to vector<16x32xf32>
    %184 = vector.shape_cast %183 : vector<16x32xf32> to vector<16x4x8xf32>
    %185 = tpu.transpose %184, [1, 0, 2] : vector<16x4x8xf32> -> vector<4x16x8xf32>
    "tpu.trace_start"() <{level = 10 : i32, message = "hld,hsd->hls"}> : () -> ()
    %cst_85 = arith.constant dense<0.000000e+00> : vector<4x8x16xf32>
    %186 = tpu.matmul %179, %182, %cst_85 {dimension_numbers = #tpu.dot_dimension_numbers<[2], [2], [1], [1], [0, 0, 0, 1, 1, 1], [0], [0]>} : vector<4x8x8xf32>, vector<4x16x8xf32>, vector<4x8x16xf32> -> vector<4x8x16xf32>
    "tpu.trace_stop"() : () -> ()
    %cst_86 = arith.constant dense<0xFF800000> : vector<4x8xf32>
    %187 = vector.multi_reduction <maximumf>, %186, %cst_86 [2] : vector<4x8x16xf32> to vector<4x8xf32>
    %188 = vector.shape_cast %187 : vector<4x8xf32> to vector<4x8x1xf32>
    %189 = vector.broadcast %188 : vector<4x8x1xf32> to vector<4x8x16xf32>
    %190 = arith.subf %186, %189 : vector<4x8x16xf32>
    %191 = math.exp %190 : vector<4x8x16xf32>
    %cst_87 = arith.constant dense<0.000000e+00> : vector<4x8xf32>
    %192 = vector.multi_reduction <add>, %191, %cst_87 [2] : vector<4x8x16xf32> to vector<4x8xf32>
    %193 = vector.shape_cast %192 : vector<4x8xf32> to vector<4x8x1xf32>
    %194 = vector.broadcast %193 : vector<4x8x1xf32> to vector<4x8x16xf32>
    %195 = arith.divf %191, %194 : vector<4x8x16xf32>
    "tpu.trace_start"() <{level = 10 : i32, message = "hls,hsd->hld"}> : () -> ()
    %cst_88 = arith.constant dense<0.000000e+00> : vector<4x8x8xf32>
    %196 = tpu.matmul %195, %185, %cst_88 {dimension_numbers = #tpu.dot_dimension_numbers<[2], [1], [1], [2], [0, 0, 0, 1, 1, 2], [0], [0]>} : vector<4x8x16xf32>, vector<4x16x8xf32>, vector<4x8x8xf32> -> vector<4x8x8xf32>
    "tpu.trace_stop"() : () -> ()
    %197 = tpu.transpose %196, [1, 0, 2] : vector<4x8x8xf32> -> vector<8x4x8xf32>
    %198 = vector.shape_cast %197 : vector<8x4x8xf32> to vector<8x32xf32>
    %199 = vector.extract_strided_slice %168 {offsets = [8, 0], sizes = [8, 32], strides = [1, 1]} : vector<32x32xf32> to vector<8x32xf32>
    %cst_89 = arith.constant 0.353553385 : f32
    %200 = vector.broadcast %cst_89 : f32 to vector<8x32xf32>
    %201 = arith.mulf %199, %200 : vector<8x32xf32>
    %202 = vector.shape_cast %201 : vector<8x32xf32> to vector<8x4x8xf32>
    %203 = tpu.transpose %202, [1, 0, 2] : vector<8x4x8xf32> -> vector<4x8x8xf32>
    %204 = vector.extract_strided_slice %171 {offsets = [16, 0], sizes = [16, 32], strides = [1, 1]} : vector<64x32xf32> to vector<16x32xf32>
    %205 = vector.shape_cast %204 : vector<16x32xf32> to vector<16x4x8xf32>
    %206 = tpu.transpose %205, [1, 0, 2] : vector<16x4x8xf32> -> vector<4x16x8xf32>
    %207 = vector.extract_strided_slice %174 {offsets = [16, 0], sizes = [16, 32], strides = [1, 1]} : vector<64x32xf32> to vector<16x32xf32>
    %208 = vector.shape_cast %207 : vector<16x32xf32> to vector<16x4x8xf32>
    %209 = tpu.transpose %208, [1, 0, 2] : vector<16x4x8xf32> -> vector<4x16x8xf32>
    "tpu.trace_start"() <{level = 10 : i32, message = "hld,hsd->hls"}> : () -> ()
    %cst_90 = arith.constant dense<0.000000e+00> : vector<4x8x16xf32>
    %210 = tpu.matmul %203, %206, %cst_90 {dimension_numbers = #tpu.dot_dimension_numbers<[2], [2], [1], [1], [0, 0, 0, 1, 1, 1], [0], [0]>} : vector<4x8x8xf32>, vector<4x16x8xf32>, vector<4x8x16xf32> -> vector<4x8x16xf32>
    "tpu.trace_stop"() : () -> ()
    %cst_91 = arith.constant dense<0xFF800000> : vector<4x8xf32>
    %211 = vector.multi_reduction <maximumf>, %210, %cst_91 [2] : vector<4x8x16xf32> to vector<4x8xf32>
    %212 = vector.shape_cast %211 : vector<4x8xf32> to vector<4x8x1xf32>
    %213 = vector.broadcast %212 : vector<4x8x1xf32> to vector<4x8x16xf32>
    %214 = arith.subf %210, %213 : vector<4x8x16xf32>
    %215 = math.exp %214 : vector<4x8x16xf32>
    %cst_92 = arith.constant dense<0.000000e+00> : vector<4x8xf32>
    %216 = vector.multi_reduction <add>, %215, %cst_92 [2] : vector<4x8x16xf32> to vector<4x8xf32>
    %217 = vector.shape_cast %216 : vector<4x8xf32> to vector<4x8x1xf32>
    %218 = vector.broadcast %217 : vector<4x8x1xf32> to vector<4x8x16xf32>
    %219 = arith.divf %215, %218 : vector<4x8x16xf32>
    "tpu.trace_start"() <{level = 10 : i32, message = "hls,hsd->hld"}> : () -> ()
    %cst_93 = arith.constant dense<0.000000e+00> : vector<4x8x8xf32>
    %220 = tpu.matmul %219, %209, %cst_93 {dimension_numbers = #tpu.dot_dimension_numbers<[2], [1], [1], [2], [0, 0, 0, 1, 1, 2], [0], [0]>} : vector<4x8x16xf32>, vector<4x16x8xf32>, vector<4x8x8xf32> -> vector<4x8x8xf32>
    "tpu.trace_stop"() : () -> ()
    %221 = tpu.transpose %220, [1, 0, 2] : vector<4x8x8xf32> -> vector<8x4x8xf32>
    %222 = vector.shape_cast %221 : vector<8x4x8xf32> to vector<8x32xf32>
    %223 = vector.extract_strided_slice %168 {offsets = [16, 0], sizes = [8, 32], strides = [1, 1]} : vector<32x32xf32> to vector<8x32xf32>
    %cst_94 = arith.constant 0.353553385 : f32
    %224 = vector.broadcast %cst_94 : f32 to vector<8x32xf32>
    %225 = arith.mulf %223, %224 : vector<8x32xf32>
    %226 = vector.shape_cast %225 : vector<8x32xf32> to vector<8x4x8xf32>
    %227 = tpu.transpose %226, [1, 0, 2] : vector<8x4x8xf32> -> vector<4x8x8xf32>
    %228 = vector.extract_strided_slice %171 {offsets = [32, 0], sizes = [16, 32], strides = [1, 1]} : vector<64x32xf32> to vector<16x32xf32>
    %229 = vector.shape_cast %228 : vector<16x32xf32> to vector<16x4x8xf32>
    %230 = tpu.transpose %229, [1, 0, 2] : vector<16x4x8xf32> -> vector<4x16x8xf32>
    %231 = vector.extract_strided_slice %174 {offsets = [32, 0], sizes = [16, 32], strides = [1, 1]} : vector<64x32xf32> to vector<16x32xf32>
    %232 = vector.shape_cast %231 : vector<16x32xf32> to vector<16x4x8xf32>
    %233 = tpu.transpose %232, [1, 0, 2] : vector<16x4x8xf32> -> vector<4x16x8xf32>
    "tpu.trace_start"() <{level = 10 : i32, message = "hld,hsd->hls"}> : () -> ()
    %cst_95 = arith.constant dense<0.000000e+00> : vector<4x8x16xf32>
    %234 = tpu.matmul %227, %230, %cst_95 {dimension_numbers = #tpu.dot_dimension_numbers<[2], [2], [1], [1], [0, 0, 0, 1, 1, 1], [0], [0]>} : vector<4x8x8xf32>, vector<4x16x8xf32>, vector<4x8x16xf32> -> vector<4x8x16xf32>
    "tpu.trace_stop"() : () -> ()
    %cst_96 = arith.constant dense<0xFF800000> : vector<4x8xf32>
    %235 = vector.multi_reduction <maximumf>, %234, %cst_96 [2] : vector<4x8x16xf32> to vector<4x8xf32>
    %236 = vector.shape_cast %235 : vector<4x8xf32> to vector<4x8x1xf32>
    %237 = vector.broadcast %236 : vector<4x8x1xf32> to vector<4x8x16xf32>
    %238 = arith.subf %234, %237 : vector<4x8x16xf32>
    %239 = math.exp %238 : vector<4x8x16xf32>
    %cst_97 = arith.constant dense<0.000000e+00> : vector<4x8xf32>
    %240 = vector.multi_reduction <add>, %239, %cst_97 [2] : vector<4x8x16xf32> to vector<4x8xf32>
    %241 = vector.shape_cast %240 : vector<4x8xf32> to vector<4x8x1xf32>
    %242 = vector.broadcast %241 : vector<4x8x1xf32> to vector<4x8x16xf32>
    %243 = arith.divf %239, %242 : vector<4x8x16xf32>
    "tpu.trace_start"() <{level = 10 : i32, message = "hls,hsd->hld"}> : () -> ()
    %cst_98 = arith.constant dense<0.000000e+00> : vector<4x8x8xf32>
    %244 = tpu.matmul %243, %233, %cst_98 {dimension_numbers = #tpu.dot_dimension_numbers<[2], [1], [1], [2], [0, 0, 0, 1, 1, 2], [0], [0]>} : vector<4x8x16xf32>, vector<4x16x8xf32>, vector<4x8x8xf32> -> vector<4x8x8xf32>
    "tpu.trace_stop"() : () -> ()
    %245 = tpu.transpose %244, [1, 0, 2] : vector<4x8x8xf32> -> vector<8x4x8xf32>
    %246 = vector.shape_cast %245 : vector<8x4x8xf32> to vector<8x32xf32>
    %247 = vector.extract_strided_slice %168 {offsets = [24, 0], sizes = [8, 32], strides = [1, 1]} : vector<32x32xf32> to vector<8x32xf32>
    %cst_99 = arith.constant 0.353553385 : f32
    %248 = vector.broadcast %cst_99 : f32 to vector<8x32xf32>
    %249 = arith.mulf %247, %248 : vector<8x32xf32>
    %250 = vector.shape_cast %249 : vector<8x32xf32> to vector<8x4x8xf32>
    %251 = tpu.transpose %250, [1, 0, 2] : vector<8x4x8xf32> -> vector<4x8x8xf32>
    %252 = vector.extract_strided_slice %171 {offsets = [48, 0], sizes = [16, 32], strides = [1, 1]} : vector<64x32xf32> to vector<16x32xf32>
    %253 = vector.shape_cast %252 : vector<16x32xf32> to vector<16x4x8xf32>
    %254 = tpu.transpose %253, [1, 0, 2] : vector<16x4x8xf32> -> vector<4x16x8xf32>
    %255 = vector.extract_strided_slice %174 {offsets = [48, 0], sizes = [16, 32], strides = [1, 1]} : vector<64x32xf32> to vector<16x32xf32>
    %256 = vector.shape_cast %255 : vector<16x32xf32> to vector<16x4x8xf32>
    %257 = tpu.transpose %256, [1, 0, 2] : vector<16x4x8xf32> -> vector<4x16x8xf32>
    "tpu.trace_start"() <{level = 10 : i32, message = "hld,hsd->hls"}> : () -> ()
    %cst_100 = arith.constant dense<0.000000e+00> : vector<4x8x16xf32>
    %258 = tpu.matmul %251, %254, %cst_100 {dimension_numbers = #tpu.dot_dimension_numbers<[2], [2], [1], [1], [0, 0, 0, 1, 1, 1], [0], [0]>} : vector<4x8x8xf32>, vector<4x16x8xf32>, vector<4x8x16xf32> -> vector<4x8x16xf32>
    "tpu.trace_stop"() : () -> ()
    %cst_101 = arith.constant dense<0xFF800000> : vector<4x8xf32>
    %259 = vector.multi_reduction <maximumf>, %258, %cst_101 [2] : vector<4x8x16xf32> to vector<4x8xf32>
    %260 = vector.shape_cast %259 : vector<4x8xf32> to vector<4x8x1xf32>
    %261 = vector.broadcast %260 : vector<4x8x1xf32> to vector<4x8x16xf32>
    %262 = arith.subf %258, %261 : vector<4x8x16xf32>
    %263 = math.exp %262 : vector<4x8x16xf32>
    %cst_102 = arith.constant dense<0.000000e+00> : vector<4x8xf32>
    %264 = vector.multi_reduction <add>, %263, %cst_102 [2] : vector<4x8x16xf32> to vector<4x8xf32>
    %265 = vector.shape_cast %264 : vector<4x8xf32> to vector<4x8x1xf32>
    %266 = vector.broadcast %265 : vector<4x8x1xf32> to vector<4x8x16xf32>
    %267 = arith.divf %263, %266 : vector<4x8x16xf32>
    "tpu.trace_start"() <{level = 10 : i32, message = "hls,hsd->hld"}> : () -> ()
    %cst_103 = arith.constant dense<0.000000e+00> : vector<4x8x8xf32>
    %268 = tpu.matmul %267, %257, %cst_103 {dimension_numbers = #tpu.dot_dimension_numbers<[2], [1], [1], [2], [0, 0, 0, 1, 1, 2], [0], [0]>} : vector<4x8x16xf32>, vector<4x16x8xf32>, vector<4x8x8xf32> -> vector<4x8x8xf32>
    "tpu.trace_stop"() : () -> ()
    %269 = tpu.transpose %268, [1, 0, 2] : vector<4x8x8xf32> -> vector<8x4x8xf32>
    %270 = vector.shape_cast %269 : vector<8x4x8xf32> to vector<8x32xf32>
    %271 = tpu.concatenate %198, %222, %246, %270 in 0 : vector<8x32xf32>, vector<8x32xf32>, vector<8x32xf32>, vector<8x32xf32> -> vector<32x32xf32>
    %cst_104 = arith.constant dense<0.000000e+00> : vector<32x32xf32>
    %272 = tpu.matmul %271, %161, %cst_104 {dimension_numbers = #tpu.dot_dimension_numbers<[1], [0], [0], [1], [0, 0, 1, 1], [], []>} : vector<32x32xf32>, vector<32x32xf32>, vector<32x32xf32> -> vector<32x32xf32>
    %273 = vector.broadcast %162 : vector<1x32xf32> to vector<32x32xf32>
    %274 = arith.addf %272, %273 : vector<32x32xf32>
    %275 = vector.shape_cast %274 : vector<32x32xf32> to vector<4x8x32xf32>
    %c0_105 = arith.constant 0 : index
    %c0_106 = arith.constant 0 : index
    %c0_107 = arith.constant 0 : index
    %276 = vector.load %arg24[%c0_105, %c0_106, %c0_107] : memref<4x8x32xf32, #tpu.memory_space<vmem>>, vector<4x8x32xf32>
    tpu.vector_store %arg24[%c0_105, %c0_106, %c0_107], %275 {strides = array<i32>} : memref<4x8x32xf32, #tpu.memory_space<vmem>>, vector<4x8x32xf32>,
    return
  }
  func.func @transform_0(%arg0: i32) -> (i32, i32, i32) {
    %c0_i32 = arith.constant 0 : i32
    %c0_i32_0 = arith.constant 0 : i32
    %c0_i32_1 = arith.constant 0 : i32
    return %arg0, %c0_i32, %c0_i32_0 : i32, i32, i32
  }
  func.func @transform_1(%arg0: i32) -> (i32, i32, i32) {
    %c0_i32 = arith.constant 0 : i32
    %c0_i32_0 = arith.constant 0 : i32
    %c0_i32_1 = arith.constant 0 : i32
    return %arg0, %c0_i32, %c0_i32_0 : i32, i32, i32
  }
  func.func @transform_2(%arg0: i32) -> (i32, i32, i32) {
    %c0_i32 = arith.constant 0 : i32
    %c0_i32_0 = arith.constant 0 : i32
    %c0_i32_1 = arith.constant 0 : i32
    return %arg0, %c0_i32, %c0_i32_0 : i32, i32, i32
  }
  func.func @transform_3(%arg0: i32) -> (i32, i32, i32) {
    %c0_i32 = arith.constant 0 : i32
    %c0_i32_0 = arith.constant 0 : i32
    %c0_i32_1 = arith.constant 0 : i32
    return %arg0, %c0_i32, %c0_i32_0 : i32, i32, i32
  }
  func.func @transform_4(%arg0: i32) -> (i32, i32) {
    %c0_i32 = arith.constant 0 : i32
    %c0_i32_0 = arith.constant 0 : i32
    %c0_i32_1 = arith.constant 0 : i32
    return %c0_i32, %c0_i32_0 : i32, i32
  }
  func.func @transform_5(%arg0: i32) -> (i32, i32) {
    %c0_i32 = arith.constant 0 : i32
    %c0_i32_0 = arith.constant 0 : i32
    %c0_i32_1 = arith.constant 0 : i32
    return %c0_i32, %c0_i32_0 : i32, i32
  }
  func.func @transform_6(%arg0: i32) -> (i32, i32) {
    %c0_i32 = arith.constant 0 : i32
    %c0_i32_0 = arith.constant 0 : i32
    %c0_i32_1 = arith.constant 0 : i32
    return %c0_i32, %c0_i32_0 : i32, i32
  }
  func.func @transform_7(%arg0: i32) -> (i32, i32) {
    %c0_i32 = arith.constant 0 : i32
    %c0_i32_0 = arith.constant 0 : i32
    %c0_i32_1 = arith.constant 0 : i32
    return %c0_i32, %c0_i32_0 : i32, i32
  }
  func.func @transform_8(%arg0: i32) -> (i32, i32) {
    %c0_i32 = arith.constant 0 : i32
    %c0_i32_0 = arith.constant 0 : i32
    %c0_i32_1 = arith.constant 0 : i32
    return %c0_i32, %c0_i32_0 : i32, i32
  }
  func.func @transform_9(%arg0: i32) -> (i32, i32) {
    %c0_i32 = arith.constant 0 : i32
    %c0_i32_0 = arith.constant 0 : i32
    %c0_i32_1 = arith.constant 0 : i32
    return %c0_i32, %c0_i32_0 : i32, i32
  }
  func.func @transform_10(%arg0: i32) -> (i32, i32) {
    %c0_i32 = arith.constant 0 : i32
    %c0_i32_0 = arith.constant 0 : i32
    %c0_i32_1 = arith.constant 0 : i32
    return %c0_i32, %c0_i32_0 : i32, i32
  }
  func.func @transform_11(%arg0: i32) -> (i32, i32) {
    %c0_i32 = arith.constant 0 : i32
    %c0_i32_0 = arith.constant 0 : i32
    %c0_i32_1 = arith.constant 0 : i32
    return %c0_i32, %c0_i32_0 : i32, i32
  }
  func.func @transform_12(%arg0: i32) -> (i32, i32) {
    %c0_i32 = arith.constant 0 : i32
    %c0_i32_0 = arith.constant 0 : i32
    %c0_i32_1 = arith.constant 0 : i32
    return %c0_i32, %c0_i32_0 : i32, i32
  }
  func.func @transform_13(%arg0: i32) -> (i32, i32) {
    %c0_i32 = arith.constant 0 : i32
    %c0_i32_0 = arith.constant 0 : i32
    %c0_i32_1 = arith.constant 0 : i32
    return %c0_i32, %c0_i32_0 : i32, i32
  }
  func.func @transform_14(%arg0: i32) -> (i32, i32) {
    %c0_i32 = arith.constant 0 : i32
    %c0_i32_0 = arith.constant 0 : i32
    %c0_i32_1 = arith.constant 0 : i32
    return %c0_i32, %c0_i32_0 : i32, i32
  }
  func.func @transform_15(%arg0: i32) -> (i32, i32) {
    %c0_i32 = arith.constant 0 : i32
    %c0_i32_0 = arith.constant 0 : i32
    %c0_i32_1 = arith.constant 0 : i32
    return %c0_i32, %c0_i32_0 : i32, i32
  }
  func.func @transform_16(%arg0: i32) -> (i32, i32) {
    %c0_i32 = arith.constant 0 : i32
    %c0_i32_0 = arith.constant 0 : i32
    %c0_i32_1 = arith.constant 0 : i32
    return %c0_i32, %c0_i32_0 : i32, i32
  }
  func.func @transform_17(%arg0: i32) -> (i32, i32) {
    %c0_i32 = arith.constant 0 : i32
    %c0_i32_0 = arith.constant 0 : i32
    %c0_i32_1 = arith.constant 0 : i32
    return %c0_i32, %c0_i32_0 : i32, i32
  }
  func.func @transform_18(%arg0: i32) -> (i32, i32) {
    %c0_i32 = arith.constant 0 : i32
    %c0_i32_0 = arith.constant 0 : i32
    %c0_i32_1 = arith.constant 0 : i32
    return %c0_i32, %c0_i32_0 : i32, i32
  }
  func.func @transform_19(%arg0: i32) -> (i32, i32) {
    %c0_i32 = arith.constant 0 : i32
    %c0_i32_0 = arith.constant 0 : i32
    %c0_i32_1 = arith.constant 0 : i32
    return %c0_i32, %c0_i32_0 : i32, i32
  }
  func.func @transform_20(%arg0: i32) -> (i32, i32) {
    %c0_i32 = arith.constant 0 : i32
    %c0_i32_0 = arith.constant 0 : i32
    %c0_i32_1 = arith.constant 0 : i32
    return %c0_i32, %c0_i32_0 : i32, i32
  }
  func.func @transform_21(%arg0: i32) -> (i32, i32) {
    %c0_i32 = arith.constant 0 : i32
    %c0_i32_0 = arith.constant 0 : i32
    %c0_i32_1 = arith.constant 0 : i32
    return %c0_i32, %c0_i32_0 : i32, i32
  }
  func.func @transform_22(%arg0: i32) -> (i32, i32, i32) {
    %c0_i32 = arith.constant 0 : i32
    %c0_i32_0 = arith.constant 0 : i32
    %c0_i32_1 = arith.constant 0 : i32
    return %arg0, %c0_i32, %c0_i32_0 : i32, i32, i32
  }
  func.func @transform_23(%arg0: i32) -> (i32, i32, i32) {
    %c0_i32 = arith.constant 0 : i32
    %c0_i32_0 = arith.constant 0 : i32
    %c0_i32_1 = arith.constant 0 : i32
    return %arg0, %c0_i32, %c0_i32_0 : i32, i32, i32
  }
}

</mosaic_0001>

<bundles_post_ra>
// kernel: tpu_custom_call.1
= control target key start
LH: loop header
LB: loop body
LE: loop exit
PB: predicated region body
PF: predicated region fallthrough
CT: control target
= control target key end

     0   :  { %s18767_s0 = inlined_call_operand.hbm [shape: f32[8,8,32], index: 0, kind: input, shape index: {}]   ;;  %s18768_s1 = inlined_call_operand.hbm [shape: f32[8,8,32], index: 1, kind: input, shape index: {}]   ;;  %s18769_s2 = inlined_call_operand.hbm [shape: f32[8,16,32], index: 2, kind: input, shape index: {}]   ;;  %s18770_s3 = inlined_call_operand.hbm [shape: f32[8,16,32], index: 3, kind: input, shape index: {}]   ;;  %s18771_s4 = inlined_call_operand.hbm [shape: f32[32,32], index: 4, kind: input, shape index: {}]   ;;  %s18772_s5 = inlined_call_operand.hbm [shape: f32[1,32], index: 5, kind: input, shape index: {}]   ;;  %s18773_s6 = inlined_call_operand.hbm [shape: f32[32,32], index: 6, kind: input, shape index: {}]   ;;  %s18774_s7 = inlined_call_operand.hbm [shape: f32[1,32], index: 7, kind: input, shape index: {}]   ;;  %s18775_s8 = inlined_call_operand.hbm [shape: f32[32,32], index: 8, kind: input, shape index: {}]   ;;  %s18776_s9 = inlined_call_operand.hbm [shape: f32[1,32], index: 9, kind: input, shape index: {}]   ;;  %s18777_s10 = inlined_call_operand.vmem [shape: f32[32,32], index: 10, kind: input, shape index: {}]   ;;  %s18778_s11 = inlined_call_operand.hbm [shape: f32[1,32], index: 11, kind: input, shape index: {}]   ;;  %s18779_s12 = inlined_call_operand.hbm [shape: f32[1,32], index: 12, kind: input, shape index: {}]   ;;  %s18780_s13 = inlined_call_operand.hbm [shape: f32[1,32], index: 13, kind: input, shape index: {}]   ;;  %s18781_s14 = inlined_call_operand.hbm [shape: f32[32,32], index: 14, kind: input, shape index: {}]   ;;  %s18782_s15 = inlined_call_operand.hbm [shape: f32[1,32], index: 15, kind: input, shape index: {}]   ;;  %s18783_s16 = inlined_call_operand.hbm [shape: f32[32,32], index: 16, kind: input, shape index: {}]   ;;  %s18784_s17 = inlined_call_operand.hbm [shape: f32[1,32], index: 17, kind: input, shape index: {}]   ;;  %s18785_s18 = inlined_call_operand.vmem [shape: f32[32,32], index: 18, kind: input, shape index: {}]   ;;  %s18786_s19 = inlined_call_operand.vmem [shape: f32[1,32], index: 19, kind: input, shape index: {}]   ;;  %s18787_s20 = inlined_call_operand.hbm [shape: f32[32,32], index: 20, kind: input, shape index: {}]   ;;  %s18788_s21 = inlined_call_operand.vmem [shape: f32[1,32], index: 21, kind: input, shape index: {}]   ;;  %s18789_s22 = inlined_call_operand.hbm [shape: f32[8,8,32], index: 22, kind: output, shape index: {0}]   ;;  %s18790_s23 = inlined_call_operand.hbm [shape: f32[8,8,32], index: 23, kind: output, shape index: {1}]  }
   0x1   :  { %18836 = sst [smem:[#allocation52_spill]] %s18767_s0 }
   0x2   :  { %18837 = sst [smem:[#allocation53_spill]] %s18768_s1 }
   0x3   :  { %18838 = sst [smem:[#allocation54_spill]] %s18769_s2 }
   0x4   :  { %18839 = sst [smem:[#allocation55_spill]] %s18770_s3 }
   0x5   :  { %18840 = sst [smem:[#allocation56_spill]] %s18771_s4 }
   0x6   :  { %18841 = sst [smem:[#allocation57_spill]] %s18772_s5 }
   0x7   :  { %18842 = sst [smem:[#allocation58_spill]] %s18773_s6 }
   0x8   :  { %18843 = sst [smem:[#allocation59_spill]] %s18774_s7 }
   0x9   :  { %18844 = sst [smem:[#allocation60_spill]] %s18775_s8 }
   0xa   :  { %18845 = sst [smem:[#allocation61_spill]] %s18776_s9 }
   0xb   :  { %18846 = sst [smem:[#allocation62_spill]] %s18777_s10 }
   0xc   :  { %18847 = sst [smem:[#allocation63_spill]] %s18778_s11 }
   0xd   :  { %18848 = sst [smem:[#allocation64_spill]] %s18779_s12 }
   0xe   :  { %18849 = sst [smem:[#allocation65_spill]] %s18780_s13 }
   0xf   :  { %18850 = sst [smem:[#allocation66_spill]] %s18781_s14 }
  0x10   :  { %18851 = sst [smem:[#allocation67_spill]] %s18782_s15 }
  0x11   :  { %18852 = sst [smem:[#allocation68_spill]] %s18783_s16 }
  0x12   :  { %18853 = sst [smem:[#allocation69_spill]] %s18784_s17 }
  0x13   :  { %18854 = sst [smem:[#allocation70_spill]] %s18785_s18 }
  0x14   :  { %18855 = sst [smem:[#allocation71_spill]] %s18786_s19 }
  0x15   :  { %18856 = sst [smem:[#allocation72_spill]] %s18787_s20 }
  0x16   :  { %18857 = sst [smem:[#allocation73_spill]] %s18788_s21 }
  0x17   :  { %18858 = sst [smem:[#allocation74_spill]] %s18789_s22 }
  0x18   :  { %18859 = sst [smem:[#allocation75_spill]] %s18790_s23 }
  0x19   :  { %29 = vsyncpa [#allocation3], 0 }
  0x1a   :  { %31 = vsyncpa [#allocation3 + $0x1], 0 }
  0x1b   :  { %32 = vsyncpa [#allocation6], 0 }
  0x1c   :  { %34 = vsyncpa [#allocation6 + $0x1], 0 }
  0x1d   :  { %35 = vsyncpa [#allocation9], 0 }
  0x1e   :  { %37 = vsyncpa [#allocation9 + $0x1], 0 }
  0x1f   :  { %38 = vsyncpa [#allocation12], 0 }
  0x20   :  { %39 = vsyncpa [#allocation15], 0 }
  0x21   :  { %40 = vsyncpa [#allocation18], 0 }
  0x22   :  { %41 = vsyncpa [#allocation21], 0 }
  0x23   :  { %42 = vsyncpa [#allocation24], 0 }
  0x24   :  { %43 = vsyncpa [#allocation27], 0 }
  0x25   :  { %44 = vsyncpa [#allocation30], 0 }
  0x26   :  { %45 = vsyncpa [#allocation4], 0 }
  0x27   :  { %47 = vsyncpa [#allocation4 + $0x1], 0 }
  0x28   :  { %48 = vsyncpa [#allocation33], 0 }
  0x29   :  { %50 = vsyncpa [#allocation33 + $0x1], 0  ;;  %s15894_s4 = smov 0   ;;  %s15896_s30 = smov 0  }
  0x2a   :  { %s15898_s24 = smov 0   ;;  %s15900_s25 = smov 0  }
  0x2b LB: > { %18860 = sst [smem:[#allocation47_spill]] %s15734_s24  ;;  %s15740_s5 = smov [#allocation10]   ;;  %s15738_s25 = sphi %s15900_s25, %s18933_s25   ;;  %s15734_s24 = sphi %s15898_s24, %s18935_s24   ;;  %s15730_s30 = sphi %s15896_s30, %s18937_s30   ;;  %s15726_s4 = sphi %s15894_s4, %s18936_s4  }
  0x2c   : > { %s607_s1 = sshll.u32 %s15740_s5, 4  ;;  %s15915_s26 = sadd.s32 4294967295, %s15738_s25   ;;  %s15920_s1 = int_to_ptr.vmem [resolvable:$true] %s607_s1 }
  0x2d   : > { %p13499_p0 = scmp.ge.s32.totalorder %s15738_s25, 1  ;;  %p18810_p1 = scmp.eq.s32.totalorder %s15915_s26, 0 }
  0x2e   : > { %p595_p2 = scmp.lt.s32.totalorder %s15738_s25, 3  ;;  %s15741_s6 = smov [#allocation11]  }
  0x2f   : > { %s621_s27 = sshll.u32 %s15741_s6, 4  ;;  %s15742_s28 = smov [#allocation14]   ;;  %s15935_s27 = int_to_ptr.vmem [resolvable:$true] %s621_s27 }
  0x30   : > { %p15922_p3 = pnand %p13499_p0, %p595_p2  ;;  %s645_s29 = sshll.u32 %s15742_s28, 4  ;;  %s15937_s29 = int_to_ptr.vmem [resolvable:$true] %s645_s29 }
  0x31   : > { %s18864_s5 = sld [smem:[#allocation56_spill]] }
  0x32   : > { %s18861_s2 = scalar_select %p15922_p3, 1, 0 }
  0x33   : > { %p14792_p5 = pneg %p15922_p3 }
  0x34   : > { %18862 = sst [smem:[#allocation48_spill]] %s18861_s2 }
  0x35   : > { %p15931_p6 = pnand %p14792_p5, %p18810_p1 }
  0x37   : > { %s18863_s7 = scalar_select %p15931_p6, 1, 0 }
  0x38   : > { %s15088_s23 = scalar_lea.hbm %s18864_s5, 512  ;;  %p15947_p8 = pneg %p15931_p6 }
  0x39   : > { %p15089_p7 = scmp.ne.s32.totalorder %s18864_s5, %s15088_s23  ;;  %p15095_p11 = scmp.lt.u32.totalorder %s15088_s23, %s18864_s5 }
  0x3a   : > { %s18865_s6 = scalar_select %p15947_p8, 1, 0 }
  0x3b   : > { %p15091_p9 = pnand %p15947_p8, %p15089_p7 }
  0x3d   : > { %p15092_p10 = pneg %p15091_p9 }
  0x3f   : > { %p15097_p12 = pnand %p15095_p11, %p15092_p10 }
  0x41   : > { %15100 = shalt.err (!%p15097_p12)
}
  0x42   : > { %s15101_s21 = scalar_lea.vmem %s15920_s1, 512  ;;  %p15109_p5 = scmp.lt.s32.totalorder %s15920_s1, %s15920_s1 }
  0x43   : > { %p15102_p13 = scmp.ne.s32.totalorder %s15920_s1, %s15101_s21  ;;  %p15110_p4 = scmp.lt.s32.totalorder %s15101_s21, %s15101_s21 }
  0x45   : > { %p15104_p0 = pnand %p15102_p13, %p15947_p8  ;;  %p15111_p7 = por %p15110_p4, %p15109_p5 }
  0x47   : > { %p15105_p2 = pneg %p15104_p0 }
  0x49   : > { %p15112_p9 = pnand %p15111_p7, %p15105_p2 }
  0x4b   : > { %15115 = shalt.err (!%p15112_p9)
}
  0x4c   : > { %s18806_s22 = smov 128   ;;  %s18808_s19 = smov 8  }
  0x4d   : > { %14795 = dma.hbm_to_vmem [thread:$0]  (!%p15931_p6), %s18864_s5, 512, %s15920_s1, [#allocation9], %s18806_s22, %s18806_s22, %s18808_s19  }
  0x4e   : > { %s18866_s18 = sld [smem:[#allocation57_spill]] }
  0x54   : > { %s15116_s21 = scalar_lea.hbm %s18866_s18, 16 }
  0x55   : > { %p15117_p4 = scmp.ne.s32.totalorder %s18866_s18, %s15116_s21  ;;  %p15123_p12 = scmp.lt.u32.totalorder %s15116_s21, %s18866_s18 }
  0x57   : > { %p15119_p10 = pnand %p15117_p4, %p15947_p8 }
  0x59   : > { %p15120_p11 = pneg %p15119_p10 }
  0x5b   : > { %p15125_p13 = pnand %p15123_p12, %p15120_p11 }
  0x5d   : > { %15128 = shalt.err (!%p15125_p13)
}
  0x5e   : > { %s15129_s1 = scalar_lea.vmem %s15935_s27, 16  ;;  %s15136_s10 = scalar_lea.vmem %s15935_s27, 32 }
  0x5f   : > { %p15130_p0 = scmp.ne.s32.totalorder %s15935_s27, %s15129_s1  ;;  %p15137_p7 = scmp.lt.s32.totalorder %s15935_s27, %s15935_s27 }
  0x60   : > { %p15138_p9 = scmp.lt.s32.totalorder %s15136_s10, %s15129_s1 }
  0x61   : > { %p15132_p2 = pnand %p15130_p0, %p15947_p8 }
  0x62   : > { %p15139_p4 = por %p15138_p9, %p15137_p7 }
  0x63   : > { %p15133_p5 = pneg %p15132_p2 }
  0x65   : > { %p15140_p10 = pnand %p15139_p4, %p15133_p5 }
  0x67   : > { %15143 = shalt.err (!%p15140_p10)
}
  0x68   : > { %14798 = dma.hbm_to_vmem [thread:$0]  (!%p15931_p6), %s18866_s18, 16, %s15935_s27, [#allocation12]  }
  0x69   : > { %s18867_s3 = sld [smem:[#allocation59_spill]] }
  0x6f   : > { %s15144_s0 = scalar_lea.hbm %s18867_s3, 16 }
  0x70   : > { %p15145_p11 = scmp.ne.s32.totalorder %s18867_s3, %s15144_s0  ;;  %p15151_p0 = scmp.lt.u32.totalorder %s15144_s0, %s18867_s3 }
  0x72   : > { %p15147_p12 = pnand %p15145_p11, %p15947_p8 }
  0x74   : > { %p15148_p13 = pneg %p15147_p12 }
  0x76   : > { %p15153_p2 = pnand %p15151_p0, %p15148_p13 }
  0x78   : > { %15156 = shalt.err (!%p15153_p2)
}
  0x79   : > { %s15157_s27 = scalar_lea.vmem %s15937_s29, 16  ;;  %s15164_s17 = scalar_lea.vmem %s15937_s29, 32 }
  0x7a   : > { %p15158_p5 = scmp.ne.s32.totalorder %s15937_s29, %s15157_s27  ;;  %p15165_p4 = scmp.lt.s32.totalorder %s15937_s29, %s15937_s29 }
  0x7b   : > { %p15166_p10 = scmp.lt.s32.totalorder %s15164_s17, %s15157_s27 }
  0x7c   : > { %p15160_p7 = pnand %p15158_p5, %p15947_p8 }
  0x7d   : > { %p15167_p11 = por %p15166_p10, %p15165_p4 }
  0x7e   : > { %p15161_p9 = pneg %p15160_p7 }
  0x80   : > { %p15168_p12 = pnand %p15167_p11, %p15161_p9 }
  0x82   : > { %15171 = shalt.err (!%p15168_p12)
}
  0x83   : > { %14804 = dma.hbm_to_vmem [thread:$0]  (!%p15931_p6), %s18867_s3, 16, %s15937_s29, [#allocation15]  }
  0x84   : > { %s15745_s23 = smov [#allocation17]   ;;  %s15746_s28 = smov [#allocation20]  }
  0x85   : > { %s669_s0 = sshll.u32 %s15745_s23, 4  ;;  %s694_s21 = sshll.u32 %s15746_s28, 4  ;;  %s670_s0 = int_to_ptr.vmem [resolvable:$true] %s669_s0  ;;  %s695_s21 = int_to_ptr.vmem [resolvable:$true] %s694_s21 }
  0x86   : > { %s18868_s9 = sld [smem:[#allocation61_spill]] }
  0x8c   : > { %s15172_s27 = scalar_lea.hbm %s18868_s9, 16 }
  0x8d   : > { %p15173_p13 = scmp.ne.s32.totalorder %s18868_s9, %s15172_s27  ;;  %p15179_p5 = scmp.lt.u32.totalorder %s15172_s27, %s18868_s9 }
  0x8f   : > { %p15175_p0 = pnand %p15173_p13, %p15947_p8 }
  0x91   : > { %p15176_p2 = pneg %p15175_p0 }
  0x93   : > { %p15181_p7 = pnand %p15179_p5, %p15176_p2 }
  0x95   : > { %15184 = shalt.err (!%p15181_p7)
}
  0x96   : > { %s15185_s29 = scalar_lea.vmem %s670_s0, 16  ;;  %s15192_s2 = scalar_lea.vmem %s670_s0, 32 }
  0x97   : > { %p15186_p9 = scmp.ne.s32.totalorder %s670_s0, %s15185_s29  ;;  %p15193_p11 = scmp.lt.s32.totalorder %s670_s0, %s670_s0 }
  0x98   : > { %p15194_p12 = scmp.lt.s32.totalorder %s15192_s2, %s15185_s29 }
  0x99   : > { %p15188_p4 = pnand %p15186_p9, %p15947_p8 }
  0x9a   : > { %p15195_p1 = por %p15194_p12, %p15193_p11 }
  0x9b   : > { %p15189_p10 = pneg %p15188_p4 }
  0x9d   : > { %p15196_p3 = pnand %p15195_p1, %p15189_p10 }
  0x9f   : > { %15199 = shalt.err (!%p15196_p3)
}
  0xa0   : > { %14810 = dma.hbm_to_vmem [thread:$0]  (!%p15931_p6), %s18868_s9, 16, %s670_s0, [#allocation18]  }
  0xa1   : > { %s18869_s12 = sld [smem:[#allocation64_spill]] }
  0xa7   : > { %s15200_s1 = scalar_lea.hbm %s18869_s12, 16 }
  0xa8   : > { %p15201_p13 = scmp.ne.s32.totalorder %s18869_s12, %s15200_s1  ;;  %p15207_p3 = scmp.lt.u32.totalorder %s15200_s1, %s18869_s12 }
  0xaa   : > { %p15203_p0 = pnand %p15201_p13, %p15947_p8 }
  0xac   : > { %p15204_p1 = pneg %p15203_p0 }
  0xae   : > { %p15209_p2 = pnand %p15207_p3, %p15204_p1 }
  0xb0   : > { %15212 = shalt.err (!%p15209_p2)
}
  0xb1   : > { %s15213_s29 = scalar_lea.vmem %s695_s21, 16  ;;  %s15220_s0 = scalar_lea.vmem %s695_s21, 32 }
  0xb2   : > { %p15214_p5 = scmp.ne.s32.totalorder %s695_s21, %s15213_s29  ;;  %p15221_p4 = scmp.lt.s32.totalorder %s695_s21, %s695_s21 }
  0xb3   : > { %p15222_p10 = scmp.lt.s32.totalorder %s15220_s0, %s15213_s29 }
  0xb4   : > { %p15216_p7 = pnand %p15214_p5, %p15947_p8 }
  0xb5   : > { %p15223_p11 = por %p15222_p10, %p15221_p4 }
  0xb6   : > { %p15217_p9 = pneg %p15216_p7 }
  0xb8   : > { %p15224_p12 = pnand %p15223_p11, %p15217_p9 }
  0xba   : > { %15227 = shalt.err (!%p15224_p12)
}
  0xbb   : > { %14816 = dma.hbm_to_vmem [thread:$0]  (!%p15931_p6), %s18869_s12, 16, %s695_s21, [#allocation21]  }
  0xbc   : > { %s15747_s23 = smov [#allocation23]   ;;  %s15748_s28 = smov [#allocation26]  }
  0xbd   : > { %s715_s19 = sshll.u32 %s15747_s23, 4  ;;  %s739_s1 = sshll.u32 %s15748_s28, 4  ;;  %s716_s19 = int_to_ptr.vmem [resolvable:$true] %s715_s19  ;;  %s740_s1 = int_to_ptr.vmem [resolvable:$true] %s739_s1 }
  0xbe   : > { %s18870_s14 = sld [smem:[#allocation66_spill]] }
  0xc4   : > { %s15228_s17 = scalar_lea.hbm %s18870_s14, 512 }
  0xc5   : > { %p15229_p13 = scmp.ne.s32.totalorder %s18870_s14, %s15228_s17  ;;  %p15235_p3 = scmp.lt.u32.totalorder %s15228_s17, %s18870_s14 }
  0xc7   : > { %p15231_p0 = pnand %p15229_p13, %p15947_p8 }
  0xc9   : > { %p15232_p1 = pneg %p15231_p0 }
  0xcb   : > { %p15237_p2 = pnand %p15235_p3, %p15232_p1 }
  0xcd   : > { %15240 = shalt.err (!%p15237_p2)
}
  0xce   : > { %s15241_s21 = scalar_lea.vmem %s716_s19, 512  ;;  %p15249_p4 = scmp.lt.s32.totalorder %s716_s19, %s716_s19 }
  0xcf   : > { %p15242_p5 = scmp.ne.s32.totalorder %s716_s19, %s15241_s21  ;;  %p15250_p10 = scmp.lt.s32.totalorder %s15241_s21, %s15241_s21 }
  0xd1   : > { %p15244_p7 = pnand %p15242_p5, %p15947_p8  ;;  %p15251_p11 = por %p15250_p10, %p15249_p4 }
  0xd3   : > { %p15245_p9 = pneg %p15244_p7 }
  0xd5   : > { %p15252_p12 = pnand %p15251_p11, %p15245_p9 }
  0xd7   : > { %15255 = shalt.err (!%p15252_p12)
}
  0xd8   : > { %s18871_s22 = smov 8   ;;  %s18872_s23 = smov 128  }
  0xd9   : > { %14822 = dma.hbm_to_vmem [thread:$0]  (!%p15931_p6), %s18870_s14, 512, %s716_s19, [#allocation24], %s18872_s23, %s18872_s23, %s18871_s22  }
  0xda   : > { %s18873_s16 = sld [smem:[#allocation68_spill]] }
  0xe0   : > { %s15256_s20 = scalar_lea.hbm %s18873_s16, 512 }
  0xe1   : > { %p15257_p13 = scmp.ne.s32.totalorder %s18873_s16, %s15256_s20  ;;  %p15263_p3 = scmp.lt.u32.totalorder %s15256_s20, %s18873_s16 }
  0xe3   : > { %p15259_p0 = pnand %p15257_p13, %p15947_p8 }
  0xe5   : > { %p15260_p1 = pneg %p15259_p0 }
  0xe7   : > { %p15265_p2 = pnand %p15263_p3, %p15260_p1 }
  0xe9   : > { %15268 = shalt.err (!%p15265_p2)
}
  0xea   : > { %s15269_s28 = scalar_lea.vmem %s740_s1, 512  ;;  %p15277_p4 = scmp.lt.s32.totalorder %s740_s1, %s740_s1 }
  0xeb   : > { %p15270_p5 = scmp.ne.s32.totalorder %s740_s1, %s15269_s28  ;;  %p15278_p10 = scmp.lt.s32.totalorder %s15269_s28, %s15269_s28 }
  0xed   : > { %p15272_p7 = pnand %p15270_p5, %p15947_p8  ;;  %p15279_p11 = por %p15278_p10, %p15277_p4 }
  0xef   : > { %p15273_p9 = pneg %p15272_p7 }
  0xf1   : > { %p15280_p12 = pnand %p15279_p11, %p15273_p9 }
  0xf3   : > { %15283 = shalt.err (!%p15280_p12)
}
  0xf4   : > { %14828 = dma.hbm_to_vmem [thread:$0]  (!%p15931_p6), %s18873_s16, 512, %s740_s1, [#allocation27], %s18872_s23, %s18872_s23, %s18871_s22  }
  0xf5   : > { %s13498_s27 = sadd.s32 4294967294, %s15738_s25   ;;  %s16099_s17 = sadd.s32 1, %s15738_s25  }
  0xf6   : > { %18874 = sst [smem:[#allocation49_spill]] %s16099_s17  ;;  %s63_s20 = sadd.s32 1, %s15734_s24 }
  0xf7   : > { %s60_s29 = ssub.s32 %s15738_s25, %s16099_s17  ;;  %p70_p13 = scmp.ne.s32.totalorder %s15734_s24, %s15730_s30 }
  0xf8   : > { %p61_p0 = scmp.eq.s32.totalorder %s60_s29, 0  ;;  %p71_p1 = scmp.eq.s32.totalorder %s15738_s25, 0 }
  0xf9   : > { %p76_p3 = scmp.ne.s32.totalorder %s15730_s30, %s15726_s4  ;;  %p556_p2 = scmp.eq.s32.totalorder %s15915_s26, 1 }
  0xfa   : > { %s16111_s0 = scalar_select %p61_p0, %s15734_s24, %s63_s20  }
  0xfb   : > { %p72_p5 = por %p71_p1, %p70_p13  ;;  %p18876_p7 = scmp.eq.s32.totalorder %s15915_s26, 0 }
  0xfc   : > { %18875 = sst [smem:[#allocation50_spill]] %s16111_s0  ;;  %p16119_p4 = por %p556_p2, %p70_p13 }
  0xfd   : > { %p16115_p9 = por %p18876_p7, %p76_p3  ;;  %p562_p10 = scmp.eq.s32.totalorder %s13498_s27, 1 }
  0xfe   : > { %s18878_s2 = scalar_select %p16119_p4, 1, 0 }
  0xff   : > { %s18877_s1 = scalar_select %p16115_p9, 1, 0 }
 0x100   : > { %p14869_p11 = scmp.lt.s32.totalorder %s15738_s25, 2  ;;  %s16125_s21 = sand.u32 1, %s15734_s24  }
 0x101   : > { %p16127_p12 = por %p562_p10, %p76_p3  ;;  %s18815_s19 = sshll.u32 %s16125_s21, 5 }
 0x102   : > { %s18816_s10 = sshll.u32 %s15738_s25, 9  ;;  %p16133_p0 = pnand %p14869_p11, %p72_p5 }
 0x103   : > { %s18879_s28 = scalar_select %p16127_p12, 1, 0 }
 0x104   : > { %s18881_s20 = scalar_select %p16133_p0, 1, 0 }
 0x105   : > { %18880 = sst [smem:[#allocation51_spill]] %s18879_s28  ;;  %s18818_s29 = sand.u32 1, %s15738_s25  }
 0x106   : > { %s18882_s5 = sld [smem:[#allocation53_spill]]  ;;  %s811_s12 = scalar_lea.vmem [#allocation5], %s18815_s19 }
 0x107   : > { %s818_s14 = sshll.u32 %s811_s12, 4  ;;  %s16151_s16 = scalar_lea.sflag [#allocation6], %s18818_s29  ;;  %s16147_s14 = int_to_ptr.vmem [resolvable:$true] %s818_s14 }
 0x108   : > { %p16157_p1 = pneg %p16133_p0 }
 0x10a   : > { %s18883_s0 = scalar_select %p16157_p1, 1, 0 }
 0x10c   : > { %s16143_s9 = scalar_lea.hbm %s18882_s5, %s18816_s10  ;;  %s15289_s12 = scalar_lea.hbm %s18882_s5, 1024 }
 0x10d   : > { %s15284_s18 = scalar_lea.hbm %s16143_s9, 512  ;;  %p15290_p5 = scmp.lt.u32.totalorder %s16143_s9, %s18882_s5 }
 0x10e   : > { %p15285_p13 = scmp.ne.s32.totalorder %s16143_s9, %s15284_s18  ;;  %p15291_p7 = scmp.lt.u32.totalorder %s15289_s12, %s15284_s18 }
 0x10f   : > { %p15293_p11 = scmp.lt.u32.totalorder %s15284_s18, %s16143_s9 }
 0x110   : > { %p15287_p3 = pnand %p16157_p1, %p15285_p13  ;;  %p15292_p10 = por %p15291_p7, %p15290_p5 }
 0x112   : > { %p15288_p2 = pneg %p15287_p3  ;;  %p15294_p12 = por %p15293_p11, %p15292_p10 }
 0x114   : > { %p15295_p4 = pnand %p15294_p12, %p15288_p2 }
 0x116   : > { %15298 = shalt.err (!%p15295_p4)
}
 0x117   : > { %s15299_s29 = scalar_lea.vmem %s16147_s14, 512  ;;  %s15749_s3 = smov [#allocation5]  }
 0x118   : > { %p15300_p13 = scmp.ne.s32.totalorder %s16147_s14, %s15299_s29  ;;  %s15304_s27 = sshll.u32 %s15749_s3, 4  ;;  %s15305_s27 = int_to_ptr.vmem [resolvable:$false] %s15304_s27 }
 0x119   : > { %s15306_s19 = scalar_lea.vmem %s15305_s27, 1024  ;;  %p15307_p6 = scmp.lt.s32.totalorder %s16147_s14, %s15305_s27 }
 0x11a   : > { %p15302_p3 = pnand %p15300_p13, %p16157_p1  ;;  %p15308_p8 = scmp.lt.s32.totalorder %s15306_s19, %s15299_s29 }
 0x11c   : > { %p15303_p9 = pneg %p15302_p3  ;;  %p15309_p5 = por %p15308_p8, %p15307_p6 }
 0x11e   : > { %p15310_p7 = pnand %p15309_p5, %p15303_p9 }
 0x120   : > { %15313 = shalt.err (!%p15310_p7)
}
 0x121   : > { %14841 = dma.hbm_to_vmem [thread:$0]  (!%p16133_p0), %s16143_s9, 512, %s16147_s14, %s16151_s16, %s18872_s23, %s18872_s23, %s18871_s22  }
 0x122   : > { %s15750_s18 = smov [#allocation13]   ;;  %s15751_s12 = smov [#allocation16]  }
 0x123   : > { %s631_s10 = sshll.u32 %s15750_s18, 4  ;;  %s655_s3 = sshll.u32 %s15751_s12, 4  ;;  %s632_s10 = int_to_ptr.vmem [resolvable:$true] %s631_s10  ;;  %s16184_s3 = int_to_ptr.vmem [resolvable:$true] %s655_s3 }
 0x124   : > { %s18884_s19 = sld [smem:[#allocation58_spill]]  ;;  %p18885_p8 = scmp.ne.s32.totalorder %s18865_s6, 0 }
 0x12a   : > { %s15314_s5 = scalar_lea.hbm %s18884_s19, 512 }
 0x12b   : > { %p15315_p6 = scmp.ne.s32.totalorder %s18884_s19, %s15314_s5  ;;  %p15321_p12 = scmp.lt.u32.totalorder %s15314_s5, %s18884_s19 }
 0x12d   : > { %p15317_p9 = pnand %p15315_p6, %p18885_p8 }
 0x12f   : > { %p15318_p4 = pneg %p15317_p9 }
 0x131   : > { %p15323_p2 = pnand %p15321_p12, %p15318_p4 }
 0x133   : > { %15326 = shalt.err (!%p15323_p2)
}
 0x134   : > { %s15327_s14 = scalar_lea.vmem %s632_s10, 512  ;;  %p15335_p3 = scmp.lt.s32.totalorder %s632_s10, %s632_s10 }
 0x135   : > { %p15328_p10 = scmp.ne.s32.totalorder %s632_s10, %s15327_s14  ;;  %p15336_p5 = scmp.lt.s32.totalorder %s15327_s14, %s15327_s14 }
 0x137   : > { %p15330_p11 = pnand %p15328_p10, %p18885_p8  ;;  %p15337_p7 = por %p15336_p5, %p15335_p3 }
 0x139   : > { %p15331_p13 = pneg %p15330_p11 }
 0x13b   : > { %p15338_p0 = pnand %p15337_p7, %p15331_p13 }
 0x13d   : > { %15341 = shalt.err (!%p15338_p0)
}
 0x13e   : > { %p18886_p6 = scmp.ne.s32.totalorder %s18863_s7, 0  ;;  %s18887_s8 = sld [smem:[#allocation60_spill]] }
 0x140   : > { %14801 = dma.hbm_to_vmem [thread:$0]  (!%p18886_p6), %s18884_s19, 512, %s632_s10, [#allocation12], %s18872_s23, %s18872_s23, %s18871_s22  }
 0x144   : > { %s15342_s18 = scalar_lea.hbm %s18887_s8, 512 }
 0x145   : > { %p15343_p9 = scmp.ne.s32.totalorder %s18887_s8, %s15342_s18  ;;  %p15349_p12 = scmp.lt.u32.totalorder %s15342_s18, %s18887_s8 }
 0x147   : > { %p15345_p0 = pnand %p15343_p9, %p18885_p8 }
 0x149   : > { %p15346_p4 = pneg %p15345_p0 }
 0x14b   : > { %p15351_p2 = pnand %p15349_p12, %p15346_p4 }
 0x14d   : > { %15354 = shalt.err (!%p15351_p2)
}
 0x14e   : > { %s15355_s10 = scalar_lea.vmem %s16184_s3, 512  ;;  %p15363_p3 = scmp.lt.s32.totalorder %s16184_s3, %s16184_s3 }
 0x14f   : > { %p15356_p10 = scmp.ne.s32.totalorder %s16184_s3, %s15355_s10  ;;  %p15364_p5 = scmp.lt.s32.totalorder %s15355_s10, %s15355_s10 }
 0x151   : > { %p15358_p11 = pnand %p15356_p10, %p18885_p8  ;;  %p15365_p7 = por %p15364_p5, %p15363_p3 }
 0x153   : > { %p15359_p13 = pneg %p15358_p11 }
 0x155   : > { %p15366_p9 = pnand %p15365_p7, %p15359_p13 }
 0x157   : > { %15369 = shalt.err (!%p15366_p9)
}
 0x158   : > { %14807 = dma.hbm_to_vmem [thread:$0]  (!%p18886_p6), %s18887_s8, 512, %s16184_s3, [#allocation15], %s18872_s23, %s18872_s23, %s18871_s22  }
 0x159   : > { %s15752_s5 = smov [#allocation19]   ;;  %s15753_s28 = smov [#allocation22]  }
 0x15a   : > { %s683_s17 = sshll.u32 %s15752_s5, 4  ;;  %s705_s18 = sshll.u32 %s15753_s28, 4  ;;  %s684_s17 = int_to_ptr.vmem [resolvable:$true] %s683_s17  ;;  %s16233_s18 = int_to_ptr.vmem [resolvable:$true] %s705_s18 }
 0x15b   : > { %s18888_s11 = sld [smem:[#allocation63_spill]] }
 0x161   : > { %s15370_s27 = scalar_lea.hbm %s18888_s11, 16 }
 0x162   : > { %p15371_p0 = scmp.ne.s32.totalorder %s18888_s11, %s15370_s27  ;;  %p15377_p2 = scmp.lt.u32.totalorder %s15370_s27, %s18888_s11 }
 0x164   : > { %p15373_p4 = pnand %p15371_p0, %p18885_p8 }
 0x166   : > { %p15374_p12 = pneg %p15373_p4 }
 0x168   : > { %p15379_p10 = pnand %p15377_p2, %p15374_p12 }
 0x16a   : > { %15382 = shalt.err (!%p15379_p10)
}
 0x16b   : > { %s15383_s24 = scalar_lea.vmem %s684_s17, 16  ;;  %s15390_s5 = scalar_lea.vmem %s684_s17, 32 }
 0x16c   : > { %p15384_p11 = scmp.ne.s32.totalorder %s684_s17, %s15383_s24  ;;  %p15391_p5 = scmp.lt.s32.totalorder %s684_s17, %s684_s17 }
 0x16d   : > { %p15392_p7 = scmp.lt.s32.totalorder %s15390_s5, %s15383_s24 }
 0x16e   : > { %p15386_p13 = pnand %p15384_p11, %p18885_p8 }
 0x16f   : > { %p15393_p9 = por %p15392_p7, %p15391_p5 }
 0x170   : > { %p15387_p3 = pneg %p15386_p13 }
 0x172   : > { %p15394_p1 = pnand %p15393_p9, %p15387_p3 }
 0x174   : > { %15397 = shalt.err (!%p15394_p1)
}
 0x175   : > { %14813 = dma.hbm_to_vmem [thread:$0]  (!%p18886_p6), %s18888_s11, 16, %s684_s17, [#allocation18]  }
 0x176   : > { %s18889_s13 = sld [smem:[#allocation65_spill]] }
 0x17c   : > { %s15398_s9 = scalar_lea.hbm %s18889_s13, 16 }
 0x17d   : > { %p15399_p0 = scmp.ne.s32.totalorder %s18889_s13, %s15398_s9  ;;  %p15405_p1 = scmp.lt.u32.totalorder %s15398_s9, %s18889_s13 }
 0x17f   : > { %p15401_p4 = pnand %p15399_p0, %p18885_p8 }
 0x181   : > { %p15402_p12 = pneg %p15401_p4 }
 0x183   : > { %p15407_p2 = pnand %p15405_p1, %p15402_p12 }
 0x185   : > { %15410 = shalt.err (!%p15407_p2)
}
 0x186   : > { %s15411_s17 = scalar_lea.vmem %s16233_s18, 16  ;;  %s15418_s5 = scalar_lea.vmem %s16233_s18, 32 }
 0x187   : > { %p15412_p10 = scmp.ne.s32.totalorder %s16233_s18, %s15411_s17  ;;  %p15419_p3 = scmp.lt.s32.totalorder %s16233_s18, %s16233_s18 }
 0x188   : > { %p15420_p5 = scmp.lt.s32.totalorder %s15418_s5, %s15411_s17 }
 0x189   : > { %p15414_p11 = pnand %p15412_p10, %p18885_p8 }
 0x18a   : > { %p15421_p7 = por %p15420_p5, %p15419_p3 }
 0x18b   : > { %p15415_p13 = pneg %p15414_p11 }
 0x18d   : > { %p15422_p9 = pnand %p15421_p7, %p15415_p13 }
 0x18f   : > { %15425 = shalt.err (!%p15422_p9)
}
 0x190   : > { %14819 = dma.hbm_to_vmem [thread:$0]  (!%p18886_p6), %s18889_s13, 16, %s16233_s18, [#allocation21]  }
 0x191   : > { %s15754_s29 = smov [#allocation25]   ;;  %s15755_s9 = smov [#allocation28]  }
 0x192   : > { %s729_s27 = sshll.u32 %s15754_s29, 4  ;;  %s753_s10 = sshll.u32 %s15755_s9, 4  ;;  %s730_s27 = int_to_ptr.vmem [resolvable:$true] %s729_s27  ;;  %s16277_s10 = int_to_ptr.vmem [resolvable:$true] %s753_s10 }
 0x193   : > { %s18890_s15 = sld [smem:[#allocation67_spill]] }
 0x199   : > { %s15426_s24 = scalar_lea.hbm %s18890_s15, 16 }
 0x19a   : > { %p15427_p0 = scmp.ne.s32.totalorder %s18890_s15, %s15426_s24  ;;  %p15433_p1 = scmp.lt.u32.totalorder %s15426_s24, %s18890_s15 }
 0x19c   : > { %p15429_p4 = pnand %p15427_p0, %p18885_p8 }
 0x19e   : > { %p15430_p12 = pneg %p15429_p4 }
 0x1a0   : > { %p15435_p2 = pnand %p15433_p1, %p15430_p12 }
 0x1a2   : > { %15438 = shalt.err (!%p15435_p2)
}
 0x1a3   : > { %s15439_s12 = scalar_lea.vmem %s730_s27, 16  ;;  %s15446_s29 = scalar_lea.vmem %s730_s27, 32 }
 0x1a4   : > { %p15440_p10 = scmp.ne.s32.totalorder %s730_s27, %s15439_s12  ;;  %p15447_p3 = scmp.lt.s32.totalorder %s730_s27, %s730_s27 }
 0x1a5   : > { %p15448_p5 = scmp.lt.s32.totalorder %s15446_s29, %s15439_s12 }
 0x1a6   : > { %p15442_p11 = pnand %p15440_p10, %p18885_p8 }
 0x1a7   : > { %p15449_p7 = por %p15448_p5, %p15447_p3 }
 0x1a8   : > { %p15443_p13 = pneg %p15442_p11 }
 0x1aa   : > { %p15450_p9 = pnand %p15449_p7, %p15443_p13 }
 0x1ac   : > { %15453 = shalt.err (!%p15450_p9)
}
 0x1ad   : > { %14825 = dma.hbm_to_vmem [thread:$0]  (!%p18886_p6), %s18890_s15, 16, %s730_s27, [#allocation24]  }
 0x1ae   : > { %s18891_s17 = sld [smem:[#allocation69_spill]] }
 0x1b4   : > { %s15454_s5 = scalar_lea.hbm %s18891_s17, 16 }
 0x1b5   : > { %p15455_p0 = scmp.ne.s32.totalorder %s18891_s17, %s15454_s5  ;;  %p15461_p1 = scmp.lt.u32.totalorder %s15454_s5, %s18891_s17 }
 0x1b7   : > { %p15457_p4 = pnand %p15455_p0, %p18885_p8 }
 0x1b9   : > { %p15458_p12 = pneg %p15457_p4 }
 0x1bb   : > { %p15463_p2 = pnand %p15461_p1, %p15458_p12 }
 0x1bd   : > { %15466 = shalt.err (!%p15463_p2)
}
 0x1be   : > { %s15467_s27 = scalar_lea.vmem %s16277_s10, 16  ;;  %s15474_s9 = scalar_lea.vmem %s16277_s10, 32 }
 0x1bf   : > { %p15468_p10 = scmp.ne.s32.totalorder %s16277_s10, %s15467_s27  ;;  %p15475_p3 = scmp.lt.s32.totalorder %s16277_s10, %s16277_s10 }
 0x1c0   : > { %p15476_p5 = scmp.lt.s32.totalorder %s15474_s9, %s15467_s27 }
 0x1c1   : > { %p15470_p11 = pnand %p15468_p10, %p18885_p8 }
 0x1c2   : > { %p15477_p7 = por %p15476_p5, %p15475_p3 }
 0x1c3   : > { %p15471_p13 = pneg %p15470_p11 }
 0x1c5   : > { %p15478_p9 = pnand %p15477_p7, %p15471_p13 }
 0x1c7   : > { %15481 = shalt.err (!%p15478_p9)
}
 0x1c8   : > { %14831 = dma.hbm_to_vmem [thread:$0]  (!%p18886_p6), %s18891_s17, 16, %s16277_s10, [#allocation27]  }
 0x1c9   : > { %s15756_s24 = smov [#allocation29]   ;;  %s18892_s28 = sshll.u32 %s15738_s25, 9 }
 0x1ca   : > { %s769_s5 = sshll.u32 %s15756_s24, 4  ;;  %s18893_s29 = sld [smem:[#allocation52_spill]]  ;;  %s770_s5 = int_to_ptr.vmem [resolvable:$true] %s769_s5 }
 0x1cb   : > { %s18894_s11 = sld [smem:[#allocation72_spill]] }
 0x1d0   : > { %s16326_s27 = scalar_lea.hbm %s18893_s29, %s18892_s28 }
 0x1d1   : > { %s15482_s13 = scalar_lea.hbm %s18894_s11, 512 }
 0x1d2   : > { %p15483_p0 = scmp.ne.s32.totalorder %s18894_s11, %s15482_s13  ;;  %p15489_p1 = scmp.lt.u32.totalorder %s15482_s13, %s18894_s11 }
 0x1d4   : > { %p15485_p4 = pnand %p15483_p0, %p18885_p8 }
 0x1d6   : > { %p15486_p12 = pneg %p15485_p4 }
 0x1d8   : > { %p15491_p2 = pnand %p15489_p1, %p15486_p12 }
 0x1da   : > { %15494 = shalt.err (!%p15491_p2)
}
 0x1db   : > { %s15495_s3 = scalar_lea.vmem %s770_s5, 512  ;;  %p15503_p3 = scmp.lt.s32.totalorder %s770_s5, %s770_s5 }
 0x1dc   : > { %p15496_p10 = scmp.ne.s32.totalorder %s770_s5, %s15495_s3  ;;  %p15504_p5 = scmp.lt.s32.totalorder %s15495_s3, %s15495_s3 }
 0x1de   : > { %p15498_p11 = pnand %p15496_p10, %p18885_p8  ;;  %p15505_p7 = por %p15504_p5, %p15503_p3 }
 0x1e0   : > { %p15499_p13 = pneg %p15498_p11 }
 0x1e2   : > { %p15506_p9 = pnand %p15505_p7, %p15499_p13 }
 0x1e4   : > { %15509 = shalt.err (!%p15506_p9)
}
 0x1e5   : > { %14834 = dma.hbm_to_vmem [thread:$0]  (!%p18886_p6), %s18894_s11, 512, %s770_s5, [#allocation30], %s18872_s23, %s18872_s23, %s18871_s22  }
 0x1e6   : > { %s18895_s15 = sshll.u32 %s16125_s21, 5  ;;  %s13521_s24 = sshll.u32 %s16125_s21, 6 }
 0x1e7   : > { %s790_s6 = scalar_lea.vmem [#allocation2], %s18895_s15  ;;  %s787_s7 = scalar_lea.sflag [#allocation3], %s16125_s21 }
 0x1e8   : > { %s797_s19 = sshll.u32 %s790_s6, 4  ;;  %s15510_s28 = scalar_lea.hbm %s16326_s27, 512  ;;  %s16352_s19 = int_to_ptr.vmem [resolvable:$true] %s797_s19 }
 0x1e9   : > { %p15511_p8 = scmp.ne.s32.totalorder %s16326_s27, %s15510_s28  ;;  %p18896_p0 = scmp.ne.s32.totalorder %s18883_s0, 0 }
 0x1ea   : > { %s15515_s9 = scalar_lea.hbm %s18893_s29, 1024  ;;  %p15516_p6 = scmp.lt.u32.totalorder %s16326_s27, %s18893_s29 }
 0x1eb   : > { %p15513_p4 = pnand %p15511_p8, %p18896_p0  ;;  %p15517_p1 = scmp.lt.u32.totalorder %s15515_s9, %s15510_s28 }
 0x1ec   : > { %p15519_p10 = scmp.lt.u32.totalorder %s15510_s28, %s16326_s27 }
 0x1ed   : > { %p15514_p12 = pneg %p15513_p4  ;;  %p15518_p2 = por %p15517_p1, %p15516_p6 }
 0x1ef   : > { %p15520_p11 = por %p15519_p10, %p15518_p2 }
 0x1f1   : > { %p15521_p13 = pnand %p15520_p11, %p15514_p12 }
 0x1f3   : > { %15524 = shalt.err (!%p15521_p13)
}
 0x1f4   : > { %s15525_s5 = scalar_lea.vmem %s16352_s19, 512  ;;  %s15757_s3 = smov [#allocation2]  }
 0x1f5   : > { %p15526_p3 = scmp.ne.s32.totalorder %s16352_s19, %s15525_s5  ;;  %s15530_s8 = sshll.u32 %s15757_s3, 4  ;;  %s15531_s8 = int_to_ptr.vmem [resolvable:$false] %s15530_s8 }
 0x1f6   : > { %s15532_s13 = scalar_lea.vmem %s15531_s8, 1024  ;;  %p15533_p9 = scmp.lt.s32.totalorder %s16352_s19, %s15531_s8 }
 0x1f7   : > { %p15528_p5 = pnand %p15526_p3, %p18896_p0  ;;  %p15534_p8 = scmp.lt.s32.totalorder %s15532_s13, %s15525_s5 }
 0x1f9   : > { %p15529_p7 = pneg %p15528_p5  ;;  %p15535_p4 = por %p15534_p8, %p15533_p9 }
 0x1fb   : > { %p15536_p6 = pnand %p15535_p4, %p15529_p7 }
 0x1fd   : > { %15539 = shalt.err (!%p15536_p6)
}
 0x1fe   : > { %p18897_p12 = scmp.ne.s32.totalorder %s18881_s20, 0  ;;  %s13803_s15 = sshll.u32 %s15738_s25, 10 }
 0x1ff   : > { %s832_s6 = scalar_lea.vmem [#allocation7], %s13521_s24  ;;  %s18898_s9 = sld [smem:[#allocation54_spill]] }
 0x200   : > { %14838 = dma.hbm_to_vmem [thread:$0]  (!%p18897_p12), %s16326_s27, 512, %s16352_s19, %s787_s7, %s18872_s23, %s18872_s23, %s18871_s22  }
 0x201   : > { %s840_s28 = sshll.u32 %s832_s6, 4  ;;  %s16391_s28 = int_to_ptr.vmem [resolvable:$true] %s840_s28 }
 0x205   : > { %s16389_s10 = scalar_lea.hbm %s18898_s9, %s13803_s15  ;;  %s15545_s7 = scalar_lea.hbm %s18898_s9, 2048 }
 0x206   : > { %s15540_s14 = scalar_lea.hbm %s16389_s10, 1024  ;;  %p15546_p11 = scmp.lt.u32.totalorder %s16389_s10, %s18898_s9 }
 0x207   : > { %p15541_p1 = scmp.ne.s32.totalorder %s16389_s10, %s15540_s14  ;;  %p15547_p13 = scmp.lt.u32.totalorder %s15545_s7, %s15540_s14 }
 0x208   : > { %p15549_p5 = scmp.lt.u32.totalorder %s15540_s14, %s16389_s10 }
 0x209   : > { %p15543_p2 = pnand %p15541_p1, %p18896_p0  ;;  %p15548_p3 = por %p15547_p13, %p15546_p11 }
 0x20b   : > { %p15544_p10 = pneg %p15543_p2  ;;  %p15550_p7 = por %p15549_p5, %p15548_p3 }
 0x20d   : > { %p15551_p9 = pnand %p15550_p7, %p15544_p10 }
 0x20f   : > { %15554 = shalt.err (!%p15551_p9)
}
 0x210   : > { %s15555_s8 = scalar_lea.vmem %s16391_s28, 1024  ;;  %s15758_s13 = smov [#allocation7]  }
 0x211   : > { %p15556_p8 = scmp.ne.s32.totalorder %s16391_s28, %s15555_s8  ;;  %s15560_s6 = sshll.u32 %s15758_s13, 4  ;;  %s15561_s6 = int_to_ptr.vmem [resolvable:$false] %s15560_s6 }
 0x212   : > { %s15562_s18 = scalar_lea.vmem %s15561_s6, 2048  ;;  %p15563_p1 = scmp.lt.s32.totalorder %s16391_s28, %s15561_s6 }
 0x213   : > { %p15558_p4 = pnand %p15556_p8, %p18896_p0  ;;  %p15564_p2 = scmp.lt.s32.totalorder %s15562_s18, %s15555_s8 }
 0x215   : > { %p15559_p6 = pneg %p15558_p4  ;;  %p15565_p11 = por %p15564_p2, %p15563_p1 }
 0x217   : > { %p15566_p13 = pnand %p15565_p11, %p15559_p6 }
 0x219   : > { %15569 = shalt.err (!%p15566_p13)
}
 0x21a   : > { %14844 = dma.hbm_to_vmem [thread:$0]  (!%p18897_p12), %s16389_s10, 1024, %s16391_s28, %s16151_s16, %s18872_s23, %s18872_s23, %s18871_s22  }
 0x21b   : > { %s18899_s27 = sld [smem:[#allocation55_spill]]  ;;  %s854_s7 = scalar_lea.vmem [#allocation8], %s13521_s24 }
 0x21c   : > { %s862_s5 = sshll.u32 %s854_s7, 4  ;;  %s18900_s3 = sand.u32 1, %s15738_s25   ;;  %s16427_s5 = int_to_ptr.vmem [resolvable:$true] %s862_s5 }
 0x21d   : > { %s16431_s8 = scalar_lea.sflag [#allocation9], %s18900_s3 }
 0x221   : > { %s16423_s19 = scalar_lea.hbm %s18899_s27, %s13803_s15  ;;  %s15575_s21 = scalar_lea.hbm %s18899_s27, 2048 }
 0x222   : > { %s15570_s13 = scalar_lea.hbm %s16423_s19, 1024  ;;  %p15576_p7 = scmp.lt.u32.totalorder %s16423_s19, %s18899_s27 }
 0x223   : > { %p15571_p10 = scmp.ne.s32.totalorder %s16423_s19, %s15570_s13  ;;  %p15577_p9 = scmp.lt.u32.totalorder %s15575_s21, %s15570_s13 }
 0x224   : > { %p15579_p4 = scmp.lt.u32.totalorder %s15570_s13, %s16423_s19 }
 0x225   : > { %p15573_p3 = pnand %p15571_p10, %p18896_p0  ;;  %p15578_p8 = por %p15577_p9, %p15576_p7 }
 0x227   : > { %p15574_p5 = pneg %p15573_p3  ;;  %p15580_p6 = por %p15579_p4, %p15578_p8 }
 0x229   : > { %p15581_p1 = pnand %p15580_p6, %p15574_p5 }
 0x22b   : > { %15584 = shalt.err (!%p15581_p1)
}
 0x22c   : > { %s15585_s24 = scalar_lea.vmem %s16427_s5, 1024  ;;  %s15759_s6 = smov [#allocation8]  }
 0x22d   : > { %p15586_p2 = scmp.ne.s32.totalorder %s16427_s5, %s15585_s24  ;;  %s15590_s18 = sshll.u32 %s15759_s6, 4  ;;  %s15591_s18 = int_to_ptr.vmem [resolvable:$false] %s15590_s18 }
 0x22e   : > { %s15592_s12 = scalar_lea.vmem %s15591_s18, 2048  ;;  %p15593_p10 = scmp.lt.s32.totalorder %s16427_s5, %s15591_s18 }
 0x22f   : > { %p15588_p11 = pnand %p15586_p2, %p18896_p0  ;;  %p15594_p3 = scmp.lt.s32.totalorder %s15592_s12, %s15585_s24 }
 0x231   : > { %p15589_p13 = pneg %p15588_p11  ;;  %p15595_p7 = por %p15594_p3, %p15593_p10 }
 0x233   : > { %p15596_p9 = pnand %p15595_p7, %p15589_p13 }
 0x235   : > { %15599 = shalt.err (!%p15596_p9)
}
 0x236   : > { %14847 = dma.hbm_to_vmem [thread:$0]  (!%p18897_p12), %s16423_s19, 1024, %s16427_s5, %s16431_s8, %s18872_s23, %s18872_s23, %s18871_s22  }
 0x237   : > { %s18901_s0 = sld [smem:[#allocation48_spill]] }
 0x23d   : > { %p18902_p0 = scmp.ne.s32.totalorder %s18901_s0, 0 }
 0x23e   : > { %s16461_s14 = sand.u32 (!%p18902_p0), 1, %s15730_s30   ;;  %p18903_p5 = scmp.ne.s32.totalorder (!%p18902_p0), %s18877_s1, 0 }
 0x23f   : > { %874 = sbr.rel (%p18902_p0) target bundleno = 7091 (0x1bb3), region = 108  ;;  %s16464_s7 = sshll.u32 (!%p18902_p0), %s16461_s14, 5 }
 0x240   : > { %s877_s20 = scalar_lea.sflag (!%p18902_p0), [#allocation3], %s16461_s14  ;;  %s16468_s3 = scalar_lea.vmem (!%p18902_p0), [#allocation2], %s16464_s7 }
 0x246   : > { %15673 = dma.done.wait (%p18903_p5), %s877_s20, 512  }
 0x247   : > { %15675 = vsyncadd (%p18903_p5), %s877_s20, 4294966784  ;;  %s885_s22 = sand.u32 1, %s15915_s26   ;;  %s16476_s19 = scalar_lea.vmem [#allocation5], %s16464_s7 }
 0x248   : > { %s886_s23 = scalar_lea.sflag [#allocation6], %s885_s22 }
 0x249   : > { %15677 = dma.done.wait (%p18903_p5), %s886_s23, 1536  }
 0x24a   : > { %15679 = vsyncadd (%p18903_p5), %s886_s23, 4294965760  ;;  %s13532_s5 = sshll.u32 %s16461_s14, 6  ;;  %s904_s13 = scalar_lea.sflag [#allocation9], %s885_s22 }
 0x24b   : > { %s16483_s8 = scalar_lea.vmem [#allocation7], %s13532_s5  ;;  %s16485_s16 = scalar_lea.vmem [#allocation8], %s13532_s5 }
 0x24c   : > { %15681 = dma.done.wait (%p18903_p5), %s904_s13, 1024  }
 0x24d   : > { %15683 = vsyncadd (%p18903_p5), %s904_s13, 4294966272  ;;  %p18904_p12 = scmp.eq.s32.totalorder %s15915_s26, 0 }
 0x24f   : > { %15685 = dma.done.wait (%p18904_p12), [#allocation9], 512   ;;  %p18905_p8 = pmov %p18904_p12 }
 0x251   : > { %15687 = vsyncadd (%p18905_p8), [#allocation9], 4294966784  ;;  %p18906_p4 = pmov %p18905_p8 }
 0x253   : > { %15689 = dma.done.wait (%p18906_p4), [#allocation12], 528   ;;  %p18907_p6 = pmov %p18906_p4 }
 0x254   : > { %p18908_p1 = pmov %p18906_p4 }
 0x255   : > { %15691 = vsyncadd (%p18907_p6), [#allocation12], 4294966768 }
 0x256   : > { %15693 = dma.done.wait (%p18908_p1), [#allocation15], 528   ;;  %p18909_p2 = pmov %p18908_p1 }
 0x257   : > { %p18910_p11 = pmov %p18908_p1 }
 0x258   : > { %15695 = vsyncadd (%p18909_p2), [#allocation15], 4294966768 }
 0x259   : > { %15697 = dma.done.wait (%p18910_p11), [#allocation18], 32   ;;  %p18911_p13 = pmov %p18908_p1 }
 0x25a   : > { %p18912_p10 = pmov %p18908_p1 }
 0x25b   : > { %15699 = vsyncadd (%p18911_p13), [#allocation18], 4294967264 }
 0x25c   : > { %15701 = dma.done.wait (%p18912_p10), [#allocation21], 32   ;;  %p18913_p3 = pmov %p18908_p1 }
 0x25d   : > { %p18914_p7 = pmov %p18908_p1 }
 0x25e   : > { %15703 = vsyncadd (%p18913_p3), [#allocation21], 4294967264 }
 0x25f   : > { %15705 = dma.done.wait (%p18914_p7), [#allocation24], 528   ;;  %p18915_p9 = pmov %p18908_p1 }
 0x260   : > { %p18916_p0 = pmov %p18908_p1 }
 0x261   : > { %15707 = vsyncadd (%p18915_p9), [#allocation24], 4294966768 }
 0x262   : > { %15709 = dma.done.wait (%p18916_p0), [#allocation27], 528   ;;  %p18917_p5 = pmov %p18916_p0 }
 0x263   : > { %p18918_p12 = pmov %p18916_p0 }
 0x264   : > { %15711 = vsyncadd (%p18917_p5), [#allocation27], 4294966768 }
 0x265   : > { %15713 = dma.done.wait (%p18918_p12), [#allocation30], 512   ;;  %p18919_p8 = pmov %p18916_p0 }
 0x266   : > { %v1064_v0 = vld [vmem:[#allocation10] sm:$0xff]  ;;  %v1065_v1 = vld [vmem:[#allocation10 + $0x8] sm:$0xff]  ;;  %v1066_v2 = vld [vmem:[#allocation10 + $0x10] sm:$0xff]  ;;  %vm1090_vm0 = vcmask 261120   ;;  %s15760_s1 = smov 120   ;;  %s15761_s15 = smov 104   ;;  %v1398_v49 = vlaneseq }
 0x267   : > { %15715 = vsyncadd (%p18919_p8), [#allocation30], 4294966784  ;;  %v14548_v3 = vpack.c.bf16 %v1065_v1, %v1064_v0  ;;  %v1067_v4 = vld [vmem:[#allocation10 + $0x18] sm:$0xff]  ;;  %v1052_v5 = vld [vmem:[%s16468_s3] sm:$0xff]  ;;  %s15762_s21 = smov 112   ;;  %v15763_v44 = vmov 0.0  }
 0x268   : > { %v1056_v6 = vld [vmem:[%s16476_s19] sm:$0xff]  ;;  %v14552_v7 = vpack.c.bf16 %v1067_v4, %v1066_v2  ;;  %14076 = vmatprep.mubr.msk.f32.mxu0 %vm1090_vm0, %v1052_v5  ;;  %v1070_v10 = vld [vmem:[#allocation13 + $0x8] sm:$0xff]  ;;  %v1071_v16 = vld [vmem:[#allocation13 + $0x10] sm:$0xff]  ;;  %vm15764_vm1 = vmmov 0   ;;  %v15765_v47 = vmov 1983009808  }
 0x269   : > { %v1060_v8 = vadd.f32 %v1056_v6, %v1052_v5  ;;  %v1069_v9 = vld [vmem:[#allocation13] sm:$0xff]  ;;  %14549 = vmatprep.subr.bf16.mxu1 %v14548_v3  ;;  %v1054_v14 = vld [vmem:[%s16468_s3 + $0x10] sm:$0xff]  ;;  %v1072_v17 = vld [vmem:[#allocation13 + $0x18] sm:$0xff]  ;;  %v1396_v48 = vunpack.c.l.s4 %v15765_v47  ;;  %v15766_v51 = vmov 1934713408   ;;  %v1399_v54 = vshrl.u32 %v1398_v49, 7 }
 0x26a   : > { %14551 = vmatpush3.bf16.msra.mxu1 %v14548_v3  ;;  %v1053_v11 = vld [vmem:[%s16468_s3 + $0x8] sm:$0xff]  ;;  %v14556_v13 = vpack.c.bf16 %v1070_v10, %v1069_v9  ;;  %v1058_v15 = vld [vmem:[%s16476_s19 + $0x10] sm:$0xff]  ;;  %v1055_v20 = vld [vmem:[%s16468_s3 + $0x18] sm:$0xff]  ;;  %v14560_v22 = vpack.c.bf16 %v1072_v17, %v1071_v16  ;;  %v1428_v52 = vunpack.c.l.s4 %v15766_v51  ;;  %vm1821_vm2 = vcmask 64512   ;;  %s15767_s28 = smov 8   ;;  %s15768_s10 = smov 16  }
 0x26b   : > { %14048 = vmatprep.mubr.msk.f32.mxu1 %vm1090_vm0, %v1060_v8  ;;  %v1057_v12 = vld [vmem:[%s16476_s19 + $0x8] sm:$0xff]  ;;  %14553 = vmatprep.subr.bf16.mxu1 %v14552_v7  ;;  %v1062_v19 = vadd.f32 %v1058_v15, %v1054_v14  ;;  %v1059_v21 = vld [vmem:[%s16476_s19 + $0x18] sm:$0xff]  ;;  %v13550_v24 = vld [vmem:[#allocation11] ss:$0 sm:$0xff]  ;;  %v1397_v53 = vunpack.c.0.s8 %v1396_v48  ;;  %s18834_s24 = smov 24   ;;  %s18920_s12 = sld [smem:[#allocation62_spill]] }
 0x26c   : > { %v1061_v18 = vadd.f32 %v1057_v12, %v1053_v11  ;;  %v1063_v23 = vadd.f32 %v1059_v21, %v1055_v20  ;;  %v1074_v33 = vld [vmem:[#allocation16] sm:$0xff]  ;;  %v1075_v34 = vld [vmem:[#allocation16 + $0x8] sm:$0xff]  ;;  %v16550_v37 = vld [vmem:[#allocation14] ss:$0 sm:$0xff]  ;;  %v1429_v57 = vunpack.c.0.s8 %v1428_v52  ;;  %vm2613_vm3 = vcmask 195584   ;;  %s18921_s0 = sld [smem:[#allocation70_spill]] }
 0x26d   : > { %v14564_v36 = vpack.c.bf16 %v1075_v34, %v1074_v33  ;;  %v1076_v40 = vld [vmem:[#allocation16 + $0x10] sm:$0xff]  ;;  %v1077_v41 = vld [vmem:[#allocation16 + $0x18] sm:$0xff]  ;;  %v16575_v58 = vsub.s32 %v1397_v53, %v1399_v54  ;;  %vm2611_vm4 = vcmask 130048   ;;  %vm17551_vm5 = vmpackc.low %vm1821_vm2, %vm1821_vm2  ;;  %s18642_s6 = scalar_lea.vmem [#allocation32], %s16464_s7  ;;  %s18927_s22 = sld [smem:[#allocation74_spill]] }
 0x26e   : > { %14555 = vmatpush3.bf16.msra.mxu1 %v14552_v7  ;;  %v14568_v43 = vpack.c.bf16 %v1077_v41, %v1076_v40  ;;  %v16577_v1 = vsub.s32 %v1429_v57, %v1399_v54  ;;  %p18928_p6 = scmp.ne.s32.totalorder %s18878_s2, 0 }
 0x26f   : > { %14557 = vmatprep.subr.bf16.mxu1 %v14556_v13  ;;  %14565 = vmatprep.subr.bf16.mxu0 %v14564_v36 }
 0x270   : > { %14567 = vmatpush3.bf16.msra.mxu0 %v14564_v36 }
 0x271   : > { %14049 = vmatmul.mubr.msk.f32.vlgmr.msra.gmra.mrb[0].mxu1 %vm1090_vm0, %v1061_v18  ;;  %14569 = vmatprep.subr.bf16.mxu0 %v14568_v43 }
 0x272   : > { %14559 = vmatpush3.bf16.msra.mxu1 %v14556_v13  ;;  %14051 = vmatprep.mubr.msk.f32.mxu1 %vm1090_vm0, %v1062_v19 }
 0x273   : > { %14561 = vmatprep.subr.bf16.mxu1 %v14560_v22 }
 0x274   : > { %14571 = vmatpush3.bf16.msra.mxu0 %v14568_v43 }
 0x275   : > { %14052 = vmatmul.mubr.msk.f32.gmra.mrb[2].mxu1 %vm1090_vm0, %v1063_v23  ;;  %14092 = vmatprep.subr.mxu0 %v15763_v44 }
 0x276   : > { %14563 = vmatpush3.bf16.msra.mxu1 %v14560_v22  ;;  %14062 = vmatprep.mubr.msk.f32.mxu1 %vm1090_vm0, %v1060_v8 }
 0x277   : > { %14077 = vmatmul.mubr.msk.f32.vlgmr.msra.gmra.mrb[0].mxu0 %vm1090_vm0, %v1053_v11  ;;  %14082 = vmatprep.subr.mxu1 %v15763_v44 }
 0x278   : > { %14079 = vmatprep.mubr.msk.f32.mxu0 %vm1090_vm0, %v1054_v14 }
 0x279   : > { %14063 = vmatmul.mubr.msk.f32.vlgmr.msra.gmra.mrb[4].mxu1 %vm1090_vm0, %v1061_v18 }
 0x27a   : > { %14065 = vmatprep.mubr.msk.f32.mxu1 %vm1090_vm0, %v1062_v19 }
 0x27b   : > { %14080 = vmatmul.mubr.msk.f32.gmra.mrb[2].mxu0 %vm1090_vm0, %v1055_v20 }
 0x27c   : > { %14094 = vmatprep.mubr.msk.f32.mxu0 %vm15764_vm1, %v15763_v44 }
 0x27d   : > { %14066 = vmatmul.mubr.msk.f32.gmra.mrb[6].mxu1 %vm1090_vm0, %v1063_v23 }
 0x27e   : > { %14084 = vmatprep.mubr.msk.f32.mxu1 %vm15764_vm1, %v15763_v44 }
 0x344   : > { %v14050_v25 = vpop.f32.mrb[0].mxu1 }
 0x345   : > { %v16540_v26 = vadd.f32 %v14050_v25, %v13550_v24  ;;  %v1169_v27 = vpop.f32.mrb[1].mxu1 }
 0x346   : > { %v1170_v28 = vadd.f32 %v13550_v24, %v1169_v27 }
 0x348   : > { %v16542_v29 = vmul.f32 0.35355338, %v1170_v28  ;;  %v14053_v30 = vpop.f32.mrb[2].mxu1 }
 0x349   : > { %v16544_v31 = vadd.f32 %v14053_v30, %v13550_v24  ;;  %v1179_v32 = vpop.f32.mrb[3].mxu1 }
 0x34a   : > { %v16546_v35 = vadd.f32 %v13550_v24, %v1179_v32  ;;  %1384 = vrot.lane.b32.xlu1 %v16542_v29, %s15760_s1 }
 0x34c   : > { %v16552_v38 = vpop.f32.mrb[4].mxu1 }
 0x34d   : > { %v1260_v39 = vpop.f32.mrb[5].mxu1 }
 0x34e   : > { %v1261_v42 = vadd.f32 %v16550_v37, %v1260_v39 }
 0x350   : > { %1530 = vrot.lane.b32.xlu0 %v1261_v42, %s15760_s1  ;;  %1536 = vrot.lane.b32.xlu1 %v1261_v42, %s15761_s15  ;;  %v16571_v45 = vpop.f32.mrb[6].mxu1 }
 0x351   : > { %v16573_v46 = vpop.f32.mrb[7].mxu1 }
 0x354   : > { %1533 = vrot.lane.b32.xlu0 %v1261_v42, %s15762_s21  ;;  %1390 = vrot.lane.b32.xlu1 %v16542_v29, %s15761_s15 }
 0x358   : > { %1387 = vrot.lane.b32.xlu0 %v16542_v29, %s15762_s21 }
 0x3bc   : > { %v1385_v50 = vpop.permute.xlu1 %1384 }
 0x3c2   : > { %v1531_v55 = vpop.permute.xlu0 %1530  ;;  %v1537_v56 = vpop.permute.xlu1 %1536 }
 0x3c3   : > { %v1555_v59 = vcombine.low %v1531_v55, %v1537_v56  ;;  %v1556_v60 = vcombine.high %v1531_v55, %v1537_v56 }
 0x3c5   : > { %v1563_v2 = vrot.slane %v1555_v59, %v16575_v58  ;;  %v1570_v3 = vrot.slane %v1556_v60, %v16575_v58 }
 0x3c6   : > { %v1534_v61 = vpop.permute.xlu0 %1533  ;;  %v1391_v0 = vpop.permute.xlu1 %1390 }
 0x3c7   : > { %v1539_v62 = vcombine.low %v1261_v42, %v1534_v61  ;;  %v1540_v63 = vcombine.high %v1261_v42, %v1534_v61  ;;  %v1409_v6 = vcombine.low %v1385_v50, %v1391_v0  ;;  %v1410_v7 = vcombine.high %v1385_v50, %v1391_v0 }
 0x3c9   : > { %v1547_v4 = vrot.slane %v1539_v62, %v16575_v58  ;;  %v1554_v5 = vrot.slane %v1540_v63, %v16575_v58  ;;  %v1417_v19 = vrot.slane %v1409_v6, %v16575_v58  ;;  %v1424_v20 = vrot.slane %v1410_v7, %v16575_v58 }
 0x3ca   : > { %v1388_v8 = vpop.permute.xlu0 %1387 }
 0x3cb   : > { %v1571_v9 = vcombine.low %v1547_v4, %v1563_v2  ;;  %v1572_v10 = vcombine.high %v1547_v4, %v1563_v2  ;;  %v1587_v11 = vcombine.low %v1554_v5, %v1570_v3  ;;  %v1588_v12 = vcombine.high %v1554_v5, %v1570_v3 }
 0x3cc   : > { %v1393_v13 = vcombine.low %v16542_v29, %v1388_v8  ;;  %v1394_v14 = vcombine.high %v16542_v29, %v1388_v8 }
 0x3cd   : > { %v1579_v15 = vrot.slane %v1571_v9, %v16577_v1  ;;  %v1586_v16 = vrot.slane %v1572_v10, %v16577_v1  ;;  %v1595_v17 = vrot.slane %v1587_v11, %v16577_v1  ;;  %v1602_v18 = vrot.slane %v1588_v12, %v16577_v1 }
 0x3ce   : > { %v1401_v21 = vrot.slane %v1393_v13, %v16575_v58  ;;  %v1408_v22 = vrot.slane %v1394_v14, %v16575_v58 }
 0x3cf   : > { %v1607_v23 = vcombine.low %v1579_v15, %v1586_v16  ;;  %v13567_v24 = vcombine.high %v1579_v15, %v1586_v16  ;;  %v1623_v25 = vcombine.low %v1595_v17, %v1602_v18  ;;  %v13568_v27 = vcombine.high %v1595_v17, %v1602_v18  ;;  %v13560_v17 = vld [vmem:[#allocation17] ss:$0 sm:$0xff]  ;;  %v14078_v18 = vpop.f32.mrb[0].mxu0 }
 0x3d0   : > { %v1425_v28 = vcombine.low %v1401_v21, %v1417_v19  ;;  %v1426_v29 = vcombine.high %v1401_v21, %v1417_v19  ;;  %v1441_v30 = vcombine.low %v1408_v22, %v1424_v20  ;;  %v1442_v32 = vcombine.high %v1408_v22, %v1424_v20  ;;  %v1363_v20 = vpop.f32.mrb[1].mxu0 }
 0x3d1   : > { %v1614_v33 = vrot.slane %v1607_v23, %v16575_v58  ;;  %v1622_v34 = vrot.slane %v13567_v24, %v16575_v58  ;;  %v1630_v36 = vrot.slane %v1623_v25, %v16575_v58  ;;  %v1638_v39 = vrot.slane %v13568_v27, %v16575_v58  ;;  %v14081_v21 = vpop.f32.mrb[2].mxu0 }
 0x3d2   : > { %v1433_v40 = vrot.slane %v1425_v28, %v16577_v1  ;;  %v1440_v41 = vrot.slane %v1426_v29, %v16577_v1  ;;  %v1449_v42 = vrot.slane %v1441_v30, %v16577_v1  ;;  %v1456_v43 = vrot.slane %v1442_v32, %v16577_v1  ;;  %v1373_v23 = vpop.f32.mrb[3].mxu0 }
 0x3d3   : > { %v1639_v47 = vcombine.low %v1614_v33, %v1622_v34  ;;  %v1640_v48 = vcombine.high %v1614_v33, %v1622_v34  ;;  %v1655_v49 = vcombine.low %v1630_v36, %v1638_v39  ;;  %v1656_v50 = vcombine.high %v1630_v36, %v1638_v39 }
 0x3d4   : > { %v1461_v51 = vcombine.low %v1433_v40, %v1440_v41  ;;  %v13565_v52 = vcombine.high %v1433_v40, %v1440_v41  ;;  %v1477_v53 = vcombine.low %v1449_v42, %v1456_v43  ;;  %v13566_v54 = vcombine.high %v1449_v42, %v1456_v43 }
 0x3d5   : > { %v1647_v55 = vrot.slane %v1639_v47, %v16577_v1  ;;  %v1663_v56 = vrot.slane %v1655_v49, %v16577_v1  ;;  %v1654_v57 = vrot.slane %v1640_v48, %v16577_v1  ;;  %v1670_v59 = vrot.slane %v1656_v50, %v16577_v1 }
 0x3d6   : > { %v1468_v60 = vrot.slane %v1461_v51, %v16575_v58  ;;  %v1476_v61 = vrot.slane %v13565_v52, %v16575_v58  ;;  %v1484_v62 = vrot.slane %v1477_v53, %v16575_v58  ;;  %v1492_v63 = vrot.slane %v13566_v54, %v16575_v58 }
 0x3d7   : > { %v1671_v0 = vcombine.low %v1647_v55, %v1663_v56  ;;  %v1673_v2 = vcombine.low %v1654_v57, %v1670_v59  ;;  %v1672_v13 = vcombine.high %v1647_v55, %v1663_v56  ;;  %v1674_v15 = vcombine.high %v1654_v57, %v1670_v59 }
 0x3d8   : > { %v1493_v3 = vcombine.low %v1468_v60, %v1476_v61  ;;  %v1494_v4 = vcombine.high %v1468_v60, %v1476_v61  ;;  %v1509_v5 = vcombine.low %v1484_v62, %v1492_v63  ;;  %v1510_v6 = vcombine.high %v1484_v62, %v1492_v63 }
 0x3d9   : > { %14083 = vmatpush3.xpose.msk.msra.mxu1 %vm1821_vm2, %v1671_v0  ;;  %14093 = vmatpush3.xpose.msk.msra.mxu0 %vm1821_vm2, %v1673_v2  ;;  %v16633_v19 = vadd.f32 %v14078_v18, %v13560_v17  ;;  %v16635_v22 = vadd.f32 %v14081_v21, %v13560_v17  ;;  %v16637_v24 = vadd.f32 %v13560_v17, %v1373_v23  ;;  %v16657_v47 = vmul.f32 0.35355338, %v16540_v26 }
 0x3da   : > { %v1501_v7 = vrot.slane %v1493_v3, %v16577_v1  ;;  %v1508_v8 = vrot.slane %v1494_v4, %v16577_v1  ;;  %v1517_v9 = vrot.slane %v1509_v5, %v16577_v1  ;;  %v1524_v10 = vrot.slane %v1510_v6, %v16577_v1  ;;  %14087 = vmatprep.subr.mxu1 %v15763_v44 }
 0x3db   : > { %14102 = vmatprep.subr.mxu0 %v15763_v44  ;;  %v1364_v42 = vadd.f32 %v13560_v17, %v1363_v20  ;;  %v16647_v43 = vadd.f32 %v16552_v38, %v16550_v37 }
 0x3dc   : > { %v1525_v11 = vcombine.low %v1501_v7, %v1517_v9  ;;  %v1527_v12 = vcombine.low %v1508_v8, %v1524_v10  ;;  %v1526_v14 = vcombine.high %v1501_v7, %v1517_v9  ;;  %v1528_v16 = vcombine.high %v1508_v8, %v1524_v10 }
 0x3de   : > { %14085 = vmatmul.mubr.msk.f32.vlgmr.msra.gmra.mrb[8].mxu1 %vm1821_vm2, %v1525_v11  ;;  %14095 = vmatmul.mubr.msk.f32.vlgmr.msra.gmra.mrb[4].mxu0 %vm1821_vm2, %v1527_v12 }
 0x3df   : > { %14088 = vmatpush3.xpose.msk.msra.mxu1 %vm1821_vm2, %v1672_v13  ;;  %14089 = vmatprep.mubr.msk.f32.mxu1 %vm15764_vm1, %v15763_v44 }
 0x3e0   : > { %14097 = vmatprep.subr.mxu1 %v15763_v44  ;;  %14104 = vmatprep.mubr.msk.f32.mxu0 %vm15764_vm1, %v15763_v44 }
 0x3e2   : > { %14090 = vmatmul.mubr.msk.f32.vlgmr.msra.gmra.mrb[10].mxu1 %vm1821_vm2, %v1526_v14 }
 0x3e3   : > { %14098 = vmatpush3.xpose.msk.msra.mxu1 %vm1821_vm2, %v1674_v15  ;;  %14099 = vmatprep.mubr.msk.f32.mxu1 %vm15764_vm1, %v15763_v44 }
 0x3e4   : > { %14107 = vmatprep.subr.mxu1 %v15763_v44 }
 0x3e6   : > { %14100 = vmatmul.mubr.msk.f32.vlgmr.msra.gmra.mrb[12].mxu1 %vm1821_vm2, %v1528_v16 }
 0x3e7   : > { %14109 = vmatprep.mubr.msk.f32.mxu1 %vm15764_vm1, %v15763_v44 }
 0x4b1   : > { %v1894_v25 = vpop.f32.mrb[8].mxu1  ;;  %v2046_v27 = vpop.f32.mrb[4].mxu0 }
 0x4b2   : > { %v14086_v28 = vpop.f32.mrb[9].mxu1  ;;  %v14096_v29 = vpop.f32.mrb[5].mxu0  ;;  %v2126_v30 = vsel %vm1821_vm2, %v1894_v25, -inf  ;;  %v2132_v34 = vsel %vm1821_vm2, %v2046_v27, -inf }
 0x4b3   : > { %2127 = vmax.xlane.f32.xlu0 %v2126_v30 }
 0x4b5   : > { %v1970_v32 = vpop.f32.mrb[10].mxu1 }
 0x4b6   : > { %v14091_v33 = vpop.f32.mrb[11].mxu1  ;;  %v2129_v36 = vsel %vm1821_vm2, %v1970_v32, -inf }
 0x4b7   : > { %2133 = vmax.xlane.f32.xlu0 %v2132_v34  ;;  %2130 = vmax.xlane.f32.xlu1 %v2129_v36 }
 0x4b9   : > { %v2122_v39 = vpop.f32.mrb[12].mxu1 }
 0x4ba   : > { %v14101_v40 = vpop.f32.mrb[13].mxu1  ;;  %v2135_v41 = vsel %vm1821_vm2, %v2122_v39, -inf }
 0x4bb   : > { %2136 = vmax.xlane.f32.xlu0 %v2135_v41 }
 0x4c8   : > { %1676 = vrot.lane.b32.xlu1 %v1364_v42, %s15760_s1 }
 0x4cc   : > { %1682 = vrot.lane.b32.xlu1 %v1364_v42, %s15761_s15 }
 0x4d0   : > { %2763 = vrot.lane.b32.xlu1 %v16647_v43, %s15760_s1 }
 0x4d1   : > { %1679 = vrot.lane.b32.xlu0 %v1364_v42, %s15762_s21 }
 0x4d4   : > { %2769 = vrot.lane.b32.xlu1 %v16647_v43, %s15761_s15 }
 0x4d5   : > { %2766 = vrot.lane.b32.xlu0 %v16647_v43, %s15762_s21 }
 0x4d9   : > { %2617 = vrot.lane.b32.xlu0 %v16657_v47, %s15760_s1 }
 0x540   : > { %v2128_v48 = vpop.xlane.xlu0 %2127 }
 0x541   : > { %v2138_v38 = vsub.f32 %v1894_v25, %v2128_v48 }
 0x543   : > { %v2142_v49 = vmul.f32 1.442695, %v2138_v38 }
 0x544   : > { %v2134_v50 = vpop.xlane.xlu0 %2133  ;;  %v2131_v51 = vpop.xlane.xlu1 %2130 }
 0x545   : > { %14945 = vpow2.f32 %v2142_v49  ;;  %v2140_v52 = vsub.f32 %v2046_v27, %v2134_v50  ;;  %v2139_v53 = vsub.f32 %v1970_v32, %v2131_v51 }
 0x547   : > { %v2146_v54 = vmul.f32 1.442695, %v2140_v52  ;;  %v2144_v55 = vmul.f32 1.442695, %v2139_v53 }
 0x548   : > { %v1677_v56 = vpop.permute.xlu1 %1676  ;;  %v2137_v57 = vpop.xlane.xlu0 %2136 }
 0x549   : > { %14947 = vpow2.f32 %v2146_v54  ;;  %v2141_v59 = vsub.f32 %v2122_v39, %v2137_v57 }
 0x54a   : > { %14949 = vpow2.f32 %v2144_v55 }
 0x54b   : > { %v2148_v26 = vmul.f32 1.442695, %v2141_v59 }
 0x54c   : > { %v1683_v60 = vpop.permute.xlu1 %1682  ;;  %v1680_v61 = vpop.permute.xlu0 %1679 }
 0x54d   : > { %14951 = vpow2.f32 %v2148_v26  ;;  %v1701_v62 = vcombine.low %v1677_v56, %v1683_v60  ;;  %v1702_v63 = vcombine.high %v1677_v56, %v1683_v60  ;;  %v1685_v0 = vcombine.low %v1364_v42, %v1680_v61 }
 0x54e   : > { %v1686_v2 = vcombine.high %v1364_v42, %v1680_v61 }
 0x54f   : > { %v16661_v3 = vpop.eup %14945  ;;  %v1709_v4 = vrot.slane %v1701_v62, %v16575_v58  ;;  %v1716_v5 = vrot.slane %v1702_v63, %v16575_v58  ;;  %v1693_v6 = vrot.slane %v1685_v0, %v16575_v58 }
 0x550   : > { %v1700_v7 = vrot.slane %v1686_v2, %v16575_v58  ;;  %v2150_v8 = vsel %vm1821_vm2, %v16661_v3, 0.0  ;;  %v2764_v55 = vpop.permute.xlu1 %2763  ;;  %v2767_v57 = vpop.permute.xlu0 %2766 }
 0x551   : > { %v1717_v9 = vcombine.low %v1693_v6, %v1709_v4  ;;  %v1718_v10 = vcombine.high %v1693_v6, %v1709_v4  ;;  %2151 = vadd.xlane.f32.xlu1 %v2150_v8  ;;  %v2772_v60 = vcombine.low %v16647_v43, %v2767_v57  ;;  %v2773_v61 = vcombine.high %v16647_v43, %v2767_v57 }
 0x552   : > { %v1733_v11 = vcombine.low %v1700_v7, %v1716_v5  ;;  %v1734_v12 = vcombine.high %v1700_v7, %v1716_v5 }
 0x553   : > { %v16669_v13 = vpop.eup %14947  ;;  %v1725_v14 = vrot.slane %v1717_v9, %v16577_v1  ;;  %v1732_v15 = vrot.slane %v1718_v10, %v16577_v1  ;;  %v2780_v0 = vrot.slane %v2772_v60, %v16575_v58  ;;  %v2787_v2 = vrot.slane %v2773_v61, %v16575_v58 }
 0x554   : > { %v16673_v16 = vpop.eup %14949  ;;  %v1741_v17 = vrot.slane %v1733_v11, %v16577_v1  ;;  %v1748_v18 = vrot.slane %v1734_v12, %v16577_v1  ;;  %v2156_v20 = vsel %vm1821_vm2, %v16669_v13, 0.0  ;;  %v2770_v56 = vpop.permute.xlu1 %2769 }
 0x555   : > { %v1753_v21 = vcombine.low %v1725_v14, %v1732_v15  ;;  %v13569_v23 = vcombine.high %v1725_v14, %v1732_v15  ;;  %2157 = vadd.xlane.f32.xlu1 %v2156_v20  ;;  %v2153_v28 = vsel %vm1821_vm2, %v16673_v16, 0.0  ;;  %v2788_v59 = vcombine.low %v2764_v55, %v2770_v56  ;;  %v2618_v12 = vpop.permute.xlu0 %2617 }
 0x556   : > { %v1769_v25 = vcombine.low %v1741_v17, %v1748_v18  ;;  %v13570_v27 = vcombine.high %v1741_v17, %v1748_v18  ;;  %2154 = vadd.xlane.f32.xlu0 %v2153_v28  ;;  %v2789_v26 = vcombine.high %v2764_v55, %v2770_v56 }
 0x557   : > { %v16681_v29 = vpop.eup %14951  ;;  %v1760_v30 = vrot.slane %v1753_v21, %v16575_v58  ;;  %v1768_v32 = vrot.slane %v13569_v23, %v16575_v58  ;;  %v2796_v62 = vrot.slane %v2788_v59, %v16575_v58 }
 0x558   : > { %v2159_v33 = vsel %vm1821_vm2, %v16681_v29, 0.0  ;;  %v1776_v34 = vrot.slane %v1769_v25, %v16575_v58  ;;  %v1784_v36 = vrot.slane %v13570_v27, %v16575_v58  ;;  %v2803_v63 = vrot.slane %v2789_v26, %v16575_v58 }
 0x559   : > { %v1785_v39 = vcombine.low %v1760_v30, %v1768_v32  ;;  %v1786_v41 = vcombine.high %v1760_v30, %v1768_v32  ;;  %v2804_v4 = vcombine.low %v2780_v0, %v2796_v62  ;;  %v2805_v5 = vcombine.high %v2780_v0, %v2796_v62 }
 0x55a   : > { %v1801_v40 = vcombine.low %v1776_v34, %v1784_v36  ;;  %v1802_v42 = vcombine.high %v1776_v34, %v1784_v36  ;;  %2160 = vadd.xlane.f32.xlu0 %v2159_v33  ;;  %v2820_v6 = vcombine.low %v2787_v2, %v2803_v63  ;;  %v2821_v7 = vcombine.high %v2787_v2, %v2803_v63 }
 0x55b   : > { %v1793_v48 = vrot.slane %v1785_v39, %v16577_v1  ;;  %v16692_v49 = vrot.slane %v1786_v41, %v16577_v1  ;;  %v2812_v8 = vrot.slane %v2804_v4, %v16577_v1  ;;  %v2819_v9 = vrot.slane %v2805_v5, %v16577_v1 }
 0x55c   : > { %v1809_v38 = vrot.slane %v1801_v40, %v16577_v1  ;;  %v16695_v50 = vrot.slane %v1802_v42, %v16577_v1  ;;  %v2828_v10 = vrot.slane %v2820_v6, %v16577_v1  ;;  %v2835_v43 = vrot.slane %v2821_v7, %v16577_v1 }
 0x55d   : > { %v2840_v14 = vcombine.low %v2812_v8, %v2819_v9  ;;  %v13587_v15 = vcombine.high %v2812_v8, %v2819_v9 }
 0x55e   : > { %v1817_v51 = vcombine.low %v1793_v48, %v1809_v38  ;;  %v1818_v52 = vcombine.high %v1793_v48, %v1809_v38  ;;  %v1819_v53 = vcombine.low %v16692_v49, %v16695_v50  ;;  %v1820_v54 = vcombine.high %v16692_v49, %v16695_v50 }
 0x55f   : > { %v2856_v17 = vcombine.low %v2828_v10, %v2835_v43  ;;  %v13588_v18 = vcombine.high %v2828_v10, %v2835_v43  ;;  %v16718_v23 = vrot.slane %v2840_v14, %v16575_v58  ;;  %v16721_v25 = vrot.slane %v13587_v15, %v16575_v58 }
 0x560   : > { %14103 = vmatpush3.msra.mxu0 %v1817_v51  ;;  %14108 = vmatpush3.msra.mxu1 %v1818_v52 }
 0x561   : > { %14112 = vmatprep.subr.mxu0 %v15763_v44  ;;  %14117 = vmatprep.subr.mxu1 %v15763_v44  ;;  %v16724_v27 = vrot.slane %v2856_v17, %v16575_v58  ;;  %v16727_v28 = vrot.slane %v13588_v18, %v16575_v58  ;;  %v2872_v34 = vcombine.low %v16718_v23, %v16721_v25 }
 0x562   : > { %v2873_v43 = vcombine.high %v16718_v23, %v16721_v25 }
 0x563   : > { %v2888_v36 = vcombine.low %v16724_v27, %v16727_v28  ;;  %v2889_v49 = vcombine.high %v16724_v27, %v16727_v28 }
 0x565   : > { %v2896_v55 = vrot.slane %v2888_v36, %v16577_v1 }
 0x566   : > { %2620 = vrot.lane.b32.xlu1 %v16657_v47, %s15762_s21 }
 0x570   : > { %2623 = vrot.lane.b32.xlu0 %v16657_v47, %s15761_s15 }
 0x5de   : > { %v2152_v11 = vpop.xlane.xlu1 %2151 }
 0x5df   : > { %14953 = vrcp.f32 %v2152_v11 }
 0x5e2   : > { %v2158_v20 = vpop.xlane.xlu1 %2157 }
 0x5e3   : > { %14955 = vrcp.f32 %v2158_v20  ;;  %v2155_v21 = vpop.xlane.xlu0 %2154  ;;  %v2887_v20 = vrot.slane %v2873_v43, %v16577_v1 }
 0x5e4   : > { %14957 = vrcp.f32 %v2155_v21  ;;  %v2903_v21 = vrot.slane %v2889_v49, %v16577_v1 }
 0x5e6   : > { %v2621_v30 = vpop.permute.xlu1 %2620 }
 0x5e7   : > { %v2161_v32 = vpop.xlane.xlu0 %2160  ;;  %v2626_v40 = vcombine.low %v16657_v47, %v2621_v30  ;;  %v2627_v41 = vcombine.high %v16657_v47, %v2621_v30 }
 0x5e8   : > { %14959 = vrcp.f32 %v2161_v32 }
 0x5e9   : > { %v14954_v33 = vpop.eup %14953  ;;  %v2634_v47 = vrot.slane %v2626_v40, %v16575_v58  ;;  %v2641_v57 = vrot.slane %v2627_v41, %v16575_v58 }
 0x5ea   : > { %v2163_v39 = vmul.f32 %v14954_v33, %v16661_v3  ;;  %v2880_v3 = vrot.slane %v2872_v34, %v16577_v1  ;;  %v2906_v33 = vcombine.low %v2887_v20, %v2903_v21  ;;  %v2907_v34 = vcombine.high %v2887_v20, %v2903_v21 }
 0x5eb   : > { %v2624_v42 = vpop.permute.xlu0 %2623 }
 0x5ec   : > { %14105 = vmatmul.mubr.msk.f32.vlgmr.msra.gmra.mrb[6].mxu0 %vm1821_vm2, %v2163_v39  ;;  %v2642_v38 = vcombine.low %v2618_v12, %v2624_v42  ;;  %v2643_v51 = vcombine.high %v2618_v12, %v2624_v42  ;;  %v2904_v63 = vcombine.low %v2880_v3, %v2896_v55  ;;  %v2905_v12 = vcombine.high %v2880_v3, %v2896_v55 }
 0x5ed   : > { %v14956_v48 = vpop.eup %14955  ;;  %14113 = vmatpush3.msra.mxu0 %v1819_v53  ;;  %14114 = vmatprep.mubr.msk.f32.mxu0 %vm15764_vm1, %v15763_v44 }
 0x5ee   : > { %v2167_v52 = vmul.f32 %v14956_v48, %v16669_v13  ;;  %14122 = vmatprep.subr.mxu0 %v15763_v44  ;;  %v14958_v56 = vpop.eup %14957  ;;  %v2650_v59 = vrot.slane %v2642_v38, %v16575_v58  ;;  %v2657_v53 = vrot.slane %v2643_v51, %v16575_v58 }
 0x5ef   : > { %v2165_v26 = vmul.f32 %v14958_v56, %v16673_v16 }
 0x5f0   : > { %14115 = vmatmul.mubr.msk.f32.vlgmr.msra.gmra.mrb[8].mxu0 %vm1821_vm2, %v2167_v52  ;;  %v2658_v13 = vcombine.low %v2634_v47, %v2650_v59  ;;  %v2659_v60 = vcombine.high %v2634_v47, %v2650_v59  ;;  %v2674_v61 = vcombine.low %v2641_v57, %v2657_v53  ;;  %v2675_v62 = vcombine.high %v2641_v57, %v2657_v53 }
 0x5f1   : > { %14124 = vmatprep.mubr.msk.f32.mxu0 %vm15764_vm1, %v15763_v44  ;;  %14110 = vmatmul.mubr.msk.f32.vlgmr.msra.gmra.mrb[14].mxu1 %vm1821_vm2, %v2165_v26 }
 0x5f2   : > { %v14960_v0 = vpop.eup %14959  ;;  %v2666_v2 = vrot.slane %v2658_v13, %v16577_v1  ;;  %v2673_v4 = vrot.slane %v2659_v60, %v16577_v1  ;;  %v2682_v5 = vrot.slane %v2674_v61, %v16577_v1  ;;  %v2689_v16 = vrot.slane %v2675_v62, %v16577_v1  ;;  %14118 = vmatpush3.msra.mxu1 %v1820_v54 }
 0x5f3   : > { %14119 = vmatprep.mubr.msk.f32.mxu1 %vm15764_vm1, %v15763_v44  ;;  %v2169_v6 = vmul.f32 %v14960_v0, %v16681_v29  ;;  %14127 = vmatprep.subr.mxu1 %v15763_v44 }
 0x5f4   : > { %14123 = vmatpush3.xpose.msk.msra.mxu0 %vm1821_vm2, %v2904_v63  ;;  %v2694_v7 = vcombine.low %v2666_v2, %v2673_v4  ;;  %v13585_v8 = vcombine.high %v2666_v2, %v2673_v4  ;;  %v2710_v9 = vcombine.low %v2682_v5, %v2689_v16  ;;  %v13586_v10 = vcombine.high %v2682_v5, %v2689_v16 }
 0x5f5   : > { %14120 = vmatmul.mubr.msk.f32.vlgmr.msra.gmra.mrb[16].mxu1 %vm1821_vm2, %v2169_v6  ;;  %14132 = vmatprep.subr.mxu0 %v15763_v44 }
 0x5f6   : > { %v2701_v50 = vrot.slane %v2694_v7, %v16575_v58  ;;  %v2709_v29 = vrot.slane %v13585_v8, %v16575_v58  ;;  %v2717_v54 = vrot.slane %v2710_v9, %v16575_v58  ;;  %v2725_v11 = vrot.slane %v13586_v10, %v16575_v58  ;;  %14129 = vmatprep.mubr.msk.f32.mxu1 %vm15764_vm1, %v15763_v44 }
 0x5f8   : > { %v2726_v14 = vcombine.low %v2701_v50, %v2709_v29  ;;  %v2727_v15 = vcombine.high %v2701_v50, %v2709_v29  ;;  %v2742_v17 = vcombine.low %v2717_v54, %v2725_v11  ;;  %v2743_v18 = vcombine.high %v2717_v54, %v2725_v11 }
 0x5f9   : > { %14128 = vmatpush3.xpose.msk.msra.mxu1 %vm1821_vm2, %v2905_v12 }
 0x5fa   : > { %14137 = vmatprep.subr.mxu1 %v15763_v44  ;;  %v2734_v23 = vrot.slane %v2726_v14, %v16577_v1  ;;  %v2750_v25 = vrot.slane %v2742_v17, %v16577_v1  ;;  %v2741_v30 = vrot.slane %v2727_v15, %v16577_v1  ;;  %v2757_v32 = vrot.slane %v2743_v18, %v16577_v1 }
 0x5fc   : > { %v2758_v27 = vcombine.low %v2734_v23, %v2750_v25  ;;  %v2759_v28 = vcombine.high %v2734_v23, %v2750_v25  ;;  %v2760_v36 = vcombine.low %v2741_v30, %v2757_v32  ;;  %v2761_v39 = vcombine.high %v2741_v30, %v2757_v32 }
 0x5fe   : > { %14125 = vmatmul.mubr.msk.f32.vlgmr.msra.gmra.mrb[10].mxu0 %vm1821_vm2, %v2758_v27  ;;  %14130 = vmatmul.mubr.msk.f32.vlgmr.msra.gmra.mrb[18].mxu1 %vm1821_vm2, %v2759_v28 }
 0x5ff   : > { %14133 = vmatpush3.xpose.msk.msra.mxu0 %vm1821_vm2, %v2906_v33  ;;  %14138 = vmatpush3.xpose.msk.msra.mxu1 %vm1821_vm2, %v2907_v34 }
 0x600   : > { %14134 = vmatprep.mubr.msk.f32.mxu0 %vm15764_vm1, %v15763_v44  ;;  %14139 = vmatprep.mubr.msk.f32.mxu1 %vm15764_vm1, %v15763_v44 }
 0x601   : > { %14142 = vmatprep.subr.mxu0 %v15763_v44  ;;  %14147 = vmatprep.subr.mxu1 %v15763_v44 }
 0x602   : > { %14135 = vmatmul.mubr.msk.f32.vlgmr.msra.gmra.mrb[12].mxu0 %vm1821_vm2, %v2760_v36  ;;  %14140 = vmatmul.mubr.msk.f32.vlgmr.msra.gmra.mrb[20].mxu1 %vm1821_vm2, %v2761_v39 }
 0x603   : > { %14144 = vmatprep.mubr.msk.f32.mxu0 %vm15764_vm1, %v15763_v44  ;;  %14149 = vmatprep.mubr.msk.f32.mxu1 %vm15764_vm1, %v15763_v44 }
 0x6bf   : > { %v2239_v40 = vpop.f32.mrb[6].mxu0 }
 0x6c0   : > { %v14106_v41 = vpop.f32.mrb[7].mxu0 }
 0x6c3   : > { %v2385_v42 = vpop.f32.mrb[8].mxu0 }
 0x6c4   : > { %v2462_v48 = vcombine.low %v2239_v40, %v2385_v42  ;;  %v2463_v38 = vcombine.high %v2239_v40, %v2385_v42  ;;  %v14116_v51 = vpop.f32.mrb[9].mxu0  ;;  %v2312_v52 = vpop.f32.mrb[14].mxu1  ;;  %v16841_v42 = vadd.f32 %v16550_v37, %v16573_v46 }
 0x6c5   : > { %v14111_v3 = vpop.f32.mrb[15].mxu1 }
 0x6c6   : > { %v2470_v59 = vrot.slane %v2462_v48, %v16575_v58  ;;  %v2477_v53 = vrot.slane %v2463_v38, %v16575_v58  ;;  %v16853_v38 = vmul.f32 0.35355338, %v16546_v35 }
 0x6c8   : > { %v2458_v55 = vpop.f32.mrb[16].mxu1 }
 0x6c9   : > { %v2478_v56 = vcombine.low %v2312_v52, %v2458_v55  ;;  %v2479_v47 = vcombine.high %v2312_v52, %v2458_v55  ;;  %v14121_v57 = vpop.f32.mrb[17].mxu1 }
 0x6cb   : > { %v2486_v26 = vrot.slane %v2478_v56, %v16575_v58  ;;  %v2493_v13 = vrot.slane %v2479_v47, %v16575_v58 }
 0x6cd   : > { %v2494_v60 = vcombine.low %v2470_v59, %v2486_v26  ;;  %v2495_v61 = vcombine.high %v2470_v59, %v2486_v26  ;;  %v2510_v62 = vcombine.low %v2477_v53, %v2493_v13  ;;  %v2511_v63 = vcombine.high %v2477_v53, %v2493_v13 }
 0x6cf   : > { %v2502_v0 = vrot.slane %v2494_v60, %v16577_v1  ;;  %v2509_v2 = vrot.slane %v2495_v61, %v16577_v1  ;;  %v2518_v4 = vrot.slane %v2510_v62, %v16577_v1  ;;  %v2525_v5 = vrot.slane %v2511_v63, %v16577_v1 }
 0x6d1   : > { %v2530_v16 = vcombine.low %v2502_v0, %v2509_v2  ;;  %v13583_v6 = vcombine.high %v2502_v0, %v2509_v2  ;;  %v2546_v7 = vcombine.low %v2518_v4, %v2525_v5  ;;  %v13584_v8 = vcombine.high %v2518_v4, %v2525_v5  ;;  %v3126_v9 = vpop.f32.mrb[10].mxu0  ;;  %v3202_v10 = vpop.f32.mrb[18].mxu1 }
 0x6d2   : > { %v14126_v43 = vpop.f32.mrb[11].mxu0  ;;  %v14131_v49 = vpop.f32.mrb[19].mxu1  ;;  %v3358_v50 = vsel %vm1821_vm2, %v3126_v9, -inf  ;;  %v3361_v29 = vsel %vm1821_vm2, %v3202_v10, -inf }
 0x6d3   : > { %3359 = vmax.xlane.f32.xlu1 %v3358_v50  ;;  %3362 = vmax.xlane.f32.xlu0 %v3361_v29  ;;  %v2537_v54 = vrot.slane %v2530_v16, %v16575_v58  ;;  %v2545_v11 = vrot.slane %v13583_v6, %v16575_v58  ;;  %v2553_v12 = vrot.slane %v2546_v7, %v16575_v58 }
 0x6d4   : > { %v2561_v14 = vrot.slane %v13584_v8, %v16575_v58 }
 0x6d5   : > { %v3278_v15 = vpop.f32.mrb[12].mxu0  ;;  %v3354_v17 = vpop.f32.mrb[20].mxu1  ;;  %v2562_v18 = vcombine.low %v2537_v54, %v2545_v11  ;;  %v2563_v20 = vcombine.high %v2537_v54, %v2545_v11 }
 0x6d6   : > { %v14136_v21 = vpop.f32.mrb[13].mxu0  ;;  %v14141_v23 = vpop.f32.mrb[21].mxu1  ;;  %v3364_v25 = vsel %vm1821_vm2, %v3278_v15, -inf  ;;  %v2578_v27 = vcombine.low %v2553_v12, %v2561_v14  ;;  %v2579_v28 = vcombine.high %v2553_v12, %v2561_v14  ;;  %v3367_v48 = vsel %vm1821_vm2, %v3354_v17, -inf }
 0x6d7   : > { %3365 = vmax.xlane.f32.xlu0 %v3364_v25  ;;  %v16816_v30 = vrot.slane %v2562_v18, %v16577_v1  ;;  %v16819_v32 = vrot.slane %v2563_v20, %v16577_v1 }
 0x6d8   : > { %v16822_v33 = vrot.slane %v2578_v27, %v16577_v1  ;;  %v16825_v34 = vrot.slane %v2579_v28, %v16577_v1 }
 0x6da   : > { %v2595_v36 = vcombine.high %v16816_v30, %v16822_v33  ;;  %v2596_v39 = vcombine.low %v16819_v32, %v16825_v34  ;;  %v2597_v40 = vcombine.high %v16819_v32, %v16825_v34  ;;  %v2594_v41 = vcombine.low %v16816_v30, %v16822_v33 }
 0x6e4   : > { %2912 = vrot.lane.b32.xlu1 %v16633_v19, %s15762_s21 }
 0x6ed   : > { %2909 = vrot.lane.b32.xlu0 %v16633_v19, %s15760_s1 }
 0x6f1   : > { %3993 = vrot.lane.b32.xlu0 %v16841_v42, %s15760_s1 }
 0x6f5   : > { %3999 = vrot.lane.b32.xlu0 %v16841_v42, %s15761_s15 }
 0x708   : > { %3368 = vmax.xlane.f32.xlu1 %v3367_v48 }
 0x719   : > { %2915 = vrot.lane.b32.xlu1 %v16633_v19, %s15761_s15 }
 0x71d   : > { %3996 = vrot.lane.b32.xlu1 %v16841_v42, %s15762_s21 }
 0x721   : > { %3847 = vrot.lane.b32.xlu1 %v16853_v38, %s15760_s1 }
 0x760   : > { %v3360_v37 = vpop.xlane.xlu1 %3359  ;;  %v3363_v46 = vpop.xlane.xlu0 %3362 }
 0x761   : > { %v3370_v51 = vsub.f32 %v3126_v9, %v3360_v37  ;;  %v3371_v52 = vsub.f32 %v3202_v10, %v3363_v46 }
 0x763   : > { %v3374_v3 = vmul.f32 1.442695, %v3370_v51  ;;  %v3376_v55 = vmul.f32 1.442695, %v3371_v52 }
 0x764   : > { %v3366_v56 = vpop.xlane.xlu0 %3365  ;;  %v2913_v61 = vpop.permute.xlu1 %2912 }
 0x765   : > { %14961 = vpow2.f32 %v3374_v3  ;;  %v3372_v47 = vsub.f32 %v3278_v15, %v3366_v56  ;;  %v2918_v0 = vcombine.low %v16633_v19, %v2913_v61  ;;  %v2919_v2 = vcombine.high %v16633_v19, %v2913_v61 }
 0x766   : > { %14963 = vpow2.f32 %v3376_v55 }
 0x767   : > { %v3378_v57 = vmul.f32 1.442695, %v3372_v47  ;;  %v2926_v8 = vrot.slane %v2918_v0, %v16575_v58  ;;  %v2933_v9 = vrot.slane %v2919_v2, %v16575_v58 }
 0x768   : > { %v2910_v5 = vpop.permute.xlu0 %2909 }
 0x769   : > { %14965 = vpow2.f32 %v3378_v57 }
 0x76c   : > { %v3994_v61 = vpop.permute.xlu0 %3993 }
 0x76f   : > { %v16857_v59 = vpop.eup %14961 }
 0x770   : > { %v16859_v53 = vpop.eup %14963  ;;  %v3382_v35 = vsel %vm1821_vm2, %v16857_v59, 0.0 }
 0x771   : > { %3383 = vadd.xlane.f32.xlu0 %v3382_v35  ;;  %v3385_v26 = vsel %vm1821_vm2, %v16859_v53, 0.0 }
 0x772   : > { %3386 = vadd.xlane.f32.xlu1 %v3385_v26 }
 0x773   : > { %v16865_v13 = vpop.eup %14965 }
 0x774   : > { %v3388_v60 = vsel %vm1821_vm2, %v16865_v13, 0.0 }
 0x775   : > { %3389 = vadd.xlane.f32.xlu0 %v3388_v60 }
 0x78b   : > { %3850 = vrot.lane.b32.xlu0 %v16853_v38, %s15762_s21 }
 0x795   : > { %v3369_v62 = vpop.xlane.xlu1 %3368 }
 0x796   : > { %v3373_v63 = vsub.f32 %v3354_v17, %v3369_v62 }
 0x798   : > { %v3380_v4 = vmul.f32 1.442695, %v3373_v63  ;;  %v4000_v63 = vpop.permute.xlu0 %3999 }
 0x799   : > { %v2916_v16 = vpop.permute.xlu1 %2915 }
 0x79a   : > { %14967 = vpow2.f32 %v3380_v4  ;;  %v2934_v6 = vcombine.low %v2910_v5, %v2916_v16  ;;  %v2935_v7 = vcombine.high %v2910_v5, %v2916_v16  ;;  %v4018_v4 = vcombine.low %v3994_v61, %v4000_v63 }
 0x79b   : > { %v4019_v5 = vcombine.high %v3994_v61, %v4000_v63 }
 0x79c   : > { %v2942_v10 = vrot.slane %v2934_v6, %v16575_v58  ;;  %v2949_v43 = vrot.slane %v2935_v7, %v16575_v58  ;;  %v4026_v7 = vrot.slane %v4018_v4, %v16575_v58 }
 0x79d   : > { %v3997_v62 = vpop.permute.xlu1 %3996 }
 0x79e   : > { %v2950_v49 = vcombine.low %v2926_v8, %v2942_v10  ;;  %v2951_v50 = vcombine.high %v2926_v8, %v2942_v10  ;;  %v2966_v29 = vcombine.low %v2933_v9, %v2949_v43  ;;  %v2967_v54 = vcombine.high %v2933_v9, %v2949_v43 }
 0x79f   : > { %v4002_v0 = vcombine.low %v16841_v42, %v3997_v62  ;;  %v4003_v2 = vcombine.high %v16841_v42, %v3997_v62  ;;  %v4033_v8 = vrot.slane %v4019_v5, %v16575_v58 }
 0x7a0   : > { %v2958_v19 = vrot.slane %v2950_v49, %v16577_v1  ;;  %v2965_v11 = vrot.slane %v2951_v50, %v16577_v1  ;;  %v2974_v12 = vrot.slane %v2966_v29, %v16577_v1  ;;  %v2981_v14 = vrot.slane %v2967_v54, %v16577_v1 }
 0x7a1   : > { %v4010_v16 = vrot.slane %v4002_v0, %v16575_v58  ;;  %v4017_v6 = vrot.slane %v4003_v2, %v16575_v58  ;;  %v3848_v50 = vpop.permute.xlu1 %3847 }
 0x7a2   : > { %v2986_v15 = vcombine.low %v2958_v19, %v2965_v11  ;;  %v13589_v17 = vcombine.high %v2958_v19, %v2965_v11  ;;  %v3002_v18 = vcombine.low %v2974_v12, %v2981_v14  ;;  %v13590_v20 = vcombine.high %v2974_v12, %v2981_v14 }
 0x7a3   : > { %v4034_v9 = vcombine.low %v4010_v16, %v4026_v7  ;;  %v4035_v10 = vcombine.high %v4010_v16, %v4026_v7  ;;  %v4050_v43 = vcombine.low %v4017_v6, %v4033_v8  ;;  %v4051_v49 = vcombine.high %v4017_v6, %v4033_v8 }
 0x7a4   : > { %v16881_v21 = vpop.eup %14967  ;;  %v2993_v23 = vrot.slane %v2986_v15, %v16575_v58  ;;  %v3001_v25 = vrot.slane %v13589_v17, %v16575_v58  ;;  %v3009_v27 = vrot.slane %v3002_v18, %v16575_v58  ;;  %v3017_v28 = vrot.slane %v13590_v20, %v16575_v58 }
 0x7a5   : > { %v3391_v48 = vsel %vm1821_vm2, %v16881_v21, 0.0  ;;  %v4042_v29 = vrot.slane %v4034_v9, %v16577_v1  ;;  %v4049_v54 = vrot.slane %v4035_v10, %v16577_v1  ;;  %v4058_v42 = vrot.slane %v4050_v43, %v16577_v1 }
 0x7a6   : > { %v3018_v37 = vcombine.low %v2993_v23, %v3001_v25  ;;  %v3034_v46 = vcombine.low %v3009_v27, %v3017_v28  ;;  %v3019_v51 = vcombine.high %v2993_v23, %v3001_v25  ;;  %3392 = vadd.xlane.f32.xlu1 %v3391_v48  ;;  %v3035_v56 = vcombine.high %v3009_v27, %v3017_v28 }
 0x7a7   : > { %v4065_v19 = vrot.slane %v4051_v49, %v16577_v1  ;;  %v4070_v14 = vcombine.low %v4042_v29, %v4049_v54  ;;  %v13607_v15 = vcombine.high %v4042_v29, %v4049_v54 }
 0x7a8   : > { %v3026_v52 = vrot.slane %v3018_v37, %v16577_v1  ;;  %v3042_v3 = vrot.slane %v3034_v46, %v16577_v1  ;;  %v3033_v55 = vrot.slane %v3019_v51, %v16577_v1  ;;  %v3049_v35 = vrot.slane %v3035_v56, %v16577_v1 }
 0x7a9   : > { %v4086_v17 = vcombine.low %v4058_v42, %v4065_v19  ;;  %v13608_v18 = vcombine.high %v4058_v42, %v4065_v19  ;;  %v16908_v23 = vrot.slane %v4070_v14, %v16575_v58  ;;  %v16911_v25 = vrot.slane %v13607_v15, %v16575_v58 }
 0x7aa   : > { %v3050_v47 = vcombine.low %v3026_v52, %v3042_v3  ;;  %v3051_v57 = vcombine.high %v3026_v52, %v3042_v3  ;;  %v3052_v26 = vcombine.low %v3033_v55, %v3049_v35  ;;  %v3053_v60 = vcombine.high %v3033_v55, %v3049_v35 }
 0x7ab   : > { %v16914_v27 = vrot.slane %v4086_v17, %v16575_v58  ;;  %v16917_v28 = vrot.slane %v13608_v18, %v16575_v58  ;;  %v4102_v46 = vcombine.low %v16908_v23, %v16911_v25 }
 0x7ac   : > { %14143 = vmatpush3.msra.mxu0 %v3050_v47  ;;  %14148 = vmatpush3.msra.mxu1 %v3051_v57 }
 0x7ad   : > { %14152 = vmatprep.subr.mxu0 %v15763_v44  ;;  %14157 = vmatprep.subr.mxu1 %v15763_v44  ;;  %v4118_v51 = vcombine.low %v16914_v27, %v16917_v28  ;;  %v4110_v47 = vrot.slane %v4102_v46, %v16577_v1 }
 0x7af   : > { %v4126_v57 = vrot.slane %v4118_v51, %v16577_v1 }
 0x7b7   : > { %3853 = vrot.lane.b32.xlu1 %v16853_v38, %s15761_s15 }
 0x7fe   : > { %v3384_v11 = vpop.xlane.xlu0 %3383 }
 0x7ff   : > { %14969 = vrcp.f32 %v3384_v11  ;;  %v3387_v12 = vpop.xlane.xlu1 %3386  ;;  %v4103_v11 = vcombine.high %v16908_v23, %v16911_v25 }
 0x800   : > { %14971 = vrcp.f32 %v3387_v12  ;;  %v4119_v12 = vcombine.high %v16914_v27, %v16917_v28 }
 0x801   : > { %v4117_v27 = vrot.slane %v4103_v11, %v16577_v1 }
 0x802   : > { %v3390_v20 = vpop.xlane.xlu0 %3389  ;;  %v4133_v28 = vrot.slane %v4119_v12, %v16577_v1 }
 0x803   : > { %14973 = vrcp.f32 %v3390_v20 }
 0x809   : > { %v14970_v48 = vpop.eup %14969 }
 0x80a   : > { %v14972_v37 = vpop.eup %14971  ;;  %v3395_v52 = vmul.f32 %v14970_v48, %v16857_v59  ;;  %v4134_v59 = vcombine.low %v4110_v47, %v4126_v57 }
 0x80b   : > { %v3397_v3 = vmul.f32 %v14972_v37, %v16859_v53  ;;  %v3851_v53 = vpop.permute.xlu0 %3850 }
 0x80c   : > { %14145 = vmatmul.mubr.msk.f32.vlgmr.msra.gmra.mrb[14].mxu0 %vm1821_vm2, %v3395_v52  ;;  %v3856_v35 = vcombine.low %v16853_v38, %v3851_v53 }
 0x80d   : > { %v14974_v55 = vpop.eup %14973  ;;  %14150 = vmatmul.mubr.msk.f32.vlgmr.msra.gmra.mrb[22].mxu1 %vm1821_vm2, %v3397_v3  ;;  %14153 = vmatpush3.msra.mxu0 %v3052_v26  ;;  %v3857_v26 = vcombine.high %v16853_v38, %v3851_v53 }
 0x80e   : > { %14158 = vmatpush3.msra.mxu1 %v3053_v60  ;;  %14154 = vmatprep.mubr.msk.f32.mxu0 %vm15764_vm1, %v15763_v44  ;;  %v3399_v56 = vmul.f32 %v14974_v55, %v16865_v13  ;;  %v3864_v63 = vrot.slane %v3856_v35, %v16575_v58  ;;  %v4136_v55 = vcombine.low %v4117_v27, %v4133_v28 }
 0x80f   : > { %14162 = vmatprep.subr.mxu0 %v15763_v44  ;;  %14159 = vmatprep.mubr.msk.f32.mxu1 %vm15764_vm1, %v15763_v44  ;;  %v3871_v0 = vrot.slane %v3857_v26, %v16575_v58 }
 0x810   : > { %14155 = vmatmul.mubr.msk.f32.vlgmr.msra.gmra.mrb[16].mxu0 %vm1821_vm2, %v3399_v56  ;;  %14167 = vmatprep.subr.mxu1 %v15763_v44  ;;  %v4137_v56 = vcombine.high %v4117_v27, %v4133_v28 }
 0x811   : > { %14164 = vmatprep.mubr.msk.f32.mxu0 %vm15764_vm1, %v15763_v44 }
 0x814   : > { %14163 = vmatpush3.xpose.msk.msra.mxu0 %vm1821_vm2, %v4134_v59 }
 0x815   : > { %14172 = vmatprep.subr.mxu0 %v15763_v44 }
 0x833   : > { %v3393_v13 = vpop.xlane.xlu1 %3392 }
 0x834   : > { %14975 = vrcp.f32 %v3393_v13 }
 0x837   : > { %v3854_v60 = vpop.permute.xlu1 %3853 }
 0x838   : > { %v3872_v61 = vcombine.low %v3848_v50, %v3854_v60  ;;  %v3873_v62 = vcombine.high %v3848_v50, %v3854_v60  ;;  %v4135_v50 = vcombine.high %v4110_v47, %v4126_v57 }
 0x83a   : > { %v3880_v2 = vrot.slane %v3872_v61, %v16575_v58  ;;  %v3887_v4 = vrot.slane %v3873_v62, %v16575_v58 }
 0x83c   : > { %v3888_v5 = vcombine.low %v3864_v63, %v3880_v2  ;;  %v3889_v16 = vcombine.high %v3864_v63, %v3880_v2  ;;  %v3904_v6 = vcombine.low %v3871_v0, %v3887_v4  ;;  %v3905_v7 = vcombine.high %v3871_v0, %v3887_v4 }
 0x83e   : > { %v14976_v8 = vpop.eup %14975  ;;  %v3896_v9 = vrot.slane %v3888_v5, %v16577_v1  ;;  %v3903_v38 = vrot.slane %v3889_v16, %v16577_v1  ;;  %v3912_v10 = vrot.slane %v3904_v6, %v16577_v1  ;;  %v3919_v43 = vrot.slane %v3905_v7, %v16577_v1 }
 0x83f   : > { %v3401_v49 = vmul.f32 %v14976_v8, %v16881_v21 }
 0x840   : > { %v3924_v29 = vcombine.low %v3896_v9, %v3903_v38  ;;  %v13605_v54 = vcombine.high %v3896_v9, %v3903_v38  ;;  %v3940_v42 = vcombine.low %v3912_v10, %v3919_v43  ;;  %v13606_v19 = vcombine.high %v3912_v10, %v3919_v43 }
 0x841   : > { %14160 = vmatmul.mubr.msk.f32.vlgmr.msra.gmra.mrb[24].mxu1 %vm1821_vm2, %v3401_v49 }
 0x842   : > { %v3931_v14 = vrot.slane %v3924_v29, %v16575_v58  ;;  %v3939_v15 = vrot.slane %v13605_v54, %v16575_v58  ;;  %v3947_v17 = vrot.slane %v3940_v42, %v16575_v58  ;;  %v3955_v21 = vrot.slane %v13606_v19, %v16575_v58  ;;  %14168 = vmatpush3.xpose.msk.msra.mxu1 %vm1821_vm2, %v4135_v50 }
 0x843   : > { %14169 = vmatprep.mubr.msk.f32.mxu1 %vm15764_vm1, %v15763_v44  ;;  %14177 = vmatprep.subr.mxu1 %v15763_v44 }
 0x844   : > { %v3956_v18 = vcombine.low %v3931_v14, %v3939_v15  ;;  %v3957_v20 = vcombine.high %v3931_v14, %v3939_v15  ;;  %v3972_v23 = vcombine.low %v3947_v17, %v3955_v21  ;;  %v3973_v25 = vcombine.high %v3947_v17, %v3955_v21 }
 0x846   : > { %v3964_v48 = vrot.slane %v3956_v18, %v16577_v1  ;;  %v3980_v37 = vrot.slane %v3972_v23, %v16577_v1  ;;  %v3971_v52 = vrot.slane %v3957_v20, %v16577_v1  ;;  %v3987_v3 = vrot.slane %v3973_v25, %v16577_v1 }
 0x848   : > { %v3988_v46 = vcombine.low %v3964_v48, %v3980_v37  ;;  %v3989_v51 = vcombine.high %v3964_v48, %v3980_v37  ;;  %v3990_v47 = vcombine.low %v3971_v52, %v3987_v3  ;;  %v3991_v57 = vcombine.high %v3971_v52, %v3987_v3 }
 0x84a   : > { %14165 = vmatmul.mubr.msk.f32.vlgmr.msra.gmra.mrb[18].mxu0 %vm1821_vm2, %v3988_v46  ;;  %14170 = vmatmul.mubr.msk.f32.vlgmr.msra.gmra.mrb[26].mxu1 %vm1821_vm2, %v3989_v51 }
 0x84b   : > { %14173 = vmatpush3.xpose.msk.msra.mxu0 %vm1821_vm2, %v4136_v55  ;;  %14178 = vmatpush3.xpose.msk.msra.mxu1 %vm1821_vm2, %v4137_v56 }
 0x84c   : > { %14174 = vmatprep.mubr.msk.f32.mxu0 %vm15764_vm1, %v15763_v44  ;;  %14179 = vmatprep.mubr.msk.f32.mxu1 %vm15764_vm1, %v15763_v44 }
 0x84d   : > { %14182 = vmatprep.subr.mxu0 %v15763_v44  ;;  %14187 = vmatprep.subr.mxu1 %v15763_v44 }
 0x84e   : > { %14175 = vmatmul.mubr.msk.f32.vlgmr.msra.gmra.mrb[20].mxu0 %vm1821_vm2, %v3990_v47  ;;  %14180 = vmatmul.mubr.msk.f32.vlgmr.msra.gmra.mrb[28].mxu1 %vm1821_vm2, %v3991_v57 }
 0x84f   : > { %14184 = vmatprep.mubr.msk.f32.mxu0 %vm15764_vm1, %v15763_v44  ;;  %14189 = vmatprep.mubr.msk.f32.mxu1 %vm15764_vm1, %v15763_v44 }
 0x8df   : > { %v3471_v59 = vpop.f32.mrb[14].mxu0 }
 0x8e0   : > { %v3544_v53 = vpop.f32.mrb[22].mxu1  ;;  %v14146_v13 = vpop.f32.mrb[15].mxu0 }
 0x8e1   : > { %v14151_v35 = vpop.f32.mrb[23].mxu1 }
 0x8e3   : > { %v3617_v26 = vpop.f32.mrb[16].mxu0 }
 0x8e4   : > { %v3694_v60 = vcombine.low %v3471_v59, %v3617_v26  ;;  %v3695_v61 = vcombine.high %v3471_v59, %v3617_v26  ;;  %v14156_v62 = vpop.f32.mrb[17].mxu0 }
 0x8e5   : > { %v15081_v62 = vld [vmem:[#allocation14] ss:$0 sm:$0xff] }
 0x8e6   : > { %v3702_v5 = vrot.slane %v3694_v60, %v16575_v58  ;;  %v3709_v16 = vrot.slane %v3695_v61, %v16575_v58 }
 0x914   : > { %v3690_v63 = vpop.f32.mrb[24].mxu1 }
 0x915   : > { %v3710_v0 = vcombine.low %v3544_v53, %v3690_v63  ;;  %v3711_v2 = vcombine.high %v3544_v53, %v3690_v63  ;;  %v14161_v4 = vpop.f32.mrb[25].mxu1  ;;  %v17028_v63 = vadd.f32 %v15081_v62, %v16571_v45 }
 0x917   : > { %v3718_v6 = vrot.slane %v3710_v0, %v16575_v58  ;;  %v3725_v7 = vrot.slane %v3711_v2, %v16575_v58  ;;  %v17039_v0 = vmul.f32 0.35355338, %v16544_v31 }
 0x919   : > { %v3726_v8 = vcombine.low %v3702_v5, %v3718_v6  ;;  %v3727_v9 = vcombine.high %v3702_v5, %v3718_v6  ;;  %v3742_v38 = vcombine.low %v3709_v16, %v3725_v7  ;;  %v3743_v10 = vcombine.high %v3709_v16, %v3725_v7 }
 0x91b   : > { %v3734_v43 = vrot.slane %v3726_v8, %v16577_v1  ;;  %v3741_v49 = vrot.slane %v3727_v9, %v16577_v1  ;;  %v3750_v50 = vrot.slane %v3742_v38, %v16577_v1  ;;  %v3757_v29 = vrot.slane %v3743_v10, %v16577_v1 }
 0x91d   : > { %v3762_v54 = vcombine.low %v3734_v43, %v3741_v49  ;;  %v13603_v42 = vcombine.high %v3734_v43, %v3741_v49  ;;  %v3778_v19 = vcombine.low %v3750_v50, %v3757_v29  ;;  %v13604_v11 = vcombine.high %v3750_v50, %v3757_v29  ;;  %v4356_v12 = vpop.f32.mrb[18].mxu0  ;;  %v4432_v14 = vpop.f32.mrb[26].mxu1 }
 0x91e   : > { %v14166_v15 = vpop.f32.mrb[19].mxu0  ;;  %v14171_v17 = vpop.f32.mrb[27].mxu1  ;;  %v4588_v21 = vsel %vm1821_vm2, %v4356_v12, -inf  ;;  %v4591_v18 = vsel %vm1821_vm2, %v4432_v14, -inf }
 0x91f   : > { %4589 = vmax.xlane.f32.xlu0 %v4588_v21  ;;  %4592 = vmax.xlane.f32.xlu1 %v4591_v18  ;;  %v3769_v20 = vrot.slane %v3762_v54, %v16575_v58  ;;  %v3777_v23 = vrot.slane %v13603_v42, %v16575_v58  ;;  %v3785_v25 = vrot.slane %v3778_v19, %v16575_v58 }
 0x920   : > { %v3793_v27 = vrot.slane %v13604_v11, %v16575_v58 }
 0x921   : > { %v4508_v28 = vpop.f32.mrb[20].mxu0  ;;  %v4584_v48 = vpop.f32.mrb[28].mxu1  ;;  %v3794_v37 = vcombine.low %v3769_v20, %v3777_v23  ;;  %v3795_v46 = vcombine.high %v3769_v20, %v3777_v23 }
 0x922   : > { %v14176_v51 = vpop.f32.mrb[21].mxu0  ;;  %v14181_v52 = vpop.f32.mrb[29].mxu1  ;;  %v4594_v3 = vsel %vm1821_vm2, %v4508_v28, -inf  ;;  %v3810_v55 = vcombine.low %v3785_v25, %v3793_v27  ;;  %v3811_v56 = vcombine.high %v3785_v25, %v3793_v27  ;;  %v4597_v13 = vsel %vm1821_vm2, %v4584_v48, -inf }
 0x923   : > { %4595 = vmax.xlane.f32.xlu0 %v4594_v3  ;;  %v17003_v47 = vrot.slane %v3794_v37, %v16577_v1  ;;  %v17006_v57 = vrot.slane %v3795_v46, %v16577_v1 }
 0x924   : > { %v17009_v59 = vrot.slane %v3810_v55, %v16577_v1  ;;  %v17012_v53 = vrot.slane %v3811_v56, %v16577_v1 }
 0x926   : > { %v3827_v35 = vcombine.high %v17003_v47, %v17009_v59  ;;  %v3828_v26 = vcombine.low %v17006_v57, %v17012_v53  ;;  %v3829_v60 = vcombine.high %v17006_v57, %v17012_v53  ;;  %v3826_v61 = vcombine.low %v17003_v47, %v17009_v59 }
 0x927   : > { %4598 = vmax.xlane.f32.xlu0 %v4597_v13 }
 0x930   : > { %4139 = vrot.lane.b32.xlu1 %v16637_v24, %s15760_s1 }
 0x934   : > { %4145 = vrot.lane.b32.xlu1 %v16637_v24, %s15761_s15 }
 0x938   : > { %5223 = vrot.lane.b32.xlu1 %v17028_v63, %s15760_s1 }
 0x93c   : > { %5229 = vrot.lane.b32.xlu1 %v17028_v63, %s15761_s15 }
 0x93d   : > { %4142 = vrot.lane.b32.xlu0 %v16637_v24, %s15762_s21 }
 0x941   : > { %5226 = vrot.lane.b32.xlu0 %v17028_v63, %s15762_s21 }
 0x945   : > { %5077 = vrot.lane.b32.xlu0 %v17039_v0, %s15760_s1 }
 0x9ac   : > { %v4590_v45 = vpop.xlane.xlu0 %4589  ;;  %v4593_v2 = vpop.xlane.xlu1 %4592 }
 0x9ad   : > { %v4600_v4 = vsub.f32 %v4356_v12, %v4590_v45  ;;  %v4601_v5 = vsub.f32 %v4432_v14, %v4593_v2 }
 0x9af   : > { %v4604_v16 = vmul.f32 1.442695, %v4600_v4  ;;  %v4606_v8 = vmul.f32 1.442695, %v4601_v5 }
 0x9b0   : > { %v4596_v6 = vpop.xlane.xlu0 %4595  ;;  %v4140_v7 = vpop.permute.xlu1 %4139 }
 0x9b1   : > { %14977 = vpow2.f32 %v4604_v16  ;;  %v4602_v9 = vsub.f32 %v4508_v28, %v4596_v6 }
 0x9b2   : > { %14979 = vpow2.f32 %v4606_v8 }
 0x9b3   : > { %v4608_v38 = vmul.f32 1.442695, %v4602_v9 }
 0x9b4   : > { %v4146_v10 = vpop.permute.xlu1 %4145  ;;  %v4599_v43 = vpop.xlane.xlu0 %4598 }
 0x9b5   : > { %v4603_v49 = vsub.f32 %v4584_v48, %v4599_v43  ;;  %14981 = vpow2.f32 %v4608_v38  ;;  %v4164_v31 = vcombine.low %v4140_v7, %v4146_v10  ;;  %v4165_v50 = vcombine.high %v4140_v7, %v4146_v10 }
 0x9b7   : > { %v4610_v29 = vmul.f32 1.442695, %v4603_v49  ;;  %v4172_v12 = vrot.slane %v4164_v31, %v16575_v58  ;;  %v4179_v14 = vrot.slane %v4165_v50, %v16575_v58 }
 0x9b8   : > { %v4143_v54 = vpop.permute.xlu0 %4142 }
 0x9b9   : > { %14983 = vpow2.f32 %v4610_v29  ;;  %v4148_v42 = vcombine.low %v16637_v24, %v4143_v54  ;;  %v4149_v19 = vcombine.high %v16637_v24, %v4143_v54 }
 0x9bb   : > { %v17045_v11 = vpop.eup %14977  ;;  %v4156_v15 = vrot.slane %v4148_v42, %v16575_v58  ;;  %v4163_v17 = vrot.slane %v4149_v19, %v16575_v58  ;;  %v5224_v42 = vpop.permute.xlu1 %5223 }
 0x9bc   : > { %v4612_v21 = vsel %vm1821_vm2, %v17045_v11, 0.0  ;;  %v17053_v27 = vpop.eup %14979 }
 0x9bd   : > { %v4180_v18 = vcombine.low %v4156_v15, %v4172_v12  ;;  %v4181_v20 = vcombine.high %v4156_v15, %v4172_v12  ;;  %v4196_v23 = vcombine.low %v4163_v17, %v4179_v14  ;;  %v4197_v25 = vcombine.high %v4163_v17, %v4179_v14  ;;  %4613 = vadd.xlane.f32.xlu1 %v4612_v21  ;;  %v5227_v12 = vpop.permute.xlu0 %5226 }
 0x9be   : > { %v4615_v13 = vsel %vm1821_vm2, %v17053_v27, 0.0  ;;  %v5232_v15 = vcombine.low %v17028_v63, %v5227_v12  ;;  %v5233_v21 = vcombine.high %v17028_v63, %v5227_v12 }
 0x9bf   : > { %v4188_v24 = vrot.slane %v4180_v18, %v16577_v1  ;;  %v4195_v28 = vrot.slane %v4181_v20, %v16577_v1  ;;  %v4204_v48 = vrot.slane %v4196_v23, %v16577_v1  ;;  %v4211_v37 = vrot.slane %v4197_v25, %v16577_v1  ;;  %v17059_v46 = vpop.eup %14981  ;;  %4616 = vadd.xlane.f32.xlu0 %v4615_v13  ;;  %v5230_v19 = vpop.permute.xlu1 %5229 }
 0x9c0   : > { %v4618_v62 = vsel %vm1821_vm2, %v17059_v46, 0.0  ;;  %v5248_v14 = vcombine.low %v5224_v42, %v5230_v19  ;;  %v5249_v17 = vcombine.high %v5224_v42, %v5230_v19  ;;  %v5240_v20 = vrot.slane %v5232_v15, %v16575_v58 }
 0x9c1   : > { %v4216_v51 = vcombine.low %v4188_v24, %v4195_v28  ;;  %v13609_v52 = vcombine.high %v4188_v24, %v4195_v28  ;;  %v4232_v3 = vcombine.low %v4204_v48, %v4211_v37  ;;  %v13610_v55 = vcombine.high %v4204_v48, %v4211_v37  ;;  %4619 = vadd.xlane.f32.xlu1 %v4618_v62  ;;  %v5078_v13 = vpop.permute.xlu0 %5077 }
 0x9c2   : > { %v5256_v18 = vrot.slane %v5248_v14, %v16575_v58  ;;  %v5263_v23 = vrot.slane %v5249_v17, %v16575_v58  ;;  %v5247_v25 = vrot.slane %v5233_v21, %v16575_v58 }
 0x9c3   : > { %v17061_v56 = vpop.eup %14983  ;;  %v4223_v45 = vrot.slane %v4216_v51, %v16575_v58  ;;  %v4231_v2 = vrot.slane %v13609_v52, %v16575_v58  ;;  %v4239_v5 = vrot.slane %v4232_v3, %v16575_v58  ;;  %v4247_v16 = vrot.slane %v13610_v55, %v16575_v58 }
 0x9c4   : > { %v4621_v4 = vsel %vm1821_vm2, %v17061_v56, 0.0  ;;  %v5264_v24 = vcombine.low %v5240_v20, %v5256_v18  ;;  %v5265_v28 = vcombine.high %v5240_v20, %v5256_v18  ;;  %v5280_v48 = vcombine.low %v5247_v25, %v5263_v23 }
 0x9c5   : > { %v4248_v6 = vcombine.low %v4223_v45, %v4231_v2  ;;  %v4264_v8 = vcombine.low %v4239_v5, %v4247_v16  ;;  %v4249_v9 = vcombine.high %v4223_v45, %v4231_v2  ;;  %v4265_v38 = vcombine.high %v4239_v5, %v4247_v16  ;;  %4622 = vadd.xlane.f32.xlu0 %v4621_v4 }
 0x9c6   : > { %v5281_v37 = vcombine.high %v5247_v25, %v5263_v23  ;;  %v5272_v51 = vrot.slane %v5264_v24, %v16577_v1  ;;  %v5279_v52 = vrot.slane %v5265_v28, %v16577_v1  ;;  %v5288_v55 = vrot.slane %v5280_v48, %v16577_v1 }
 0x9c7   : > { %v4256_v7 = vrot.slane %v4248_v6, %v16577_v1  ;;  %v4272_v10 = vrot.slane %v4264_v8, %v16577_v1  ;;  %v17076_v43 = vrot.slane %v4249_v9, %v16577_v1  ;;  %v17079_v49 = vrot.slane %v4265_v38, %v16577_v1 }
 0x9c8   : > { %v5295_v63 = vrot.slane %v5281_v37, %v16577_v1  ;;  %v5300_v62 = vcombine.low %v5272_v51, %v5279_v52  ;;  %v13627_v45 = vcombine.high %v5272_v51, %v5279_v52 }
 0x9c9   : > { %v4280_v31 = vcombine.low %v4256_v7, %v4272_v10  ;;  %v4281_v50 = vcombine.high %v4256_v7, %v4272_v10  ;;  %v4282_v29 = vcombine.low %v17076_v43, %v17079_v49  ;;  %v4283_v54 = vcombine.high %v17076_v43, %v17079_v49 }
 0x9ca   : > { %v5316_v2 = vcombine.low %v5288_v55, %v5295_v63  ;;  %v13628_v4 = vcombine.high %v5288_v55, %v5295_v63  ;;  %v17102_v16 = vrot.slane %v5300_v62, %v16575_v58  ;;  %v17105_v7 = vrot.slane %v13627_v45, %v16575_v58 }
 0x9cb   : > { %14183 = vmatpush3.msra.mxu0 %v4280_v31  ;;  %14188 = vmatpush3.msra.mxu1 %v4281_v50 }
 0x9cc   : > { %14192 = vmatprep.subr.mxu0 %v15763_v44  ;;  %14197 = vmatprep.subr.mxu1 %v15763_v44  ;;  %v17108_v8 = vrot.slane %v5316_v2, %v16575_v58  ;;  %v17111_v9 = vrot.slane %v13628_v4, %v16575_v58  ;;  %v5332_v42 = vcombine.low %v17102_v16, %v17105_v7 }
 0x9ce   : > { %v5348_v19 = vcombine.low %v17108_v8, %v17111_v9  ;;  %v5349_v43 = vcombine.high %v17108_v8, %v17111_v9 }
 0x9d0   : > { %v5356_v18 = vrot.slane %v5348_v19, %v16577_v1 }
 0x9d2   : > { %5080 = vrot.lane.b32.xlu1 %v17039_v0, %s15762_s21 }
 0x9db   : > { %5083 = vrot.lane.b32.xlu0 %v17039_v0, %s15761_s15 }
 0xa4a   : > { %v4614_v3 = vpop.xlane.xlu1 %4613 }
 0xa4b   : > { %14985 = vrcp.f32 %v4614_v3 }
 0xa4c   : > { %v4617_v5 = vpop.xlane.xlu0 %4616 }
 0xa4d   : > { %14987 = vrcp.f32 %v4617_v5 }
 0xa4e   : > { %v4620_v6 = vpop.xlane.xlu1 %4619 }
 0xa4f   : > { %14989 = vrcp.f32 %v4620_v6 }
 0xa52   : > { %v4623_v10 = vpop.xlane.xlu0 %4622  ;;  %v5081_v31 = vpop.permute.xlu1 %5080 }
 0xa53   : > { %14991 = vrcp.f32 %v4623_v10  ;;  %v5086_v12 = vcombine.low %v17039_v0, %v5081_v31  ;;  %v5087_v14 = vcombine.high %v17039_v0, %v5081_v31 }
 0xa55   : > { %v14986_v38 = vpop.eup %14985  ;;  %v5094_v23 = vrot.slane %v5086_v12, %v16575_v58  ;;  %v5101_v0 = vrot.slane %v5087_v14, %v16575_v58 }
 0xa56   : > { %v4625_v50 = vmul.f32 %v14986_v38, %v17045_v11  ;;  %v5084_v15 = vpop.permute.xlu0 %5083  ;;  %v5340_v11 = vrot.slane %v5332_v42, %v16577_v1  ;;  %v5333_v38 = vcombine.high %v17102_v16, %v17105_v7  ;;  %v5363_v42 = vrot.slane %v5349_v43, %v16577_v1 }
 0xa57   : > { %v5102_v17 = vcombine.low %v5078_v13, %v5084_v15  ;;  %v5103_v21 = vcombine.high %v5078_v13, %v5084_v15  ;;  %v14988_v20 = vpop.eup %14987 }
 0xa58   : > { %14185 = vmatmul.mubr.msk.f32.vlgmr.msra.gmra.mrb[22].mxu0 %vm1821_vm2, %v4625_v50  ;;  %v4627_v28 = vmul.f32 %v14988_v20, %v17053_v27  ;;  %v5364_v55 = vcombine.low %v5340_v11, %v5356_v18  ;;  %v5365_v31 = vcombine.high %v5340_v11, %v5356_v18  ;;  %v5347_v50 = vrot.slane %v5333_v38, %v16577_v1 }
 0xa59   : > { %14193 = vmatpush3.msra.mxu0 %v4282_v29  ;;  %14194 = vmatprep.mubr.msk.f32.mxu0 %vm15764_vm1, %v15763_v44  ;;  %v5110_v25 = vrot.slane %v5102_v17, %v16575_v58  ;;  %v5117_v29 = vrot.slane %v5103_v21, %v16575_v58  ;;  %v14990_v24 = vpop.eup %14989 }
 0xa5a   : > { %14202 = vmatprep.subr.mxu0 %v15763_v44  ;;  %14190 = vmatmul.mubr.msk.f32.vlgmr.msra.gmra.mrb[30].mxu1 %vm1821_vm2, %v4627_v28  ;;  %v4629_v3 = vmul.f32 %v14990_v24, %v17059_v46  ;;  %v5366_v11 = vcombine.low %v5347_v50, %v5363_v42  ;;  %v5367_v18 = vcombine.high %v5347_v50, %v5363_v42 }
 0xa5b   : > { %v5118_v48 = vcombine.low %v5094_v23, %v5110_v25  ;;  %v5119_v37 = vcombine.high %v5094_v23, %v5110_v25  ;;  %v5134_v51 = vcombine.low %v5101_v0, %v5117_v29  ;;  %v5135_v52 = vcombine.high %v5101_v0, %v5117_v29  ;;  %14198 = vmatpush3.msra.mxu1 %v4283_v54 }
 0xa5c   : > { %14195 = vmatmul.mubr.msk.f32.vlgmr.msra.gmra.mrb[24].mxu0 %vm1821_vm2, %v4629_v3  ;;  %14199 = vmatprep.mubr.msk.f32.mxu1 %vm15764_vm1, %v15763_v44 }
 0xa5d   : > { %v14992_v63 = vpop.eup %14991  ;;  %v5126_v13 = vrot.slane %v5118_v48, %v16577_v1  ;;  %v5133_v62 = vrot.slane %v5119_v37, %v16577_v1  ;;  %v5142_v45 = vrot.slane %v5134_v51, %v16577_v1  ;;  %v5149_v2 = vrot.slane %v5135_v52, %v16577_v1  ;;  %14207 = vmatprep.subr.mxu1 %v15763_v44 }
 0xa5e   : > { %v4631_v27 = vmul.f32 %v14992_v63, %v17061_v56  ;;  %14204 = vmatprep.mubr.msk.f32.mxu0 %vm15764_vm1, %v15763_v44 }
 0xa5f   : > { %v5154_v46 = vcombine.low %v5126_v13, %v5133_v62  ;;  %v13625_v4 = vcombine.high %v5126_v13, %v5133_v62  ;;  %v5170_v5 = vcombine.low %v5142_v45, %v5149_v2  ;;  %v13626_v6 = vcombine.high %v5142_v45, %v5149_v2 }
 0xa60   : > { %14203 = vmatpush3.xpose.msk.msra.mxu0 %vm1821_vm2, %v5364_v55  ;;  %14200 = vmatmul.mubr.msk.f32.vlgmr.msra.gmra.mrb[32].mxu1 %vm1821_vm2, %v4631_v27 }
 0xa61   : > { %v5161_v49 = vrot.slane %v5154_v46, %v16575_v58  ;;  %v5169_v56 = vrot.slane %v13625_v4, %v16575_v58  ;;  %v5177_v54 = vrot.slane %v5170_v5, %v16575_v58  ;;  %v5185_v10 = vrot.slane %v13626_v6, %v16575_v58  ;;  %14209 = vmatprep.mubr.msk.f32.mxu1 %vm15764_vm1, %v15763_v44 }
 0xa62   : > { %14212 = vmatprep.subr.mxu0 %v15763_v44  ;;  %14208 = vmatpush3.xpose.msk.msra.mxu1 %vm1821_vm2, %v5365_v31 }
 0xa63   : > { %v5186_v16 = vcombine.low %v5161_v49, %v5169_v56  ;;  %v5187_v7 = vcombine.high %v5161_v49, %v5169_v56  ;;  %v5202_v8 = vcombine.low %v5177_v54, %v5185_v10  ;;  %v5203_v9 = vcombine.high %v5177_v54, %v5185_v10  ;;  %14217 = vmatprep.subr.mxu1 %v15763_v44 }
 0xa65   : > { %v5194_v19 = vrot.slane %v5186_v16, %v16577_v1  ;;  %v5210_v12 = vrot.slane %v5202_v8, %v16577_v1  ;;  %v5201_v17 = vrot.slane %v5187_v7, %v16577_v1  ;;  %v5217_v21 = vrot.slane %v5203_v9, %v16577_v1 }
 0xa67   : > { %v5218_v14 = vcombine.low %v5194_v19, %v5210_v12  ;;  %v5219_v15 = vcombine.high %v5194_v19, %v5210_v12  ;;  %v5220_v20 = vcombine.low %v5201_v17, %v5217_v21  ;;  %v5221_v23 = vcombine.high %v5201_v17, %v5217_v21 }
 0xa69   : > { %14205 = vmatmul.mubr.msk.f32.vlgmr.msra.gmra.mrb[26].mxu0 %vm1821_vm2, %v5218_v14  ;;  %14210 = vmatmul.mubr.msk.f32.vlgmr.msra.gmra.mrb[34].mxu1 %vm1821_vm2, %v5219_v15 }
 0xa6a   : > { %14213 = vmatpush3.xpose.msk.msra.mxu0 %vm1821_vm2, %v5366_v11  ;;  %14218 = vmatpush3.xpose.msk.msra.mxu1 %vm1821_vm2, %v5367_v18 }
 0xa6b   : > { %14214 = vmatprep.mubr.msk.f32.mxu0 %vm15764_vm1, %v15763_v44  ;;  %14219 = vmatprep.mubr.msk.f32.mxu1 %vm15764_vm1, %v15763_v44 }
 0xa6c   : > { %14222 = vmatprep.subr.mxu0 %v15763_v44  ;;  %14227 = vmatprep.subr.mxu1 %v15763_v44 }
 0xa6d   : > { %14215 = vmatmul.mubr.msk.f32.vlgmr.msra.gmra.mrb[28].mxu0 %vm1821_vm2, %v5220_v20  ;;  %14220 = vmatmul.mubr.msk.f32.vlgmr.msra.gmra.mrb[36].mxu1 %vm1821_vm2, %v5221_v23 }
 0xa6e   : > { %14224 = vmatprep.mubr.msk.f32.mxu0 %vm15764_vm1, %v15763_v44  ;;  %14229 = vmatprep.mubr.msk.f32.mxu1 %vm15764_vm1, %v15763_v44 }
 0xb2b   : > { %v4701_v0 = vpop.f32.mrb[22].mxu0 }
 0xb2c   : > { %v14186_v25 = vpop.f32.mrb[23].mxu0 }
 0xb2d   : > { %v4774_v29 = vpop.f32.mrb[30].mxu1 }
 0xb2e   : > { %v14191_v24 = vpop.f32.mrb[31].mxu1 }
 0xb2f   : > { %v4847_v28 = vpop.f32.mrb[24].mxu0 }
 0xb30   : > { %v4924_v48 = vcombine.low %v4701_v0, %v4847_v28  ;;  %v4925_v37 = vcombine.high %v4701_v0, %v4847_v28  ;;  %v14196_v51 = vpop.f32.mrb[25].mxu0 }
 0xb32   : > { %v4932_v13 = vrot.slane %v4924_v48, %v16575_v58  ;;  %v4939_v62 = vrot.slane %v4925_v37, %v16575_v58 }
 0xb33   : > { %v4920_v52 = vpop.f32.mrb[32].mxu1 }
 0xb34   : > { %v4940_v3 = vcombine.low %v4774_v29, %v4920_v52  ;;  %v4941_v55 = vcombine.high %v4774_v29, %v4920_v52  ;;  %v14201_v63 = vpop.f32.mrb[33].mxu1 }
 0xb36   : > { %v4948_v45 = vrot.slane %v4940_v3, %v16575_v58  ;;  %v4955_v2 = vrot.slane %v4941_v55, %v16575_v58 }
 0xb38   : > { %v4956_v27 = vcombine.low %v4932_v13, %v4948_v45  ;;  %v4957_v46 = vcombine.high %v4932_v13, %v4948_v45  ;;  %v4972_v4 = vcombine.low %v4939_v62, %v4955_v2  ;;  %v4973_v5 = vcombine.high %v4939_v62, %v4955_v2 }
 0xb3a   : > { %v4964_v6 = vrot.slane %v4956_v27, %v16577_v1  ;;  %v4971_v38 = vrot.slane %v4957_v46, %v16577_v1  ;;  %v4980_v43 = vrot.slane %v4972_v4, %v16577_v1  ;;  %v4987_v49 = vrot.slane %v4973_v5, %v16577_v1 }
 0xb3c   : > { %v4992_v56 = vcombine.low %v4964_v6, %v4971_v38  ;;  %v13623_v54 = vcombine.high %v4964_v6, %v4971_v38  ;;  %v5008_v10 = vcombine.low %v4980_v43, %v4987_v49  ;;  %v13624_v31 = vcombine.high %v4980_v43, %v4987_v49  ;;  %v5586_v16 = vpop.f32.mrb[26].mxu0  ;;  %v5662_v7 = vpop.f32.mrb[34].mxu1 }
 0xb3d   : > { %v14206_v8 = vpop.f32.mrb[27].mxu0  ;;  %v14211_v9 = vpop.f32.mrb[35].mxu1  ;;  %v5818_v50 = vsel %vm1821_vm2, %v5586_v16, -inf  ;;  %v5821_v42 = vsel %vm1821_vm2, %v5662_v7, -inf }
 0xb3e   : > { %5819 = vmax.xlane.f32.xlu1 %v5818_v50  ;;  %5822 = vmax.xlane.f32.xlu0 %v5821_v42  ;;  %v4999_v19 = vrot.slane %v4992_v56, %v16575_v58  ;;  %v5007_v12 = vrot.slane %v13623_v54, %v16575_v58  ;;  %v5015_v14 = vrot.slane %v5008_v10, %v16575_v58 }
 0xb3f   : > { %v5023_v15 = vrot.slane %v13624_v31, %v16575_v58 }
 0xb40   : > { %v5738_v17 = vpop.f32.mrb[28].mxu0  ;;  %v5814_v21 = vpop.f32.mrb[36].mxu1  ;;  %v5024_v11 = vcombine.low %v4999_v19, %v5007_v12  ;;  %v5025_v18 = vcombine.high %v4999_v19, %v5007_v12 }
 0xb41   : > { %v14216_v20 = vpop.f32.mrb[29].mxu0  ;;  %v14221_v23 = vpop.f32.mrb[37].mxu1  ;;  %v5824_v0 = vsel %vm1821_vm2, %v5738_v17, -inf  ;;  %v5827_v25 = vsel %vm1821_vm2, %v5814_v21, -inf  ;;  %v5040_v29 = vcombine.low %v5015_v14, %v5023_v15  ;;  %v5041_v24 = vcombine.high %v5015_v14, %v5023_v15 }
 0xb42   : > { %5825 = vmax.xlane.f32.xlu0 %v5824_v0  ;;  %5828 = vmax.xlane.f32.xlu1 %v5827_v25  ;;  %v17201_v28 = vrot.slane %v5024_v11, %v16577_v1  ;;  %v5039_v48 = vrot.slane %v5025_v18, %v16577_v1 }
 0xb43   : > { %v17205_v37 = vrot.slane %v5040_v29, %v16577_v1  ;;  %v5055_v51 = vrot.slane %v5041_v24, %v16577_v1 }
 0xb45   : > { %v5057_v52 = vcombine.high %v17201_v28, %v17205_v37  ;;  %v5058_v3 = vcombine.low %v5039_v48, %v5055_v51  ;;  %v5059_v55 = vcombine.high %v5039_v48, %v5055_v51  ;;  %v5056_v63 = vcombine.low %v17201_v28, %v17205_v37 }
 0xbcb   : > { %v5820_v13 = vpop.xlane.xlu1 %5819  ;;  %v5823_v62 = vpop.xlane.xlu0 %5822 }
 0xbcc   : > { %v5830_v45 = vsub.f32 %v5586_v16, %v5820_v13  ;;  %v5831_v2 = vsub.f32 %v5662_v7, %v5823_v62 }
 0xbce   : > { %v5834_v27 = vmul.f32 1.442695, %v5830_v45  ;;  %v5836_v46 = vmul.f32 1.442695, %v5831_v2 }
 0xbcf   : > { %v5826_v4 = vpop.xlane.xlu0 %5825  ;;  %v5829_v31 = vpop.xlane.xlu1 %5828 }
 0xbd0   : > { %14993 = vpow2.f32 %v5834_v27  ;;  %v5832_v5 = vsub.f32 %v5738_v17, %v5826_v4  ;;  %v5833_v16 = vsub.f32 %v5814_v21, %v5829_v31 }
 0xbd1   : > { %14995 = vpow2.f32 %v5836_v46 }
 0xbd2   : > { %v5838_v6 = vmul.f32 1.442695, %v5832_v5  ;;  %v5840_v7 = vmul.f32 1.442695, %v5833_v16 }
 0xbd4   : > { %14997 = vpow2.f32 %v5838_v6  ;;  %v1079_v6 = vld [vmem:[%s18920_s12] sm:$0xff] }
 0xbd5   : > { %14999 = vpow2.f32 %v5840_v7 }
 0xbda   : > { %v17212_v38 = vpop.eup %14993 }
 0xbdb   : > { %v17214_v43 = vpop.eup %14995  ;;  %v5842_v49 = vsel %vm1821_vm2, %v17212_v38, 0.0 }
 0xbdc   : > { %5843 = vadd.xlane.f32.xlu0 %v5842_v49  ;;  %v5845_v56 = vsel %vm1821_vm2, %v17214_v43, 0.0  ;;  %v1080_v49 = vld [vmem:[%s18920_s12 + $0x8] sm:$0xff] }
 0xbdd   : > { %5846 = vadd.xlane.f32.xlu1 %v5845_v56 }
 0xbde   : > { %v17220_v54 = vpop.eup %14997 }
 0xbdf   : > { %v5848_v10 = vsel %vm1821_vm2, %v17220_v54, 0.0  ;;  %v17243_v8 = vpop.eup %14999 }
 0xbe0   : > { %5849 = vadd.xlane.f32.xlu0 %v5848_v10 }
 0xbee   : > { %5372 = vrot.lane.b32.xlu1 %v16635_v22, %s15762_s21 }
 0xbf2   : > { %5375 = vrot.lane.b32.xlu1 %v16635_v22, %s15761_s15 }
 0xbf6   : > { %5369 = vrot.lane.b32.xlu0 %v16635_v22, %s15760_s1 }
 0xbfa   : > { %2599 = vrot.lane.b32.xlu0 %v2595_v36, %s15767_s28  ;;  %v5851_v36 = vsel %vm1821_vm2, %v17243_v8, 0.0 }
 0xbfe   : > { %3831 = vrot.lane.b32.xlu0 %v3827_v35, %s15767_s28 }
 0xc02   : > { %3835 = vrot.lane.b32.xlu0 %v3828_v26, %s15768_s10 }
 0xc06   : > { %5061 = vrot.lane.b32.xlu0 %v5057_v52, %s15767_s28 }
 0xc16   : > { %5852 = vadd.xlane.f32.xlu1 %v5851_v36  ;;  %v14572_v36 = vpack.c.bf16 %v1080_v49, %v1079_v6 }
 0xc27   : > { %2603 = vrot.lane.b32.xlu1 %v2596_v39, %s15768_s10 }
 0xc2b   : > { %2607 = vrot.lane.b32.xlu1 %v2597_v40, %s18834_s24 }
 0xc2f   : > { %3839 = vrot.lane.b32.xlu1 %v3829_v60, %s18834_s24 }
 0xc33   : > { %5065 = vrot.lane.b32.xlu1 %v5058_v3, %s15768_s10 }
 0xc37   : > { %5069 = vrot.lane.b32.xlu1 %v5059_v55, %s18834_s24 }
 0xc69   : > { %v5844_v35 = vpop.xlane.xlu0 %5843 }
 0xc6a   : > { %v5847_v26 = vpop.xlane.xlu1 %5846  ;;  %15001 = vrcp.f32 %v5844_v35  ;;  %v1081_v35 = vld [vmem:[%s18920_s12 + $0x10] sm:$0xff] }
 0xc6b   : > { %15003 = vrcp.f32 %v5847_v26  ;;  %v1082_v26 = vld [vmem:[%s18920_s12 + $0x18] sm:$0xff] }
 0xc6d   : > { %v5850_v9 = vpop.xlane.xlu0 %5849 }
 0xc6e   : > { %v5373_v50 = vpop.permute.xlu1 %5372  ;;  %15005 = vrcp.f32 %v5850_v9 }
 0xc6f   : > { %v5378_v39 = vcombine.low %v16635_v22, %v5373_v50  ;;  %v5379_v42 = vcombine.high %v16635_v22, %v5373_v50 }
 0xc71   : > { %v5370_v19 = vpop.permute.xlu0 %5369  ;;  %v5386_v57 = vrot.slane %v5378_v39, %v16575_v58  ;;  %v5393_v53 = vrot.slane %v5379_v42, %v16575_v58 }
 0xc72   : > { %v5376_v32 = vpop.permute.xlu1 %5375 }
 0xc73   : > { %v5394_v34 = vcombine.low %v5370_v19, %v5376_v32  ;;  %v5395_v40 = vcombine.high %v5370_v19, %v5376_v32 }
 0xc74   : > { %v15002_v3 = vpop.eup %15001 }
 0xc75   : > { %v5402_v60 = vrot.slane %v5394_v34, %v16575_v58  ;;  %v5409_v12 = vrot.slane %v5395_v40, %v16575_v58  ;;  %v15004_v2 = vpop.eup %15003  ;;  %v5855_v16 = vmul.f32 %v15002_v3, %v17212_v38  ;;  %v2600_v39 = vpop.permute.xlu0 %2599 }
 0xc76   : > { %v5857_v7 = vmul.f32 %v15004_v2, %v17214_v43  ;;  %v14576_v43 = vpack.c.bf16 %v1082_v26, %v1081_v35  ;;  %v6528_v35 = vld [vmem:[#allocation26] sm:$0xff]  ;;  %v6529_v26 = vld [vmem:[#allocation26 + $0x8] sm:$0xff] }
 0xc77   : > { %v5410_v14 = vcombine.low %v5386_v57, %v5402_v60  ;;  %v5411_v15 = vcombine.high %v5386_v57, %v5402_v60  ;;  %v5426_v17 = vcombine.low %v5393_v53, %v5409_v12  ;;  %v5427_v21 = vcombine.high %v5393_v53, %v5409_v12 }
 0xc78   : > { %v15006_v31 = vpop.eup %15005 }
 0xc79   : > { %v5418_v22 = vrot.slane %v5410_v14, %v16577_v1  ;;  %v5425_v11 = vrot.slane %v5411_v15, %v16577_v1  ;;  %v5434_v18 = vrot.slane %v5426_v17, %v16577_v1  ;;  %v5441_v20 = vrot.slane %v5427_v21, %v16577_v1  ;;  %v3832_v19 = vpop.permute.xlu0 %3831 }
 0xc7a   : > { %v5859_v38 = vmul.f32 %v15006_v31, %v17220_v54  ;;  %v2610_v54 = vsel %vm1821_vm2, %v2594_v41, %v2600_v39  ;;  %v3842_v12 = vsel %vm1821_vm2, %v3826_v61, %v3832_v19  ;;  %v14588_v19 = vpack.c.bf16 %v6529_v26, %v6528_v35 }
 0xc7b   : > { %v5446_v23 = vcombine.low %v5418_v22, %v5425_v11  ;;  %v13629_v0 = vcombine.high %v5418_v22, %v5425_v11  ;;  %v5462_v25 = vcombine.low %v5434_v18, %v5441_v20  ;;  %v13630_v29 = vcombine.high %v5434_v18, %v5441_v20 }
 0xc7d   : > { %v5453_v24 = vrot.slane %v5446_v23, %v16575_v58  ;;  %v5461_v48 = vrot.slane %v13629_v0, %v16575_v58  ;;  %v5469_v51 = vrot.slane %v5462_v25, %v16575_v58  ;;  %v5477_v52 = vrot.slane %v13630_v29, %v16575_v58  ;;  %v3836_v57 = vpop.permute.xlu0 %3835 }
 0xc7e   : > { %v3843_v14 = vsel %vm2611_vm4, %v3842_v12, %v3836_v57 }
 0xc7f   : > { %v5478_v55 = vcombine.low %v5453_v24, %v5461_v48  ;;  %v5494_v13 = vcombine.low %v5469_v51, %v5477_v52  ;;  %v5479_v62 = vcombine.high %v5453_v24, %v5461_v48  ;;  %v5495_v45 = vcombine.high %v5469_v51, %v5477_v52 }
 0xc81   : > { %v5486_v27 = vrot.slane %v5478_v55, %v16577_v1  ;;  %v5502_v46 = vrot.slane %v5494_v13, %v16577_v1  ;;  %v5493_v4 = vrot.slane %v5479_v62, %v16577_v1  ;;  %v5509_v5 = vrot.slane %v5495_v45, %v16577_v1  ;;  %v5062_v15 = vpop.permute.xlu0 %5061 }
 0xc82   : > { %v5072_v47 = vsel %vm1821_vm2, %v5056_v63, %v5062_v15  ;;  %v15082_v15 = vld [vmem:[%s16468_s3] sm:$0xff] }
 0xc83   : > { %v5510_v56 = vcombine.low %v5486_v27, %v5502_v46  ;;  %v5511_v10 = vcombine.high %v5486_v27, %v5502_v46  ;;  %v5512_v9 = vcombine.low %v5493_v4, %v5509_v5  ;;  %v5513_v50 = vcombine.high %v5493_v4, %v5509_v5 }
 0xc85   : > { %14223 = vmatpush3.msra.mxu0 %v5510_v56  ;;  %14228 = vmatpush3.msra.mxu1 %v5511_v10 }
 0xc86   : > { %14225 = vmatmul.mubr.msk.f32.vlgmr.msra.gmra.mrb[30].mxu0 %vm1821_vm2, %v5855_v16  ;;  %14230 = vmatmul.mubr.msk.f32.vlgmr.msra.gmra.mrb[38].mxu1 %vm1821_vm2, %v5857_v7 }
 0xc87   : > { %14232 = vmatprep.subr.mxu0 %v15763_v44  ;;  %14237 = vmatprep.subr.mxu1 %v15763_v44 }
 0xc88   : > { %14233 = vmatpush3.msra.mxu0 %v5512_v9  ;;  %14238 = vmatpush3.msra.mxu1 %v5513_v50  ;;  %v6530_v9 = vld [vmem:[#allocation26 + $0x10] sm:$0xff] }
 0xc89   : > { %14234 = vmatprep.mubr.msk.f32.mxu0 %vm15764_vm1, %v15763_v44  ;;  %14573 = vmatprep.subr.bf16.mxu0 %v14572_v36 }
 0xc8a   : > { %14235 = vmatmul.mubr.msk.f32.vlgmr.msra.gmra.mrb[32].mxu0 %vm1821_vm2, %v5859_v38  ;;  %14239 = vmatprep.mubr.msk.f32.mxu1 %vm15764_vm1, %v15763_v44 }
 0xc8b   : > { %14575 = vmatpush3.bf16.msra.mxu0 %v14572_v36 }
 0xc8c   : > { %14577 = vmatprep.subr.bf16.mxu0 %v14576_v43 }
 0xc8f   : > { %14579 = vmatpush3.bf16.msra.mxu0 %v14576_v43 }
 0xc90   : > { %14589 = vmatprep.subr.bf16.mxu0 %v14588_v19 }
 0xca3   : > { %v5853_v42 = vpop.xlane.xlu1 %5852 }
 0xca4   : > { %15007 = vrcp.f32 %v5853_v42  ;;  %v6531_v42 = vld [vmem:[#allocation26 + $0x18] sm:$0xff] }
 0xca7   : > { %v2604_v32 = vpop.permute.xlu1 %2603 }
 0xca8   : > { %v2612_v34 = vsel %vm2611_vm4, %v2610_v54, %v2604_v32  ;;  %v14592_v32 = vpack.c.bf16 %v6531_v42, %v6530_v9 }
 0xcab   : > { %v2608_v40 = vpop.permute.xlu1 %2607 }
 0xcac   : > { %v2614_v53 = vsel %vm2613_vm3, %v2612_v34, %v2608_v40 }
 0xcad   : > { %14250 = vmatprep.mubr.msk.f32.mxu0 %vm1090_vm0, %v2614_v53 }
 0xcae   : > { %v15008_v60 = vpop.eup %15007 }
 0xcaf   : > { %v3840_v30 = vpop.permute.xlu1 %3839  ;;  %v5861_v33 = vmul.f32 %v15008_v60, %v17243_v8 }
 0xcb0   : > { %v3844_v41 = vsel %vm2613_vm3, %v3843_v14, %v3840_v30  ;;  %v13645_v30 = vld [vmem:[#allocation19] ss:$0 sm:$0xff] }
 0xcb1   : > { %14240 = vmatmul.mubr.msk.f32.vlgmr.msra.gmra.mrb[40].mxu1 %vm1821_vm2, %v5861_v33  ;;  %14251 = vmatmul.mubr.msk.f32.vlgmr.msra.gmra.mrb[34].mxu0 %vm1090_vm0, %v3844_v41 }
 0xcb2   : > { %14591 = vmatpush3.bf16.msra.mxu0 %v14588_v19 }
 0xcb3   : > { %v5066_v17 = vpop.permute.xlu1 %5065  ;;  %14593 = vmatprep.subr.bf16.mxu0 %v14592_v32 }
 0xcb4   : > { %v5073_v59 = vsel %vm2611_vm4, %v5072_v47, %v5066_v17  ;;  %v15083_v47 = vld [vmem:[%s16468_s3 + $0x8] sm:$0xff] }
 0xcb6   : > { %14595 = vmatpush3.bf16.msra.mxu0 %v14592_v32 }
 0xcb7   : > { %v5070_v61 = vpop.permute.xlu1 %5069 }
 0xcb8   : > { %v5074_v21 = vsel %vm2613_vm3, %v5073_v59, %v5070_v61 }
 0xcb9   : > { %14253 = vmatprep.mubr.msk.f32.mxu0 %vm1090_vm0, %v5074_v21 }
 0xd59   : > { %v5931_v8 = vpop.f32.mrb[30].mxu0  ;;  %v6004_v22 = vpop.f32.mrb[38].mxu1 }
 0xd5a   : > { %v14226_v11 = vpop.f32.mrb[31].mxu0  ;;  %v14231_v18 = vpop.f32.mrb[39].mxu1 }
 0xd5b   : > { %v6507_v11 = vld [vmem:[%s16485_s16] sm:$0xff] }
 0xd5d   : > { %v6077_v20 = vpop.f32.mrb[32].mxu0 }
 0xd5e   : > { %v6154_v23 = vcombine.low %v5931_v8, %v6077_v20  ;;  %v6155_v0 = vcombine.high %v5931_v8, %v6077_v20  ;;  %v14236_v25 = vpop.f32.mrb[33].mxu0 }
 0xd5f   : > { %v6508_v25 = vld [vmem:[%s16485_s16 + $0x8] sm:$0xff] }
 0xd60   : > { %v6162_v51 = vrot.slane %v6154_v23, %v16575_v58  ;;  %v6169_v52 = vrot.slane %v6155_v0, %v16575_v58  ;;  %v17356_v0 = vld [vmem:[%s16483_s8 + $0x8] sm:$0xff] }
 0xd84   : > { %v6150_v29 = vpop.f32.mrb[40].mxu1  ;;  %v14252_v24 = vpop.f32.mrb[34].mxu0 }
 0xd85   : > { %v6170_v28 = vcombine.low %v6004_v22, %v6150_v29  ;;  %v6171_v37 = vcombine.high %v6004_v22, %v6150_v29  ;;  %v14241_v63 = vpop.f32.mrb[41].mxu1  ;;  %v6389_v48 = vpop.f32.mrb[35].mxu0  ;;  %v6395_v41 = vadd.f32 %v14252_v24, %v13645_v30  ;;  %v17350_v22 = vld [vmem:[%s16483_s8] sm:$0xff] }
 0xd86   : > { %v6390_v33 = vadd.f32 %v13645_v30, %v6389_v48  ;;  %v6515_v23 = vadd.f32 %v6507_v11, %v17350_v22 }
 0xd87   : > { %v6178_v3 = vrot.slane %v6170_v28, %v16575_v58  ;;  %v6185_v55 = vrot.slane %v6171_v37, %v16575_v58  ;;  %v6409_v59 = vadd.f32 %v15083_v47, %v6395_v41  ;;  %v6516_v37 = vadd.f32 %v6508_v25, %v17356_v0  ;;  %v6500_v47 = vld [vmem:[%s16476_s19 + $0x8] sm:$0xff] }
 0xd88   : > { %v6408_v17 = vadd.f32 %v15082_v15, %v6390_v33 }
 0xd89   : > { %v6186_v13 = vcombine.low %v6162_v51, %v6178_v3  ;;  %v6187_v62 = vcombine.high %v6162_v51, %v6178_v3  ;;  %v6202_v45 = vcombine.low %v6169_v52, %v6185_v55  ;;  %v6203_v2 = vcombine.high %v6169_v52, %v6185_v55 }
 0xd8a   : > { %v6414_v61 = vsel %vm1090_vm0, %v6408_v17, 0.0  ;;  %v6417_v21 = vsel %vm1090_vm0, %v6409_v59, 0.0 }
 0xd8b   : > { %v6194_v27 = vrot.slane %v6186_v13, %v16577_v1  ;;  %v6201_v46 = vrot.slane %v6187_v62, %v16577_v1  ;;  %v6210_v4 = vrot.slane %v6202_v45, %v16577_v1  ;;  %v6217_v5 = vrot.slane %v6203_v2, %v16577_v1 }
 0xd8d   : > { %v6222_v6 = vcombine.low %v6194_v27, %v6201_v46  ;;  %v13643_v49 = vcombine.high %v6194_v27, %v6201_v46  ;;  %v6238_v56 = vcombine.low %v6210_v4, %v6217_v5  ;;  %v13644_v10 = vcombine.high %v6210_v4, %v6217_v5  ;;  %v6523_v27 = vld [vmem:[#allocation23] sm:$0xff]  ;;  %v6524_v46 = vld [vmem:[#allocation23 + $0x8] sm:$0xff]  ;;  %v6525_v4 = vld [vmem:[#allocation23 + $0x10] sm:$0xff] }
 0xd8e   : > { %v14580_v5 = vpack.c.bf16 %v6524_v46, %v6523_v27 }
 0xd8f   : > { %v6229_v31 = vrot.slane %v6222_v6, %v16575_v58  ;;  %v6237_v16 = vrot.slane %v13643_v49, %v16575_v58  ;;  %v6245_v7 = vrot.slane %v6238_v56, %v16575_v58  ;;  %v6253_v36 = vrot.slane %v13644_v10, %v16575_v58  ;;  %v6526_v6 = vld [vmem:[#allocation23 + $0x18] sm:$0xff] }
 0xd90   : > { %v14584_v49 = vpack.c.bf16 %v6526_v6, %v6525_v4  ;;  %14581 = vmatprep.subr.bf16.mxu1 %v14580_v5  ;;  %v6509_v6 = vld [vmem:[%s16485_s16 + $0x10] sm:$0xff] }
 0xd91   : > { %v6255_v50 = vcombine.high %v6229_v31, %v6237_v16  ;;  %v6271_v38 = vcombine.high %v6245_v7, %v6253_v36  ;;  %v6254_v43 = vcombine.low %v6229_v31, %v6237_v16  ;;  %v6270_v39 = vcombine.low %v6245_v7, %v6253_v36  ;;  %14583 = vmatpush3.bf16.msra.mxu1 %v14580_v5  ;;  %v17440_v5 = vld [vmem:[%s16483_s8 + $0x10] sm:$0xff] }
 0xd92   : > { %14585 = vmatprep.subr.bf16.mxu1 %v14584_v49 }
 0xd93   : > { %v6269_v54 = vrot.slane %v6255_v50, %v16577_v1  ;;  %v6285_v34 = vrot.slane %v6271_v38, %v16577_v1  ;;  %v6262_v40 = vrot.slane %v6254_v43, %v16577_v1  ;;  %v6278_v57 = vrot.slane %v6270_v39, %v16577_v1  ;;  %v15084_v38 = vld [vmem:[%s16468_s3 + $0x18] sm:$0xff]  ;;  %v15085_v39 = vld [vmem:[%s16468_s3 + $0x10] sm:$0xff]  ;;  %s17379_s3 = scalar_lea.vmem [#allocation31], %s16464_s7  ;;  %s13806_s7 = sshll.u32 %s15915_s26, 9 }
 0xd94   : > { %s18674_s23 = scalar_lea.hbm %s18927_s22, %s13806_s7  ;;  %s13178_s5 = sshll.u32 %s17379_s3, 4  ;;  %s18677_s5 = int_to_ptr.vmem [resolvable:$true] %s13178_s5 }
 0xd95   : > { %v6289_v53 = vcombine.high %v6269_v54, %v6285_v34  ;;  %v6287_v60 = vcombine.high %v6262_v40, %v6278_v57  ;;  %v6288_v12 = vcombine.low %v6269_v54, %v6285_v34  ;;  %v6286_v14 = vcombine.low %v6262_v40, %v6278_v57  ;;  %14587 = vmatpush3.bf16.msra.mxu1 %v14584_v49  ;;  %v17371_v57 = vld [vmem:[#allocation20] ss:$0 sm:$0xff]  ;;  %s15600_s13 = scalar_lea.vmem %s18677_s5, 512 }
 0xd96   : > { %v6517_v49 = vadd.f32 %v6509_v6, %v17440_v5  ;;  %p15601_p4 = scmp.ne.s32.totalorder %s18677_s5, %s15600_s13 }
 0xd97   : > { %6299 = vrot.lane.b32.xlu1 %v6289_v53, %s18834_s24  ;;  %6291 = vrot.lane.b32.xlu0 %v6287_v60, %s15767_s28  ;;  %v17373_v60 = vld [vmem:[#allocation22] ss:$0 sm:$0xff]  ;;  %s18926_s24 = sld [smem:[#allocation73_spill]] }
 0xd98   : > { %p15602_p1 = pnand %p15601_p4, %p18928_p6 }
 0xd9a   : > { %p15603_p2 = pneg %p15602_p1 }
 0xd9b   : > { %6295 = vrot.lane.b32.xlu0 %v6288_v12, %s15768_s10 }
 0xdba   : > { %6415 = vadd.xlane.f32.xlu0 %v6414_v61  ;;  %v17387_v61 = vld [vmem:[#allocation28] ss:$0 sm:$0xff] }
 0xdbb   : > { %6418 = vadd.xlane.f32.xlu1 %v6417_v21 }
 0xe09   : > { %v6292_v8 = vpop.permute.xlu0 %6291  ;;  %v6300_v29 = vpop.permute.xlu1 %6299 }
 0xe0a   : > { %v6302_v18 = vsel %vm1821_vm2, %v6286_v14, %v6292_v8 }
 0xe0d   : > { %v6296_v20 = vpop.permute.xlu0 %6295 }
 0xe0e   : > { %v6303_v24 = vsel %vm2611_vm4, %v6302_v18, %v6296_v20 }
 0xe0f   : > { %v6304_v28 = vsel %vm2613_vm3, %v6303_v24, %v6300_v29 }
 0xe10   : > { %14254 = vmatmul.mubr.msk.f32.gmra.mrb[36].mxu0 %vm1090_vm0, %v6304_v28 }
 0xe11   : > { %14278 = vmatprep.mubr.msk.f32.mxu0 %vm1090_vm0, %v6515_v23 }
 0xe14   : > { %14279 = vmatmul.mubr.msk.f32.vlgmr.msra.gmra.mrb[38].mxu0 %vm1090_vm0, %v6516_v37 }
 0xe15   : > { %14281 = vmatprep.mubr.msk.f32.mxu0 %vm1090_vm0, %v6517_v49 }
 0xe47   : > { %v6416_v63 = vpop.xlane.xlu0 %6415 }
 0xe48   : > { %v6427_v48 = vmul.f32 0.03125, %v6416_v63  ;;  %v6419_v51 = vpop.xlane.xlu1 %6418 }
 0xe49   : > { %v6428_v52 = vmul.f32 0.03125, %v6419_v51  ;;  %v6533_v51 = vld [vmem:[%s18921_s0] sm:$0xff] }
 0xe4a   : > { %v6431_v3 = vsub.f32 %v6408_v17, %v6427_v48 }
 0xe4b   : > { %v6432_v55 = vsub.f32 %v6409_v59, %v6428_v52  ;;  %v6534_v52 = vld [vmem:[%s18921_s0 + $0x8] sm:$0xff] }
 0xe4c   : > { %v6435_v13 = vmul.f32 %v6431_v3, %v6431_v3 }
 0xe4d   : > { %v6436_v45 = vmul.f32 %v6432_v55, %v6432_v55 }
 0xe4e   : > { %v6439_v62 = vsel %vm1090_vm0, %v6435_v13, 0.0  ;;  %v6536_v13 = vld [vmem:[%s18921_s0 + $0x18] sm:$0xff] }
 0xe4f   : > { %6440 = vadd.xlane.f32.xlu0 %v6439_v62  ;;  %v6442_v2 = vsel %vm1090_vm0, %v6436_v45, 0.0  ;;  %v15770_v45 = vmov 0.0|0.0  }
 0xe50   : > { %14604 = vmatprep.subr.bf16.mxu0 %v15770_v45 }
 0xe53   : > { %6443 = vadd.xlane.f32.xlu0 %v6442_v2  ;;  %v17434_v2 = vld [vmem:[#allocation25] ss:$0 sm:$0xff] }
 0xedc   : > { %v6441_v56 = vpop.xlane.xlu0 %6440 }
 0xedd   : > { %v6451_v10 = vmul.f32 0.03125, %v6441_v56  ;;  %v17445_v56 = vld [vmem:[%s16483_s8 + $0x18] sm:$0xff] }
 0xedf   : > { %v6455_v31 = vadd.f32 1e-05, %v6451_v10  ;;  %v6510_v10 = vld [vmem:[%s16485_s16 + $0x18] sm:$0xff] }
 0xee0   : > { %v6444_v16 = vpop.xlane.xlu0 %6443 }
 0xee1   : > { %15009 = vrsqrt.f32 %v6455_v31  ;;  %v6452_v7 = vmul.f32 0.03125, %v6444_v16  ;;  %v6518_v16 = vadd.f32 %v6510_v10, %v17445_v56 }
 0xee3   : > { %v6456_v36 = vadd.f32 1e-05, %v6452_v7  ;;  %v14255_v35 = vpop.f32.mrb[36].mxu0  ;;  %v17457_v7 = vld [vmem:[%s16483_s8 + $0x20] sm:$0xff]  ;;  %14282 = vmatmul.mubr.msk.f32.gmra.mrb[40].mxu0 %vm1090_vm0, %v6518_v16 }
 0xee4   : > { %v6405_v26 = vadd.f32 %v14255_v35, %v13645_v30  ;;  %v6399_v9 = vpop.f32.mrb[37].mxu0 }
 0xee5   : > { %15011 = vrsqrt.f32 %v6456_v36  ;;  %v6400_v50 = vadd.f32 %v13645_v30, %v6399_v9  ;;  %v6499_v30 = vld [vmem:[%s16476_s19] sm:$0xff]  ;;  %v6512_v9 = vld [vmem:[%s16485_s16 + $0x28] sm:$0xff] }
 0xee6   : > { %v6411_v43 = vadd.f32 %v15084_v38, %v6405_v26  ;;  %v6511_v36 = vld [vmem:[%s16485_s16 + $0x20] sm:$0xff]  ;;  %v17463_v26 = vld [vmem:[%s16483_s8 + $0x28] sm:$0xff]  ;;  %v17471_v38 = vld [vmem:[%s16483_s8 + $0x30] sm:$0xff] }
 0xee7   : > { %v6410_v42 = vadd.f32 %v15085_v39, %v6400_v50  ;;  %v14280_v19 = vpop.f32.mrb[38].mxu0  ;;  %v6519_v35 = vadd.f32 %v6511_v36, %v17457_v7  ;;  %v6520_v50 = vadd.f32 %v6512_v9, %v17463_v26 }
 0xee8   : > { %v6423_v32 = vsel %vm1090_vm0, %v6411_v43, 0.0  ;;  %v6742_v54 = vpop.f32.mrb[39].mxu0  ;;  %v17392_v8 = vadd.f32 %v14280_v19, %v17387_v61  ;;  %v6514_v19 = vld [vmem:[%s16485_s16 + $0x38] sm:$0xff] }
 0xee9   : > { %6424 = vadd.xlane.f32.xlu0 %v6423_v32  ;;  %v6420_v34 = vsel %vm1090_vm0, %v6410_v42, 0.0  ;;  %v17398_v11 = vadd.f32 %v17387_v61, %v6742_v54  ;;  %14284 = vmatprep.mubr.msk.f32.mxu0 %vm1090_vm0, %v6519_v35 }
 0xeea   : > { %6421 = vadd.xlane.f32.xlu1 %v6420_v34  ;;  %14285 = vmatmul.mubr.msk.f32.gmra.mrb[42].mxu0 %vm1090_vm0, %v6520_v50 }
 0xeeb   : > { %v15010_v40 = vpop.eup %15009 }
 0xeec   : > { %v6463_v53 = vmul.f32 %v15010_v40, %v6431_v3  ;;  %v14596_v3 = vpack.c.bf16 %v6534_v52, %v6533_v51 }
 0xeee   : > { %v6473_v12 = vmul.f32 %v17371_v57, %v6463_v53  ;;  %14597 = vmatprep.subr.bf16.mxu1 %v14596_v3 }
 0xeef   : > { %v15012_v14 = vpop.eup %15011 }
 0xef0   : > { %v6464_v33 = vmul.f32 %v15012_v14, %v6432_v55  ;;  %v6483_v41 = vadd.f32 %v17373_v60, %v6473_v12  ;;  %v6535_v55 = vld [vmem:[%s18921_s0 + $0x10] sm:$0xff] }
 0xef1   : > { %v14600_v62 = vpack.c.bf16 %v6536_v13, %v6535_v55 }
 0xef2   : > { %6487 = vst.msk [vmem:[%s17379_s3] sm:$0xff] %vm1090_vm0, %v6483_v41  ;;  %v6503_v15 = vadd.f32 %v6499_v30, %v6483_v41  ;;  %v6474_v17 = vmul.f32 %v17371_v57, %v6464_v33 }
 0xef4   : > { %14264 = vmatprep.mubr.msk.f32.mxu1 %vm1090_vm0, %v6503_v15  ;;  %v6484_v59 = vadd.f32 %v17373_v60, %v6474_v17 }
 0xef6   : > { %6488 = vst.msk [vmem:[%s17379_s3 + $0x8] sm:$0xff] %vm1090_vm0, %v6484_v59  ;;  %v6504_v21 = vadd.f32 %v6500_v47, %v6484_v59 }
 0xef8   : > { %14265 = vmatmul.mubr.msk.f32.vlgmr.msra.gmra.mrb[42].mxu1 %vm1090_vm0, %v6504_v21 }
 0xef9   : > { %14599 = vmatpush3.bf16.msra.mxu1 %v14596_v3 }
 0xefa   : > { %14601 = vmatprep.subr.bf16.mxu1 %v14600_v62 }
 0xefb   : > { %7073 = vrot.lane.b32.xlu1 %v17392_v8, %s15762_s21 }
 0xefd   : > { %14603 = vmatpush3.bf16.msra.mxu1 %v14600_v62 }
 0xefe   : > { %14608 = vmatprep.subr.bf16.mxu1 %v15770_v45 }
 0xeff   : > { %7065 = vrot.lane.b32.xlu1 %v17398_v11, %s15760_s1  ;;  %7067 = vrot.lane.b32.xlu0 %v17392_v8, %s15760_s1 }
 0xf03   : > { %7071 = vrot.lane.b32.xlu1 %v17398_v11, %s15762_s21 }
 0xf76   : > { %v6425_v18 = vpop.xlane.xlu0 %6424 }
 0xf77   : > { %v6430_v20 = vmul.f32 0.03125, %v6425_v18  ;;  %v6422_v23 = vpop.xlane.xlu1 %6421 }
 0xf78   : > { %v6429_v25 = vmul.f32 0.03125, %v6422_v23 }
 0xf79   : > { %v17406_v29 = vsub.f32 %v6411_v43, %v6430_v20  ;;  %v6513_v43 = vld [vmem:[%s16485_s16 + $0x30] sm:$0xff]  ;;  %s18924_s16 = sld [smem:[#allocation71_spill]] }
 0xf7a   : > { %v17408_v24 = vsub.f32 %v6410_v42, %v6429_v25  ;;  %v6521_v39 = vadd.f32 %v6513_v43, %v17471_v38  ;;  %v17477_v42 = vld [vmem:[%s16483_s8 + $0x38] sm:$0xff]  ;;  %v7068_v40 = vpop.permute.xlu0 %7067 }
 0xf7b   : > { %v6438_v28 = vmul.f32 %v17406_v29, %v17406_v29  ;;  %v6522_v32 = vadd.f32 %v6514_v19, %v17477_v42  ;;  %v7074_v54 = vpop.permute.xlu1 %7073 }
 0xf7c   : > { %v6437_v37 = vmul.f32 %v17408_v24, %v17408_v24  ;;  %14287 = vmatprep.mubr.msk.f32.mxu0 %vm1090_vm0, %v6521_v39  ;;  %v7151_v47 = vcombine.low %v17392_v8, %v7074_v54  ;;  %v7152_v59 = vcombine.high %v17392_v8, %v7074_v54 }
 0xf7d   : > { %v6448_v63 = vsel %vm1090_vm0, %v6438_v28, 0.0  ;;  %14288 = vmatmul.mubr.msk.f32.gmra.mrb[44].mxu0 %vm1090_vm0, %v6522_v32 }
 0xf7e   : > { %6449 = vadd.xlane.f32.xlu0 %v6448_v63  ;;  %v6445_v48 = vsel %vm1090_vm0, %v6437_v37, 0.0  ;;  %14314 = vmatprep.mubr.msk.f32.mxu0 %vm15764_vm1, %v15763_v44  ;;  %v7159_v52 = vrot.slane %v7151_v47, %v16575_v58 }
 0xf7f   : > { %6446 = vadd.xlane.f32.xlu1 %v6445_v48  ;;  %v7066_v34 = vpop.permute.xlu1 %7065 }
 0xf83   : > { %v7072_v53 = vpop.permute.xlu1 %7071 }
 0xf84   : > { %v7083_v41 = vcombine.low %v17398_v11, %v7072_v53  ;;  %v7084_v15 = vcombine.high %v17398_v11, %v7072_v53 }
 0xf86   : > { %v7091_v63 = vrot.slane %v7083_v41, %v16575_v58  ;;  %v7098_v48 = vrot.slane %v7084_v15, %v16575_v58 }
 0xf90   : > { %7079 = vrot.lane.b32.xlu1 %v17392_v8, %s15761_s15  ;;  %v7166_v8 = vrot.slane %v7152_v59, %v16575_v58 }
 0xf94   : > { %7077 = vrot.lane.b32.xlu0 %v17398_v11, %s15761_s15 }
 0xfcb   : > { %v17436_v27 = vpop.f32.mrb[42].mxu1 }
 0xfcc   : > { %v6627_v46 = vpop.f32.mrb[43].mxu1 }
 0xfcd   : > { %v6628_v4 = vadd.f32 %v17434_v2, %v6627_v46 }
 0xfcf   : > { %v17448_v31 = vmul.f32 0.35355338, %v6628_v4 }
 0xfd1   : > { %6921 = vrot.lane.b32.xlu1 %v17448_v31, %s15762_s21  ;;  %6918 = vrot.lane.b32.xlu0 %v17448_v31, %s15760_s1 }
 0xfd5   : > { %6924 = vrot.lane.b32.xlu0 %v17448_v31, %s15761_s15 }
0x100b   : > { %v6450_v12 = vpop.xlane.xlu0 %6449 }
0x100c   : > { %v6454_v14 = vmul.f32 0.03125, %v6450_v12  ;;  %v6447_v30 = vpop.xlane.xlu1 %6446 }
0x100d   : > { %v6453_v33 = vmul.f32 0.03125, %v6447_v30 }
0x100e   : > { %v6458_v17 = vadd.f32 1e-05, %v6454_v14 }
0x100f   : > { %v6457_v21 = vadd.f32 1e-05, %v6453_v33  ;;  %v7078_v18 = vpop.permute.xlu0 %7077 }
0x1010   : > { %15013 = vrsqrt.f32 %v6458_v17  ;;  %v7099_v20 = vcombine.low %v7066_v34, %v7078_v18  ;;  %v7100_v23 = vcombine.high %v7066_v34, %v7078_v18  ;;  %v7080_v25 = vpop.permute.xlu1 %7079 }
0x1011   : > { %15015 = vrsqrt.f32 %v6457_v21  ;;  %v7167_v28 = vcombine.low %v7068_v40, %v7080_v25  ;;  %v7168_v37 = vcombine.high %v7068_v40, %v7080_v25 }
0x1012   : > { %v7107_v11 = vrot.slane %v7099_v20, %v16575_v58  ;;  %v7114_v51 = vrot.slane %v7100_v23, %v16575_v58 }
0x1013   : > { %v7175_v3 = vrot.slane %v7167_v28, %v16575_v58  ;;  %v7182_v55 = vrot.slane %v7168_v37, %v16575_v58 }
0x1014   : > { %v7115_v13 = vcombine.low %v7091_v63, %v7107_v11  ;;  %v7116_v62 = vcombine.high %v7091_v63, %v7107_v11  ;;  %v7131_v46 = vcombine.low %v7098_v48, %v7114_v51  ;;  %v7132_v4 = vcombine.high %v7098_v48, %v7114_v51 }
0x1015   : > { %v7183_v6 = vcombine.low %v7159_v52, %v7175_v3  ;;  %v7184_v49 = vcombine.high %v7159_v52, %v7175_v3  ;;  %v7199_v10 = vcombine.low %v7166_v8, %v7182_v55  ;;  %v7200_v16 = vcombine.high %v7166_v8, %v7182_v55 }
0x1016   : > { %v7123_v36 = vrot.slane %v7115_v13, %v16577_v1  ;;  %v7130_v35 = vrot.slane %v7116_v62, %v16577_v1  ;;  %v7139_v9 = vrot.slane %v7131_v46, %v16577_v1  ;;  %v7146_v50 = vrot.slane %v7132_v4, %v16577_v1  ;;  %v6501_v4 = vld [vmem:[%s16476_s19 + $0x10] sm:$0xff] }
0x1017   : > { %v7191_v43 = vrot.slane %v7183_v6, %v16577_v1  ;;  %v7198_v39 = vrot.slane %v7184_v49, %v16577_v1  ;;  %v7207_v19 = vrot.slane %v7199_v10, %v16577_v1  ;;  %v7214_v32 = vrot.slane %v7200_v16, %v16577_v1  ;;  %v6502_v49 = vld [vmem:[%s16476_s19 + $0x18] sm:$0xff]  ;;  %s15771_s19 = smov [#allocation31]  }
0x1018   : > { %v7219_v54 = vcombine.low %v7123_v36, %v7130_v35  ;;  %v13677_v34 = vcombine.high %v7123_v36, %v7130_v35  ;;  %v7235_v40 = vcombine.low %v7139_v9, %v7146_v50  ;;  %v13678_v53 = vcombine.high %v7139_v9, %v7146_v50  ;;  %s15604_s8 = sshll.u32 %s15771_s19, 4  ;;  %s15605_s8 = int_to_ptr.vmem [resolvable:$false] %s15604_s8 }
0x1019   : > { %v7287_v12 = vcombine.low %v7191_v43, %v7198_v39  ;;  %v13679_v14 = vcombine.high %v7191_v43, %v7198_v39  ;;  %v7303_v30 = vcombine.low %v7207_v19, %v7214_v32  ;;  %v13680_v33 = vcombine.high %v7207_v19, %v7214_v32  ;;  %p15607_p11 = scmp.lt.s32.totalorder %s18677_s5, %s15605_s8 }
0x101a   : > { %v15014_v41 = vpop.eup %15013  ;;  %v17506_v15 = vrot.slane %v7219_v54, %v16575_v58  ;;  %v17509_v17 = vrot.slane %v13677_v34, %v16575_v58  ;;  %v17512_v47 = vrot.slane %v7235_v40, %v16575_v58  ;;  %v17515_v59 = vrot.slane %v13678_v53, %v16575_v58 }
0x101b   : > { %v15016_v21 = vpop.eup %15015  ;;  %v17518_v18 = vrot.slane %v7287_v12, %v16575_v58  ;;  %v17521_v20 = vrot.slane %v13679_v14, %v16575_v58  ;;  %v17524_v23 = vrot.slane %v7303_v30, %v16575_v58  ;;  %v17527_v25 = vrot.slane %v13680_v33, %v16575_v58 }
0x101c   : > { %v7251_v28 = vcombine.low %v17506_v15, %v17509_v17  ;;  %v7267_v37 = vcombine.low %v17512_v47, %v17515_v59  ;;  %v6465_v11 = vmul.f32 %v15016_v21, %v17408_v24  ;;  %v6466_v51 = vmul.f32 %v15014_v41, %v17406_v29 }
0x101d   : > { %v7319_v63 = vcombine.low %v17518_v18, %v17521_v20  ;;  %v7335_v48 = vcombine.low %v17524_v23, %v17527_v25  ;;  %v7252_v40 = vcombine.high %v17506_v15, %v17509_v17  ;;  %v7320_v53 = vcombine.high %v17518_v18, %v17521_v20 }
0x101e   : > { %v7259_v52 = vrot.slane %v7251_v28, %v16577_v1  ;;  %v7275_v8 = vrot.slane %v7267_v37, %v16577_v1  ;;  %v6475_v13 = vmul.f32 %v17371_v57, %v6465_v11  ;;  %v6476_v62 = vmul.f32 %v17371_v57, %v6466_v51 }
0x101f   : > { %v7327_v3 = vrot.slane %v7319_v63, %v16577_v1  ;;  %v7343_v55 = vrot.slane %v7335_v48, %v16577_v1  ;;  %v7336_v12 = vcombine.high %v17524_v23, %v17527_v25  ;;  %v7334_v18 = vrot.slane %v7320_v53, %v16577_v1 }
0x1020   : > { %v7283_v46 = vcombine.low %v7259_v52, %v7275_v8  ;;  %v6485_v24 = vadd.f32 %v17373_v60, %v6475_v13  ;;  %v6486_v29 = vadd.f32 %v17373_v60, %v6476_v62  ;;  %v7284_v60 = vcombine.high %v7259_v52, %v7275_v8 }
0x1021   : > { %v7351_v6 = vcombine.low %v7327_v3, %v7343_v55  ;;  %v7352_v35 = vcombine.high %v7327_v3, %v7343_v55  ;;  %v7350_v20 = vrot.slane %v7336_v12, %v16577_v1 }
0x1022   : > { %6489 = vst.msk [vmem:[%s17379_s3 + $0x10] sm:$0xff] %vm1090_vm0, %v6485_v24  ;;  %v6505_v36 = vadd.f32 %v6501_v4, %v6485_v24  ;;  %6490 = vst.msk [vmem:[%s17379_s3 + $0x18] sm:$0xff] %vm1090_vm0, %v6486_v29  ;;  %v6506_v57 = vadd.f32 %v6502_v49, %v6486_v29 }
0x1023   : > { %v14605_v16 = vpack.c.bf16 %v7351_v6, %v7283_v46  ;;  %v14609_v9 = vpack.c.bf16 %v7352_v35, %v7284_v60  ;;  %v7353_v52 = vcombine.low %v7334_v18, %v7350_v20  ;;  %v7354_v3 = vcombine.high %v7334_v18, %v7350_v20  ;;  %v14283_v60 = vpop.f32.mrb[40].mxu0 }
0x1024   : > { %14267 = vmatprep.mubr.msk.f32.mxu1 %vm1090_vm0, %v6505_v36  ;;  %v6752_v35 = vpop.f32.mrb[41].mxu0 }
0x1025   : > { %14607 = vmatpush3.bf16.xpose.msk.msra.mxu0 %vm17551_vm5, %v14605_v16  ;;  %14268 = vmatmul.mubr.msk.f32.gmra.mrb[44].mxu1 %vm1090_vm0, %v6506_v57 }
0x1026   : > { %14612 = vmatprep.subr.bf16.mxu0 %v15770_v45  ;;  %14298 = vmatprep.mubr.msk.f32.mxu1 %vm1090_vm0, %v17350_v22 }
0x1029   : > { %14299 = vmatmul.mubr.msk.f32.vlgmr.msra.gmra.mrb[46].mxu1 %vm1090_vm0, %v17356_v0 }
0x102a   : > { %14611 = vmatpush3.bf16.xpose.msk.msra.mxu1 %vm17551_vm5, %v14609_v9  ;;  %14301 = vmatprep.mubr.msk.f32.mxu1 %vm1090_vm0, %v17440_v5  ;;  %v17633_v9 = vpop.f32.mrb[42].mxu0 }
0x102b   : > { %14616 = vmatprep.subr.bf16.mxu1 %v15770_v45 }
0x102d   : > { %14302 = vmatmul.mubr.msk.f32.gmra.mrb[48].mxu1 %vm1090_vm0, %v17445_v56 }
0x102e   : > { %14304 = vmatprep.mubr.msk.f32.mxu1 %vm1090_vm0, %v17457_v7 }
0x1031   : > { %14305 = vmatmul.mubr.msk.f32.gmra.mrb[50].mxu1 %vm1090_vm0, %v17463_v26 }
0x1032   : > { %14307 = vmatprep.mubr.msk.f32.mxu1 %vm1090_vm0, %v17471_v38 }
0x1035   : > { %14308 = vmatmul.mubr.msk.f32.gmra.mrb[52].mxu1 %vm1090_vm0, %v17477_v42 }
0x1036   : > { %14321 = vmatprep.mubr.msk.f32.mxu1 %vm15764_vm1, %v15763_v44 }
0x1043   : > { %v6922_v22 = vpop.permute.xlu1 %6921  ;;  %v6919_v0 = vpop.permute.xlu0 %6918 }
0x1044   : > { %v6927_v5 = vcombine.low %v17448_v31, %v6922_v22  ;;  %v6928_v56 = vcombine.high %v17448_v31, %v6922_v22  ;;  %v7268_v31 = vcombine.high %v17512_v47, %v17515_v59  ;;  %v7266_v47 = vrot.slane %v7252_v40, %v16577_v1  ;;  %v17635_v22 = vpop.f32.mrb[43].mxu0 }
0x1046   : > { %v6935_v26 = vrot.slane %v6927_v5, %v16575_v58  ;;  %v6942_v39 = vrot.slane %v6928_v56, %v16575_v58  ;;  %v7282_v59 = vrot.slane %v7268_v31, %v16577_v1 }
0x1047   : > { %v6925_v50 = vpop.permute.xlu0 %6924 }
0x1048   : > { %v6943_v7 = vcombine.low %v6919_v0, %v6925_v50  ;;  %v6944_v43 = vcombine.high %v6919_v0, %v6925_v50  ;;  %v7285_v51 = vcombine.low %v7266_v47, %v7282_v59  ;;  %v7286_v8 = vcombine.high %v7266_v47, %v7282_v59 }
0x104a   : > { %v6951_v38 = vrot.slane %v6943_v7, %v16575_v58  ;;  %v6958_v42 = vrot.slane %v6944_v43, %v16575_v58  ;;  %v14613_v24 = vpack.c.bf16 %v7353_v52, %v7285_v51  ;;  %v14617_v29 = vpack.c.bf16 %v7354_v3, %v7286_v8 }
0x104c   : > { %v6959_v19 = vcombine.low %v6935_v26, %v6951_v38  ;;  %v6960_v32 = vcombine.high %v6935_v26, %v6951_v38  ;;  %v6975_v54 = vcombine.low %v6942_v39, %v6958_v42  ;;  %v6976_v34 = vcombine.high %v6942_v39, %v6958_v42  ;;  %v13666_v26 = vld [vmem:[%s18924_s16] ss:$0 sm:$0xff]  ;;  %s15606_s16 = scalar_lea.vmem %s15605_s8, 1024 }
0x104d   : > { %p15608_p13 = scmp.lt.s32.totalorder %s15606_s16, %s15600_s13 }
0x104e   : > { %v6967_v14 = vrot.slane %v6959_v19, %v16577_v1  ;;  %v6974_v30 = vrot.slane %v6960_v32, %v16577_v1  ;;  %v6983_v33 = vrot.slane %v6975_v54, %v16577_v1  ;;  %v6990_v41 = vrot.slane %v6976_v34, %v16577_v1 }
0x104f   : > { %p15609_p10 = por %p15608_p13, %p15607_p11 }
0x1050   : > { %v6995_v21 = vcombine.low %v6967_v14, %v6974_v30  ;;  %v13675_v28 = vcombine.high %v6967_v14, %v6974_v30  ;;  %v7011_v15 = vcombine.low %v6983_v33, %v6990_v41  ;;  %v13676_v17 = vcombine.high %v6983_v33, %v6990_v41  ;;  %v17637_v0 = vpop.f32.mrb[44].mxu0 }
0x1051   : > { %v17639_v5 = vpop.f32.mrb[45].mxu0  ;;  %p15610_p3 = pnand %p15609_p10, %p15603_p2 }
0x1052   : > { %v7002_v23 = vrot.slane %v6995_v21, %v16575_v58  ;;  %v7010_v25 = vrot.slane %v13675_v28, %v16575_v58  ;;  %v7018_v37 = vrot.slane %v7011_v15, %v16575_v58  ;;  %v7026_v63 = vrot.slane %v13676_v17, %v16575_v58 }
0x1054   : > { %v7027_v48 = vcombine.low %v7002_v23, %v7010_v25  ;;  %v7043_v11 = vcombine.low %v7018_v37, %v7026_v63  ;;  %v7028_v62 = vcombine.high %v7002_v23, %v7010_v25  ;;  %v7044_v46 = vcombine.high %v7018_v37, %v7026_v63 }
0x1055   : > { %v17677_v37 = vadd.f32 %v17387_v61, %v6752_v35  ;;  %v17682_v63 = vadd.f32 %v14283_v60, %v17387_v61  ;;  %v6633_v61 = vadd.f32 %v17436_v27, %v17434_v2 }
0x1056   : > { %v7035_v55 = vrot.slane %v7027_v48, %v16577_v1  ;;  %v7051_v13 = vrot.slane %v7043_v11, %v16577_v1  ;;  %v7042_v49 = vrot.slane %v7028_v62, %v16577_v1  ;;  %v7058_v16 = vrot.slane %v7044_v46, %v16577_v1 }
0x1057   : > { %v17698_v11 = vmul.f32 0.35355338, %v6633_v61 }
0x1058   : > { %v7059_v4 = vcombine.low %v7035_v55, %v7051_v13  ;;  %v7060_v6 = vcombine.high %v7035_v55, %v7051_v13  ;;  %v7061_v36 = vcombine.low %v7042_v49, %v7058_v16  ;;  %v7062_v57 = vcombine.high %v7042_v49, %v7058_v16 }
0x105a   : > { %14315 = vmatmul.mubr.msk.f32.vlgmr.msra.gmra.mrb[46].mxu0 %vm1821_vm2, %v7059_v4  ;;  %14322 = vmatmul.mubr.msk.f32.vlgmr.msra.gmra.mrb[54].mxu1 %vm1821_vm2, %v7060_v6 }
0x105b   : > { %14615 = vmatpush3.bf16.xpose.msk.msra.mxu0 %vm17551_vm5, %v14613_v24  ;;  %14619 = vmatpush3.bf16.xpose.msk.msra.mxu1 %vm17551_vm5, %v14617_v29 }
0x105c   : > { %14328 = vmatprep.mubr.msk.f32.mxu0 %vm15764_vm1, %v15763_v44  ;;  %14335 = vmatprep.mubr.msk.f32.mxu1 %vm15764_vm1, %v15763_v44 }
0x105d   : > { %14620 = vmatprep.subr.bf16.mxu0 %v15770_v45  ;;  %14623 = vmatprep.subr.bf16.mxu1 %v15770_v45 }
0x1062   : > { %14329 = vmatmul.mubr.msk.f32.vlgmr.msra.gmra.mrb[48].mxu0 %vm1821_vm2, %v7061_v36  ;;  %14336 = vmatmul.mubr.msk.f32.vlgmr.msra.gmra.mrb[56].mxu1 %vm1821_vm2, %v7062_v57 }
0x1063   : > { %14342 = vmatprep.mubr.msk.f32.mxu0 %vm15764_vm1, %v15763_v44  ;;  %14349 = vmatprep.mubr.msk.f32.mxu1 %vm15764_vm1, %v15763_v44 }
0x10f8   : > { %v17641_v56 = vpop.f32.mrb[44].mxu1 }
0x10f9   : > { %v17643_v50 = vpop.f32.mrb[45].mxu1 }
0x10fc   : > { %v14300_v7 = vpop.f32.mrb[46].mxu1 }
0x10fd   : > { %v6877_v43 = vpop.f32.mrb[47].mxu1  ;;  %v17665_v23 = vadd.f32 %v14300_v7, %v13666_v26 }
0x10fe   : > { %v6878_v25 = vadd.f32 %v13666_v26, %v6877_v43 }
0x1100   : > { %v14303_v39 = vpop.f32.mrb[48].mxu1 }
0x1101   : > { %v17648_v38 = vadd.f32 %v14303_v39, %v13666_v26  ;;  %v6887_v42 = vpop.f32.mrb[49].mxu1 }
0x1102   : > { %v17650_v19 = vadd.f32 %v13666_v26, %v6887_v42 }
0x1104   : > { %v14306_v32 = vpop.f32.mrb[50].mxu1 }
0x1105   : > { %v17652_v54 = vadd.f32 %v14306_v32, %v13666_v26  ;;  %v6897_v34 = vpop.f32.mrb[51].mxu1 }
0x1106   : > { %v17654_v40 = vadd.f32 %v13666_v26, %v6897_v34 }
0x1108   : > { %v14309_v31 = vpop.f32.mrb[52].mxu1 }
0x1109   : > { %v17656_v53 = vadd.f32 %v14309_v31, %v13666_v26  ;;  %v6907_v12 = vpop.f32.mrb[53].mxu1 }
0x110a   : > { %v17658_v14 = vadd.f32 %v13666_v26, %v6907_v12 }
0x112d   : > { %v7722_v30 = vpop.f32.mrb[46].mxu0  ;;  %v7801_v33 = vpop.f32.mrb[54].mxu1 }
0x112e   : > { %v14316_v41 = vpop.f32.mrb[47].mxu0  ;;  %v14323_v21 = vpop.f32.mrb[55].mxu1  ;;  %v7966_v28 = vsel %vm2611_vm4, %v7801_v33, -inf  ;;  %v7963_v15 = vsel %vm2611_vm4, %v7722_v30, -inf }
0x112f   : > { %7967 = vmax.xlane.f32.xlu0 %v7966_v28  ;;  %7964 = vmax.xlane.f32.xlu1 %v7963_v15 }
0x1135   : > { %v7880_v17 = vpop.f32.mrb[48].mxu0  ;;  %v17662_v47 = vpop.f32.mrb[56].mxu1 }
0x1136   : > { %v14330_v59 = vpop.f32.mrb[49].mxu0  ;;  %v14337_v18 = vpop.f32.mrb[57].mxu1  ;;  %v7969_v20 = vsel %vm2611_vm4, %v7880_v17, -inf  ;;  %v7972_v48 = vsel %vm2611_vm4, %v17662_v47, -inf }
0x1137   : > { %7970 = vmax.xlane.f32.xlu0 %v7969_v20 }
0x1140   : > { %7359 = vrot.lane.b32.xlu1 %v17665_v23, %s15760_s1 }
0x1144   : > { %7363 = vrot.lane.b32.xlu1 %v6878_v25, %s15762_s21 }
0x1148   : > { %7369 = vrot.lane.b32.xlu1 %v6878_v25, %s15761_s15 }
0x114d   : > { %7357 = vrot.lane.b32.xlu0 %v6878_v25, %s15760_s1 }
0x1151   : > { %7365 = vrot.lane.b32.xlu0 %v17665_v23, %s15762_s21 }
0x1155   : > { %7371 = vrot.lane.b32.xlu0 %v17665_v23, %s15761_s15 }
0x1159   : > { %8599 = vrot.lane.b32.xlu0 %v17677_v37, %s15760_s1 }
0x115d   : > { %8607 = vrot.lane.b32.xlu0 %v17682_v63, %s15762_s21 }
0x1161   : > { %8613 = vrot.lane.b32.xlu0 %v17682_v63, %s15761_s15 }
0x116c   : > { %7973 = vmax.xlane.f32.xlu1 %v7972_v48 }
0x117d   : > { %8601 = vrot.lane.b32.xlu1 %v17682_v63, %s15760_s1 }
0x1181   : > { %8605 = vrot.lane.b32.xlu1 %v17677_v37, %s15762_s21 }
0x1185   : > { %8611 = vrot.lane.b32.xlu1 %v17677_v37, %s15761_s15 }
0x1189   : > { %8452 = vrot.lane.b32.xlu1 %v17698_v11, %s15760_s1 }
0x11bc   : > { %v7965_v51 = vpop.xlane.xlu1 %7964  ;;  %v7968_v8 = vpop.xlane.xlu0 %7967 }
0x11bd   : > { %v7975_v52 = vsub.f32 %v7722_v30, %v7965_v51  ;;  %v7976_v13 = vsub.f32 %v7801_v33, %v7968_v8 }
0x11bf   : > { %v7979_v3 = vmul.f32 1.442695, %v7975_v52  ;;  %v7981_v6 = vmul.f32 1.442695, %v7976_v13 }
0x11c0   : > { %v7360_v55 = vpop.permute.xlu1 %7359 }
0x11c1   : > { %15017 = vpow2.f32 %v7979_v3 }
0x11c4   : > { %v7971_v62 = vpop.xlane.xlu0 %7970  ;;  %v7364_v46 = vpop.permute.xlu1 %7363 }
0x11c5   : > { %v7977_v4 = vsub.f32 %v7880_v17, %v7971_v62  ;;  %v7375_v27 = vcombine.low %v6878_v25, %v7364_v46  ;;  %v7376_v24 = vcombine.high %v6878_v25, %v7364_v46 }
0x11c7   : > { %v7983_v2 = vmul.f32 1.442695, %v7977_v4  ;;  %v7383_v57 = vrot.slane %v7375_v27, %v16575_v58  ;;  %v7390_v60 = vrot.slane %v7376_v24, %v16575_v58 }
0x11c8   : > { %v7358_v29 = vpop.permute.xlu0 %7357  ;;  %v7370_v49 = vpop.permute.xlu1 %7369 }
0x11c9   : > { %15019 = vpow2.f32 %v7983_v2  ;;  %v7391_v16 = vcombine.low %v7358_v29, %v7370_v49  ;;  %v7392_v36 = vcombine.high %v7358_v29, %v7370_v49 }
0x11ca   : > { %15021 = vpow2.f32 %v7981_v6 }
0x11cb   : > { %v7399_v35 = vrot.slane %v7391_v16, %v16575_v58  ;;  %v7406_v7 = vrot.slane %v7392_v36, %v16575_v58  ;;  %v17706_v43 = vpop.eup %15017 }
0x11cc   : > { %v7366_v26 = vpop.permute.xlu0 %7365  ;;  %v7987_v12 = vsel %vm2611_vm4, %v17706_v43, 0.0 }
0x11cd   : > { %v7407_v39 = vcombine.low %v7383_v57, %v7399_v35  ;;  %v7408_v42 = vcombine.high %v7383_v57, %v7399_v35  ;;  %v7423_v32 = vcombine.low %v7390_v60, %v7406_v7  ;;  %v7424_v34 = vcombine.high %v7390_v60, %v7406_v7  ;;  %7988 = vadd.xlane.f32.xlu0 %v7987_v12 }
0x11ce   : > { %v7443_v31 = vcombine.low %v17665_v23, %v7366_v26  ;;  %v7444_v28 = vcombine.high %v17665_v23, %v7366_v26 }
0x11cf   : > { %v7415_v30 = vrot.slane %v7407_v39, %v16577_v1  ;;  %v7422_v33 = vrot.slane %v7408_v42, %v16577_v1  ;;  %v7431_v41 = vrot.slane %v7423_v32, %v16577_v1  ;;  %v7438_v21 = vrot.slane %v7424_v34, %v16577_v1 }
0x11d0   : > { %v7372_v15 = vpop.permute.xlu0 %7371  ;;  %v7451_v25 = vrot.slane %v7443_v31, %v16575_v58  ;;  %v7458_v62 = vrot.slane %v7444_v28, %v16575_v58 }
0x11d1   : > { %v7511_v17 = vcombine.low %v7415_v30, %v7422_v33  ;;  %v13681_v59 = vcombine.high %v7415_v30, %v7422_v33  ;;  %v7527_v18 = vcombine.low %v7431_v41, %v7438_v21  ;;  %v13682_v20 = vcombine.high %v7431_v41, %v7438_v21 }
0x11d2   : > { %v7459_v48 = vcombine.low %v7360_v55, %v7372_v15  ;;  %v7460_v61 = vcombine.high %v7360_v55, %v7372_v15 }
0x11d3   : > { %v17717_v51 = vpop.eup %15019  ;;  %v7518_v52 = vrot.slane %v7511_v17, %v16575_v58  ;;  %v7526_v8 = vrot.slane %v13681_v59, %v16575_v58  ;;  %v7534_v3 = vrot.slane %v7527_v18, %v16575_v58  ;;  %v7542_v13 = vrot.slane %v13682_v20, %v16575_v58 }
0x11d4   : > { %v17723_v23 = vpop.eup %15021  ;;  %v7467_v46 = vrot.slane %v7459_v48, %v16575_v58  ;;  %v7474_v4 = vrot.slane %v7460_v61, %v16575_v58  ;;  %v7993_v55 = vsel %vm2611_vm4, %v17717_v51, 0.0 }
0x11d5   : > { %7994 = vadd.xlane.f32.xlu1 %v7993_v55  ;;  %v7544_v6 = vcombine.high %v7518_v52, %v7526_v8  ;;  %v7560_v2 = vcombine.high %v7534_v3, %v7542_v13  ;;  %v7990_v16 = vsel %vm2611_vm4, %v17723_v23, 0.0  ;;  %v7543_v39 = vcombine.low %v7518_v52, %v7526_v8 }
0x11d6   : > { %v7475_v27 = vcombine.low %v7451_v25, %v7467_v46  ;;  %v7476_v24 = vcombine.high %v7451_v25, %v7467_v46  ;;  %v7491_v29 = vcombine.low %v7458_v62, %v7474_v4  ;;  %v7492_v49 = vcombine.high %v7458_v62, %v7474_v4 }
0x11d7   : > { %v7558_v36 = vrot.slane %v7544_v6, %v16577_v1  ;;  %v7574_v57 = vrot.slane %v7560_v2, %v16577_v1  ;;  %v7559_v42 = vcombine.low %v7534_v3, %v7542_v13  ;;  %v7551_v17 = vrot.slane %v7543_v39, %v16577_v1 }
0x11d8   : > { %v7483_v60 = vrot.slane %v7475_v27, %v16577_v1  ;;  %v7490_v35 = vrot.slane %v7476_v24, %v16577_v1  ;;  %v7499_v7 = vrot.slane %v7491_v29, %v16577_v1  ;;  %v7506_v26 = vrot.slane %v7492_v49, %v16577_v1 }
0x11d9   : > { %7991 = vadd.xlane.f32.xlu1 %v7990_v16  ;;  %v7577_v30 = vcombine.low %v7558_v36, %v7574_v57  ;;  %v7578_v33 = vcombine.high %v7558_v36, %v7574_v57  ;;  %v7567_v59 = vrot.slane %v7559_v42, %v16577_v1 }
0x11da   : > { %v7579_v32 = vcombine.low %v7483_v60, %v7490_v35  ;;  %v13683_v34 = vcombine.high %v7483_v60, %v7490_v35  ;;  %v7595_v31 = vcombine.low %v7499_v7, %v7506_v26  ;;  %v13684_v12 = vcombine.high %v7499_v7, %v7506_v26  ;;  %v8600_v7 = vpop.permute.xlu0 %8599 }
0x11db   : > { %v7575_v13 = vcombine.low %v7551_v17, %v7567_v59  ;;  %v7576_v62 = vcombine.high %v7551_v17, %v7567_v59 }
0x11dc   : > { %v7586_v41 = vrot.slane %v7579_v32, %v16575_v58  ;;  %v7594_v21 = vrot.slane %v13683_v34, %v16575_v58  ;;  %v7602_v28 = vrot.slane %v7595_v31, %v16575_v58  ;;  %v7610_v15 = vrot.slane %v13684_v12, %v16575_v58 }
0x11de   : > { %v7611_v18 = vcombine.low %v7586_v41, %v7594_v21  ;;  %v7627_v20 = vcombine.low %v7602_v28, %v7610_v15  ;;  %v7612_v25 = vcombine.high %v7586_v41, %v7594_v21  ;;  %v7628_v48 = vcombine.high %v7602_v28, %v7610_v15  ;;  %v8608_v39 = vpop.permute.xlu0 %8607 }
0x11df   : > { %v8685_v41 = vcombine.low %v17682_v63, %v8608_v39  ;;  %v8686_v21 = vcombine.high %v17682_v63, %v8608_v39 }
0x11e0   : > { %v7619_v61 = vrot.slane %v7611_v18, %v16577_v1  ;;  %v7635_v52 = vrot.slane %v7627_v20, %v16577_v1  ;;  %v7626_v8 = vrot.slane %v7612_v25, %v16577_v1  ;;  %v7642_v3 = vrot.slane %v7628_v48, %v16577_v1 }
0x11e1   : > { %v8693_v25 = vrot.slane %v8685_v41, %v16575_v58 }
0x11e2   : > { %v7643_v46 = vcombine.low %v7619_v61, %v7635_v52  ;;  %v7644_v4 = vcombine.high %v7619_v61, %v7635_v52  ;;  %v7645_v55 = vcombine.low %v7626_v8, %v7642_v3  ;;  %v7646_v6 = vcombine.high %v7626_v8, %v7642_v3  ;;  %v8614_v31 = vpop.permute.xlu0 %8613 }
0x11e4   : > { %v14621_v2 = vpack.c.bf16 %v7643_v46, %v7575_v13  ;;  %v14624_v27 = vpack.c.bf16 %v7644_v4, %v7576_v62  ;;  %v17748_v24 = vpack.c.bf16 %v7645_v55, %v7577_v30  ;;  %v17750_v29 = vpack.c.bf16 %v7646_v6, %v7578_v33 }
0x11e6   : > { %14622 = vmatpush3.bf16.msra.mxu0 %v14621_v2  ;;  %14625 = vmatpush3.bf16.msra.mxu1 %v14624_v27 }
0x11e7   : > { %14626 = vmatprep.subr.bf16.mxu0 %v15770_v45  ;;  %14629 = vmatprep.subr.bf16.mxu1 %v15770_v45 }
0x11ea   : > { %8458 = vrot.lane.b32.xlu1 %v17698_v11, %s15761_s15 }
0x11ee   : > { %8891 = vrot.lane.b32.xlu1 %v17650_v19, %s15760_s1 }
0x11f9   : > { %v7974_v49 = vpop.xlane.xlu1 %7973 }
0x11fa   : > { %v7978_v16 = vsub.f32 %v17662_v47, %v7974_v49 }
0x11fc   : > { %v7985_v36 = vmul.f32 1.442695, %v7978_v16 }
0x11fd   : > { %v8602_v35 = vpop.permute.xlu1 %8601 }
0x11fe   : > { %15023 = vpow2.f32 %v7985_v36  ;;  %v8701_v47 = vcombine.low %v8602_v35, %v8614_v31  ;;  %v8702_v12 = vcombine.high %v8602_v35, %v8614_v31 }
0x1200   : > { %v8709_v17 = vrot.slane %v8701_v47, %v16575_v58  ;;  %v8716_v59 = vrot.slane %v8702_v12, %v16575_v58 }
0x1201   : > { %v8606_v26 = vpop.permute.xlu1 %8605 }
0x1202   : > { %v8617_v30 = vcombine.low %v17677_v37, %v8606_v26  ;;  %v8618_v33 = vcombine.high %v17677_v37, %v8606_v26  ;;  %v8700_v37 = vrot.slane %v8686_v21, %v16575_v58  ;;  %v8717_v8 = vcombine.low %v8693_v25, %v8709_v17 }
0x1203   : > { %v8718_v3 = vcombine.high %v8693_v25, %v8709_v17 }
0x1204   : > { %v8625_v18 = vrot.slane %v8617_v30, %v16575_v58  ;;  %v8632_v20 = vrot.slane %v8618_v33, %v16575_v58  ;;  %v8733_v13 = vcombine.low %v8700_v37, %v8716_v59  ;;  %v8734_v62 = vcombine.high %v8700_v37, %v8716_v59 }
0x1205   : > { %v8612_v42 = vpop.permute.xlu1 %8611  ;;  %v8725_v2 = vrot.slane %v8717_v8, %v16577_v1  ;;  %v8732_v27 = vrot.slane %v8718_v3, %v16577_v1 }
0x1206   : > { %v8633_v32 = vcombine.low %v8600_v7, %v8612_v42  ;;  %v8634_v34 = vcombine.high %v8600_v7, %v8612_v42  ;;  %v8741_v49 = vrot.slane %v8733_v13, %v16577_v1  ;;  %v8748_v16 = vrot.slane %v8734_v62, %v16577_v1 }
0x1207   : > { %v8821_v42 = vcombine.low %v8725_v2, %v8732_v27 }
0x1208   : > { %v17759_v57 = vpop.eup %15023  ;;  %v8641_v28 = vrot.slane %v8633_v32, %v16575_v58  ;;  %v8648_v15 = vrot.slane %v8634_v34, %v16575_v58  ;;  %v13707_v32 = vcombine.high %v8725_v2, %v8732_v27  ;;  %v8837_v34 = vcombine.low %v8741_v49, %v8748_v16 }
0x1209   : > { %v7996_v60 = vsel %vm2611_vm4, %v17759_v57, 0.0  ;;  %v8453_v39 = vpop.permute.xlu1 %8452  ;;  %v13708_v31 = vcombine.high %v8741_v49, %v8748_v16  ;;  %v17798_v21 = vrot.slane %v8821_v42, %v16575_v58 }
0x120a   : > { %7997 = vadd.xlane.f32.xlu0 %v7996_v60  ;;  %v8649_v48 = vcombine.low %v8625_v18, %v8641_v28  ;;  %v8650_v61 = vcombine.high %v8625_v18, %v8641_v28  ;;  %v8665_v52 = vcombine.low %v8632_v20, %v8648_v15  ;;  %v8666_v63 = vcombine.high %v8632_v20, %v8648_v15 }
0x120b   : > { %v17801_v28 = vrot.slane %v13707_v32, %v16575_v58  ;;  %v17804_v15 = vrot.slane %v8837_v34, %v16575_v58  ;;  %v17807_v17 = vrot.slane %v13708_v31, %v16575_v58 }
0x120c   : > { %v8657_v46 = vrot.slane %v8649_v48, %v16577_v1  ;;  %v8664_v4 = vrot.slane %v8650_v61, %v16577_v1  ;;  %v8673_v55 = vrot.slane %v8665_v52, %v16577_v1  ;;  %v8680_v6 = vrot.slane %v8666_v63, %v16577_v1 }
0x120d   : > { %v8853_v37 = vcombine.low %v17798_v21, %v17801_v28  ;;  %v8869_v48 = vcombine.low %v17804_v15, %v17807_v17 }
0x120e   : > { %v8753_v60 = vcombine.low %v8657_v46, %v8664_v4  ;;  %v13705_v35 = vcombine.high %v8657_v46, %v8664_v4  ;;  %v8769_v7 = vcombine.low %v8673_v55, %v8680_v6  ;;  %v13706_v26 = vcombine.high %v8673_v55, %v8680_v6 }
0x120f   : > { %v8861_v8 = vrot.slane %v8853_v37, %v16577_v1  ;;  %v8877_v3 = vrot.slane %v8869_v48, %v16577_v1  ;;  %v8854_v37 = vcombine.high %v17798_v21, %v17801_v28  ;;  %v8870_v48 = vcombine.high %v17804_v15, %v17807_v17 }
0x1210   : > { %v17786_v47 = vrot.slane %v8753_v60, %v16575_v58  ;;  %v17789_v12 = vrot.slane %v13705_v35, %v16575_v58  ;;  %v17792_v30 = vrot.slane %v8769_v7, %v16575_v58  ;;  %v17795_v33 = vrot.slane %v13706_v26, %v16575_v58 }
0x1211   : > { %v8885_v46 = vcombine.low %v8861_v8, %v8877_v3  ;;  %v8884_v17 = vrot.slane %v8870_v48, %v16577_v1 }
0x1212   : > { %v8785_v59 = vcombine.low %v17786_v47, %v17789_v12  ;;  %v8801_v18 = vcombine.low %v17792_v30, %v17795_v33  ;;  %v8802_v31 = vcombine.high %v17792_v30, %v17795_v33 }
0x1214   : > { %v8793_v52 = vrot.slane %v8785_v59, %v16577_v1  ;;  %v8809_v63 = vrot.slane %v8801_v18, %v16577_v1 }
0x1216   : > { %v8817_v62 = vcombine.low %v8793_v52, %v8809_v63  ;;  %v8818_v7 = vcombine.high %v8793_v52, %v8809_v63 }
0x1218   : > { %v14633_v55 = vpack.c.bf16 %v8885_v46, %v8817_v62 }
0x1220   : > { %8455 = vrot.lane.b32.xlu0 %v17698_v11, %s15762_s21 }
0x125a   : > { %v7989_v36 = vpop.xlane.xlu0 %7988 }
0x125b   : > { %15025 = vrcp.f32 %v7989_v36 }
0x1262   : > { %v7995_v41 = vpop.xlane.xlu1 %7994 }
0x1263   : > { %15027 = vrcp.f32 %v7995_v41 }
0x1265   : > { %v15026_v25 = vpop.eup %15025 }
0x1266   : > { %v7992_v20 = vpop.xlane.xlu1 %7991  ;;  %v8000_v61 = vmul.f32 %v15026_v25, %v17706_v43 }
0x1267   : > { %15029 = vrcp.f32 %v7992_v20 }
0x1268   : > { %14343 = vmatmul.mubr.msk.f32.vlgmr.msra.gmra.mrb[50].mxu0 %vm2611_vm4, %v8000_v61 }
0x1269   : > { %14628 = vmatpush3.bf16.msra.mxu0 %v17748_v24  ;;  %14356 = vmatprep.mubr.msk.f32.mxu0 %vm15764_vm1, %v15763_v44 }
0x126a   : > { %14632 = vmatprep.subr.bf16.mxu0 %v15770_v45 }
0x126d   : > { %v15028_v13 = vpop.eup %15027 }
0x126e   : > { %v8004_v43 = vmul.f32 %v15028_v13, %v17717_v51  ;;  %v8459_v51 = vpop.permute.xlu1 %8458 }
0x126f   : > { %v8477_v2 = vcombine.low %v8453_v39, %v8459_v51 }
0x1270   : > { %14357 = vmatmul.mubr.msk.f32.vlgmr.msra.gmra.mrb[52].mxu0 %vm2611_vm4, %v8004_v43 }
0x1271   : > { %v15030_v4 = vpop.eup %15029  ;;  %14370 = vmatprep.mubr.msk.f32.mxu0 %vm15764_vm1, %v15763_v44  ;;  %v8485_v36 = vrot.slane %v8477_v2, %v16575_v58 }
0x1272   : > { %v8002_v24 = vmul.f32 %v15030_v4, %v17723_v23  ;;  %14635 = vmatpush3.bf16.xpose.msk.msra.mxu0 %vm17551_vm5, %v14633_v55  ;;  %v8478_v23 = vcombine.high %v8453_v39, %v8459_v51  ;;  %v8786_v39 = vcombine.high %v17786_v47, %v17789_v12 }
0x1273   : > { %14640 = vmatprep.subr.bf16.mxu0 %v15770_v45 }
0x1274   : > { %14350 = vmatmul.mubr.msk.f32.vlgmr.msra.gmra.mrb[58].mxu1 %vm2611_vm4, %v8002_v24  ;;  %v8800_v63 = vrot.slane %v8786_v39, %v16577_v1 }
0x1275   : > { %14631 = vmatpush3.bf16.msra.mxu1 %v17750_v29  ;;  %14363 = vmatprep.mubr.msk.f32.mxu1 %vm15764_vm1, %v15763_v44  ;;  %v8492_v29 = vrot.slane %v8478_v23, %v16575_v58 }
0x1276   : > { %14636 = vmatprep.subr.bf16.mxu1 %v15770_v45 }
0x1297   : > { %v7998_v6 = vpop.xlane.xlu0 %7997 }
0x1298   : > { %15031 = vrcp.f32 %v7998_v6 }
0x129b   : > { %v8456_v27 = vpop.permute.xlu0 %8455 }
0x129c   : > { %v8461_v49 = vcombine.low %v17698_v11, %v8456_v27  ;;  %v8462_v16 = vcombine.high %v17698_v11, %v8456_v27  ;;  %v8886_v11 = vcombine.high %v8861_v8, %v8877_v3  ;;  %v8816_v8 = vrot.slane %v8802_v31, %v16577_v1 }
0x129e   : > { %v8469_v60 = vrot.slane %v8461_v49, %v16575_v58  ;;  %v8476_v35 = vrot.slane %v8462_v16, %v16575_v58  ;;  %v14637_v12 = vpack.c.bf16 %v8886_v11, %v8818_v7  ;;  %v8819_v62 = vcombine.low %v8800_v63, %v8816_v8 }
0x129f   : > { %v8820_v46 = vcombine.high %v8800_v63, %v8816_v8 }
0x12a0   : > { %v8493_v26 = vcombine.low %v8469_v60, %v8485_v36  ;;  %v8494_v42 = vcombine.high %v8469_v60, %v8485_v36  ;;  %v8509_v32 = vcombine.low %v8476_v35, %v8492_v29  ;;  %v8510_v34 = vcombine.high %v8476_v35, %v8492_v29 }
0x12a2   : > { %v15032_v41 = vpop.eup %15031  ;;  %v8501_v59 = vrot.slane %v8493_v26, %v16577_v1  ;;  %v8508_v18 = vrot.slane %v8494_v42, %v16577_v1  ;;  %v8517_v20 = vrot.slane %v8509_v32, %v16577_v1  ;;  %v8524_v25 = vrot.slane %v8510_v34, %v16577_v1 }
0x12a3   : > { %v8006_v47 = vmul.f32 %v15032_v41, %v17759_v57  ;;  %v8868_v57 = vrot.slane %v8854_v37, %v16577_v1 }
0x12a4   : > { %v8529_v30 = vcombine.low %v8501_v59, %v8508_v18  ;;  %v13703_v33 = vcombine.high %v8501_v59, %v8508_v18  ;;  %v8545_v61 = vcombine.low %v8517_v20, %v8524_v25  ;;  %v13704_v52 = vcombine.high %v8517_v20, %v8524_v25 }
0x12a5   : > { %14364 = vmatmul.mubr.msk.f32.vlgmr.msra.gmra.mrb[60].mxu1 %vm2611_vm4, %v8006_v47  ;;  %v8887_v55 = vcombine.low %v8868_v57, %v8884_v17  ;;  %v8888_v51 = vcombine.high %v8868_v57, %v8884_v17 }
0x12a6   : > { %v8536_v3 = vrot.slane %v8529_v30, %v16575_v58  ;;  %v8544_v21 = vrot.slane %v13703_v33, %v16575_v58  ;;  %v8552_v28 = vrot.slane %v8545_v61, %v16575_v58  ;;  %v8560_v15 = vrot.slane %v13704_v52, %v16575_v58  ;;  %14639 = vmatpush3.bf16.xpose.msk.msra.mxu1 %vm17551_vm5, %v14637_v12 }
0x12a7   : > { %14377 = vmatprep.mubr.msk.f32.mxu1 %vm15764_vm1, %v15763_v44  ;;  %14644 = vmatprep.subr.bf16.mxu1 %v15770_v45  ;;  %v14641_v49 = vpack.c.bf16 %v8887_v55, %v8819_v62  ;;  %v14645_v16 = vpack.c.bf16 %v8888_v51, %v8820_v46 }
0x12a8   : > { %v8561_v13 = vcombine.low %v8536_v3, %v8544_v21  ;;  %v8577_v43 = vcombine.low %v8552_v28, %v8560_v15  ;;  %v8562_v6 = vcombine.high %v8536_v3, %v8544_v21  ;;  %v8578_v2 = vcombine.high %v8552_v28, %v8560_v15 }
0x12aa   : > { %v8569_v4 = vrot.slane %v8561_v13, %v16577_v1  ;;  %v8585_v24 = vrot.slane %v8577_v43, %v16577_v1  ;;  %v8576_v36 = vrot.slane %v8562_v6, %v16577_v1  ;;  %v8592_v29 = vrot.slane %v8578_v2, %v16577_v1 }
0x12ac   : > { %v8593_v23 = vcombine.low %v8569_v4, %v8585_v24  ;;  %v8594_v27 = vcombine.high %v8569_v4, %v8585_v24  ;;  %v8595_v60 = vcombine.low %v8576_v36, %v8592_v29  ;;  %v8596_v35 = vcombine.high %v8576_v36, %v8592_v29 }
0x12ae   : > { %14371 = vmatmul.mubr.msk.f32.vlgmr.msra.gmra.mrb[54].mxu0 %vm1821_vm2, %v8593_v23  ;;  %14378 = vmatmul.mubr.msk.f32.vlgmr.msra.gmra.mrb[62].mxu1 %vm1821_vm2, %v8594_v27 }
0x12af   : > { %14643 = vmatpush3.bf16.xpose.msk.msra.mxu0 %vm17551_vm5, %v14641_v49  ;;  %14647 = vmatpush3.bf16.xpose.msk.msra.mxu1 %vm17551_vm5, %v14645_v16 }
0x12b0   : > { %14384 = vmatprep.mubr.msk.f32.mxu0 %vm15764_vm1, %v15763_v44  ;;  %14391 = vmatprep.mubr.msk.f32.mxu1 %vm15764_vm1, %v15763_v44 }
0x12b1   : > { %14648 = vmatprep.subr.bf16.mxu0 %v15770_v45  ;;  %14651 = vmatprep.subr.bf16.mxu1 %v15770_v45 }
0x12b6   : > { %14385 = vmatmul.mubr.msk.f32.vlgmr.msra.gmra.mrb[56].mxu0 %vm1821_vm2, %v8595_v60  ;;  %14392 = vmatmul.mubr.msk.f32.vlgmr.msra.gmra.mrb[64].mxu1 %vm1821_vm2, %v8596_v35 }
0x12b7   : > { %14398 = vmatprep.mubr.msk.f32.mxu0 %vm15764_vm1, %v15763_v44  ;;  %14405 = vmatprep.mubr.msk.f32.mxu1 %vm15764_vm1, %v15763_v44 }
0x133b   : > { %v8076_v7 = vpop.f32.mrb[50].mxu0 }
0x133c   : > { %v14344_v26 = vpop.f32.mrb[51].mxu0 }
0x1343   : > { %v8222_v42 = vpop.f32.mrb[52].mxu0 }
0x1344   : > { %v8299_v32 = vcombine.low %v8076_v7, %v8222_v42  ;;  %v8300_v34 = vcombine.high %v8076_v7, %v8222_v42  ;;  %v14358_v39 = vpop.f32.mrb[53].mxu0 }
0x1346   : > { %v8307_v25 = vrot.slane %v8299_v32, %v16575_v58  ;;  %v8314_v37 = vrot.slane %v8300_v34, %v16575_v58 }
0x1347   : > { %v8149_v31 = vpop.f32.mrb[58].mxu1 }
0x1348   : > { %v14351_v11 = vpop.f32.mrb[59].mxu1 }
0x1349   : > { %v17944_v11 = vld [vmem:[#allocation28] ss:$0 sm:$0xff] }
0x1378   : > { %v8295_v41 = vpop.f32.mrb[60].mxu1 }
0x1379   : > { %v8315_v59 = vcombine.low %v8149_v31, %v8295_v41  ;;  %v8316_v18 = vcombine.high %v8149_v31, %v8295_v41  ;;  %v14365_v20 = vpop.f32.mrb[61].mxu1  ;;  %v17948_v41 = vadd.f32 %v17944_v11, %v17633_v9  ;;  %v17964_v9 = vadd.f32 %v17944_v11, %v17635_v22  ;;  %v17980_v22 = vpop.permute.xlu1 %8891 }
0x137a   : > { %v17970_v20 = vld [vmem:[#allocation25] ss:$0 sm:$0xff] }
0x137b   : > { %v8323_v48 = vrot.slane %v8315_v59, %v16575_v58  ;;  %v8330_v47 = vrot.slane %v8316_v18, %v16575_v58 }
0x137d   : > { %v8331_v12 = vcombine.low %v8307_v25, %v8323_v48  ;;  %v8332_v30 = vcombine.high %v8307_v25, %v8323_v48  ;;  %v8347_v33 = vcombine.low %v8314_v37, %v8330_v47  ;;  %v8348_v61 = vcombine.high %v8314_v37, %v8330_v47 }
0x137e   : > { %v6638_v25 = vadd.f32 %v17970_v20, %v17643_v50 }
0x137f   : > { %v8339_v52 = vrot.slane %v8331_v12, %v16577_v1  ;;  %v8346_v63 = vrot.slane %v8332_v30, %v16577_v1  ;;  %v8355_v8 = vrot.slane %v8347_v33, %v16577_v1  ;;  %v8362_v3 = vrot.slane %v8348_v61, %v16577_v1 }
0x1380   : > { %v17976_v37 = vmul.f32 0.35355338, %v6638_v25 }
0x1381   : > { %v8367_v21 = vcombine.low %v8339_v52, %v8346_v63  ;;  %v13701_v28 = vcombine.high %v8339_v52, %v8346_v63  ;;  %v8383_v15 = vcombine.low %v8355_v8, %v8362_v3  ;;  %v13702_v57 = vcombine.high %v8355_v8, %v8362_v3  ;;  %v9256_v17 = vpop.f32.mrb[54].mxu0  ;;  %v17903_v13 = vpop.f32.mrb[62].mxu1 }
0x1382   : > { %v14372_v43 = vpop.f32.mrb[55].mxu0  ;;  %v14379_v62 = vpop.f32.mrb[63].mxu1  ;;  %v9500_v46 = vsel %vm2611_vm4, %v17903_v13, -inf  ;;  %v9497_v4 = vsel %vm2611_vm4, %v9256_v17, -inf }
0x1383   : > { %v8374_v24 = vrot.slane %v8367_v21, %v16575_v58  ;;  %v8382_v55 = vrot.slane %v13701_v28, %v16575_v58  ;;  %v8390_v51 = vrot.slane %v8383_v15, %v16575_v58  ;;  %v8398_v6 = vrot.slane %v13702_v57, %v16575_v58  ;;  %9501 = vmax.xlane.f32.xlu1 %v9500_v46 }
0x1384   : > { %9498 = vmax.xlane.f32.xlu0 %v9497_v4 }
0x1385   : > { %v8400_v2 = vcombine.high %v8374_v24, %v8382_v55  ;;  %v8416_v23 = vcombine.high %v8390_v51, %v8398_v6  ;;  %v8399_v27 = vcombine.low %v8374_v24, %v8382_v55  ;;  %v8415_v49 = vcombine.low %v8390_v51, %v8398_v6 }
0x1387   : > { %v17913_v16 = vrot.slane %v8400_v2, %v16577_v1  ;;  %v17916_v36 = vrot.slane %v8416_v23, %v16577_v1  ;;  %v17919_v29 = vrot.slane %v8399_v27, %v16577_v1  ;;  %v17922_v60 = vrot.slane %v8415_v49, %v16577_v1 }
0x1389   : > { %v17924_v35 = vpop.f32.mrb[56].mxu0  ;;  %v17926_v7 = vpop.f32.mrb[64].mxu1  ;;  %v8433_v26 = vcombine.low %v17913_v16, %v17916_v36  ;;  %v8432_v42 = vcombine.high %v17919_v29, %v17922_v60  ;;  %v8434_v32 = vcombine.high %v17913_v16, %v17916_v36  ;;  %v8431_v34 = vcombine.low %v17919_v29, %v17922_v60 }
0x138a   : > { %v14386_v39 = vpop.f32.mrb[57].mxu0  ;;  %v14393_v31 = vpop.f32.mrb[65].mxu1  ;;  %v9503_v59 = vsel %vm2611_vm4, %v17924_v35, -inf  ;;  %v9506_v18 = vsel %vm2611_vm4, %v17926_v7, -inf }
0x1394   : > { %8897 = vrot.lane.b32.xlu1 %v17650_v19, %s15762_s21 }
0x1398   : > { %8899 = vrot.lane.b32.xlu1 %v17648_v38, %s15762_s21 }
0x139a   : > { %8893 = vrot.lane.b32.xlu0 %v17648_v38, %s15760_s1 }
0x139c   : > { %8905 = vrot.lane.b32.xlu1 %v17648_v38, %s15761_s15 }
0x13a0   : > { %10135 = vrot.lane.b32.xlu1 %v17948_v41, %s15760_s1 }
0x13a4   : > { %10141 = vrot.lane.b32.xlu1 %v17948_v41, %s15762_s21 }
0x13a8   : > { %10147 = vrot.lane.b32.xlu1 %v17948_v41, %s15761_s15 }
0x13b9   : > { %9504 = vmax.xlane.f32.xlu0 %v9503_v59 }
0x13bd   : > { %9507 = vmax.xlane.f32.xlu0 %v9506_v18 }
0x13d3   : > { %8903 = vrot.lane.b32.xlu0 %v17650_v19, %s15761_s15 }
0x13d7   : > { %10133 = vrot.lane.b32.xlu0 %v17964_v9, %s15760_s1 }
0x13db   : > { %10139 = vrot.lane.b32.xlu0 %v17964_v9, %s15762_s21 }
0x13df   : > { %10145 = vrot.lane.b32.xlu0 %v17964_v9, %s15761_s15 }
0x13e3   : > { %9986 = vrot.lane.b32.xlu0 %v17976_v37, %s15760_s1 }
0x1410   : > { %v9502_v48 = vpop.xlane.xlu1 %9501 }
0x1411   : > { %v9499_v47 = vpop.xlane.xlu0 %9498 }
0x1412   : > { %v9509_v12 = vsub.f32 %v9256_v17, %v9499_v47 }
0x1414   : > { %v9513_v30 = vmul.f32 1.442695, %v9509_v12  ;;  %v8898_v33 = vpop.permute.xlu1 %8897 }
0x1415   : > { %v8894_v63 = vpop.permute.xlu0 %8893 }
0x1416   : > { %15033 = vpow2.f32 %v9513_v30 }
0x1418   : > { %v8900_v61 = vpop.permute.xlu1 %8899 }
0x1419   : > { %v8977_v52 = vcombine.low %v17648_v38, %v8900_v61  ;;  %v8978_v50 = vcombine.high %v17648_v38, %v8900_v61 }
0x141b   : > { %v8985_v28 = vrot.slane %v8977_v52, %v16575_v58  ;;  %v8992_v15 = vrot.slane %v8978_v50, %v16575_v58 }
0x141c   : > { %v8906_v8 = vpop.permute.xlu1 %8905 }
0x141d   : > { %v8993_v3 = vcombine.low %v8894_v63, %v8906_v8  ;;  %v8994_v21 = vcombine.high %v8894_v63, %v8906_v8  ;;  %v9510_v63 = vsub.f32 %v17903_v13, %v9502_v48 }
0x141f   : > { %v9001_v57 = vrot.slane %v8993_v3, %v16575_v58  ;;  %v9008_v17 = vrot.slane %v8994_v21, %v16575_v58  ;;  %v9515_v21 = vmul.f32 1.442695, %v9510_v63 }
0x1420   : > { %v17988_v43 = vpop.eup %15033 }
0x1421   : > { %v9009_v62 = vcombine.low %v8985_v28, %v9001_v57  ;;  %v9010_v46 = vcombine.high %v8985_v28, %v9001_v57  ;;  %v9025_v4 = vcombine.low %v8992_v15, %v9008_v17  ;;  %v9026_v24 = vcombine.high %v8992_v15, %v9008_v17 }
0x1422   : > { %v9521_v38 = vsel %vm2611_vm4, %v17988_v43, 0.0  ;;  %v8909_v17 = vcombine.low %v17650_v19, %v8898_v33 }
0x1423   : > { %v9017_v55 = vrot.slane %v9009_v62, %v16577_v1  ;;  %v9024_v51 = vrot.slane %v9010_v46, %v16577_v1  ;;  %v9033_v6 = vrot.slane %v9025_v4, %v16577_v1  ;;  %v9040_v2 = vrot.slane %v9026_v24, %v16577_v1  ;;  %9522 = vadd.xlane.f32.xlu1 %v9521_v38 }
0x1424   : > { %v8910_v62 = vcombine.high %v17650_v19, %v8898_v33 }
0x1425   : > { %v9113_v23 = vcombine.low %v9017_v55, %v9024_v51  ;;  %v13711_v27 = vcombine.high %v9017_v55, %v9024_v51  ;;  %v9129_v49 = vcombine.low %v9033_v6, %v9040_v2  ;;  %v13712_v39 = vcombine.high %v9033_v6, %v9040_v2 }
0x1426   : > { %v8924_v48 = vrot.slane %v8910_v62, %v16575_v58 }
0x1427   : > { %v9120_v31 = vrot.slane %v9113_v23, %v16575_v58  ;;  %v9128_v59 = vrot.slane %v13711_v27, %v16575_v58  ;;  %v9136_v18 = vrot.slane %v9129_v49, %v16575_v58  ;;  %v9144_v25 = vrot.slane %v13712_v39, %v16575_v58 }
0x1429   : > { %v9146_v47 = vcombine.high %v9120_v31, %v9128_v59  ;;  %v9162_v12 = vcombine.high %v9136_v18, %v9144_v25  ;;  %v9145_v39 = vcombine.low %v9120_v31, %v9128_v59 }
0x142b   : > { %v18001_v30 = vrot.slane %v9146_v47, %v16577_v1  ;;  %v18004_v61 = vrot.slane %v9162_v12, %v16577_v1  ;;  %v9161_v47 = vcombine.low %v9136_v18, %v9144_v25  ;;  %v9153_v25 = vrot.slane %v9145_v39, %v16577_v1 }
0x142d   : > { %v9179_v52 = vcombine.low %v18001_v30, %v18004_v61  ;;  %v9180_v50 = vcombine.high %v18001_v30, %v18004_v61 }
0x1446   : > { %v9505_v8 = vpop.xlane.xlu0 %9504 }
0x1447   : > { %v9511_v3 = vsub.f32 %v17924_v35, %v9505_v8  ;;  %v8917_v35 = vrot.slane %v8909_v17, %v16575_v58 }
0x1449   : > { %v9517_v28 = vmul.f32 1.442695, %v9511_v3 }
0x144a   : > { %v9508_v15 = vpop.xlane.xlu0 %9507 }
0x144b   : > { %15035 = vpow2.f32 %v9517_v28  ;;  %v9512_v57 = vsub.f32 %v17926_v7, %v9508_v15 }
0x144c   : > { %15037 = vpow2.f32 %v9515_v21 }
0x144d   : > { %v9519_v46 = vmul.f32 1.442695, %v9512_v57 }
0x144e   : > { %v8904_v4 = vpop.permute.xlu0 %8903 }
0x144f   : > { %15039 = vpow2.f32 %v9519_v46  ;;  %v8925_v24 = vcombine.low %v17980_v22, %v8904_v4  ;;  %v8926_v13 = vcombine.high %v17980_v22, %v8904_v4  ;;  %v9169_v46 = vrot.slane %v9161_v47, %v16577_v1  ;;  %v10136_v47 = vpop.permute.xlu1 %10135 }
0x1451   : > { %v8933_v38 = vrot.slane %v8925_v24, %v16575_v58  ;;  %v8940_v7 = vrot.slane %v8926_v13, %v16575_v58 }
0x1453   : > { %v8941_v55 = vcombine.low %v8917_v35, %v8933_v38  ;;  %v8942_v51 = vcombine.high %v8917_v35, %v8933_v38  ;;  %v8957_v6 = vcombine.low %v8924_v48, %v8940_v7  ;;  %v8958_v2 = vcombine.high %v8924_v48, %v8940_v7 }
0x1455   : > { %v18021_v19 = vpop.eup %15035  ;;  %v8949_v33 = vrot.slane %v8941_v55, %v16577_v1  ;;  %v8956_v23 = vrot.slane %v8942_v51, %v16577_v1  ;;  %v8965_v22 = vrot.slane %v8957_v6, %v16577_v1  ;;  %v8972_v27 = vrot.slane %v8958_v2, %v16577_v1 }
0x1456   : > { %v9527_v49 = vsel %vm2611_vm4, %v18021_v19, 0.0  ;;  %v18029_v12 = vpop.eup %15037  ;;  %v9177_v55 = vcombine.low %v9153_v25, %v9169_v46  ;;  %v9178_v51 = vcombine.high %v9153_v25, %v9169_v46 }
0x1457   : > { %v9045_v63 = vcombine.low %v8949_v33, %v8956_v23  ;;  %v13709_v8 = vcombine.high %v8949_v33, %v8956_v23  ;;  %v9061_v3 = vcombine.low %v8965_v22, %v8972_v27  ;;  %v13710_v21 = vcombine.high %v8965_v22, %v8972_v27  ;;  %9528 = vadd.xlane.f32.xlu0 %v9527_v49 }
0x1458   : > { %v9524_v31 = vsel %vm2611_vm4, %v18029_v12, 0.0 }
0x1459   : > { %v18031_v28 = vpop.eup %15039  ;;  %v9052_v15 = vrot.slane %v9045_v63, %v16575_v58  ;;  %v9060_v57 = vrot.slane %v13709_v8, %v16575_v58  ;;  %v9068_v17 = vrot.slane %v9061_v3, %v16575_v58  ;;  %v9076_v62 = vrot.slane %v13710_v21, %v16575_v58  ;;  %v10142_v63 = vpop.permute.xlu1 %10141 }
0x145a   : > { %v9530_v59 = vsel %vm2611_vm4, %v18031_v28, 0.0 }
0x145b   : > { %9525 = vadd.xlane.f32.xlu0 %v9524_v31  ;;  %9531 = vadd.xlane.f32.xlu1 %v9530_v59  ;;  %v9077_v18 = vcombine.low %v9052_v15, %v9060_v57  ;;  %v9093_v4 = vcombine.low %v9068_v17, %v9076_v62  ;;  %v9078_v24 = vcombine.high %v9052_v15, %v9060_v57 }
0x145c   : > { %v9094_v13 = vcombine.high %v9068_v17, %v9076_v62 }
0x145d   : > { %v9085_v35 = vrot.slane %v9077_v18, %v16577_v1  ;;  %v9101_v48 = vrot.slane %v9093_v4, %v16577_v1  ;;  %v9092_v38 = vrot.slane %v9078_v24, %v16577_v1  ;;  %v10220_v18 = vcombine.high %v17948_v41, %v10142_v63 }
0x145e   : > { %v9108_v7 = vrot.slane %v9094_v13, %v16577_v1 }
0x145f   : > { %v9109_v6 = vcombine.low %v9085_v35, %v9101_v48  ;;  %v9110_v2 = vcombine.high %v9085_v35, %v9101_v48 }
0x1460   : > { %v9111_v33 = vcombine.low %v9092_v38, %v9108_v7  ;;  %v9112_v23 = vcombine.high %v9092_v38, %v9108_v7 }
0x1461   : > { %v14649_v22 = vpack.c.bf16 %v9177_v55, %v9109_v6  ;;  %v14652_v27 = vpack.c.bf16 %v9178_v51, %v9110_v2 }
0x1462   : > { %v14655_v49 = vpack.c.bf16 %v9179_v52, %v9111_v33  ;;  %v18053_v39 = vpack.c.bf16 %v9180_v50, %v9112_v23  ;;  %v10148_v52 = vpop.permute.xlu1 %10147  ;;  %v10134_v50 = vpop.permute.xlu0 %10133 }
0x1463   : > { %14650 = vmatpush3.bf16.msra.mxu0 %v14649_v22  ;;  %14653 = vmatpush3.bf16.msra.mxu1 %v14652_v27  ;;  %v10235_v17 = vcombine.low %v10136_v47, %v10148_v52  ;;  %v10236_v62 = vcombine.high %v10136_v47, %v10148_v52 }
0x1464   : > { %14654 = vmatprep.subr.bf16.mxu0 %v15770_v45  ;;  %14657 = vmatprep.subr.bf16.mxu1 %v15770_v45 }
0x1465   : > { %v10243_v4 = vrot.slane %v10235_v17, %v16575_v58  ;;  %v10250_v24 = vrot.slane %v10236_v62, %v16575_v58 }
0x1466   : > { %v10140_v3 = vpop.permute.xlu0 %10139 }
0x1467   : > { %v10151_v31 = vcombine.low %v17964_v9, %v10140_v3  ;;  %v10152_v59 = vcombine.high %v17964_v9, %v10140_v3  ;;  %v10234_v9 = vrot.slane %v10220_v18, %v16575_v58 }
0x1469   : > { %v10159_v13 = vrot.slane %v10151_v31, %v16575_v58  ;;  %v10166_v35 = vrot.slane %v10152_v59, %v16575_v58  ;;  %v10267_v2 = vcombine.low %v10234_v9, %v10250_v24  ;;  %v10268_v33 = vcombine.high %v10234_v9, %v10250_v24 }
0x146a   : > { %v10146_v21 = vpop.permute.xlu0 %10145 }
0x146b   : > { %v10167_v15 = vcombine.low %v10134_v50, %v10146_v21  ;;  %v10168_v57 = vcombine.high %v10134_v50, %v10146_v21  ;;  %v10275_v52 = vrot.slane %v10267_v2, %v16577_v1 }
0x146c   : > { %9989 = vrot.lane.b32.xlu1 %v17976_v37, %s15762_s21 }
0x146d   : > { %v10175_v25 = vrot.slane %v10167_v15, %v16575_v58  ;;  %v10182_v46 = vrot.slane %v10168_v57, %v16575_v58 }
0x146e   : > { %v9987_v18 = vpop.permute.xlu0 %9986 }
0x146f   : > { %v10183_v38 = vcombine.low %v10159_v13, %v10175_v25  ;;  %v10184_v7 = vcombine.high %v10159_v13, %v10175_v25  ;;  %v10199_v55 = vcombine.low %v10166_v35, %v10182_v46 }
0x1471   : > { %9992 = vrot.lane.b32.xlu0 %v17976_v37, %s15761_s15  ;;  %v10191_v23 = vrot.slane %v10183_v38, %v16577_v1  ;;  %v10198_v22 = vrot.slane %v10184_v7, %v16577_v1  ;;  %v10207_v27 = vrot.slane %v10199_v55, %v16577_v1 }
0x14b0   : > { %v9523_v8 = vpop.xlane.xlu1 %9522 }
0x14b1   : > { %15041 = vrcp.f32 %v9523_v8  ;;  %v10282_v8 = vrot.slane %v10268_v33, %v16577_v1 }
0x14b3   : > { %v10371_v57 = vcombine.low %v10275_v52, %v10282_v8  ;;  %v13736_v17 = vcombine.high %v10275_v52, %v10282_v8 }
0x14b5   : > { %v18100_v24 = vrot.slane %v13736_v17, %v16575_v58 }
0x14bb   : > { %v15042_v30 = vpop.eup %15041 }
0x14bc   : > { %v9534_v61 = vmul.f32 %v15042_v30, %v17988_v43  ;;  %v10219_v43 = vcombine.low %v17948_v41, %v10142_v63  ;;  %v10200_v41 = vcombine.high %v10166_v35, %v10182_v46  ;;  %v10287_v30 = vcombine.low %v10191_v23, %v10198_v22 }
0x14be   : > { %14399 = vmatmul.mubr.msk.f32.vlgmr.msra.gmra.mrb[58].mxu0 %vm2611_vm4, %v9534_v61  ;;  %v10227_v48 = vrot.slane %v10219_v43, %v16575_v58  ;;  %v13733_v61 = vcombine.high %v10191_v23, %v10198_v22  ;;  %v10294_v62 = vrot.slane %v10287_v30, %v16575_v58 }
0x14bf   : > { %14656 = vmatpush3.bf16.msra.mxu0 %v14655_v49  ;;  %14412 = vmatprep.mubr.msk.f32.mxu0 %vm15764_vm1, %v15763_v44  ;;  %v10214_v49 = vrot.slane %v10200_v41, %v16577_v1 }
0x14c0   : > { %14660 = vmatprep.subr.bf16.mxu0 %v15770_v45  ;;  %v10251_v51 = vcombine.low %v10227_v48, %v10243_v4  ;;  %v10252_v6 = vcombine.high %v10227_v48, %v10243_v4  ;;  %v10302_v31 = vrot.slane %v13733_v61, %v16575_v58  ;;  %v18097_v4 = vrot.slane %v10371_v57, %v16575_v58 }
0x14c1   : > { %v10303_v50 = vcombine.low %v10207_v27, %v10214_v49  ;;  %v13734_v3 = vcombine.high %v10207_v27, %v10214_v49 }
0x14c2   : > { %v10259_v47 = vrot.slane %v10251_v51, %v16577_v1  ;;  %v10266_v63 = vrot.slane %v10252_v6, %v16577_v1  ;;  %v10319_v13 = vcombine.low %v10294_v62, %v10302_v31  ;;  %v10403_v38 = vcombine.low %v18097_v4, %v18100_v24 }
0x14c3   : > { %v10310_v59 = vrot.slane %v10303_v50, %v16575_v58  ;;  %v10318_v43 = vrot.slane %v13734_v3, %v16575_v58 }
0x14c4   : > { %v10355_v21 = vcombine.low %v10259_v47, %v10266_v63  ;;  %v13735_v15 = vcombine.high %v10259_v47, %v10266_v63  ;;  %v18107_v7 = vrot.slane %v10319_v13, %v16577_v1  ;;  %v18116_v2 = vrot.slane %v10403_v38, %v16577_v1 }
0x14c5   : > { %v10335_v35 = vcombine.low %v10310_v59, %v10318_v43 }
0x14c6   : > { %v18091_v25 = vrot.slane %v10355_v21, %v16575_v58  ;;  %v18094_v46 = vrot.slane %v13735_v15, %v16575_v58 }
0x14c7   : > { %v18110_v55 = vrot.slane %v10335_v35, %v16577_v1  ;;  %v10336_v35 = vcombine.high %v10310_v59, %v10318_v43 }
0x14c8   : > { %v10387_v9 = vcombine.low %v18091_v25, %v18094_v46 }
0x14c9   : > { %v10351_v22 = vcombine.low %v18107_v7, %v18110_v55 }
0x14ca   : > { %v18113_v6 = vrot.slane %v10387_v9, %v16577_v1 }
0x14cc   : > { %v10419_v52 = vcombine.low %v18113_v6, %v18116_v2 }
0x14ce   : > { %v14661_v15 = vpack.c.bf16 %v10419_v52, %v10351_v22 }
0x14e4   : > { %v9529_v48 = vpop.xlane.xlu0 %9528 }
0x14e5   : > { %15043 = vrcp.f32 %v9529_v48 }
0x14e8   : > { %v9532_v41 = vpop.xlane.xlu1 %9531  ;;  %v9526_v51 = vpop.xlane.xlu0 %9525 }
0x14e9   : > { %15045 = vrcp.f32 %v9526_v51  ;;  %v10388_v51 = vcombine.high %v18091_v25, %v18094_v46 }
0x14ea   : > { %15047 = vrcp.f32 %v9532_v41 }
0x14ec   : > { %v9990_v33 = vpop.permute.xlu1 %9989  ;;  %v9993_v23 = vpop.permute.xlu0 %9992 }
0x14ed   : > { %v9995_v27 = vcombine.low %v17976_v37, %v9990_v33  ;;  %v9996_v49 = vcombine.high %v17976_v37, %v9990_v33  ;;  %v10011_v47 = vcombine.low %v9987_v18, %v9993_v23  ;;  %v10012_v63 = vcombine.high %v9987_v18, %v9993_v23 }
0x14ee   : > { %v10320_v18 = vcombine.high %v10294_v62, %v10302_v31  ;;  %v10404_v62 = vcombine.high %v18097_v4, %v18100_v24 }
0x14ef   : > { %v15044_v8 = vpop.eup %15043  ;;  %v10003_v30 = vrot.slane %v9995_v27, %v16575_v58  ;;  %v10010_v61 = vrot.slane %v9996_v49, %v16575_v58  ;;  %v10019_v50 = vrot.slane %v10011_v47, %v16575_v58  ;;  %v10026_v3 = vrot.slane %v10012_v63, %v16575_v58 }
0x14f0   : > { %v9538_v21 = vmul.f32 %v15044_v8, %v18021_v19  ;;  %v10334_v22 = vrot.slane %v10320_v18, %v16577_v1  ;;  %v10350_v49 = vrot.slane %v10336_v35, %v16577_v1  ;;  %v10418_v47 = vrot.slane %v10404_v62, %v16577_v1 }
0x14f1   : > { %v10027_v57 = vcombine.low %v10003_v30, %v10019_v50  ;;  %v10028_v17 = vcombine.high %v10003_v30, %v10019_v50  ;;  %v10043_v37 = vcombine.low %v10010_v61, %v10026_v3  ;;  %v10044_v13 = vcombine.high %v10010_v61, %v10026_v3 }
0x14f2   : > { %14413 = vmatmul.mubr.msk.f32.vlgmr.msra.gmra.mrb[60].mxu0 %vm2611_vm4, %v9538_v21  ;;  %v10353_v61 = vcombine.low %v10334_v22, %v10350_v49 }
0x14f3   : > { %v10035_v48 = vrot.slane %v10027_v57, %v16577_v1  ;;  %v10042_v9 = vrot.slane %v10028_v17, %v16577_v1  ;;  %v10051_v38 = vrot.slane %v10043_v37, %v16577_v1  ;;  %v10058_v41 = vrot.slane %v10044_v13, %v16577_v1  ;;  %14663 = vmatpush3.bf16.xpose.msk.msra.mxu0 %vm17551_vm5, %v14661_v15  ;;  %v15046_v19 = vpop.eup %15045 }
0x14f4   : > { %14426 = vmatprep.mubr.msk.f32.mxu0 %vm15764_vm1, %v15763_v44  ;;  %14668 = vmatprep.subr.bf16.mxu0 %v15770_v45  ;;  %v9536_v31 = vmul.f32 %v15046_v19, %v18029_v12  ;;  %v15048_v23 = vpop.eup %15047  ;;  %v10402_v12 = vrot.slane %v10388_v51, %v16577_v1 }
0x14f5   : > { %v10063_v59 = vcombine.low %v10035_v48, %v10042_v9  ;;  %v13731_v43 = vcombine.high %v10035_v48, %v10042_v9  ;;  %v10079_v33 = vcombine.low %v10051_v38, %v10058_v41  ;;  %v13732_v27 = vcombine.high %v10051_v38, %v10058_v41 }
0x14f6   : > { %14406 = vmatmul.mubr.msk.f32.vlgmr.msra.gmra.mrb[66].mxu1 %vm2611_vm4, %v9536_v31  ;;  %v9540_v63 = vmul.f32 %v15048_v23, %v18031_v28  ;;  %v10420_v28 = vcombine.high %v18113_v6, %v18116_v2  ;;  %v10421_v3 = vcombine.low %v10402_v12, %v10418_v47  ;;  %v10354_v6 = vcombine.high %v10334_v22, %v10350_v49 }
0x14f7   : > { %v10070_v25 = vrot.slane %v10063_v59, %v16575_v58  ;;  %v10078_v46 = vrot.slane %v13731_v43, %v16575_v58  ;;  %v10086_v4 = vrot.slane %v10079_v33, %v16575_v58  ;;  %v10094_v24 = vrot.slane %v13732_v27, %v16575_v58  ;;  %14659 = vmatpush3.bf16.msra.mxu1 %v18053_v39 }
0x14f8   : > { %14419 = vmatprep.mubr.msk.f32.mxu1 %vm15764_vm1, %v15763_v44  ;;  %14664 = vmatprep.subr.bf16.mxu1 %v15770_v45  ;;  %v10352_v39 = vcombine.high %v18107_v7, %v18110_v55  ;;  %v14669_v37 = vpack.c.bf16 %v10421_v3, %v10353_v61  ;;  %v10422_v2 = vcombine.high %v10402_v12, %v10418_v47 }
0x14f9   : > { %v10095_v52 = vcombine.low %v10070_v25, %v10078_v46  ;;  %v10111_v8 = vcombine.low %v10086_v4, %v10094_v24  ;;  %v10096_v21 = vcombine.high %v10070_v25, %v10078_v46  ;;  %v10112_v15 = vcombine.high %v10086_v4, %v10094_v24 }
0x14fa   : > { %14420 = vmatmul.mubr.msk.f32.vlgmr.msra.gmra.mrb[68].mxu1 %vm2611_vm4, %v9540_v63  ;;  %v14665_v17 = vpack.c.bf16 %v10420_v28, %v10352_v39  ;;  %v14673_v35 = vpack.c.bf16 %v10422_v2, %v10354_v6 }
0x14fb   : > { %v10103_v30 = vrot.slane %v10095_v52, %v16577_v1  ;;  %v10119_v50 = vrot.slane %v10111_v8, %v16577_v1  ;;  %14433 = vmatprep.mubr.msk.f32.mxu1 %vm15764_vm1, %v15763_v44  ;;  %v10110_v7 = vrot.slane %v10096_v21, %v16577_v1  ;;  %v10126_v55 = vrot.slane %v10112_v15, %v16577_v1 }
0x14fd   : > { %v10127_v57 = vcombine.low %v10103_v30, %v10119_v50  ;;  %v10128_v13 = vcombine.high %v10103_v30, %v10119_v50  ;;  %v10129_v18 = vcombine.low %v10110_v7, %v10126_v55  ;;  %v10130_v48 = vcombine.high %v10110_v7, %v10126_v55 }
0x14ff   : > { %14427 = vmatmul.mubr.msk.f32.vlgmr.msra.gmra.mrb[62].mxu0 %vm1821_vm2, %v10127_v57 }
0x1500   : > { %14667 = vmatpush3.bf16.xpose.msk.msra.mxu1 %vm17551_vm5, %v14665_v17  ;;  %14671 = vmatpush3.bf16.xpose.msk.msra.mxu0 %vm17551_vm5, %v14669_v37 }
0x1501   : > { %14440 = vmatprep.mubr.msk.f32.mxu0 %vm15764_vm1, %v15763_v44  ;;  %14672 = vmatprep.subr.bf16.mxu1 %v15770_v45 }
0x1502   : > { %14676 = vmatprep.subr.bf16.mxu0 %v15770_v45 }
0x1507   : > { %14434 = vmatmul.mubr.msk.f32.vlgmr.msra.gmra.mrb[70].mxu1 %vm1821_vm2, %v10128_v13  ;;  %14441 = vmatmul.mubr.msk.f32.vlgmr.msra.gmra.mrb[64].mxu0 %vm1821_vm2, %v10129_v18 }
0x1508   : > { %14675 = vmatpush3.bf16.xpose.msk.msra.mxu1 %vm17551_vm5, %v14673_v35  ;;  %14447 = vmatprep.mubr.msk.f32.mxu1 %vm15764_vm1, %v15763_v44 }
0x1509   : > { %14679 = vmatprep.subr.bf16.mxu1 %v15770_v45  ;;  %14454 = vmatprep.mubr.msk.f32.mxu0 %vm15764_vm1, %v15763_v44 }
0x150f   : > { %14448 = vmatmul.mubr.msk.f32.vlgmr.msra.gmra.mrb[72].mxu1 %vm1821_vm2, %v10130_v48 }
0x1510   : > { %14461 = vmatprep.mubr.msk.f32.mxu1 %vm15764_vm1, %v15763_v44 }
0x1591   : > { %v9610_v9 = vpop.f32.mrb[58].mxu0 }
0x1592   : > { %v14400_v38 = vpop.f32.mrb[59].mxu0 }
0x15c5   : > { %v9756_v41 = vpop.f32.mrb[60].mxu0 }
0x15c6   : > { %v9833_v19 = vcombine.low %v9610_v9, %v9756_v41  ;;  %v9834_v51 = vcombine.high %v9610_v9, %v9756_v41  ;;  %v14414_v62 = vpop.f32.mrb[61].mxu0 }
0x15c8   : > { %v9841_v27 = vrot.slane %v9833_v19, %v16575_v58  ;;  %v9848_v49 = vrot.slane %v9834_v51, %v16575_v58 }
0x15c9   : > { %v9683_v31 = vpop.f32.mrb[66].mxu1 }
0x15ca   : > { %v14407_v59 = vpop.f32.mrb[67].mxu1 }
0x15cd   : > { %v9829_v43 = vpop.f32.mrb[68].mxu1 }
0x15ce   : > { %v9849_v33 = vcombine.low %v9683_v31, %v9829_v43  ;;  %v9850_v23 = vcombine.high %v9683_v31, %v9829_v43  ;;  %v14421_v22 = vpop.f32.mrb[69].mxu1 }
0x15d0   : > { %v9857_v25 = vrot.slane %v9849_v33, %v16575_v58  ;;  %v9864_v46 = vrot.slane %v9850_v23, %v16575_v58 }
0x15d2   : > { %v9865_v4 = vcombine.low %v9841_v27, %v9857_v25  ;;  %v9866_v24 = vcombine.high %v9841_v27, %v9857_v25  ;;  %v9881_v12 = vcombine.low %v9848_v49, %v9864_v46  ;;  %v9882_v47 = vcombine.high %v9848_v49, %v9864_v46  ;;  %v10790_v63 = vpop.f32.mrb[62].mxu0 }
0x15d3   : > { %v14428_v52 = vpop.f32.mrb[63].mxu0  ;;  %v11031_v8 = vsel %vm2611_vm4, %v10790_v63, -inf  ;;  %v18241_v49 = vadd.f32 %v17944_v11, %v17639_v5  ;;  %v18247_v25 = vadd.f32 %v17944_v11, %v17637_v0  ;;  %v6643_v0 = vadd.f32 %v17970_v20, %v17641_v56 }
0x15d4   : > { %v9873_v30 = vrot.slane %v9865_v4, %v16577_v1  ;;  %v9880_v39 = vrot.slane %v9866_v24, %v16577_v1  ;;  %v9889_v61 = vrot.slane %v9881_v12, %v16577_v1  ;;  %v9896_v50 = vrot.slane %v9882_v47, %v16577_v1  ;;  %11032 = vmax.xlane.f32.xlu1 %v11031_v8 }
0x15d5   : > { %v18263_v5 = vmul.f32 0.35355338, %v6643_v0 }
0x15d6   : > { %v9901_v28 = vcombine.low %v9873_v30, %v9880_v39  ;;  %v13729_v3 = vcombine.high %v9873_v30, %v9880_v39  ;;  %v9917_v21 = vcombine.low %v9889_v61, %v9896_v50  ;;  %v13730_v15 = vcombine.high %v9889_v61, %v9896_v50 }
0x15d8   : > { %v9908_v57 = vrot.slane %v9901_v28, %v16575_v58  ;;  %v9916_v17 = vrot.slane %v13729_v3, %v16575_v58  ;;  %v9924_v37 = vrot.slane %v9917_v21, %v16575_v58  ;;  %v9932_v7 = vrot.slane %v13730_v15, %v16575_v58 }
0x15da   : > { %v10869_v55 = vpop.f32.mrb[70].mxu1  ;;  %v10948_v6 = vpop.f32.mrb[64].mxu0  ;;  %v9933_v2 = vcombine.low %v9908_v57, %v9916_v17  ;;  %v9949_v13 = vcombine.low %v9924_v37, %v9932_v7  ;;  %v9934_v18 = vcombine.high %v9908_v57, %v9916_v17  ;;  %v9950_v35 = vcombine.high %v9924_v37, %v9932_v7 }
0x15db   : > { %v14435_v48 = vpop.f32.mrb[71].mxu1  ;;  %v14442_v9 = vpop.f32.mrb[65].mxu0  ;;  %v11034_v38 = vsel %vm2611_vm4, %v10869_v55, -inf  ;;  %v11037_v23 = vsel %vm2611_vm4, %v10948_v6, -inf }
0x15dc   : > { %11035 = vmax.xlane.f32.xlu0 %v11034_v38  ;;  %v18205_v41 = vrot.slane %v9933_v2, %v16577_v1  ;;  %v18208_v19 = vrot.slane %v9949_v13, %v16577_v1  ;;  %v18211_v51 = vrot.slane %v9934_v18, %v16577_v1  ;;  %v18214_v62 = vrot.slane %v9950_v35, %v16577_v1 }
0x15de   : > { %v9966_v31 = vcombine.high %v18205_v41, %v18208_v19  ;;  %v9968_v59 = vcombine.high %v18211_v51, %v18214_v62  ;;  %v9967_v43 = vcombine.low %v18211_v51, %v18214_v62  ;;  %v9965_v33 = vcombine.low %v18205_v41, %v18208_v19 }
0x15e0   : > { %11038 = vmax.xlane.f32.xlu0 %v11037_v23 }
0x15e2   : > { %v18225_v22 = vpop.f32.mrb[72].mxu1 }
0x15e3   : > { %v14449_v27 = vpop.f32.mrb[73].mxu1  ;;  %v11040_v46 = vsel %vm2611_vm4, %v18225_v22, -inf }
0x15e5   : > { %10427 = vrot.lane.b32.xlu1 %v17652_v54, %s15760_s1 }
0x15e9   : > { %10431 = vrot.lane.b32.xlu1 %v17654_v40, %s15762_s21 }
0x15ed   : > { %10437 = vrot.lane.b32.xlu1 %v17654_v40, %s15761_s15 }
0x15f6   : > { %10425 = vrot.lane.b32.xlu0 %v17654_v40, %s15760_s1 }
0x15fa   : > { %10433 = vrot.lane.b32.xlu0 %v17652_v54, %s15762_s21 }
0x15fe   : > { %10439 = vrot.lane.b32.xlu0 %v17652_v54, %s15761_s15 }
0x1602   : > { %11667 = vrot.lane.b32.xlu0 %v18241_v49, %s15760_s1 }
0x1606   : > { %11675 = vrot.lane.b32.xlu0 %v18247_v25, %s15762_s21 }
0x160a   : > { %11681 = vrot.lane.b32.xlu0 %v18247_v25, %s15761_s15 }
0x1611   : > { %11041 = vmax.xlane.f32.xlu1 %v11040_v46 }
0x1622   : > { %11669 = vrot.lane.b32.xlu1 %v18247_v25, %s15760_s1 }
0x1626   : > { %11673 = vrot.lane.b32.xlu1 %v18241_v49, %s15762_s21 }
0x162a   : > { %11679 = vrot.lane.b32.xlu1 %v18241_v49, %s15761_s15 }
0x162e   : > { %11520 = vrot.lane.b32.xlu1 %v18263_v5, %s15760_s1 }
0x1661   : > { %v11033_v11 = vpop.xlane.xlu1 %11032 }
0x1662   : > { %v11043_v4 = vsub.f32 %v10790_v63, %v11033_v11 }
0x1664   : > { %v11047_v24 = vmul.f32 1.442695, %v11043_v4 }
0x1665   : > { %v10428_v12 = vpop.permute.xlu1 %10427 }
0x1666   : > { %15049 = vpow2.f32 %v11047_v24 }
0x1669   : > { %v11036_v47 = vpop.xlane.xlu0 %11035  ;;  %v10432_v8 = vpop.permute.xlu1 %10431 }
0x166a   : > { %v11044_v52 = vsub.f32 %v10869_v55, %v11036_v47  ;;  %v10443_v20 = vcombine.low %v17654_v40, %v10432_v8  ;;  %v10444_v50 = vcombine.high %v17654_v40, %v10432_v8 }
0x166c   : > { %v11049_v61 = vmul.f32 1.442695, %v11044_v52  ;;  %v10451_v17 = vrot.slane %v10443_v20, %v16575_v58  ;;  %v10458_v37 = vrot.slane %v10444_v50, %v16575_v58 }
0x166d   : > { %v11039_v30 = vpop.xlane.xlu0 %11038  ;;  %v10438_v3 = vpop.permute.xlu1 %10437 }
0x166e   : > { %v11045_v39 = vsub.f32 %v10948_v6, %v11039_v30 }
0x1670   : > { %v18267_v56 = vpop.eup %15049  ;;  %v11051_v28 = vmul.f32 1.442695, %v11045_v39 }
0x1671   : > { %v10426_v21 = vpop.permute.xlu0 %10425  ;;  %v11055_v63 = vsel %vm2611_vm4, %v18267_v56, 0.0 }
0x1672   : > { %15051 = vpow2.f32 %v11051_v28  ;;  %v10459_v15 = vcombine.low %v10426_v21, %v10438_v3  ;;  %v10460_v57 = vcombine.high %v10426_v21, %v10438_v3  ;;  %11056 = vadd.xlane.f32.xlu0 %v11055_v63 }
0x1673   : > { %15053 = vpow2.f32 %v11049_v61 }
0x1674   : > { %v10467_v7 = vrot.slane %v10459_v15, %v16575_v58  ;;  %v10474_v55 = vrot.slane %v10460_v57, %v16575_v58 }
0x1675   : > { %v10434_v40 = vpop.permute.xlu0 %10433 }
0x1676   : > { %v10475_v6 = vcombine.low %v10451_v17, %v10467_v7  ;;  %v10476_v2 = vcombine.high %v10451_v17, %v10467_v7  ;;  %v10491_v13 = vcombine.low %v10458_v37, %v10474_v55  ;;  %v10492_v18 = vcombine.high %v10458_v37, %v10474_v55 }
0x1677   : > { %v10511_v35 = vcombine.low %v17652_v54, %v10434_v40  ;;  %v10512_v27 = vcombine.high %v17652_v54, %v10434_v40 }
0x1678   : > { %v10483_v48 = vrot.slane %v10475_v6, %v16577_v1  ;;  %v10490_v9 = vrot.slane %v10476_v2, %v16577_v1  ;;  %v10499_v38 = vrot.slane %v10491_v13, %v16577_v1  ;;  %v10506_v23 = vrot.slane %v10492_v18, %v16577_v1 }
0x1679   : > { %v10440_v46 = vpop.permute.xlu0 %10439  ;;  %v10519_v47 = vrot.slane %v10511_v35, %v16575_v58  ;;  %v10526_v28 = vrot.slane %v10512_v27, %v16575_v58 }
0x167a   : > { %v10579_v0 = vcombine.low %v10483_v48, %v10490_v9  ;;  %v13737_v11 = vcombine.high %v10483_v48, %v10490_v9  ;;  %v10595_v4 = vcombine.low %v10499_v38, %v10506_v23  ;;  %v13738_v24 = vcombine.high %v10499_v38, %v10506_v23 }
0x167b   : > { %v10527_v52 = vcombine.low %v10428_v12, %v10440_v46  ;;  %v10528_v8 = vcombine.high %v10428_v12, %v10440_v46 }
0x167c   : > { %v18284_v30 = vpop.eup %15051  ;;  %v10586_v39 = vrot.slane %v10579_v0, %v16575_v58  ;;  %v10594_v61 = vrot.slane %v13737_v11, %v16575_v58  ;;  %v10602_v20 = vrot.slane %v10595_v4, %v16575_v58  ;;  %v10610_v50 = vrot.slane %v13738_v24, %v16575_v58 }
0x167d   : > { %v18290_v54 = vpop.eup %15053  ;;  %v10535_v3 = vrot.slane %v10527_v52, %v16575_v58  ;;  %v10542_v21 = vrot.slane %v10528_v8, %v16575_v58  ;;  %v11061_v12 = vsel %vm2611_vm4, %v18284_v30, 0.0 }
0x167e   : > { %11062 = vadd.xlane.f32.xlu1 %v11061_v12  ;;  %v10612_v63 = vcombine.high %v10586_v39, %v10594_v61  ;;  %v10628_v15 = vcombine.high %v10602_v20, %v10610_v50  ;;  %v11058_v55 = vsel %vm2611_vm4, %v18290_v54, 0.0  ;;  %v10611_v48 = vcombine.low %v10586_v39, %v10594_v61 }
0x167f   : > { %v10543_v57 = vcombine.low %v10519_v47, %v10535_v3  ;;  %v10544_v17 = vcombine.high %v10519_v47, %v10535_v3  ;;  %v10559_v37 = vcombine.low %v10526_v28, %v10542_v21  ;;  %v10560_v7 = vcombine.high %v10526_v28, %v10542_v21 }
0x1680   : > { %v10626_v40 = vrot.slane %v10612_v63, %v16577_v1  ;;  %v10642_v6 = vrot.slane %v10628_v15, %v16577_v1  ;;  %v10627_v9 = vcombine.low %v10602_v20, %v10610_v50  ;;  %v10619_v8 = vrot.slane %v10611_v48, %v16577_v1 }
0x1681   : > { %v10551_v2 = vrot.slane %v10543_v57, %v16577_v1  ;;  %v10558_v13 = vrot.slane %v10544_v17, %v16577_v1  ;;  %v10567_v18 = vrot.slane %v10559_v37, %v16577_v1  ;;  %v10574_v35 = vrot.slane %v10560_v7, %v16577_v1 }
0x1682   : > { %11059 = vadd.xlane.f32.xlu1 %v11058_v55  ;;  %v10645_v0 = vcombine.low %v10626_v40, %v10642_v6  ;;  %v10646_v11 = vcombine.high %v10626_v40, %v10642_v6  ;;  %v10635_v28 = vrot.slane %v10627_v9, %v16577_v1 }
0x1683   : > { %v10647_v38 = vcombine.low %v10551_v2, %v10558_v13  ;;  %v13739_v23 = vcombine.high %v10551_v2, %v10558_v13  ;;  %v10663_v27 = vcombine.low %v10567_v18, %v10574_v35  ;;  %v13740_v46 = vcombine.high %v10567_v18, %v10574_v35 }
0x1684   : > { %v10643_v15 = vcombine.low %v10619_v8, %v10635_v28  ;;  %v10644_v57 = vcombine.high %v10619_v8, %v10635_v28 }
0x1685   : > { %v10654_v4 = vrot.slane %v10647_v38, %v16575_v58  ;;  %v10662_v24 = vrot.slane %v13739_v23, %v16575_v58  ;;  %v10670_v47 = vrot.slane %v10663_v27, %v16575_v58  ;;  %v10678_v52 = vrot.slane %v13740_v46, %v16575_v58  ;;  %v11668_v27 = vpop.permute.xlu0 %11667 }
0x1687   : > { %v10679_v39 = vcombine.low %v10654_v4, %v10662_v24  ;;  %v10695_v61 = vcombine.low %v10670_v47, %v10678_v52  ;;  %v10680_v20 = vcombine.high %v10654_v4, %v10662_v24  ;;  %v10696_v50 = vcombine.high %v10670_v47, %v10678_v52 }
0x1689   : > { %v10687_v3 = vrot.slane %v10679_v39, %v16577_v1  ;;  %v10703_v21 = vrot.slane %v10695_v61, %v16577_v1  ;;  %v10694_v12 = vrot.slane %v10680_v20, %v16577_v1  ;;  %v10710_v63 = vrot.slane %v10696_v50, %v16577_v1 }
0x168b   : > { %v10711_v17 = vcombine.low %v10687_v3, %v10703_v21  ;;  %v10712_v37 = vcombine.high %v10687_v3, %v10703_v21  ;;  %v10713_v7 = vcombine.low %v10694_v12, %v10710_v63  ;;  %v10714_v55 = vcombine.high %v10694_v12, %v10710_v63 }
0x168d   : > { %v14677_v40 = vpack.c.bf16 %v10711_v17, %v10643_v15  ;;  %v14680_v6 = vpack.c.bf16 %v10712_v37, %v10644_v57  ;;  %v18315_v2 = vpack.c.bf16 %v10713_v7, %v10645_v0  ;;  %v18317_v13 = vpack.c.bf16 %v10714_v55, %v10646_v11  ;;  %v11676_v0 = vpop.permute.xlu0 %11675 }
0x168e   : > { %v11753_v39 = vcombine.low %v18247_v25, %v11676_v0  ;;  %v11754_v20 = vcombine.high %v18247_v25, %v11676_v0 }
0x168f   : > { %14678 = vmatpush3.bf16.msra.mxu0 %v14677_v40  ;;  %14681 = vmatpush3.bf16.msra.mxu1 %v14680_v6 }
0x1690   : > { %14682 = vmatprep.subr.bf16.mxu0 %v15770_v45  ;;  %14685 = vmatprep.subr.bf16.mxu1 %v15770_v45  ;;  %v11761_v15 = vrot.slane %v11753_v39, %v16575_v58 }
0x1691   : > { %v11682_v47 = vpop.permute.xlu0 %11681 }
0x1693   : > { %11526 = vrot.lane.b32.xlu1 %v18263_v5, %s15761_s15 }
0x169e   : > { %v11042_v18 = vpop.xlane.xlu1 %11041 }
0x169f   : > { %v11046_v35 = vsub.f32 %v18225_v22, %v11042_v18 }
0x16a1   : > { %v11053_v48 = vmul.f32 1.442695, %v11046_v35 }
0x16a2   : > { %v11670_v23 = vpop.permute.xlu1 %11669 }
0x16a3   : > { %15055 = vpow2.f32 %v11053_v48  ;;  %v11769_v52 = vcombine.low %v11670_v23, %v11682_v47  ;;  %v11770_v8 = vcombine.high %v11670_v23, %v11682_v47 }
0x16a5   : > { %v11777_v21 = vrot.slane %v11769_v52, %v16575_v58  ;;  %v11784_v12 = vrot.slane %v11770_v8, %v16575_v58 }
0x16a6   : > { %v11674_v46 = vpop.permute.xlu1 %11673 }
0x16a7   : > { %v11685_v22 = vcombine.low %v18241_v49, %v11674_v46  ;;  %v11686_v28 = vcombine.high %v18241_v49, %v11674_v46  ;;  %v11768_v49 = vrot.slane %v11754_v20, %v16575_v58  ;;  %v11785_v55 = vcombine.low %v11761_v15, %v11777_v21 }
0x16a8   : > { %v11786_v25 = vcombine.high %v11761_v15, %v11777_v21 }
0x16a9   : > { %v11693_v3 = vrot.slane %v11685_v22, %v16575_v58  ;;  %v11700_v63 = vrot.slane %v11686_v28, %v16575_v58  ;;  %v11801_v40 = vcombine.low %v11768_v49, %v11784_v12  ;;  %v11802_v6 = vcombine.high %v11768_v49, %v11784_v12 }
0x16aa   : > { %v11680_v11 = vpop.permute.xlu1 %11679  ;;  %v11800_v46 = vrot.slane %v11786_v25, %v16577_v1 }
0x16ab   : > { %v11701_v4 = vcombine.low %v11668_v27, %v11680_v11  ;;  %v11702_v24 = vcombine.high %v11668_v27, %v11680_v11  ;;  %v11793_v27 = vrot.slane %v11785_v55, %v16577_v1  ;;  %v11809_v0 = vrot.slane %v11801_v40, %v16577_v1 }
0x16ac   : > { %v11816_v11 = vrot.slane %v11802_v6, %v16577_v1 }
0x16ad   : > { %v18324_v9 = vpop.eup %15055  ;;  %v11709_v61 = vrot.slane %v11701_v4, %v16575_v58  ;;  %v11716_v50 = vrot.slane %v11702_v24, %v16575_v58  ;;  %v11889_v52 = vcombine.low %v11793_v27, %v11800_v46  ;;  %v13763_v8 = vcombine.high %v11793_v27, %v11800_v46 }
0x16ae   : > { %v11064_v38 = vsel %vm2611_vm4, %v18324_v9, 0.0  ;;  %v11905_v28 = vcombine.low %v11809_v0, %v11816_v11  ;;  %v13764_v39 = vcombine.high %v11809_v0, %v11816_v11 }
0x16af   : > { %11065 = vadd.xlane.f32.xlu0 %v11064_v38  ;;  %v11717_v57 = vcombine.low %v11693_v3, %v11709_v61  ;;  %v11718_v17 = vcombine.high %v11693_v3, %v11709_v61  ;;  %v11733_v37 = vcombine.low %v11700_v63, %v11716_v50  ;;  %v11734_v7 = vcombine.high %v11700_v63, %v11716_v50  ;;  %v11521_v61 = vpop.permute.xlu1 %11520 }
0x16b0   : > { %v18363_v63 = vrot.slane %v11889_v52, %v16575_v58  ;;  %v18366_v15 = vrot.slane %v13763_v8, %v16575_v58  ;;  %v18372_v49 = vrot.slane %v13764_v39, %v16575_v58 }
0x16b1   : > { %v11725_v18 = vrot.slane %v11717_v57, %v16577_v1  ;;  %v11732_v48 = vrot.slane %v11718_v17, %v16577_v1  ;;  %v11741_v38 = vrot.slane %v11733_v37, %v16577_v1  ;;  %v11748_v23 = vrot.slane %v11734_v7, %v16577_v1 }
0x16b2   : > { %v18369_v57 = vrot.slane %v11905_v28, %v16575_v58  ;;  %v11921_v25 = vcombine.low %v18363_v63, %v18366_v15 }
0x16b3   : > { %v11821_v4 = vcombine.low %v11725_v18, %v11732_v48  ;;  %v13761_v24 = vcombine.high %v11725_v18, %v11732_v48  ;;  %v11837_v47 = vcombine.low %v11741_v38, %v11748_v23  ;;  %v13762_v22 = vcombine.high %v11741_v38, %v11748_v23 }
0x16b4   : > { %v11937_v40 = vcombine.low %v18369_v57, %v18372_v49 }
0x16b5   : > { %v18351_v20 = vrot.slane %v11821_v4, %v16575_v58  ;;  %v18354_v50 = vrot.slane %v13761_v24, %v16575_v58  ;;  %v18357_v3 = vrot.slane %v11837_v47, %v16575_v58  ;;  %v18360_v21 = vrot.slane %v13762_v22, %v16575_v58 }
0x16b6   : > { %v11945_v48 = vrot.slane %v11937_v40, %v16577_v1 }
0x16b7   : > { %v11853_v7 = vcombine.low %v18351_v20, %v18354_v50  ;;  %v11869_v55 = vcombine.low %v18357_v3, %v18360_v21 }
0x16b9   : > { %v11861_v6 = vrot.slane %v11853_v7, %v16577_v1  ;;  %v11877_v18 = vrot.slane %v11869_v55, %v16577_v1 }
0x16bb   : > { %v11885_v38 = vcombine.low %v11861_v6, %v11877_v18 }
0x16c5   : > { %11523 = vrot.lane.b32.xlu0 %v18263_v5, %s15762_s21 }
0x16ff   : > { %v11057_v35 = vpop.xlane.xlu0 %11056 }
0x1700   : > { %15057 = vrcp.f32 %v11057_v35  ;;  %v11929_v35 = vrot.slane %v11921_v25, %v16577_v1  ;;  %v11870_v25 = vcombine.high %v18357_v3, %v18360_v21 }
0x1702   : > { %v11953_v27 = vcombine.low %v11929_v35, %v11945_v48 }
0x1704   : > { %v14689_v46 = vpack.c.bf16 %v11953_v27, %v11885_v38  ;;  %v11938_v27 = vcombine.high %v18369_v57, %v18372_v49 }
0x1706   : > { %v11952_v49 = vrot.slane %v11938_v27, %v16577_v1 }
0x170a   : > { %v15058_v12 = vpop.eup %15057 }
0x170b   : > { %v11068_v17 = vmul.f32 %v15058_v12, %v18267_v56  ;;  %v11063_v37 = vpop.xlane.xlu1 %11062  ;;  %v11886_v12 = vcombine.high %v11861_v6, %v11877_v18  ;;  %v11922_v18 = vcombine.high %v18363_v63, %v18366_v15 }
0x170c   : > { %15059 = vrcp.f32 %v11063_v37 }
0x170d   : > { %14455 = vmatmul.mubr.msk.f32.vlgmr.msra.gmra.mrb[66].mxu0 %vm2611_vm4, %v11068_v17 }
0x170e   : > { %14684 = vmatpush3.bf16.msra.mxu0 %v18315_v2  ;;  %14468 = vmatprep.mubr.msk.f32.mxu0 %vm15764_vm1, %v15763_v44 }
0x170f   : > { %v11060_v56 = vpop.xlane.xlu1 %11059  ;;  %14688 = vmatprep.subr.bf16.mxu0 %v15770_v45 }
0x1710   : > { %15061 = vrcp.f32 %v11060_v56 }
0x1716   : > { %v15060_v23 = vpop.eup %15059 }
0x1717   : > { %v11072_v2 = vmul.f32 %v15060_v23, %v18284_v30  ;;  %v11527_v30 = vpop.permute.xlu1 %11526 }
0x1718   : > { %v11545_v24 = vcombine.low %v11521_v61, %v11527_v30  ;;  %v11546_v47 = vcombine.high %v11521_v61, %v11527_v30  ;;  %v11854_v61 = vcombine.high %v18351_v20, %v18354_v50 }
0x1719   : > { %14469 = vmatmul.mubr.msk.f32.vlgmr.msra.gmra.mrb[68].mxu0 %vm2611_vm4, %v11072_v2 }
0x171a   : > { %v15062_v0 = vpop.eup %15061  ;;  %14691 = vmatpush3.bf16.xpose.msk.msra.mxu0 %vm17551_vm5, %v14689_v46  ;;  %14482 = vmatprep.mubr.msk.f32.mxu0 %vm15764_vm1, %v15763_v44  ;;  %v11553_v8 = vrot.slane %v11545_v24, %v16575_v58  ;;  %v11560_v28 = vrot.slane %v11546_v47, %v16575_v58  ;;  %v11868_v2 = vrot.slane %v11854_v61, %v16577_v1 }
0x171b   : > { %v11070_v11 = vmul.f32 %v15062_v0, %v18290_v54  ;;  %14696 = vmatprep.subr.bf16.mxu0 %v15770_v45  ;;  %v11884_v46 = vrot.slane %v11870_v25, %v16577_v1 }
0x171d   : > { %14462 = vmatmul.mubr.msk.f32.vlgmr.msra.gmra.mrb[74].mxu1 %vm2611_vm4, %v11070_v11  ;;  %v11888_v24 = vcombine.high %v11868_v2, %v11884_v46 }
0x171e   : > { %14687 = vmatpush3.bf16.msra.mxu1 %v18317_v13  ;;  %14475 = vmatprep.mubr.msk.f32.mxu1 %vm15764_vm1, %v15763_v44 }
0x171f   : > { %14692 = vmatprep.subr.bf16.mxu1 %v15770_v45 }
0x173c   : > { %v11066_v4 = vpop.xlane.xlu0 %11065 }
0x173d   : > { %15063 = vrcp.f32 %v11066_v4  ;;  %v11887_v4 = vcombine.low %v11868_v2, %v11884_v46 }
0x1740   : > { %v11524_v22 = vpop.permute.xlu0 %11523 }
0x1741   : > { %v11529_v52 = vcombine.low %v18263_v5, %v11524_v22  ;;  %v11530_v54 = vcombine.high %v18263_v5, %v11524_v22  ;;  %v11954_v5 = vcombine.high %v11929_v35, %v11945_v48 }
0x1743   : > { %v11537_v13 = vrot.slane %v11529_v52, %v16575_v58  ;;  %v11544_v39 = vrot.slane %v11530_v54, %v16575_v58  ;;  %v14693_v50 = vpack.c.bf16 %v11954_v5, %v11886_v12 }
0x1745   : > { %v11561_v17 = vcombine.low %v11537_v13, %v11553_v8  ;;  %v11562_v37 = vcombine.high %v11537_v13, %v11553_v8  ;;  %v11577_v7 = vcombine.low %v11544_v39, %v11560_v28  ;;  %v11578_v55 = vcombine.high %v11544_v39, %v11560_v28 }
0x1747   : > { %v15064_v40 = vpop.eup %15063  ;;  %v11569_v56 = vrot.slane %v11561_v17, %v16577_v1  ;;  %v11576_v38 = vrot.slane %v11562_v37, %v16577_v1  ;;  %v11585_v23 = vrot.slane %v11577_v7, %v16577_v1  ;;  %v11592_v6 = vrot.slane %v11578_v55, %v16577_v1 }
0x1748   : > { %v11074_v20 = vmul.f32 %v15064_v40, %v18324_v9  ;;  %v11936_v9 = vrot.slane %v11922_v18, %v16577_v1 }
0x1749   : > { %v11597_v3 = vcombine.low %v11569_v56, %v11576_v38  ;;  %v13759_v21 = vcombine.high %v11569_v56, %v11576_v38  ;;  %v11613_v35 = vcombine.low %v11585_v23, %v11592_v6  ;;  %v13760_v48 = vcombine.high %v11585_v23, %v11592_v6 }
0x174a   : > { %14476 = vmatmul.mubr.msk.f32.vlgmr.msra.gmra.mrb[76].mxu1 %vm2611_vm4, %v11074_v20  ;;  %v11955_v52 = vcombine.low %v11936_v9, %v11952_v49  ;;  %v11956_v54 = vcombine.high %v11936_v9, %v11952_v49 }
0x174b   : > { %v11604_v0 = vrot.slane %v11597_v3, %v16575_v58  ;;  %v11612_v63 = vrot.slane %v13759_v21, %v16575_v58  ;;  %v11620_v15 = vrot.slane %v11613_v35, %v16575_v58  ;;  %v11628_v57 = vrot.slane %v13760_v48, %v16575_v58  ;;  %14695 = vmatpush3.bf16.xpose.msk.msra.mxu1 %vm17551_vm5, %v14693_v50 }
0x174c   : > { %14489 = vmatprep.mubr.msk.f32.mxu1 %vm15764_vm1, %v15763_v44  ;;  %14700 = vmatprep.subr.bf16.mxu1 %v15770_v45  ;;  %v14697_v12 = vpack.c.bf16 %v11955_v52, %v11887_v4  ;;  %v14701_v17 = vpack.c.bf16 %v11956_v54, %v11888_v24 }
0x174d   : > { %v11629_v11 = vcombine.low %v11604_v0, %v11612_v63  ;;  %v11645_v30 = vcombine.low %v11620_v15, %v11628_v57  ;;  %v11630_v8 = vcombine.high %v11604_v0, %v11612_v63  ;;  %v11646_v28 = vcombine.high %v11620_v15, %v11628_v57 }
0x174f   : > { %v11637_v47 = vrot.slane %v11629_v11, %v16577_v1  ;;  %v11653_v22 = vrot.slane %v11645_v30, %v16577_v1  ;;  %v11644_v37 = vrot.slane %v11630_v8, %v16577_v1  ;;  %v11660_v7 = vrot.slane %v11646_v28, %v16577_v1 }
0x1751   : > { %v11661_v13 = vcombine.low %v11637_v47, %v11653_v22  ;;  %v11662_v39 = vcombine.high %v11637_v47, %v11653_v22  ;;  %v11663_v55 = vcombine.low %v11644_v37, %v11660_v7  ;;  %v11664_v61 = vcombine.high %v11644_v37, %v11660_v7 }
0x1753   : > { %14483 = vmatmul.mubr.msk.f32.vlgmr.msra.gmra.mrb[70].mxu0 %vm1821_vm2, %v11661_v13  ;;  %14490 = vmatmul.mubr.msk.f32.vlgmr.msra.gmra.mrb[78].mxu1 %vm1821_vm2, %v11662_v39 }
0x1754   : > { %14699 = vmatpush3.bf16.xpose.msk.msra.mxu0 %vm17551_vm5, %v14697_v12  ;;  %14703 = vmatpush3.bf16.xpose.msk.msra.mxu1 %vm17551_vm5, %v14701_v17 }
0x1755   : > { %14496 = vmatprep.mubr.msk.f32.mxu0 %vm15764_vm1, %v15763_v44  ;;  %14503 = vmatprep.mubr.msk.f32.mxu1 %vm15764_vm1, %v15763_v44 }
0x1756   : > { %14704 = vmatprep.subr.bf16.mxu0 %v15770_v45  ;;  %14707 = vmatprep.subr.bf16.mxu1 %v15770_v45 }
0x175b   : > { %14497 = vmatmul.mubr.msk.f32.vlgmr.msra.gmra.mrb[72].mxu0 %vm1821_vm2, %v11663_v55  ;;  %14504 = vmatmul.mubr.msk.f32.vlgmr.msra.gmra.mrb[80].mxu1 %vm1821_vm2, %v11664_v61 }
0x175c   : > { %14510 = vmatprep.mubr.msk.f32.mxu0 %vm15764_vm1, %v15763_v44  ;;  %14517 = vmatprep.mubr.msk.f32.mxu1 %vm15764_vm1, %v15763_v44 }
0x17e0   : > { %v11144_v10 = vpop.f32.mrb[66].mxu0 }
0x17e1   : > { %v14456_v25 = vpop.f32.mrb[67].mxu0 }
0x17ec   : > { %v11290_v5 = vpop.f32.mrb[68].mxu0 }
0x17ed   : > { %v11367_v40 = vcombine.low %v11144_v10, %v11290_v5  ;;  %v11368_v56 = vcombine.high %v11144_v10, %v11290_v5  ;;  %v14470_v38 = vpop.f32.mrb[69].mxu0 }
0x17ef   : > { %v11375_v3 = vrot.slane %v11367_v40, %v16575_v58  ;;  %v11382_v21 = vrot.slane %v11368_v56, %v16575_v58 }
0x17f0   : > { %v11217_v23 = vpop.f32.mrb[74].mxu1 }
0x17f1   : > { %v14463_v6 = vpop.f32.mrb[75].mxu1 }
0x181d   : > { %v11363_v18 = vpop.f32.mrb[76].mxu1 }
0x181e   : > { %v11383_v27 = vcombine.low %v11217_v23, %v11363_v18  ;;  %v11384_v20 = vcombine.high %v11217_v23, %v11363_v18  ;;  %v14477_v50 = vpop.f32.mrb[77].mxu1 }
0x1820   : > { %v11391_v35 = vrot.slane %v11383_v27, %v16575_v58  ;;  %v11398_v48 = vrot.slane %v11384_v20, %v16575_v58 }
0x1822   : > { %v11399_v2 = vcombine.low %v11375_v3, %v11391_v35  ;;  %v11400_v46 = vcombine.high %v11375_v3, %v11391_v35  ;;  %v11415_v0 = vcombine.low %v11382_v21, %v11398_v48  ;;  %v11416_v63 = vcombine.high %v11382_v21, %v11398_v48 }
0x1824   : > { %v11407_v15 = vrot.slane %v11399_v2, %v16577_v1  ;;  %v11414_v57 = vrot.slane %v11400_v46, %v16577_v1  ;;  %v11423_v9 = vrot.slane %v11415_v0, %v16577_v1  ;;  %v11430_v49 = vrot.slane %v11416_v63, %v16577_v1 }
0x1826   : > { %v11435_v11 = vcombine.low %v11407_v15, %v11414_v57  ;;  %v13757_v30 = vcombine.high %v11407_v15, %v11414_v57  ;;  %v11451_v4 = vcombine.low %v11423_v9, %v11430_v49  ;;  %v13758_v24 = vcombine.high %v11423_v9, %v11430_v49  ;;  %v12324_v47 = vpop.f32.mrb[70].mxu0  ;;  %v12403_v22 = vpop.f32.mrb[78].mxu1 }
0x1827   : > { %v14484_v52 = vpop.f32.mrb[71].mxu0  ;;  %v14491_v54 = vpop.f32.mrb[79].mxu1  ;;  %v12568_v8 = vsel %vm2611_vm4, %v12403_v22, -inf  ;;  %v12565_v28 = vsel %vm2611_vm4, %v12324_v47, -inf }
0x1828   : > { %v11442_v13 = vrot.slane %v11435_v11, %v16575_v58  ;;  %v11450_v39 = vrot.slane %v13757_v30, %v16575_v58  ;;  %v11458_v12 = vrot.slane %v11451_v4, %v16575_v58  ;;  %v11466_v17 = vrot.slane %v13758_v24, %v16575_v58  ;;  %12569 = vmax.xlane.f32.xlu1 %v12568_v8 }
0x1829   : > { %12566 = vmax.xlane.f32.xlu0 %v12565_v28 }
0x182a   : > { %v11468_v37 = vcombine.high %v11442_v13, %v11450_v39  ;;  %v11484_v7 = vcombine.high %v11458_v12, %v11466_v17  ;;  %v11467_v55 = vcombine.low %v11442_v13, %v11450_v39  ;;  %v11483_v61 = vcombine.low %v11458_v12, %v11466_v17 }
0x182c   : > { %v18475_v10 = vrot.slane %v11468_v37, %v16577_v1  ;;  %v18478_v25 = vrot.slane %v11484_v7, %v16577_v1  ;;  %v18481_v5 = vrot.slane %v11467_v55, %v16577_v1  ;;  %v18484_v40 = vrot.slane %v11483_v61, %v16577_v1 }
0x182e   : > { %v12482_v56 = vpop.f32.mrb[72].mxu0  ;;  %v12561_v38 = vpop.f32.mrb[80].mxu1  ;;  %v11501_v23 = vcombine.low %v18475_v10, %v18478_v25  ;;  %v11500_v6 = vcombine.high %v18481_v5, %v18484_v40  ;;  %v11502_v18 = vcombine.high %v18475_v10, %v18478_v25  ;;  %v11499_v27 = vcombine.low %v18481_v5, %v18484_v40 }
0x182f   : > { %v14498_v20 = vpop.f32.mrb[73].mxu0  ;;  %v14505_v50 = vpop.f32.mrb[81].mxu1  ;;  %v12571_v3 = vsel %vm2611_vm4, %v12482_v56, -inf  ;;  %v12574_v21 = vsel %vm2611_vm4, %v12561_v38, -inf }
0x1830   : > { %12572 = vmax.xlane.f32.xlu0 %v12571_v3 }
0x1834   : > { %12575 = vmax.xlane.f32.xlu0 %v12574_v21 }
0x1839   : > { %11959 = vrot.lane.b32.xlu1 %v17658_v14, %s15760_s1 }
0x183d   : > { %11965 = vrot.lane.b32.xlu1 %v17658_v14, %s15762_s21 }
0x1841   : > { %11967 = vrot.lane.b32.xlu1 %v17656_v53, %s15762_s21 }
0x1845   : > { %11973 = vrot.lane.b32.xlu1 %v17656_v53, %s15761_s15 }
0x184a   : > { %11961 = vrot.lane.b32.xlu0 %v17656_v53, %s15760_s1  ;;  %s18925_s1 = smov 24  }
0x184e   : > { %11971 = vrot.lane.b32.xlu0 %v17658_v14, %s15761_s15 }
0x18b5   : > { %v12570_v35 = vpop.xlane.xlu1 %12569 }
0x18b6   : > { %v12578_v48 = vsub.f32 %v12403_v22, %v12570_v35  ;;  %v12567_v2 = vpop.xlane.xlu0 %12566 }
0x18b7   : > { %v12577_v46 = vsub.f32 %v12324_v47, %v12567_v2 }
0x18b8   : > { %v12583_v0 = vmul.f32 1.442695, %v12578_v48 }
0x18b9   : > { %v12581_v63 = vmul.f32 1.442695, %v12577_v46  ;;  %v11960_v15 = vpop.permute.xlu1 %11959 }
0x18ba   : > { %15065 = vpow2.f32 %v12583_v0 }
0x18bb   : > { %15067 = vpow2.f32 %v12581_v63 }
0x18bd   : > { %v12573_v57 = vpop.xlane.xlu0 %12572  ;;  %v11966_v9 = vpop.permute.xlu1 %11965 }
0x18be   : > { %v12579_v49 = vsub.f32 %v12482_v56, %v12573_v57  ;;  %v11977_v7 = vcombine.low %v17658_v14, %v11966_v9 }
0x18c0   : > { %v12585_v11 = vmul.f32 1.442695, %v12579_v49  ;;  %v11985_v48 = vrot.slane %v11977_v7, %v16575_v58 }
0x18c1   : > { %v12576_v30 = vpop.xlane.xlu0 %12575  ;;  %v11968_v4 = vpop.permute.xlu1 %11967 }
0x18c2   : > { %15069 = vpow2.f32 %v12585_v11  ;;  %v12580_v24 = vsub.f32 %v12561_v38, %v12576_v30  ;;  %v12045_v22 = vcombine.low %v17656_v53, %v11968_v4  ;;  %v12046_v47 = vcombine.high %v17656_v53, %v11968_v4 }
0x18c3   : > { %v11978_v38 = vcombine.high %v17658_v14, %v11966_v9 }
0x18c4   : > { %v18508_v52 = vpop.eup %15065  ;;  %v12587_v54 = vmul.f32 1.442695, %v12580_v24  ;;  %v12053_v55 = vrot.slane %v12045_v22, %v16575_v58  ;;  %v12060_v53 = vrot.slane %v12046_v47, %v16575_v58 }
0x18c5   : > { %v18512_v8 = vpop.eup %15067  ;;  %v11962_v28 = vpop.permute.xlu0 %11961  ;;  %v12592_v39 = vsel %vm2611_vm4, %v18508_v52, 0.0  ;;  %v11992_v14 = vrot.slane %v11978_v38, %v16575_v58 }
0x18c6   : > { %v11974_v13 = vpop.permute.xlu1 %11973  ;;  %15071 = vpow2.f32 %v12587_v54  ;;  %v12589_v37 = vsel %vm2611_vm4, %v18512_v8, 0.0  ;;  %12593 = vadd.xlane.f32.xlu0 %v12592_v39 }
0x18c7   : > { %v12061_v12 = vcombine.low %v11962_v28, %v11974_v13  ;;  %v12062_v17 = vcombine.high %v11962_v28, %v11974_v13  ;;  %12590 = vadd.xlane.f32.xlu1 %v12589_v37 }
0x18c9   : > { %v12069_v61 = vrot.slane %v12061_v12, %v16575_v58  ;;  %v12076_v56 = vrot.slane %v12062_v17, %v16575_v58  ;;  %v11972_v20 = vpop.permute.xlu0 %11971 }
0x18ca   : > { %v11993_v2 = vcombine.low %v11960_v15, %v11972_v20  ;;  %v11994_v46 = vcombine.high %v11960_v15, %v11972_v20 }
0x18cb   : > { %v12077_v50 = vcombine.low %v12053_v55, %v12069_v61  ;;  %v12078_v3 = vcombine.high %v12053_v55, %v12069_v61  ;;  %v12093_v21 = vcombine.low %v12060_v53, %v12076_v56  ;;  %v12094_v35 = vcombine.high %v12060_v53, %v12076_v56 }
0x18cc   : > { %v18525_v0 = vpop.eup %15069  ;;  %v12001_v9 = vrot.slane %v11993_v2, %v16575_v58  ;;  %v12008_v30 = vrot.slane %v11994_v46, %v16575_v58 }
0x18cd   : > { %v12085_v63 = vrot.slane %v12077_v50, %v16577_v1  ;;  %v12092_v57 = vrot.slane %v12078_v3, %v16577_v1  ;;  %v12101_v49 = vrot.slane %v12093_v21, %v16577_v1  ;;  %v12108_v11 = vrot.slane %v12094_v35, %v16577_v1 }
0x18ce   : > { %v12595_v4 = vsel %vm2611_vm4, %v18525_v0, 0.0  ;;  %v12009_v47 = vcombine.low %v11985_v48, %v12001_v9  ;;  %v12010_v28 = vcombine.high %v11985_v48, %v12001_v9  ;;  %v12025_v13 = vcombine.low %v11992_v14, %v12008_v30 }
0x18cf   : > { %v12181_v15 = vcombine.low %v12085_v63, %v12092_v57  ;;  %v13767_v24 = vcombine.high %v12085_v63, %v12092_v57  ;;  %v12197_v54 = vcombine.low %v12101_v49, %v12108_v11  ;;  %v13768_v22 = vcombine.high %v12101_v49, %v12108_v11  ;;  %12596 = vadd.xlane.f32.xlu0 %v12595_v4 }
0x18d0   : > { %v12026_v39 = vcombine.high %v11992_v14, %v12008_v30  ;;  %v18536_v12 = vpop.eup %15071  ;;  %v12017_v53 = vrot.slane %v12009_v47, %v16577_v1  ;;  %v12024_v61 = vrot.slane %v12010_v28, %v16577_v1  ;;  %v12033_v56 = vrot.slane %v12025_v13, %v16577_v1 }
0x18d1   : > { %v12188_v17 = vrot.slane %v12181_v15, %v16575_v58  ;;  %v12196_v37 = vrot.slane %v13767_v24, %v16575_v58  ;;  %v12204_v7 = vrot.slane %v12197_v54, %v16575_v58  ;;  %v12212_v55 = vrot.slane %v13768_v22, %v16575_v58 }
0x18d2   : > { %v12040_v38 = vrot.slane %v12026_v39, %v16577_v1  ;;  %v12598_v20 = vsel %vm2611_vm4, %v18536_v12, 0.0  ;;  %v12113_v35 = vcombine.low %v12017_v53, %v12024_v61  ;;  %v13765_v48 = vcombine.high %v12017_v53, %v12024_v61 }
0x18d3   : > { %v12213_v50 = vcombine.low %v12188_v17, %v12196_v37  ;;  %v12229_v3 = vcombine.low %v12204_v7, %v12212_v55  ;;  %v12214_v21 = vcombine.high %v12188_v17, %v12196_v37  ;;  %12599 = vadd.xlane.f32.xlu1 %v12598_v20  ;;  %v12230_v57 = vcombine.high %v12204_v7, %v12212_v55 }
0x18d4   : > { %v12129_v2 = vcombine.low %v12033_v56, %v12040_v38  ;;  %v13766_v46 = vcombine.high %v12033_v56, %v12040_v38  ;;  %v12120_v49 = vrot.slane %v12113_v35, %v16575_v58  ;;  %v12128_v11 = vrot.slane %v13765_v48, %v16575_v58 }
0x18d5   : > { %v12228_v63 = vrot.slane %v12214_v21, %v16577_v1  ;;  %v12221_v30 = vrot.slane %v12213_v50, %v16577_v1  ;;  %v12237_v4 = vrot.slane %v12229_v3, %v16577_v1  ;;  %v12244_v15 = vrot.slane %v12230_v57, %v16577_v1 }
0x18d6   : > { %v12136_v14 = vrot.slane %v12129_v2, %v16575_v58  ;;  %v12144_v9 = vrot.slane %v13766_v46, %v16575_v58  ;;  %v12145_v24 = vcombine.low %v12120_v49, %v12128_v11  ;;  %v12146_v22 = vcombine.high %v12120_v49, %v12128_v11 }
0x18d7   : > { %v12247_v28 = vcombine.low %v12228_v63, %v12244_v15  ;;  %v12248_v13 = vcombine.high %v12228_v63, %v12244_v15  ;;  %v12245_v55 = vcombine.low %v12221_v30, %v12237_v4  ;;  %v12246_v53 = vcombine.high %v12221_v30, %v12237_v4 }
0x18d8   : > { %v12161_v54 = vcombine.low %v12136_v14, %v12144_v9  ;;  %v12162_v47 = vcombine.high %v12136_v14, %v12144_v9  ;;  %v12153_v39 = vrot.slane %v12145_v24, %v16577_v1  ;;  %v12160_v37 = vrot.slane %v12146_v22, %v16577_v1 }
0x18da   : > { %v12169_v17 = vrot.slane %v12161_v54, %v16577_v1  ;;  %v12176_v7 = vrot.slane %v12162_v47, %v16577_v1 }
0x18dc   : > { %v12177_v61 = vcombine.low %v12153_v39, %v12169_v17  ;;  %v12178_v56 = vcombine.high %v12153_v39, %v12169_v17  ;;  %v12179_v38 = vcombine.low %v12160_v37, %v12176_v7  ;;  %v12180_v20 = vcombine.high %v12160_v37, %v12176_v7  ;;  %v18634_v39 = vld [vmem:[%s18926_s24] ss:$0 sm:$0xff] }
0x18de   : > { %v14705_v50 = vpack.c.bf16 %v12245_v55, %v12177_v61  ;;  %v14708_v3 = vpack.c.bf16 %v12246_v53, %v12178_v56  ;;  %v14711_v21 = vpack.c.bf16 %v12247_v28, %v12179_v38  ;;  %v14714_v35 = vpack.c.bf16 %v12248_v13, %v12180_v20 }
0x18e0   : > { %14706 = vmatpush3.bf16.msra.mxu0 %v14705_v50  ;;  %14709 = vmatpush3.bf16.msra.mxu1 %v14708_v3 }
0x18e1   : > { %14710 = vmatprep.subr.bf16.mxu0 %v15770_v45  ;;  %14713 = vmatprep.subr.bf16.mxu1 %v15770_v45 }
0x18e4   : > { %8440 = vrot.lane.b32.xlu1 %v8433_v26, %s15768_s10  ;;  %v6538_v26 = vld [vmem:[#allocation29] sm:$0xff] }
0x18e5   : > { %8436 = vrot.lane.b32.xlu0 %v8432_v42, %s15767_s28  ;;  %v6539_v42 = vld [vmem:[#allocation29 + $0x8] sm:$0xff] }
0x18e8   : > { %8444 = vrot.lane.b32.xlu1 %v8434_v32, %s18925_s1 }
0x18e9   : > { %9970 = vrot.lane.b32.xlu0 %v9966_v31, %s15767_s28 }
0x18ec   : > { %9978 = vrot.lane.b32.xlu1 %v9968_v59, %s18925_s1 }
0x18ed   : > { %9974 = vrot.lane.b32.xlu0 %v9967_v43, %s15768_s10 }
0x18f0   : > { %11508 = vrot.lane.b32.xlu1 %v11501_v23, %s15768_s10  ;;  %v14716_v23 = vpack.c.bf16 %v6539_v42, %v6538_v26 }
0x18f1   : > { %11504 = vrot.lane.b32.xlu0 %v11500_v6, %s15767_s28  ;;  %v6540_v6 = vld [vmem:[#allocation29 + $0x10] sm:$0xff] }
0x18f4   : > { %11512 = vrot.lane.b32.xlu1 %v11502_v18, %s18925_s1  ;;  %v6541_v18 = vld [vmem:[#allocation29 + $0x18] sm:$0xff] }
0x18f5   : > { %v14720_v2 = vpack.c.bf16 %v6541_v18, %v6540_v6 }
0x1953   : > { %v12594_v45 = vpop.xlane.xlu0 %12593 }
0x1954   : > { %v12591_v16 = vpop.xlane.xlu1 %12590  ;;  %15073 = vrcp.f32 %v12594_v45 }
0x1955   : > { %15075 = vrcp.f32 %v12591_v16 }
0x195c   : > { %v12597_v36 = vpop.xlane.xlu0 %12596 }
0x195d   : > { %15077 = vrcp.f32 %v12597_v36 }
0x195e   : > { %v15074_v32 = vpop.eup %15073 }
0x195f   : > { %v15076_v51 = vpop.eup %15075  ;;  %v12604_v62 = vmul.f32 %v15074_v32, %v18508_v52 }
0x1960   : > { %v8437_v31 = vpop.permute.xlu0 %8436  ;;  %v12602_v59 = vmul.f32 %v15076_v51, %v18512_v8  ;;  %v12600_v43 = vpop.xlane.xlu1 %12599 }
0x1961   : > { %15079 = vrcp.f32 %v12600_v43  ;;  %14518 = vmatmul.mubr.msk.f32.vlgmr.msra.gmra.mrb[82].mxu1 %vm2611_vm4, %v12604_v62  ;;  %v8447_v48 = vsel %vm1821_vm2, %v8431_v34, %v8437_v31 }
0x1962   : > { %14511 = vmatmul.mubr.msk.f32.vlgmr.msra.gmra.mrb[74].mxu0 %vm2611_vm4, %v12602_v59  ;;  %14715 = vmatpush3.bf16.msra.mxu1 %v14714_v35 }
0x1963   : > { %14712 = vmatpush3.bf16.msra.mxu0 %v14711_v21  ;;  %14524 = vmatprep.mubr.msk.f32.mxu0 %vm15764_vm1, %v15763_v44 }
0x1964   : > { %v8441_v10 = vpop.permute.xlu1 %8440  ;;  %v9971_v25 = vpop.permute.xlu0 %9970  ;;  %14717 = vmatprep.subr.bf16.mxu0 %v14716_v23  ;;  %14531 = vmatprep.mubr.msk.f32.mxu1 %vm15764_vm1, %v15763_v44 }
0x1965   : > { %v8448_v46 = vsel %vm2611_vm4, %v8447_v48, %v8441_v10  ;;  %v9981_v29 = vsel %vm1821_vm2, %v9965_v33, %v9971_v25 }
0x1967   : > { %v15078_v52 = vpop.eup %15077 }
0x1968   : > { %v12606_v8 = vmul.f32 %v15078_v52, %v18525_v0  ;;  %v8445_v63 = vpop.permute.xlu1 %8444  ;;  %v9975_v49 = vpop.permute.xlu0 %9974 }
0x1969   : > { %v8449_v57 = vsel %vm2613_vm3, %v8448_v46, %v8445_v63  ;;  %v9982_v60 = vsel %vm2611_vm4, %v9981_v29, %v9975_v49 }
0x196a   : > { %14525 = vmatmul.mubr.msk.f32.vlgmr.msra.gmra.mrb[76].mxu0 %vm2611_vm4, %v12606_v8 }
0x196b   : > { %14719 = vmatpush3.bf16.msra.mxu0 %v14716_v23  ;;  %14542 = vmatprep.mubr.msk.f32.mxu0 %vm1090_vm0, %v8449_v57  ;;  %v15080_v44 = vpop.eup %15079 }
0x196c   : > { %14721 = vmatprep.subr.bf16.mxu0 %v14720_v2  ;;  %v12608_v0 = vmul.f32 %v15080_v44, %v18536_v12  ;;  %v9979_v11 = vpop.permute.xlu1 %9978  ;;  %v11505_v14 = vpop.permute.xlu0 %11504 }
0x196d   : > { %v9983_v34 = vsel %vm2613_vm3, %v9982_v60, %v9979_v11  ;;  %v11515_v12 = vsel %vm1821_vm2, %v11499_v27, %v11505_v14 }
0x196e   : > { %14532 = vmatmul.mubr.msk.f32.vlgmr.msra.gmra.mrb[84].mxu1 %vm2611_vm4, %v12608_v0 }
0x196f   : > { %14723 = vmatpush3.bf16.msra.mxu0 %v14720_v2 }
0x1970   : > { %v11509_v9 = vpop.permute.xlu1 %11508 }
0x1971   : > { %v11516_v41 = vsel %vm2611_vm4, %v11515_v12, %v11509_v9 }
0x1972   : > { %14543 = vmatmul.mubr.msk.f32.vlgmr.msra.gmra.mrb[78].mxu0 %vm1090_vm0, %v9983_v34 }
0x1974   : > { %v11513_v19 = vpop.permute.xlu1 %11512 }
0x1975   : > { %v11517_v33 = vsel %vm2613_vm3, %v11516_v41, %v11513_v19 }
0x1976   : > { %14545 = vmatprep.mubr.msk.f32.mxu0 %vm1090_vm0, %v11517_v33 }
0x1a34   : > { %v12751_v30 = vpop.f32.mrb[82].mxu1 }
0x1a35   : > { %v12678_v4 = vpop.f32.mrb[74].mxu0  ;;  %v14519_v15 = vpop.f32.mrb[83].mxu1 }
0x1a36   : > { %v14512_v24 = vpop.f32.mrb[75].mxu0 }
0x1a3d   : > { %v12824_v54 = vpop.f32.mrb[76].mxu0 }
0x1a3e   : > { %v12901_v22 = vcombine.low %v12678_v4, %v12824_v54  ;;  %v12902_v47 = vcombine.high %v12678_v4, %v12824_v54  ;;  %v14526_v28 = vpop.f32.mrb[77].mxu0 }
0x1a40   : > { %v12909_v17 = vrot.slane %v12901_v22, %v16575_v58  ;;  %v12916_v37 = vrot.slane %v12902_v47, %v16575_v58 }
0x1a41   : > { %v12897_v13 = vpop.f32.mrb[84].mxu1 }
0x1a42   : > { %v12917_v5 = vcombine.low %v12751_v30, %v12897_v13  ;;  %v12918_v40 = vcombine.high %v12751_v30, %v12897_v13  ;;  %v14533_v27 = vpop.f32.mrb[85].mxu1 }
0x1a44   : > { %v12925_v7 = vrot.slane %v12917_v5, %v16575_v58  ;;  %v12932_v55 = vrot.slane %v12918_v40, %v16575_v58 }
0x1a45   : > { %v14544_v53 = vpop.f32.mrb[78].mxu0 }
0x1a46   : > { %v13142_v61 = vadd.f32 %v14544_v53, %v18634_v39  ;;  %v13136_v56 = vpop.f32.mrb[79].mxu0  ;;  %v12933_v38 = vcombine.low %v12909_v17, %v12925_v7  ;;  %v12934_v20 = vcombine.high %v12909_v17, %v12925_v7  ;;  %v12949_v50 = vcombine.low %v12916_v37, %v12932_v55 }
0x1a47   : > { %v12950_v3 = vcombine.high %v12916_v37, %v12932_v55  ;;  %v13137_v21 = vadd.f32 %v18634_v39, %v13136_v56 }
0x1a48   : > { %13156 = vst.msk [vmem:[%s18642_s6 + $0x8] sm:$0xff] %vm1090_vm0, %v13142_v61  ;;  %v12941_v35 = vrot.slane %v12933_v38, %v16577_v1  ;;  %v12948_v45 = vrot.slane %v12934_v20, %v16577_v1  ;;  %v12957_v16 = vrot.slane %v12949_v50, %v16577_v1 }
0x1a49   : > { %v12964_v36 = vrot.slane %v12950_v3, %v16577_v1  ;;  %13155 = vst.msk [vmem:[%s18642_s6] sm:$0xff] %vm1090_vm0, %v13137_v21 }
0x1a4a   : > { %v12969_v26 = vcombine.low %v12941_v35, %v12948_v45  ;;  %v13785_v42 = vcombine.high %v12941_v35, %v12948_v45 }
0x1a4b   : > { %v12985_v32 = vcombine.low %v12957_v16, %v12964_v36  ;;  %v13786_v51 = vcombine.high %v12957_v16, %v12964_v36 }
0x1a4c   : > { %v12976_v62 = vrot.slane %v12969_v26, %v16575_v58  ;;  %v12984_v31 = vrot.slane %v13785_v42, %v16575_v58 }
0x1a4d   : > { %v12992_v59 = vrot.slane %v12985_v32, %v16575_v58  ;;  %v13000_v43 = vrot.slane %v13786_v51, %v16575_v58 }
0x1a4e   : > { %v13002_v23 = vcombine.high %v12976_v62, %v12984_v31  ;;  %v13001_v25 = vcombine.low %v12976_v62, %v12984_v31 }
0x1a4f   : > { %v13018_v10 = vcombine.high %v12992_v59, %v13000_v43  ;;  %v13017_v6 = vcombine.low %v12992_v59, %v13000_v43 }
0x1a50   : > { %v13016_v18 = vrot.slane %v13002_v23, %v16577_v1  ;;  %v13009_v8 = vrot.slane %v13001_v25, %v16577_v1 }
0x1a51   : > { %v13032_v52 = vrot.slane %v13018_v10, %v16577_v1  ;;  %v13025_v48 = vrot.slane %v13017_v6, %v16577_v1 }
0x1a53   : > { %v13036_v2 = vcombine.high %v13016_v18, %v13032_v52  ;;  %v13034_v46 = vcombine.high %v13009_v8, %v13025_v48  ;;  %v13035_v63 = vcombine.low %v13016_v18, %v13032_v52  ;;  %v13033_v58 = vcombine.low %v13009_v8, %v13025_v48 }
0x1a55   : > { %13046 = vrot.lane.b32.xlu1 %v13036_v2, %s18925_s1  ;;  %13038 = vrot.lane.b32.xlu0 %v13034_v46, %s15767_s28 }
0x1a59   : > { %13042 = vrot.lane.b32.xlu0 %v13035_v63, %s15768_s10  ;;  %s13160_s10 = scalar_lea.sflag [#allocation4], %s16461_s14 }
0x1ac7   : > { %v13039_v57 = vpop.permute.xlu0 %13038  ;;  %v13047_v0 = vpop.permute.xlu1 %13046 }
0x1ac8   : > { %v13049_v49 = vsel %vm1821_vm2, %v13033_v58, %v13039_v57 }
0x1acb   : > { %v13043_v44 = vpop.permute.xlu0 %13042 }
0x1acc   : > { %v13050_v1 = vsel %vm2611_vm4, %v13049_v49, %v13043_v44 }
0x1acd   : > { %v13051_v11 = vsel %vm2613_vm3, %v13050_v1, %v13047_v0 }
0x1ace   : > { %14546 = vmatmul.mubr.msk.f32.gmra.mrb[80].mxu0 %vm1090_vm0, %v13051_v11 }
0x1acf   : > { %15613 = shalt.err (!%p15610_p3)
}
0x1ad0   : > { %s15614_s3 = scalar_lea.hbm %s18674_s23, 512  ;;  %s15618_s21 = scalar_lea.hbm %s18927_s22, 1024 }
0x1ad1   : > { %p15615_p7 = scmp.ne.s32.totalorder %s18674_s23, %s15614_s3  ;;  %p15619_p5 = scmp.lt.u32.totalorder %s18674_s23, %s18927_s22 }
0x1ad2   : > { %p15620_p12 = scmp.lt.u32.totalorder %s15618_s21, %s15614_s3  ;;  %p15622_p4 = scmp.lt.u32.totalorder %s15614_s3, %s18674_s23 }
0x1ad3   : > { %p15616_p9 = pnand %p15615_p7, %p18928_p6 }
0x1ad4   : > { %p15621_p8 = por %p15620_p12, %p15619_p5 }
0x1ad5   : > { %p15617_p0 = pneg %p15616_p9 }
0x1ad6   : > { %p15623_p1 = por %p15622_p4, %p15621_p8 }
0x1ad8   : > { %p15624_p2 = pnand %p15623_p1, %p15617_p0 }
0x1ada   : > { %15627 = shalt.err (!%p15624_p2)
}
0x1adb   : > { %s15772_s20 = smov 128   ;;  %s13194_s13 = sshll.u32 %s18642_s6, 4  ;;  %s18707_s13 = int_to_ptr.vmem [resolvable:$true] %s13194_s13 }
0x1adc   : > { %14788 = dma.vmem_to_hbm [thread:$0]  (%p18928_p6), %s18677_s5, 512, %s18674_s23, %s13160_s10, %s15772_s20, %s15772_s20, %s15767_s28  }
0x1add   : > { %s18929_s16 = sld [smem:[#allocation75_spill]]  ;;  %s13165_s23 = scalar_lea.sflag [#allocation33], %s16461_s14 }
0x1ade   : > { %s15628_s5 = scalar_lea.vmem %s18707_s13, 512  ;;  %s15773_s10 = smov [#allocation32]  }
0x1adf   : > { %p15629_p11 = scmp.ne.s32.totalorder %s18707_s13, %s15628_s5  ;;  %s15632_s1 = sshll.u32 %s15773_s10, 4  ;;  %s15633_s1 = int_to_ptr.vmem [resolvable:$false] %s15632_s1 }
0x1ae0   : > { %s15634_s15 = scalar_lea.vmem %s15633_s1, 1024  ;;  %p15635_p3 = scmp.lt.s32.totalorder %s18707_s13, %s15633_s1 }
0x1ae1   : > { %p15630_p13 = pnand %p15629_p11, %p18928_p6  ;;  %p15636_p7 = scmp.lt.s32.totalorder %s15634_s15, %s15628_s5 }
0x1ae3   : > { %s18716_s3 = scalar_lea.hbm %s18929_s16, %s13806_s7  ;;  %p15631_p10 = pneg %p15630_p13 }
0x1ae4   : > { %p15637_p9 = por %p15636_p7, %p15635_p3 }
0x1ae6   : > { %p15638_p0 = pnand %p15637_p9, %p15631_p10 }
0x1ba1   : > { %v14547_v29 = vpop.f32.mrb[80].mxu0 }
0x1ba2   : > { %v13152_v60 = vadd.f32 %v14547_v29, %v18634_v39  ;;  %v13146_v34 = vpop.f32.mrb[81].mxu0 }
0x1ba3   : > { %v13147_v14 = vadd.f32 %v18634_v39, %v13146_v34 }
0x1ba4   : > { %13158 = vst.msk [vmem:[%s18642_s6 + $0x18] sm:$0xff] %vm1090_vm0, %v13152_v60 }
0x1ba5   : > { %13157 = vst.msk [vmem:[%s18642_s6 + $0x10] sm:$0xff] %vm1090_vm0, %v13147_v14 }
0x1ba6   : > { %15641 = shalt.err (!%p15638_p0)
}
0x1ba7   : > { %s15642_s26 = scalar_lea.hbm %s18716_s3, 512  ;;  %s15646_s21 = scalar_lea.hbm %s18929_s16, 1024 }
0x1ba8   : > { %p15643_p5 = scmp.ne.s32.totalorder %s18716_s3, %s15642_s26  ;;  %p15647_p4 = scmp.lt.u32.totalorder %s18716_s3, %s18929_s16 }
0x1ba9   : > { %p15648_p1 = scmp.lt.u32.totalorder %s15646_s21, %s15642_s26  ;;  %p15650_p11 = scmp.lt.u32.totalorder %s15642_s26, %s18716_s3 }
0x1baa   : > { %p15644_p12 = pnand %p15643_p5, %p18928_p6 }
0x1bab   : > { %p15649_p2 = por %p15648_p1, %p15647_p4 }
0x1bac   : > { %p15645_p8 = pneg %p15644_p12 }
0x1bad   : > { %p15651_p13 = por %p15650_p11, %p15649_p2 }
0x1baf   : > { %p15652_p10 = pnand %p15651_p13, %p15645_p8 }
0x1bb1   : > { %15655 = shalt.err (!%p15652_p10)
}
0x1bb2   : > { %14789 = dma.vmem_to_hbm [thread:$0]  (%p18928_p6), %s18707_s13, 512, %s18716_s3, %s13165_s23, %s15772_s20, %s15772_s20, %s15767_s28  }
0x1bb3 PF: > { %s18930_s19 = sld [smem:[#allocation51_spill]]  ;;  %s13209_s8 = sand.u32 1, %s15726_s4  }
0x1bb4   : > { %p18932_p7 = scmp.ge.s32.totalorder %s15738_s25, 2  ;;  %s13210_s5 = scalar_lea.sflag [#allocation4], %s13209_s8 }
0x1bb9   : > { %p18931_p3 = scmp.ne.s32.totalorder %s18930_s19, 0 }
0x1bbb   : > { %p14849_p9 = pnand %p18932_p7, %p18931_p3 }
0x1bbd   : > { %15717 = dma.done.wait (!%p14849_p9), %s13210_s5, 512  }
0x1bbe   : > { %15719 = vsyncadd (!%p14849_p9), %s13210_s5, 4294966784  ;;  %s13219_s2 = scalar_lea.sflag [#allocation33], %s13209_s8 }
0x1bbf   : > { %15721 = dma.done.wait (!%p14849_p9), %s13219_s2, 512  }
0x1bc0   : > { %15723 = vsyncadd (!%p14849_p9), %s13219_s2, 4294966784  ;;  %s18933_s25 = sld [smem:[#allocation49_spill]]  ;;  %s18934_s14 = sld [smem:[#allocation47_spill]] }
0x1bc1   : > { %s18935_s24 = sld [smem:[#allocation50_spill]]  ;;  %s18936_s4 = smov %s15730_s30 }
0x1bc6   : > { %p53_p6 = scmp.ge.s32.totalorder %s18933_s25, 4   ;;  %s18937_s30 = smov %s18934_s14 }
0x1bc8   :  { %55 = sbr.rel (!%p53_p6) target bundleno = 43 (0x2b), region = 263 }
0x1bcf   :  { %13224 = vsyncpa [#allocation3], 1 }
0x1bd0   :  { %13226 = vsyncpa [#allocation3 + $0x1], 1 }
0x1bd1   :  { %13227 = vsyncpa [#allocation6], 1 }
0x1bd2   :  { %13229 = vsyncpa [#allocation6 + $0x1], 1 }
0x1bd3   :  { %13230 = vsyncpa [#allocation9], 1 }
0x1bd4   :  { %13232 = vsyncpa [#allocation9 + $0x1], 1 }
0x1bd5   :  { %13233 = vsyncpa [#allocation12], 1 }
0x1bd6   :  { %13234 = vsyncpa [#allocation15], 1 }
0x1bd7   :  { %13235 = vsyncpa [#allocation18], 1 }
0x1bd8   :  { %13236 = vsyncpa [#allocation21], 1 }
0x1bd9   :  { %13237 = vsyncpa [#allocation24], 1 }
0x1bda   :  { %13238 = vsyncpa [#allocation27], 1 }
0x1bdb   :  { %13239 = vsyncpa [#allocation30], 1 }
0x1bdc   :  { %13240 = vsyncpa [#allocation4], 1 }
0x1bdd   :  { %13242 = vsyncpa [#allocation4 + $0x1], 1 }
0x1bde   :  { %13243 = vsyncpa [#allocation33], 1 }
0x1bdf   :  { %13245 = vsyncpa [#allocation33 + $0x1], 1 }

</bundles_post_ra>
